<compile_context>
chip_gen: v7x
topology: tpu7x:2x2x1
jax: 0.10.0
libtpu: 0.0.40
codegen_flags: <defaults>
</compile_context>

<pallas_src>
import math

import jax
import jax.numpy as jnp
from jax.experimental import pallas as pl
from jax.experimental.pallas import tpu as pltpu


# ----------------------------------------------------------------------------
# Pallas kernel: one grid step == one batch element.
# ----------------------------------------------------------------------------
def dynamic_weights_kernel(xflat_ref, sup_ref, woff_ref, wdef_ref, rowsC_ref,
                           colsC_ref, out_ref, tap_ref, ry_ref, p_ref):
    # xflat_ref : (1, 2C, L)       zero-padded concat input, flattened padded grid (+ tail)
    # sup_ref   : (1, C*W, H) bf16 support, (c, x) on sublanes, H = contraction axis
    # woff_ref  : (18, 25*2C) f32  fused 5x5 conv weight
    # wdef_ref  : (9, 9*C*W)  bf16 fused deform weight [out, tap*C*W + c*W + x]
    # rowsC_ref : (H,   NPOS) f32  rowsC[h, b]     = h - (b // Wp)
    # colsC_ref : (C*W, NPOS) f32  colsC[c*W+x, b] = x - (b %  Wp)
    # out_ref   : (1, 9, NPOS)
    # tap_ref   : (25*2C, NPOS) f32  scratch: fused 5x5 im2col tap matrix
    # ry_ref    : (H, 9*NPOS)  bf16  scratch: row-hat weights, lane-stacked per tap
    # p_ref     : (9*C*W, NPOS) bf16 scratch: column-weighted samples, sublane-stacked per tap
    _, CW, H = sup_ref.shape
    C2 = xflat_ref.shape[1]
    C = C2 // 2
    W = CW // C
    Wp = W + 4
    NPOS = tap_ref.shape[1]
    KK = 9

    # ---- (1) fused 5x5 im2col tap matrix: 25 shifted slices of the padded grid ----
    xflat = xflat_ref[0]                                         # (2C, L) f32
    for t in range(25):
        s = (t // 5) * Wp + (t % 5)
        tap_ref[t * C2:(t + 1) * C2, :] = xflat[:, s:s + NPOS]

    # ---- (2) 5x5 offset conv: ONE large-K MXU matmul (f32: feeds coordinates) ----
    off = jnp.dot(woff_ref[...], tap_ref[...],
                  preferred_element_type=jnp.float32)            # (18, NPOS)

    # ---- (3) row-hat weights for all 9 taps, lane-stacked into one scratch ----
    rowsC = rowsC_ref[...]                                       # (H, NPOS) f32
    for k in range(KK):
        ky = k // 3
        dy = off[2 * k:2 * k + 1, :]                             # (1, NPOS)
        ry = jnp.maximum(0.0, 1.0 - jnp.abs(rowsC - (float(ky) - 1.0) - dy))
        ry_ref[:, k * NPOS:(k + 1) * NPOS] = ry.astype(jnp.bfloat16)

    # ---- (4) ONE row-sampling matmul for all 9 taps: (C*W, H) @ (H, 9*NPOS) ----
    t_all = jnp.dot(sup_ref[0], ry_ref[...],
                    preferred_element_type=jnp.float32)          # (C*W, 9*NPOS)

    # ---- (5) column-hat weighting, written per tap into the fused-K scratch ----
    # NOTE: correctness of the wdef repeat-over-x layout relies on the column
    # hat zeroing every |x - px| >= 1 column inside each channel block.
    colsC = colsC_ref[...]                                       # (C*W, NPOS) f32
    for k in range(KK):
        kx = k % 3
        dx = off[2 * k + 1:2 * k + 2, :]                         # (1, NPOS)
        cx = jnp.maximum(0.0, 1.0 - jnp.abs(colsC - (float(kx) - 1.0) - dx))
        p_ref[k * CW:(k + 1) * CW, :] = (
            t_all[:, k * NPOS:(k + 1) * NPOS] * cx).astype(jnp.bfloat16)

    # ---- (6) ONE fused deform-conv output matmul over (tap, channel, column) ----
    acc = jnp.dot(wdef_ref[...], p_ref[...],
                  preferred_element_type=jnp.float32)            # (9, NPOS)
    out_ref[0] = jax.nn.sigmoid(acc).astype(out_ref.dtype)


# ----------------------------------------------------------------------------
# Wrapper: layout glue + pallas_call
# ----------------------------------------------------------------------------
def dynamic_weights_forward(support, query, w_off, w_def):
    """support, query: (N, C, H, W) NCHW.  Returns (N, 9, H, W) NCHW."""
    N, C, H, W = support.shape
    C2 = 2 * C
    CW = C * W
    Hp, Wp = H + 4, W + 4
    NPOS_valid = Hp * Wp
    # Lane-pad the padded-grid axis to a multiple of 128 so every tap copy,
    # scratch write and output store is an unmasked full-vreg access.
    NPOS = ((NPOS_valid + 127) // 128) * 128
    L = NPOS + 4 * Wp + 4                  # tail so every shifted tap slice stays in bounds

    # Zero-padded concat input, flattened over the padded grid (+ zero tail).
    xcat = jnp.concatenate([query, support], axis=1)                   # (N, 2C, H, W)
    xpad = jnp.pad(xcat, ((0, 0), (0, 0), (2, 2), (2, 2)))             # (N, 2C, Hp, Wp)
    xflat = jnp.pad(xpad.reshape(N, C2, NPOS_valid),
                    ((0, 0), (0, 0), (0, L - NPOS_valid)))             # (N, 2C, L)

    # Support with (c, x) on sublanes, H as the (contraction) minor axis, bf16.
    sup_r = jnp.transpose(support, (0, 1, 3, 2)).reshape(N, CW, H).astype(jnp.bfloat16)

    # Offset-conv weight fused over the 25 taps (stays f32: produces coordinates).
    woff_r = jnp.transpose(w_off, (0, 2, 3, 1)).reshape(18, 25 * C2)   # (18, 25*2C)

    # Deform-conv weight fused over (tap, channel, column), bf16:
    #   wdef2[o, k*C*W + c*W + x] = w_def[o, c, ky(k), kx(k)]   (repeated over x;
    # the column hat zeroes every |x - px| >= 1 column, so the repeat + hat is
    # exactly bilinear column weighting fused with the channel contraction).
    wdef_r = jnp.transpose(w_def, (0, 2, 3, 1)).reshape(9, 9, C)       # (o, tap, c)
    wdef2 = jnp.repeat(wdef_r, W, axis=2).reshape(9, 9 * CW).astype(jnp.bfloat16)

    # Per-column relative coordinates, hoisted out of the kernel (resident VMEM):
    #   rowsC[h, b] = h - (b // Wp),  colsC[c*W + x, b] = x - (b % Wp)
    b = jnp.arange(NPOS, dtype=jnp.int32)
    ybase = (b // Wp).astype(jnp.float32)
    xbase = (b % Wp).astype(jnp.float32)
    rowsC = jnp.arange(H, dtype=jnp.float32)[:, None] - ybase[None, :]              # (H, NPOS)
    colsC = jnp.tile(jnp.arange(W, dtype=jnp.float32), C)[:, None] - xbase[None, :]  # (CW, NPOS)

    out = pl.pallas_call(
        dynamic_weights_kernel,
        out_shape=jax.ShapeDtypeStruct((N, 9, NPOS), jnp.float32),
        grid_spec=pltpu.PrefetchScalarGridSpec(
            num_scalar_prefetch=0,
            grid=(N,),
            in_specs=[
                pl.BlockSpec((1, C2, L), lambda n: (n, 0, 0)),
                pl.BlockSpec((1, CW, H), lambda n: (n, 0, 0)),
                pl.BlockSpec((18, 25 * C2), lambda n: (0, 0)),
                pl.BlockSpec((9, 9 * CW), lambda n: (0, 0)),
                pl.BlockSpec((H, NPOS), lambda n: (0, 0)),
                pl.BlockSpec((CW, NPOS), lambda n: (0, 0)),
            ],
            out_specs=pl.BlockSpec((1, 9, NPOS), lambda n: (n, 0, 0)),
            scratch_shapes=[
                pltpu.VMEM((25 * C2, NPOS), jnp.float32),   # fused 5x5 tap matrix
                pltpu.VMEM((H, 9 * NPOS), jnp.bfloat16),    # lane-stacked row hats
                pltpu.VMEM((9 * CW, NPOS), jnp.bfloat16),   # sublane-stacked samples
            ],
        ),
        compiler_params=pltpu.CompilerParams(
            dimension_semantics=("parallel",),
            vmem_limit_bytes=64 * 1024 * 1024,
        ),
    )(xflat, sup_r, woff_r, wdef2, rowsC, colsC)

    # Lane-dense (N, 9, NPOS) -> NCHW via static slice + reshape only (no transpose).
    return out[:, :, :NPOS_valid].reshape(N, 9, Hp, Wp)[:, :, :H, :W]


# ----------------------------------------------------------------------------
# Pure-JAX reference (for correctness check only)
# ----------------------------------------------------------------------------
def _bilinear_gather(img, yc, xc):
    # img: (C, H, W); yc, xc: (H, W) integer-valued float corner coords
    H, W = img.shape[1], img.shape[2]
    valid = (yc >= 0) & (yc <= H - 1) & (xc >= 0) & (xc <= W - 1)
    yi = jnp.clip(yc, 0, H - 1).astype(jnp.int32)
    xi = jnp.clip(xc, 0, W - 1).astype(jnp.int32)
    g = img[:, yi, xi]
    return g * valid[None].astype(img.dtype)


def ref_forward(support, query, w_off, w_def):
    N, C, H, W = support.shape
    xcat = jnp.concatenate([query, support], axis=1)
    offset = jax.lax.conv_general_dilated(
        xcat, w_off, window_strides=(1, 1), padding=((2, 2), (2, 2)),
        dimension_numbers=("NCHW", "OIHW", "NCHW"),
        precision=jax.lax.Precision.HIGHEST)
    yy, xx = jnp.meshgrid(jnp.arange(H, dtype=jnp.float32),
                          jnp.arange(W, dtype=jnp.float32), indexing="ij")
    out = jnp.zeros((N, 9, H, W), jnp.float32)
    for k in range(9):
        ky, kx = k // 3, k % 3
        dy = offset[:, 2 * k]
        dx = offset[:, 2 * k + 1]
        py = yy[None] + (ky - 1) + dy
        px = xx[None] + (kx - 1) + dx
        y0 = jnp.floor(py)
        x0 = jnp.floor(px)
        ly = py - y0
        lx = px - x0
        vs = []
        for n in range(N):
            img = support[n]
            v = (_bilinear_gather(img, y0[n], x0[n]) * ((1 - ly[n]) * (1 - lx[n]))[None]
                 + _bilinear_gather(img, y0[n], x0[n] + 1) * ((1 - ly[n]) * lx[n])[None]
                 + _bilinear_gather(img, y0[n] + 1, x0[n]) * (ly[n] * (1 - lx[n]))[None]
                 + _bilinear_gather(img, y0[n] + 1, x0[n] + 1) * (ly[n] * lx[n])[None])
            vs.append(v)
        v = jnp.stack(vs, axis=0)                                  # (N, C, H, W)
        out = out + jnp.einsum("oc,nchw->nohw", w_def[:, :, ky, kx], v,
                               precision=jax.lax.Precision.HIGHEST)
    return jax.nn.sigmoid(out)


# ----------------------------------------------------------------------------
if __name__ == "__main__":
    N, C, H, W = 2, 4, 16, 16

    key = jax.random.PRNGKey(0)
    k1, k2, k3, k4 = jax.random.split(key, 4)
    support = jax.random.normal(k1, (N, C, H, W), jnp.float32)
    query = jax.random.normal(k2, (N, C, H, W), jnp.float32)

    # Deterministic Conv weights (kaiming-uniform-like bounds, no bias).
    fan_off = 2 * C * 5 * 5
    w_off = jax.random.uniform(k3, (18, 2 * C, 5, 5), jnp.float32,
                               -1.0 / math.sqrt(fan_off), 1.0 / math.sqrt(fan_off))
    fan_def = C * 3 * 3
    w_def = jax.random.uniform(k4, (9, C, 3, 3), jnp.float32,
                               -1.0 / math.sqrt(fan_def), 1.0 / math.sqrt(fan_def))

    out = jax.block_until_ready(dynamic_weights_forward(support, query, w_off, w_def))
    ref = jax.block_until_ready(ref_forward(support, query, w_off, w_def))

    assert out.shape == (N, 9, H, W), out.shape
    # Tolerance covers bf16 MXU operands on the sampling path (offsets stay f32).
    err = float(jnp.max(jnp.abs(out - ref)))
    assert err < 2.5e-2, f"max abs error vs reference: {err}"
    print("KERNEL_OK")
</pallas_src>

<mosaic_0001>
module attributes {stable_mosaic.version = 11 : i64} {
  func.func @dynamic_weights_kernel(%arg0: i32, %arg1: memref<1x8x596xf32, #tpu.memory_space<vmem>>, %arg2: memref<1x64x16xbf16, #tpu.memory_space<vmem>>, %arg3: memref<18x200xf32, #tpu.memory_space<vmem>>, %arg4: memref<9x576xbf16, #tpu.memory_space<vmem>>, %arg5: memref<16x512xf32, #tpu.memory_space<vmem>>, %arg6: memref<64x512xf32, #tpu.memory_space<vmem>>, %arg7: memref<1x9x512xf32, #tpu.memory_space<vmem>>, %arg8: memref<200x512xf32, #tpu.memory_space<vmem>>, %arg9: memref<16x4608xbf16, #tpu.memory_space<vmem>>, %arg10: memref<576x512xbf16, #tpu.memory_space<vmem>>) attributes {dimension_semantics = [#tpu.dimension_semantics<parallel>], iteration_bounds = array<i64: 2>, scalar_prefetch = 0 : i64, scratch_operands = 3 : i64, tpu.core_type = #tpu.core_type<tc>, window_params = [{transform_indices = @transform_0, window_bounds = array<i64: 1, 8, 596>}, {transform_indices = @transform_1, window_bounds = array<i64: 1, 64, 16>}, {pipeline_mode = #tpu.pipeline_mode<synchronous>, transform_indices = @transform_2, window_bounds = array<i64: 18, 200>}, {pipeline_mode = #tpu.pipeline_mode<synchronous>, transform_indices = @transform_3, window_bounds = array<i64: 9, 576>}, {pipeline_mode = #tpu.pipeline_mode<synchronous>, transform_indices = @transform_4, window_bounds = array<i64: 16, 512>}, {pipeline_mode = #tpu.pipeline_mode<synchronous>, transform_indices = @transform_5, window_bounds = array<i64: 64, 512>}, {transform_indices = @transform_6, window_bounds = array<i64: 1, 9, 512>}]} {
    %c0 = arith.constant 0 : index
    %c0_0 = arith.constant 0 : index
    %c0_1 = arith.constant 0 : index
    %0 = vector.load %arg1[%c0, %c0_0, %c0_1] : memref<1x8x596xf32, #tpu.memory_space<vmem>>, vector<1x8x596xf32>
    %1 = vector.shape_cast %0 : vector<1x8x596xf32> to vector<8x596xf32>
    %2 = vector.extract_strided_slice %1 {offsets = [0, 0], sizes = [8, 512], strides = [1, 1]} : vector<8x596xf32> to vector<8x512xf32>
    %c0_2 = arith.constant 0 : index
    %c0_3 = arith.constant 0 : index
    %3 = vector.load %arg8[%c0_2, %c0_3] : memref<200x512xf32, #tpu.memory_space<vmem>>, vector<8x512xf32>
    tpu.vector_store %arg8[%c0_2, %c0_3], %2 {strides = array<i32>} : memref<200x512xf32, #tpu.memory_space<vmem>>, vector<8x512xf32>,
    %4 = vector.extract_strided_slice %1 {offsets = [0, 1], sizes = [8, 512], strides = [1, 1]} : vector<8x596xf32> to vector<8x512xf32>
    %c8 = arith.constant 8 : index
    %c0_4 = arith.constant 0 : index
    %5 = vector.load %arg8[%c8, %c0_4] : memref<200x512xf32, #tpu.memory_space<vmem>>, vector<8x512xf32>
    tpu.vector_store %arg8[%c8, %c0_4], %4 {strides = array<i32>} : memref<200x512xf32, #tpu.memory_space<vmem>>, vector<8x512xf32>,
    %6 = vector.extract_strided_slice %1 {offsets = [0, 2], sizes = [8, 512], strides = [1, 1]} : vector<8x596xf32> to vector<8x512xf32>
    %c16 = arith.constant 16 : index
    %c0_5 = arith.constant 0 : index
    %7 = vector.load %arg8[%c16, %c0_5] : memref<200x512xf32, #tpu.memory_space<vmem>>, vector<8x512xf32>
    tpu.vector_store %arg8[%c16, %c0_5], %6 {strides = array<i32>} : memref<200x512xf32, #tpu.memory_space<vmem>>, vector<8x512xf32>,
    %8 = vector.extract_strided_slice %1 {offsets = [0, 3], sizes = [8, 512], strides = [1, 1]} : vector<8x596xf32> to vector<8x512xf32>
    %c24 = arith.constant 24 : index
    %c0_6 = arith.constant 0 : index
    %9 = vector.load %arg8[%c24, %c0_6] : memref<200x512xf32, #tpu.memory_space<vmem>>, vector<8x512xf32>
    tpu.vector_store %arg8[%c24, %c0_6], %8 {strides = array<i32>} : memref<200x512xf32, #tpu.memory_space<vmem>>, vector<8x512xf32>,
    %10 = vector.extract_strided_slice %1 {offsets = [0, 4], sizes = [8, 512], strides = [1, 1]} : vector<8x596xf32> to vector<8x512xf32>
    %c32 = arith.constant 32 : index
    %c0_7 = arith.constant 0 : index
    %11 = vector.load %arg8[%c32, %c0_7] : memref<200x512xf32, #tpu.memory_space<vmem>>, vector<8x512xf32>
    tpu.vector_store %arg8[%c32, %c0_7], %10 {strides = array<i32>} : memref<200x512xf32, #tpu.memory_space<vmem>>, vector<8x512xf32>,
    %12 = vector.extract_strided_slice %1 {offsets = [0, 20], sizes = [8, 512], strides = [1, 1]} : vector<8x596xf32> to vector<8x512xf32>
    %c40 = arith.constant 40 : index
    %c0_8 = arith.constant 0 : index
    %13 = vector.load %arg8[%c40, %c0_8] : memref<200x512xf32, #tpu.memory_space<vmem>>, vector<8x512xf32>
    tpu.vector_store %arg8[%c40, %c0_8], %12 {strides = array<i32>} : memref<200x512xf32, #tpu.memory_space<vmem>>, vector<8x512xf32>,
    %14 = vector.extract_strided_slice %1 {offsets = [0, 21], sizes = [8, 512], strides = [1, 1]} : vector<8x596xf32> to vector<8x512xf32>
    %c48 = arith.constant 48 : index
    %c0_9 = arith.constant 0 : index
    %15 = vector.load %arg8[%c48, %c0_9] : memref<200x512xf32, #tpu.memory_space<vmem>>, vector<8x512xf32>
    tpu.vector_store %arg8[%c48, %c0_9], %14 {strides = array<i32>} : memref<200x512xf32, #tpu.memory_space<vmem>>, vector<8x512xf32>,
    %16 = vector.extract_strided_slice %1 {offsets = [0, 22], sizes = [8, 512], strides = [1, 1]} : vector<8x596xf32> to vector<8x512xf32>
    %c56 = arith.constant 56 : index
    %c0_10 = arith.constant 0 : index
    %17 = vector.load %arg8[%c56, %c0_10] : memref<200x512xf32, #tpu.memory_space<vmem>>, vector<8x512xf32>
    tpu.vector_store %arg8[%c56, %c0_10], %16 {strides = array<i32>} : memref<200x512xf32, #tpu.memory_space<vmem>>, vector<8x512xf32>,
    %18 = vector.extract_strided_slice %1 {offsets = [0, 23], sizes = [8, 512], strides = [1, 1]} : vector<8x596xf32> to vector<8x512xf32>
    %c64 = arith.constant 64 : index
    %c0_11 = arith.constant 0 : index
    %19 = vector.load %arg8[%c64, %c0_11] : memref<200x512xf32, #tpu.memory_space<vmem>>, vector<8x512xf32>
    tpu.vector_store %arg8[%c64, %c0_11], %18 {strides = array<i32>} : memref<200x512xf32, #tpu.memory_space<vmem>>, vector<8x512xf32>,
    %20 = vector.extract_strided_slice %1 {offsets = [0, 24], sizes = [8, 512], strides = [1, 1]} : vector<8x596xf32> to vector<8x512xf32>
    %c72 = arith.constant 72 : index
    %c0_12 = arith.constant 0 : index
    %21 = vector.load %arg8[%c72, %c0_12] : memref<200x512xf32, #tpu.memory_space<vmem>>, vector<8x512xf32>
    tpu.vector_store %arg8[%c72, %c0_12], %20 {strides = array<i32>} : memref<200x512xf32, #tpu.memory_space<vmem>>, vector<8x512xf32>,
    %22 = vector.extract_strided_slice %1 {offsets = [0, 40], sizes = [8, 512], strides = [1, 1]} : vector<8x596xf32> to vector<8x512xf32>
    %c80 = arith.constant 80 : index
    %c0_13 = arith.constant 0 : index
    %23 = vector.load %arg8[%c80, %c0_13] : memref<200x512xf32, #tpu.memory_space<vmem>>, vector<8x512xf32>
    tpu.vector_store %arg8[%c80, %c0_13], %22 {strides = array<i32>} : memref<200x512xf32, #tpu.memory_space<vmem>>, vector<8x512xf32>,
    %24 = vector.extract_strided_slice %1 {offsets = [0, 41], sizes = [8, 512], strides = [1, 1]} : vector<8x596xf32> to vector<8x512xf32>
    %c88 = arith.constant 88 : index
    %c0_14 = arith.constant 0 : index
    %25 = vector.load %arg8[%c88, %c0_14] : memref<200x512xf32, #tpu.memory_space<vmem>>, vector<8x512xf32>
    tpu.vector_store %arg8[%c88, %c0_14], %24 {strides = array<i32>} : memref<200x512xf32, #tpu.memory_space<vmem>>, vector<8x512xf32>,
    %26 = vector.extract_strided_slice %1 {offsets = [0, 42], sizes = [8, 512], strides = [1, 1]} : vector<8x596xf32> to vector<8x512xf32>
    %c96 = arith.constant 96 : index
    %c0_15 = arith.constant 0 : index
    %27 = vector.load %arg8[%c96, %c0_15] : memref<200x512xf32, #tpu.memory_space<vmem>>, vector<8x512xf32>
    tpu.vector_store %arg8[%c96, %c0_15], %26 {strides = array<i32>} : memref<200x512xf32, #tpu.memory_space<vmem>>, vector<8x512xf32>,
    %28 = vector.extract_strided_slice %1 {offsets = [0, 43], sizes = [8, 512], strides = [1, 1]} : vector<8x596xf32> to vector<8x512xf32>
    %c104 = arith.constant 104 : index
    %c0_16 = arith.constant 0 : index
    %29 = vector.load %arg8[%c104, %c0_16] : memref<200x512xf32, #tpu.memory_space<vmem>>, vector<8x512xf32>
    tpu.vector_store %arg8[%c104, %c0_16], %28 {strides = array<i32>} : memref<200x512xf32, #tpu.memory_space<vmem>>, vector<8x512xf32>,
    %30 = vector.extract_strided_slice %1 {offsets = [0, 44], sizes = [8, 512], strides = [1, 1]} : vector<8x596xf32> to vector<8x512xf32>
    %c112 = arith.constant 112 : index
    %c0_17 = arith.constant 0 : index
    %31 = vector.load %arg8[%c112, %c0_17] : memref<200x512xf32, #tpu.memory_space<vmem>>, vector<8x512xf32>
    tpu.vector_store %arg8[%c112, %c0_17], %30 {strides = array<i32>} : memref<200x512xf32, #tpu.memory_space<vmem>>, vector<8x512xf32>,
    %32 = vector.extract_strided_slice %1 {offsets = [0, 60], sizes = [8, 512], strides = [1, 1]} : vector<8x596xf32> to vector<8x512xf32>
    %c120 = arith.constant 120 : index
    %c0_18 = arith.constant 0 : index
    %33 = vector.load %arg8[%c120, %c0_18] : memref<200x512xf32, #tpu.memory_space<vmem>>, vector<8x512xf32>
    tpu.vector_store %arg8[%c120, %c0_18], %32 {strides = array<i32>} : memref<200x512xf32, #tpu.memory_space<vmem>>, vector<8x512xf32>,
    %34 = vector.extract_strided_slice %1 {offsets = [0, 61], sizes = [8, 512], strides = [1, 1]} : vector<8x596xf32> to vector<8x512xf32>
    %c128 = arith.constant 128 : index
    %c0_19 = arith.constant 0 : index
    %35 = vector.load %arg8[%c128, %c0_19] : memref<200x512xf32, #tpu.memory_space<vmem>>, vector<8x512xf32>
    tpu.vector_store %arg8[%c128, %c0_19], %34 {strides = array<i32>} : memref<200x512xf32, #tpu.memory_space<vmem>>, vector<8x512xf32>,
    %36 = vector.extract_strided_slice %1 {offsets = [0, 62], sizes = [8, 512], strides = [1, 1]} : vector<8x596xf32> to vector<8x512xf32>
    %c136 = arith.constant 136 : index
    %c0_20 = arith.constant 0 : index
    %37 = vector.load %arg8[%c136, %c0_20] : memref<200x512xf32, #tpu.memory_space<vmem>>, vector<8x512xf32>
    tpu.vector_store %arg8[%c136, %c0_20], %36 {strides = array<i32>} : memref<200x512xf32, #tpu.memory_space<vmem>>, vector<8x512xf32>,
    %38 = vector.extract_strided_slice %1 {offsets = [0, 63], sizes = [8, 512], strides = [1, 1]} : vector<8x596xf32> to vector<8x512xf32>
    %c144 = arith.constant 144 : index
    %c0_21 = arith.constant 0 : index
    %39 = vector.load %arg8[%c144, %c0_21] : memref<200x512xf32, #tpu.memory_space<vmem>>, vector<8x512xf32>
    tpu.vector_store %arg8[%c144, %c0_21], %38 {strides = array<i32>} : memref<200x512xf32, #tpu.memory_space<vmem>>, vector<8x512xf32>,
    %40 = vector.extract_strided_slice %1 {offsets = [0, 64], sizes = [8, 512], strides = [1, 1]} : vector<8x596xf32> to vector<8x512xf32>
    %c152 = arith.constant 152 : index
    %c0_22 = arith.constant 0 : index
    %41 = vector.load %arg8[%c152, %c0_22] : memref<200x512xf32, #tpu.memory_space<vmem>>, vector<8x512xf32>
    tpu.vector_store %arg8[%c152, %c0_22], %40 {strides = array<i32>} : memref<200x512xf32, #tpu.memory_space<vmem>>, vector<8x512xf32>,
    %42 = vector.extract_strided_slice %1 {offsets = [0, 80], sizes = [8, 512], strides = [1, 1]} : vector<8x596xf32> to vector<8x512xf32>
    %c160 = arith.constant 160 : index
    %c0_23 = arith.constant 0 : index
    %43 = vector.load %arg8[%c160, %c0_23] : memref<200x512xf32, #tpu.memory_space<vmem>>, vector<8x512xf32>
    tpu.vector_store %arg8[%c160, %c0_23], %42 {strides = array<i32>} : memref<200x512xf32, #tpu.memory_space<vmem>>, vector<8x512xf32>,
    %44 = vector.extract_strided_slice %1 {offsets = [0, 81], sizes = [8, 512], strides = [1, 1]} : vector<8x596xf32> to vector<8x512xf32>
    %c168 = arith.constant 168 : index
    %c0_24 = arith.constant 0 : index
    %45 = vector.load %arg8[%c168, %c0_24] : memref<200x512xf32, #tpu.memory_space<vmem>>, vector<8x512xf32>
    tpu.vector_store %arg8[%c168, %c0_24], %44 {strides = array<i32>} : memref<200x512xf32, #tpu.memory_space<vmem>>, vector<8x512xf32>,
    %46 = vector.extract_strided_slice %1 {offsets = [0, 82], sizes = [8, 512], strides = [1, 1]} : vector<8x596xf32> to vector<8x512xf32>
    %c176 = arith.constant 176 : index
    %c0_25 = arith.constant 0 : index
    %47 = vector.load %arg8[%c176, %c0_25] : memref<200x512xf32, #tpu.memory_space<vmem>>, vector<8x512xf32>
    tpu.vector_store %arg8[%c176, %c0_25], %46 {strides = array<i32>} : memref<200x512xf32, #tpu.memory_space<vmem>>, vector<8x512xf32>,
    %48 = vector.extract_strided_slice %1 {offsets = [0, 83], sizes = [8, 512], strides = [1, 1]} : vector<8x596xf32> to vector<8x512xf32>
    %c184 = arith.constant 184 : index
    %c0_26 = arith.constant 0 : index
    %49 = vector.load %arg8[%c184, %c0_26] : memref<200x512xf32, #tpu.memory_space<vmem>>, vector<8x512xf32>
    tpu.vector_store %arg8[%c184, %c0_26], %48 {strides = array<i32>} : memref<200x512xf32, #tpu.memory_space<vmem>>, vector<8x512xf32>,
    %50 = vector.extract_strided_slice %1 {offsets = [0, 84], sizes = [8, 512], strides = [1, 1]} : vector<8x596xf32> to vector<8x512xf32>
    %c192 = arith.constant 192 : index
    %c0_27 = arith.constant 0 : index
    %51 = vector.load %arg8[%c192, %c0_27] : memref<200x512xf32, #tpu.memory_space<vmem>>, vector<8x512xf32>
    tpu.vector_store %arg8[%c192, %c0_27], %50 {strides = array<i32>} : memref<200x512xf32, #tpu.memory_space<vmem>>, vector<8x512xf32>,
    %c0_28 = arith.constant 0 : index
    %c0_29 = arith.constant 0 : index
    %52 = vector.load %arg3[%c0_28, %c0_29] : memref<18x200xf32, #tpu.memory_space<vmem>>, vector<18x200xf32>
    %c0_30 = arith.constant 0 : index
    %c0_31 = arith.constant 0 : index
    %53 = vector.load %arg8[%c0_30, %c0_31] : memref<200x512xf32, #tpu.memory_space<vmem>>, vector<200x512xf32>
    %cst = arith.constant dense<0.000000e+00> : vector<18x512xf32>
    %54 = tpu.matmul %52, %53, %cst {dimension_numbers = #tpu.dot_dimension_numbers<[1], [0], [0], [1], [0, 0, 1, 1], [], []>} : vector<18x200xf32>, vector<200x512xf32>, vector<18x512xf32> -> vector<18x512xf32>
    %c0_32 = arith.constant 0 : index
    %c0_33 = arith.constant 0 : index
    %55 = vector.load %arg5[%c0_32, %c0_33] : memref<16x512xf32, #tpu.memory_space<vmem>>, vector<16x512xf32>
    %56 = vector.extract_strided_slice %54 {offsets = [0, 0], sizes = [1, 512], strides = [1, 1]} : vector<18x512xf32> to vector<1x512xf32>
    %cst_34 = arith.constant -1.000000e+00 : f32
    %57 = vector.broadcast %cst_34 : f32 to vector<16x512xf32>
    %58 = arith.subf %55, %57 : vector<16x512xf32>
    %59 = vector.broadcast %56 : vector<1x512xf32> to vector<16x512xf32>
    %60 = arith.subf %58, %59 : vector<16x512xf32>
    %61 = math.absf %60 : vector<16x512xf32>
    %cst_35 = arith.constant 1.000000e+00 : f32
    %62 = vector.broadcast %cst_35 : f32 to vector<16x512xf32>
    %63 = arith.subf %62, %61 : vector<16x512xf32>
    %cst_36 = arith.constant 0.000000e+00 : f32
    %64 = vector.broadcast %cst_36 : f32 to vector<16x512xf32>
    %65 = arith.maximumf %64, %63 : vector<16x512xf32>
    %66 = arith.truncf %65 : vector<16x512xf32> to vector<16x512xbf16>
    %c0_37 = arith.constant 0 : index
    %c0_38 = arith.constant 0 : index
    %67 = vector.load %arg9[%c0_37, %c0_38] : memref<16x4608xbf16, #tpu.memory_space<vmem>>, vector<16x512xbf16>
    tpu.vector_store %arg9[%c0_37, %c0_38], %66 {strides = array<i32>} : memref<16x4608xbf16, #tpu.memory_space<vmem>>, vector<16x512xbf16>,
    %68 = vector.extract_strided_slice %54 {offsets = [2, 0], sizes = [1, 512], strides = [1, 1]} : vector<18x512xf32> to vector<1x512xf32>
    %cst_39 = arith.constant -1.000000e+00 : f32
    %69 = vector.broadcast %cst_39 : f32 to vector<16x512xf32>
    %70 = arith.subf %55, %69 : vector<16x512xf32>
    %71 = vector.broadcast %68 : vector<1x512xf32> to vector<16x512xf32>
    %72 = arith.subf %70, %71 : vector<16x512xf32>
    %73 = math.absf %72 : vector<16x512xf32>
    %cst_40 = arith.constant 1.000000e+00 : f32
    %74 = vector.broadcast %cst_40 : f32 to vector<16x512xf32>
    %75 = arith.subf %74, %73 : vector<16x512xf32>
    %cst_41 = arith.constant 0.000000e+00 : f32
    %76 = vector.broadcast %cst_41 : f32 to vector<16x512xf32>
    %77 = arith.maximumf %76, %75 : vector<16x512xf32>
    %78 = arith.truncf %77 : vector<16x512xf32> to vector<16x512xbf16>
    %c0_42 = arith.constant 0 : index
    %c512 = arith.constant 512 : index
    %79 = vector.load %arg9[%c0_42, %c512] : memref<16x4608xbf16, #tpu.memory_space<vmem>>, vector<16x512xbf16>
    tpu.vector_store %arg9[%c0_42, %c512], %78 {strides = array<i32>} : memref<16x4608xbf16, #tpu.memory_space<vmem>>, vector<16x512xbf16>,
    %80 = vector.extract_strided_slice %54 {offsets = [4, 0], sizes = [1, 512], strides = [1, 1]} : vector<18x512xf32> to vector<1x512xf32>
    %cst_43 = arith.constant -1.000000e+00 : f32
    %81 = vector.broadcast %cst_43 : f32 to vector<16x512xf32>
    %82 = arith.subf %55, %81 : vector<16x512xf32>
    %83 = vector.broadcast %80 : vector<1x512xf32> to vector<16x512xf32>
    %84 = arith.subf %82, %83 : vector<16x512xf32>
    %85 = math.absf %84 : vector<16x512xf32>
    %cst_44 = arith.constant 1.000000e+00 : f32
    %86 = vector.broadcast %cst_44 : f32 to vector<16x512xf32>
    %87 = arith.subf %86, %85 : vector<16x512xf32>
    %cst_45 = arith.constant 0.000000e+00 : f32
    %88 = vector.broadcast %cst_45 : f32 to vector<16x512xf32>
    %89 = arith.maximumf %88, %87 : vector<16x512xf32>
    %90 = arith.truncf %89 : vector<16x512xf32> to vector<16x512xbf16>
    %c0_46 = arith.constant 0 : index
    %c1024 = arith.constant 1024 : index
    %91 = vector.load %arg9[%c0_46, %c1024] : memref<16x4608xbf16, #tpu.memory_space<vmem>>, vector<16x512xbf16>
    tpu.vector_store %arg9[%c0_46, %c1024], %90 {strides = array<i32>} : memref<16x4608xbf16, #tpu.memory_space<vmem>>, vector<16x512xbf16>,
    %92 = vector.extract_strided_slice %54 {offsets = [6, 0], sizes = [1, 512], strides = [1, 1]} : vector<18x512xf32> to vector<1x512xf32>
    %cst_47 = arith.constant 0.000000e+00 : f32
    %93 = vector.broadcast %cst_47 : f32 to vector<16x512xf32>
    %94 = arith.subf %55, %93 : vector<16x512xf32>
    %95 = vector.broadcast %92 : vector<1x512xf32> to vector<16x512xf32>
    %96 = arith.subf %94, %95 : vector<16x512xf32>
    %97 = math.absf %96 : vector<16x512xf32>
    %cst_48 = arith.constant 1.000000e+00 : f32
    %98 = vector.broadcast %cst_48 : f32 to vector<16x512xf32>
    %99 = arith.subf %98, %97 : vector<16x512xf32>
    %cst_49 = arith.constant 0.000000e+00 : f32
    %100 = vector.broadcast %cst_49 : f32 to vector<16x512xf32>
    %101 = arith.maximumf %100, %99 : vector<16x512xf32>
    %102 = arith.truncf %101 : vector<16x512xf32> to vector<16x512xbf16>
    %c0_50 = arith.constant 0 : index
    %c1536 = arith.constant 1536 : index
    %103 = vector.load %arg9[%c0_50, %c1536] : memref<16x4608xbf16, #tpu.memory_space<vmem>>, vector<16x512xbf16>
    tpu.vector_store %arg9[%c0_50, %c1536], %102 {strides = array<i32>} : memref<16x4608xbf16, #tpu.memory_space<vmem>>, vector<16x512xbf16>,
    %104 = vector.extract_strided_slice %54 {offsets = [8, 0], sizes = [1, 512], strides = [1, 1]} : vector<18x512xf32> to vector<1x512xf32>
    %cst_51 = arith.constant 0.000000e+00 : f32
    %105 = vector.broadcast %cst_51 : f32 to vector<16x512xf32>
    %106 = arith.subf %55, %105 : vector<16x512xf32>
    %107 = vector.broadcast %104 : vector<1x512xf32> to vector<16x512xf32>
    %108 = arith.subf %106, %107 : vector<16x512xf32>
    %109 = math.absf %108 : vector<16x512xf32>
    %cst_52 = arith.constant 1.000000e+00 : f32
    %110 = vector.broadcast %cst_52 : f32 to vector<16x512xf32>
    %111 = arith.subf %110, %109 : vector<16x512xf32>
    %cst_53 = arith.constant 0.000000e+00 : f32
    %112 = vector.broadcast %cst_53 : f32 to vector<16x512xf32>
    %113 = arith.maximumf %112, %111 : vector<16x512xf32>
    %114 = arith.truncf %113 : vector<16x512xf32> to vector<16x512xbf16>
    %c0_54 = arith.constant 0 : index
    %c2048 = arith.constant 2048 : index
    %115 = vector.load %arg9[%c0_54, %c2048] : memref<16x4608xbf16, #tpu.memory_space<vmem>>, vector<16x512xbf16>
    tpu.vector_store %arg9[%c0_54, %c2048], %114 {strides = array<i32>} : memref<16x4608xbf16, #tpu.memory_space<vmem>>, vector<16x512xbf16>,
    %116 = vector.extract_strided_slice %54 {offsets = [10, 0], sizes = [1, 512], strides = [1, 1]} : vector<18x512xf32> to vector<1x512xf32>
    %cst_55 = arith.constant 0.000000e+00 : f32
    %117 = vector.broadcast %cst_55 : f32 to vector<16x512xf32>
    %118 = arith.subf %55, %117 : vector<16x512xf32>
    %119 = vector.broadcast %116 : vector<1x512xf32> to vector<16x512xf32>
    %120 = arith.subf %118, %119 : vector<16x512xf32>
    %121 = math.absf %120 : vector<16x512xf32>
    %cst_56 = arith.constant 1.000000e+00 : f32
    %122 = vector.broadcast %cst_56 : f32 to vector<16x512xf32>
    %123 = arith.subf %122, %121 : vector<16x512xf32>
    %cst_57 = arith.constant 0.000000e+00 : f32
    %124 = vector.broadcast %cst_57 : f32 to vector<16x512xf32>
    %125 = arith.maximumf %124, %123 : vector<16x512xf32>
    %126 = arith.truncf %125 : vector<16x512xf32> to vector<16x512xbf16>
    %c0_58 = arith.constant 0 : index
    %c2560 = arith.constant 2560 : index
    %127 = vector.load %arg9[%c0_58, %c2560] : memref<16x4608xbf16, #tpu.memory_space<vmem>>, vector<16x512xbf16>
    tpu.vector_store %arg9[%c0_58, %c2560], %126 {strides = array<i32>} : memref<16x4608xbf16, #tpu.memory_space<vmem>>, vector<16x512xbf16>,
    %128 = vector.extract_strided_slice %54 {offsets = [12, 0], sizes = [1, 512], strides = [1, 1]} : vector<18x512xf32> to vector<1x512xf32>
    %cst_59 = arith.constant 1.000000e+00 : f32
    %129 = vector.broadcast %cst_59 : f32 to vector<16x512xf32>
    %130 = arith.subf %55, %129 : vector<16x512xf32>
    %131 = vector.broadcast %128 : vector<1x512xf32> to vector<16x512xf32>
    %132 = arith.subf %130, %131 : vector<16x512xf32>
    %133 = math.absf %132 : vector<16x512xf32>
    %cst_60 = arith.constant 1.000000e+00 : f32
    %134 = vector.broadcast %cst_60 : f32 to vector<16x512xf32>
    %135 = arith.subf %134, %133 : vector<16x512xf32>
    %cst_61 = arith.constant 0.000000e+00 : f32
    %136 = vector.broadcast %cst_61 : f32 to vector<16x512xf32>
    %137 = arith.maximumf %136, %135 : vector<16x512xf32>
    %138 = arith.truncf %137 : vector<16x512xf32> to vector<16x512xbf16>
    %c0_62 = arith.constant 0 : index
    %c3072 = arith.constant 3072 : index
    %139 = vector.load %arg9[%c0_62, %c3072] : memref<16x4608xbf16, #tpu.memory_space<vmem>>, vector<16x512xbf16>
    tpu.vector_store %arg9[%c0_62, %c3072], %138 {strides = array<i32>} : memref<16x4608xbf16, #tpu.memory_space<vmem>>, vector<16x512xbf16>,
    %140 = vector.extract_strided_slice %54 {offsets = [14, 0], sizes = [1, 512], strides = [1, 1]} : vector<18x512xf32> to vector<1x512xf32>
    %cst_63 = arith.constant 1.000000e+00 : f32
    %141 = vector.broadcast %cst_63 : f32 to vector<16x512xf32>
    %142 = arith.subf %55, %141 : vector<16x512xf32>
    %143 = vector.broadcast %140 : vector<1x512xf32> to vector<16x512xf32>
    %144 = arith.subf %142, %143 : vector<16x512xf32>
    %145 = math.absf %144 : vector<16x512xf32>
    %cst_64 = arith.constant 1.000000e+00 : f32
    %146 = vector.broadcast %cst_64 : f32 to vector<16x512xf32>
    %147 = arith.subf %146, %145 : vector<16x512xf32>
    %cst_65 = arith.constant 0.000000e+00 : f32
    %148 = vector.broadcast %cst_65 : f32 to vector<16x512xf32>
    %149 = arith.maximumf %148, %147 : vector<16x512xf32>
    %150 = arith.truncf %149 : vector<16x512xf32> to vector<16x512xbf16>
    %c0_66 = arith.constant 0 : index
    %c3584 = arith.constant 3584 : index
    %151 = vector.load %arg9[%c0_66, %c3584] : memref<16x4608xbf16, #tpu.memory_space<vmem>>, vector<16x512xbf16>
    tpu.vector_store %arg9[%c0_66, %c3584], %150 {strides = array<i32>} : memref<16x4608xbf16, #tpu.memory_space<vmem>>, vector<16x512xbf16>,
    %152 = vector.extract_strided_slice %54 {offsets = [16, 0], sizes = [1, 512], strides = [1, 1]} : vector<18x512xf32> to vector<1x512xf32>
    %cst_67 = arith.constant 1.000000e+00 : f32
    %153 = vector.broadcast %cst_67 : f32 to vector<16x512xf32>
    %154 = arith.subf %55, %153 : vector<16x512xf32>
    %155 = vector.broadcast %152 : vector<1x512xf32> to vector<16x512xf32>
    %156 = arith.subf %154, %155 : vector<16x512xf32>
    %157 = math.absf %156 : vector<16x512xf32>
    %cst_68 = arith.constant 1.000000e+00 : f32
    %158 = vector.broadcast %cst_68 : f32 to vector<16x512xf32>
    %159 = arith.subf %158, %157 : vector<16x512xf32>
    %cst_69 = arith.constant 0.000000e+00 : f32
    %160 = vector.broadcast %cst_69 : f32 to vector<16x512xf32>
    %161 = arith.maximumf %160, %159 : vector<16x512xf32>
    %162 = arith.truncf %161 : vector<16x512xf32> to vector<16x512xbf16>
    %c0_70 = arith.constant 0 : index
    %c4096 = arith.constant 4096 : index
    %163 = vector.load %arg9[%c0_70, %c4096] : memref<16x4608xbf16, #tpu.memory_space<vmem>>, vector<16x512xbf16>
    tpu.vector_store %arg9[%c0_70, %c4096], %162 {strides = array<i32>} : memref<16x4608xbf16, #tpu.memory_space<vmem>>, vector<16x512xbf16>,
    %c0_71 = arith.constant 0 : index
    %c0_72 = arith.constant 0 : index
    %c0_73 = arith.constant 0 : index
    %164 = vector.load %arg2[%c0_71, %c0_72, %c0_73] : memref<1x64x16xbf16, #tpu.memory_space<vmem>>, vector<1x64x16xbf16>
    %165 = vector.shape_cast %164 : vector<1x64x16xbf16> to vector<64x16xbf16>
    %c0_74 = arith.constant 0 : index
    %c0_75 = arith.constant 0 : index
    %166 = vector.load %arg9[%c0_74, %c0_75] : memref<16x4608xbf16, #tpu.memory_space<vmem>>, vector<16x4608xbf16>
    %cst_76 = arith.constant dense<0.000000e+00> : vector<64x4608xf32>
    %167 = tpu.matmul %165, %166, %cst_76 {dimension_numbers = #tpu.dot_dimension_numbers<[1], [0], [0], [1], [0, 0, 1, 1], [], []>} : vector<64x16xbf16>, vector<16x4608xbf16>, vector<64x4608xf32> -> vector<64x4608xf32>
    %c0_77 = arith.constant 0 : index
    %c0_78 = arith.constant 0 : index
    %168 = vector.load %arg6[%c0_77, %c0_78] : memref<64x512xf32, #tpu.memory_space<vmem>>, vector<64x512xf32>
    %169 = vector.extract_strided_slice %54 {offsets = [1, 0], sizes = [1, 512], strides = [1, 1]} : vector<18x512xf32> to vector<1x512xf32>
    %cst_79 = arith.constant -1.000000e+00 : f32
    %170 = vector.broadcast %cst_79 : f32 to vector<64x512xf32>
    %171 = arith.subf %168, %170 : vector<64x512xf32>
    %172 = vector.broadcast %169 : vector<1x512xf32> to vector<64x512xf32>
    %173 = arith.subf %171, %172 : vector<64x512xf32>
    %174 = math.absf %173 : vector<64x512xf32>
    %cst_80 = arith.constant 1.000000e+00 : f32
    %175 = vector.broadcast %cst_80 : f32 to vector<64x512xf32>
    %176 = arith.subf %175, %174 : vector<64x512xf32>
    %cst_81 = arith.constant 0.000000e+00 : f32
    %177 = vector.broadcast %cst_81 : f32 to vector<64x512xf32>
    %178 = arith.maximumf %177, %176 : vector<64x512xf32>
    %179 = vector.extract_strided_slice %167 {offsets = [0, 0], sizes = [64, 512], strides = [1, 1]} : vector<64x4608xf32> to vector<64x512xf32>
    %180 = arith.mulf %179, %178 : vector<64x512xf32>
    %181 = arith.truncf %180 : vector<64x512xf32> to vector<64x512xbf16>
    %c0_82 = arith.constant 0 : index
    %c0_83 = arith.constant 0 : index
    %182 = vector.load %arg10[%c0_82, %c0_83] : memref<576x512xbf16, #tpu.memory_space<vmem>>, vector<64x512xbf16>
    tpu.vector_store %arg10[%c0_82, %c0_83], %181 {strides = array<i32>} : memref<576x512xbf16, #tpu.memory_space<vmem>>, vector<64x512xbf16>,
    %183 = vector.extract_strided_slice %54 {offsets = [3, 0], sizes = [1, 512], strides = [1, 1]} : vector<18x512xf32> to vector<1x512xf32>
    %cst_84 = arith.constant 0.000000e+00 : f32
    %184 = vector.broadcast %cst_84 : f32 to vector<64x512xf32>
    %185 = arith.subf %168, %184 : vector<64x512xf32>
    %186 = vector.broadcast %183 : vector<1x512xf32> to vector<64x512xf32>
    %187 = arith.subf %185, %186 : vector<64x512xf32>
    %188 = math.absf %187 : vector<64x512xf32>
    %cst_85 = arith.constant 1.000000e+00 : f32
    %189 = vector.broadcast %cst_85 : f32 to vector<64x512xf32>
    %190 = arith.subf %189, %188 : vector<64x512xf32>
    %cst_86 = arith.constant 0.000000e+00 : f32
    %191 = vector.broadcast %cst_86 : f32 to vector<64x512xf32>
    %192 = arith.maximumf %191, %190 : vector<64x512xf32>
    %193 = vector.extract_strided_slice %167 {offsets = [0, 512], sizes = [64, 512], strides = [1, 1]} : vector<64x4608xf32> to vector<64x512xf32>
    %194 = arith.mulf %193, %192 : vector<64x512xf32>
    %195 = arith.truncf %194 : vector<64x512xf32> to vector<64x512xbf16>
    %c64_87 = arith.constant 64 : index
    %c0_88 = arith.constant 0 : index
    %196 = vector.load %arg10[%c64_87, %c0_88] : memref<576x512xbf16, #tpu.memory_space<vmem>>, vector<64x512xbf16>
    tpu.vector_store %arg10[%c64_87, %c0_88], %195 {strides = array<i32>} : memref<576x512xbf16, #tpu.memory_space<vmem>>, vector<64x512xbf16>,
    %197 = vector.extract_strided_slice %54 {offsets = [5, 0], sizes = [1, 512], strides = [1, 1]} : vector<18x512xf32> to vector<1x512xf32>
    %cst_89 = arith.constant 1.000000e+00 : f32
    %198 = vector.broadcast %cst_89 : f32 to vector<64x512xf32>
    %199 = arith.subf %168, %198 : vector<64x512xf32>
    %200 = vector.broadcast %197 : vector<1x512xf32> to vector<64x512xf32>
    %201 = arith.subf %199, %200 : vector<64x512xf32>
    %202 = math.absf %201 : vector<64x512xf32>
    %cst_90 = arith.constant 1.000000e+00 : f32
    %203 = vector.broadcast %cst_90 : f32 to vector<64x512xf32>
    %204 = arith.subf %203, %202 : vector<64x512xf32>
    %cst_91 = arith.constant 0.000000e+00 : f32
    %205 = vector.broadcast %cst_91 : f32 to vector<64x512xf32>
    %206 = arith.maximumf %205, %204 : vector<64x512xf32>
    %207 = vector.extract_strided_slice %167 {offsets = [0, 1024], sizes = [64, 512], strides = [1, 1]} : vector<64x4608xf32> to vector<64x512xf32>
    %208 = arith.mulf %207, %206 : vector<64x512xf32>
    %209 = arith.truncf %208 : vector<64x512xf32> to vector<64x512xbf16>
    %c128_92 = arith.constant 128 : index
    %c0_93 = arith.constant 0 : index
    %210 = vector.load %arg10[%c128_92, %c0_93] : memref<576x512xbf16, #tpu.memory_space<vmem>>, vector<64x512xbf16>
    tpu.vector_store %arg10[%c128_92, %c0_93], %209 {strides = array<i32>} : memref<576x512xbf16, #tpu.memory_space<vmem>>, vector<64x512xbf16>,
    %211 = vector.extract_strided_slice %54 {offsets = [7, 0], sizes = [1, 512], strides = [1, 1]} : vector<18x512xf32> to vector<1x512xf32>
    %cst_94 = arith.constant -1.000000e+00 : f32
    %212 = vector.broadcast %cst_94 : f32 to vector<64x512xf32>
    %213 = arith.subf %168, %212 : vector<64x512xf32>
    %214 = vector.broadcast %211 : vector<1x512xf32> to vector<64x512xf32>
    %215 = arith.subf %213, %214 : vector<64x512xf32>
    %216 = math.absf %215 : vector<64x512xf32>
    %cst_95 = arith.constant 1.000000e+00 : f32
    %217 = vector.broadcast %cst_95 : f32 to vector<64x512xf32>
    %218 = arith.subf %217, %216 : vector<64x512xf32>
    %cst_96 = arith.constant 0.000000e+00 : f32
    %219 = vector.broadcast %cst_96 : f32 to vector<64x512xf32>
    %220 = arith.maximumf %219, %218 : vector<64x512xf32>
    %221 = vector.extract_strided_slice %167 {offsets = [0, 1536], sizes = [64, 512], strides = [1, 1]} : vector<64x4608xf32> to vector<64x512xf32>
    %222 = arith.mulf %221, %220 : vector<64x512xf32>
    %223 = arith.truncf %222 : vector<64x512xf32> to vector<64x512xbf16>
    %c192_97 = arith.constant 192 : index
    %c0_98 = arith.constant 0 : index
    %224 = vector.load %arg10[%c192_97, %c0_98] : memref<576x512xbf16, #tpu.memory_space<vmem>>, vector<64x512xbf16>
    tpu.vector_store %arg10[%c192_97, %c0_98], %223 {strides = array<i32>} : memref<576x512xbf16, #tpu.memory_space<vmem>>, vector<64x512xbf16>,
    %225 = vector.extract_strided_slice %54 {offsets = [9, 0], sizes = [1, 512], strides = [1, 1]} : vector<18x512xf32> to vector<1x512xf32>
    %cst_99 = arith.constant 0.000000e+00 : f32
    %226 = vector.broadcast %cst_99 : f32 to vector<64x512xf32>
    %227 = arith.subf %168, %226 : vector<64x512xf32>
    %228 = vector.broadcast %225 : vector<1x512xf32> to vector<64x512xf32>
    %229 = arith.subf %227, %228 : vector<64x512xf32>
    %230 = math.absf %229 : vector<64x512xf32>
    %cst_100 = arith.constant 1.000000e+00 : f32
    %231 = vector.broadcast %cst_100 : f32 to vector<64x512xf32>
    %232 = arith.subf %231, %230 : vector<64x512xf32>
    %cst_101 = arith.constant 0.000000e+00 : f32
    %233 = vector.broadcast %cst_101 : f32 to vector<64x512xf32>
    %234 = arith.maximumf %233, %232 : vector<64x512xf32>
    %235 = vector.extract_strided_slice %167 {offsets = [0, 2048], sizes = [64, 512], strides = [1, 1]} : vector<64x4608xf32> to vector<64x512xf32>
    %236 = arith.mulf %235, %234 : vector<64x512xf32>
    %237 = arith.truncf %236 : vector<64x512xf32> to vector<64x512xbf16>
    %c256 = arith.constant 256 : index
    %c0_102 = arith.constant 0 : index
    %238 = vector.load %arg10[%c256, %c0_102] : memref<576x512xbf16, #tpu.memory_space<vmem>>, vector<64x512xbf16>
    tpu.vector_store %arg10[%c256, %c0_102], %237 {strides = array<i32>} : memref<576x512xbf16, #tpu.memory_space<vmem>>, vector<64x512xbf16>,
    %239 = vector.extract_strided_slice %54 {offsets = [11, 0], sizes = [1, 512], strides = [1, 1]} : vector<18x512xf32> to vector<1x512xf32>
    %cst_103 = arith.constant 1.000000e+00 : f32
    %240 = vector.broadcast %cst_103 : f32 to vector<64x512xf32>
    %241 = arith.subf %168, %240 : vector<64x512xf32>
    %242 = vector.broadcast %239 : vector<1x512xf32> to vector<64x512xf32>
    %243 = arith.subf %241, %242 : vector<64x512xf32>
    %244 = math.absf %243 : vector<64x512xf32>
    %cst_104 = arith.constant 1.000000e+00 : f32
    %245 = vector.broadcast %cst_104 : f32 to vector<64x512xf32>
    %246 = arith.subf %245, %244 : vector<64x512xf32>
    %cst_105 = arith.constant 0.000000e+00 : f32
    %247 = vector.broadcast %cst_105 : f32 to vector<64x512xf32>
    %248 = arith.maximumf %247, %246 : vector<64x512xf32>
    %249 = vector.extract_strided_slice %167 {offsets = [0, 2560], sizes = [64, 512], strides = [1, 1]} : vector<64x4608xf32> to vector<64x512xf32>
    %250 = arith.mulf %249, %248 : vector<64x512xf32>
    %251 = arith.truncf %250 : vector<64x512xf32> to vector<64x512xbf16>
    %c320 = arith.constant 320 : index
    %c0_106 = arith.constant 0 : index
    %252 = vector.load %arg10[%c320, %c0_106] : memref<576x512xbf16, #tpu.memory_space<vmem>>, vector<64x512xbf16>
    tpu.vector_store %arg10[%c320, %c0_106], %251 {strides = array<i32>} : memref<576x512xbf16, #tpu.memory_space<vmem>>, vector<64x512xbf16>,
    %253 = vector.extract_strided_slice %54 {offsets = [13, 0], sizes = [1, 512], strides = [1, 1]} : vector<18x512xf32> to vector<1x512xf32>
    %cst_107 = arith.constant -1.000000e+00 : f32
    %254 = vector.broadcast %cst_107 : f32 to vector<64x512xf32>
    %255 = arith.subf %168, %254 : vector<64x512xf32>
    %256 = vector.broadcast %253 : vector<1x512xf32> to vector<64x512xf32>
    %257 = arith.subf %255, %256 : vector<64x512xf32>
    %258 = math.absf %257 : vector<64x512xf32>
    %cst_108 = arith.constant 1.000000e+00 : f32
    %259 = vector.broadcast %cst_108 : f32 to vector<64x512xf32>
    %260 = arith.subf %259, %258 : vector<64x512xf32>
    %cst_109 = arith.constant 0.000000e+00 : f32
    %261 = vector.broadcast %cst_109 : f32 to vector<64x512xf32>
    %262 = arith.maximumf %261, %260 : vector<64x512xf32>
    %263 = vector.extract_strided_slice %167 {offsets = [0, 3072], sizes = [64, 512], strides = [1, 1]} : vector<64x4608xf32> to vector<64x512xf32>
    %264 = arith.mulf %263, %262 : vector<64x512xf32>
    %265 = arith.truncf %264 : vector<64x512xf32> to vector<64x512xbf16>
    %c384 = arith.constant 384 : index
    %c0_110 = arith.constant 0 : index
    %266 = vector.load %arg10[%c384, %c0_110] : memref<576x512xbf16, #tpu.memory_space<vmem>>, vector<64x512xbf16>
    tpu.vector_store %arg10[%c384, %c0_110], %265 {strides = array<i32>} : memref<576x512xbf16, #tpu.memory_space<vmem>>, vector<64x512xbf16>,
    %267 = vector.extract_strided_slice %54 {offsets = [15, 0], sizes = [1, 512], strides = [1, 1]} : vector<18x512xf32> to vector<1x512xf32>
    %cst_111 = arith.constant 0.000000e+00 : f32
    %268 = vector.broadcast %cst_111 : f32 to vector<64x512xf32>
    %269 = arith.subf %168, %268 : vector<64x512xf32>
    %270 = vector.broadcast %267 : vector<1x512xf32> to vector<64x512xf32>
    %271 = arith.subf %269, %270 : vector<64x512xf32>
    %272 = math.absf %271 : vector<64x512xf32>
    %cst_112 = arith.constant 1.000000e+00 : f32
    %273 = vector.broadcast %cst_112 : f32 to vector<64x512xf32>
    %274 = arith.subf %273, %272 : vector<64x512xf32>
    %cst_113 = arith.constant 0.000000e+00 : f32
    %275 = vector.broadcast %cst_113 : f32 to vector<64x512xf32>
    %276 = arith.maximumf %275, %274 : vector<64x512xf32>
    %277 = vector.extract_strided_slice %167 {offsets = [0, 3584], sizes = [64, 512], strides = [1, 1]} : vector<64x4608xf32> to vector<64x512xf32>
    %278 = arith.mulf %277, %276 : vector<64x512xf32>
    %279 = arith.truncf %278 : vector<64x512xf32> to vector<64x512xbf16>
    %c448 = arith.constant 448 : index
    %c0_114 = arith.constant 0 : index
    %280 = vector.load %arg10[%c448, %c0_114] : memref<576x512xbf16, #tpu.memory_space<vmem>>, vector<64x512xbf16>
    tpu.vector_store %arg10[%c448, %c0_114], %279 {strides = array<i32>} : memref<576x512xbf16, #tpu.memory_space<vmem>>, vector<64x512xbf16>,
    %281 = vector.extract_strided_slice %54 {offsets = [17, 0], sizes = [1, 512], strides = [1, 1]} : vector<18x512xf32> to vector<1x512xf32>
    %cst_115 = arith.constant 1.000000e+00 : f32
    %282 = vector.broadcast %cst_115 : f32 to vector<64x512xf32>
    %283 = arith.subf %168, %282 : vector<64x512xf32>
    %284 = vector.broadcast %281 : vector<1x512xf32> to vector<64x512xf32>
    %285 = arith.subf %283, %284 : vector<64x512xf32>
    %286 = math.absf %285 : vector<64x512xf32>
    %cst_116 = arith.constant 1.000000e+00 : f32
    %287 = vector.broadcast %cst_116 : f32 to vector<64x512xf32>
    %288 = arith.subf %287, %286 : vector<64x512xf32>
    %cst_117 = arith.constant 0.000000e+00 : f32
    %289 = vector.broadcast %cst_117 : f32 to vector<64x512xf32>
    %290 = arith.maximumf %289, %288 : vector<64x512xf32>
    %291 = vector.extract_strided_slice %167 {offsets = [0, 4096], sizes = [64, 512], strides = [1, 1]} : vector<64x4608xf32> to vector<64x512xf32>
    %292 = arith.mulf %291, %290 : vector<64x512xf32>
    %293 = arith.truncf %292 : vector<64x512xf32> to vector<64x512xbf16>
    %c512_118 = arith.constant 512 : index
    %c0_119 = arith.constant 0 : index
    %294 = vector.load %arg10[%c512_118, %c0_119] : memref<576x512xbf16, #tpu.memory_space<vmem>>, vector<64x512xbf16>
    tpu.vector_store %arg10[%c512_118, %c0_119], %293 {strides = array<i32>} : memref<576x512xbf16, #tpu.memory_space<vmem>>, vector<64x512xbf16>,
    %c0_120 = arith.constant 0 : index
    %c0_121 = arith.constant 0 : index
    %295 = vector.load %arg4[%c0_120, %c0_121] : memref<9x576xbf16, #tpu.memory_space<vmem>>, vector<9x576xbf16>
    %c0_122 = arith.constant 0 : index
    %c0_123 = arith.constant 0 : index
    %296 = vector.load %arg10[%c0_122, %c0_123] : memref<576x512xbf16, #tpu.memory_space<vmem>>, vector<576x512xbf16>
    %cst_124 = arith.constant dense<0.000000e+00> : vector<9x512xf32>
    %297 = tpu.matmul %295, %296, %cst_124 {dimension_numbers = #tpu.dot_dimension_numbers<[1], [0], [0], [1], [0, 0, 1, 1], [], []>} : vector<9x576xbf16>, vector<576x512xbf16>, vector<9x512xf32> -> vector<9x512xf32>
    %298 = arith.negf %297 : vector<9x512xf32>
    %299 = math.exp %298 : vector<9x512xf32>
    %cst_125 = arith.constant 1.000000e+00 : f32
    %300 = vector.broadcast %cst_125 : f32 to vector<9x512xf32>
    %301 = arith.addf %300, %299 : vector<9x512xf32>
    %302 = arith.divf %300, %301 : vector<9x512xf32>
    %c0_126 = arith.constant 0 : index
    %c0_127 = arith.constant 0 : index
    %c0_128 = arith.constant 0 : index
    %303 = vector.load %arg7[%c0_126, %c0_127, %c0_128] : memref<1x9x512xf32, #tpu.memory_space<vmem>>, vector<1x9x512xf32>
    %304 = vector.shape_cast %303 : vector<1x9x512xf32> to vector<9x512xf32>
    %305 = vector.shape_cast %302 : vector<9x512xf32> to vector<1x9x512xf32>
    tpu.vector_store %arg7[%c0_126, %c0_127, %c0_128], %305 {strides = array<i32>} : memref<1x9x512xf32, #tpu.memory_space<vmem>>, vector<1x9x512xf32>,
    return
  }
  func.func @transform_0(%arg0: i32) -> (i32, i32, i32) {
    %c0_i32 = arith.constant 0 : i32
    %c0_i32_0 = arith.constant 0 : i32
    %c0_i32_1 = arith.constant 0 : i32
    return %arg0, %c0_i32, %c0_i32_0 : i32, i32, i32
  }
  func.func @transform_1(%arg0: i32) -> (i32, i32, i32) {
    %c0_i32 = arith.constant 0 : i32
    %c0_i32_0 = arith.constant 0 : i32
    %c0_i32_1 = arith.constant 0 : i32
    return %arg0, %c0_i32, %c0_i32_0 : i32, i32, i32
  }
  func.func @transform_2(%arg0: i32) -> (i32, i32) {
    %c0_i32 = arith.constant 0 : i32
    %c0_i32_0 = arith.constant 0 : i32
    %c0_i32_1 = arith.constant 0 : i32
    return %c0_i32, %c0_i32_0 : i32, i32
  }
  func.func @transform_3(%arg0: i32) -> (i32, i32) {
    %c0_i32 = arith.constant 0 : i32
    %c0_i32_0 = arith.constant 0 : i32
    %c0_i32_1 = arith.constant 0 : i32
    return %c0_i32, %c0_i32_0 : i32, i32
  }
  func.func @transform_4(%arg0: i32) -> (i32, i32) {
    %c0_i32 = arith.constant 0 : i32
    %c0_i32_0 = arith.constant 0 : i32
    %c0_i32_1 = arith.constant 0 : i32
    return %c0_i32, %c0_i32_0 : i32, i32
  }
  func.func @transform_5(%arg0: i32) -> (i32, i32) {
    %c0_i32 = arith.constant 0 : i32
    %c0_i32_0 = arith.constant 0 : i32
    %c0_i32_1 = arith.constant 0 : i32
    return %c0_i32, %c0_i32_0 : i32, i32
  }
  func.func @transform_6(%arg0: i32) -> (i32, i32, i32) {
    %c0_i32 = arith.constant 0 : i32
    %c0_i32_0 = arith.constant 0 : i32
    %c0_i32_1 = arith.constant 0 : i32
    return %arg0, %c0_i32, %c0_i32_0 : i32, i32, i32
  }
}

</mosaic_0001>

<bundles_post_ra>
// kernel: tpu_custom_call.1
= control target key start
LH: loop header
LB: loop body
LE: loop exit
PB: predicated region body
PF: predicated region fallthrough
CT: control target
= control target key end

     0   :  { %s10191_s0 = inlined_call_operand.hbm [shape: f32[2,8,596], index: 0, kind: input, shape index: {}]   ;;  %s10192_s1 = inlined_call_operand.hbm [shape: bf16[2,64,16], index: 1, kind: input, shape index: {}]   ;;  %s10193_s2 = inlined_call_operand.hbm [shape: f32[18,200], index: 2, kind: input, shape index: {}]   ;;  %s10194_s3 = inlined_call_operand.hbm [shape: bf16[9,576], index: 3, kind: input, shape index: {}]   ;;  %s10195_s4 = inlined_call_operand.hbm [shape: f32[16,512], index: 4, kind: input, shape index: {}]   ;;  %s10196_s5 = inlined_call_operand.hbm [shape: f32[64,512], index: 5, kind: input, shape index: {}]   ;;  %s10197_s6 = inlined_call_operand.hbm [shape: f32[2,9,512], index: 6, kind: output, shape index: {}]  }
   0x1   :  { %10377 = sst [smem:[#allocation216_spill]] %s10191_s0 }
   0x2   :  { %10378 = sst [smem:[#allocation217_spill]] %s10193_s2 }
   0x3   :  { %11 = vsyncpa [#allocation6], 0 }
   0x4   :  { %13 = vsyncpa [#allocation6 + $0x1], 0 }
   0x5   :  { %14 = vsyncpa [#allocation9], 0 }
   0x6   :  { %16 = vsyncpa [#allocation9 + $0x1], 0 }
   0x7   :  { %17 = vsyncpa [#allocation12], 0 }
   0x8   :  { %18 = vsyncpa [#allocation15], 0 }
   0x9   :  { %19 = vsyncpa [#allocation7], 0 }
   0xa   :  { %21 = vsyncpa [#allocation7 + $0x1], 0  ;;  %s6896_s21 = smov 0   ;;  %s6898_s22 = smov 0  }
   0xb   :  { %s6900_s23 = smov 0   ;;  %s6902_s24 = smov 0  }
   0xc LB: > { %s6819_s25 = smov [#allocation10]   ;;  %s6917_s27 = sadd.s32 4294967295, %s6817_s24   ;;  %s6817_s24 = sphi %s6902_s24, %s11129_s24   ;;  %s6813_s23 = sphi %s6900_s23, %s11128_s23   ;;  %s6809_s22 = sphi %s6898_s22, %s11127_s22   ;;  %s6805_s21 = sphi %s6896_s21, %s11126_s21  }
   0xd   : > { %s206_s26 = sshll.u32 %s6819_s25, 4  ;;  %p5743_p0 = scmp.ge.s32.totalorder %s6817_s24, 1  ;;  %s6922_s26 = int_to_ptr.vmem [resolvable:$true] %s206_s26 }
   0xe   : > { %p10198_p1 = scmp.eq.s32.totalorder %s6917_s27, 0  ;;  %p194_p2 = scmp.lt.s32.totalorder %s6817_s24, 3 }
   0xf   : > { %s6820_s29 = smov [#allocation11]   ;;  %s6821_s8 = smov [#allocation13]  }
  0x10   : > { %p6924_p3 = pnand %p5743_p0, %p194_p2  ;;  %s219_s30 = sshll.u32 %s6820_s29, 4  ;;  %s6937_s30 = int_to_ptr.vmem [resolvable:$true] %s219_s30 }
  0x11   : > { %s6939_s9 = sshll.u32 %s6821_s8, 4  ;;  %s10381_s2 = sld [smem:[#allocation217_spill]]  ;;  %s233_s9 = int_to_ptr.vmem [resolvable:$true] %s6939_s9 }
  0x12   : > { %s10379_s28 = scalar_select %p6924_p3, 1, 0 }
  0x13   : > { %p6081_p5 = pneg %p6924_p3 }
  0x15   : > { %p6933_p6 = pnand %p6081_p5, %p10198_p1 }
  0x17   : > { %s6563_s12 = scalar_lea.hbm %s10381_s2, 768  ;;  %p6949_p8 = pneg %p6933_p6 }
  0x18   : > { %p6564_p7 = scmp.ne.s32.totalorder %s10381_s2, %s6563_s12  ;;  %p6570_p11 = scmp.lt.u32.totalorder %s6563_s12, %s10381_s2 }
  0x1a   : > { %p6566_p9 = pnand %p6949_p8, %p6564_p7 }
  0x1c   : > { %p6567_p10 = pneg %p6566_p9 }
  0x1e   : > { %p6572_p12 = pnand %p6570_p11, %p6567_p10 }
  0x20   : > { %6575 = shalt.err (!%p6572_p12)
}
  0x21   : > { %s6576_s18 = scalar_lea.vmem %s6922_s26, 768  ;;  %p6584_p5 = scmp.lt.s32.totalorder %s6922_s26, %s6922_s26 }
  0x22   : > { %p6577_p13 = scmp.ne.s32.totalorder %s6922_s26, %s6576_s18  ;;  %p6585_p4 = scmp.lt.s32.totalorder %s6576_s18, %s6576_s18 }
  0x24   : > { %p6579_p0 = pnand %p6577_p13, %p6949_p8  ;;  %p6586_p7 = por %p6585_p4, %p6584_p5 }
  0x26   : > { %p6580_p2 = pneg %p6579_p0 }
  0x28   : > { %p6587_p9 = pnand %p6586_p7, %p6580_p2 }
  0x2a   : > { %6590 = shalt.err (!%p6587_p9)
}
  0x2b   : > { %s6822_s19 = smov 256   ;;  %s6823_s20 = smov 16  }
  0x2c   : > { %6084 = dma.hbm_to_vmem [thread:$0]  (!%p6933_p6), %s10381_s2, 768, %s6922_s26, [#allocation9], %s6822_s19, %s6822_s19, %s6823_s20  }
  0x2d   : > { %s6591_s11 = scalar_lea.hbm %s10194_s3, 640 }
  0x2e   : > { %p6592_p4 = scmp.ne.s32.totalorder %s10194_s3, %s6591_s11  ;;  %p6598_p12 = scmp.lt.u32.totalorder %s6591_s11, %s10194_s3 }
  0x30   : > { %p6594_p10 = pnand %p6592_p4, %p6949_p8 }
  0x32   : > { %p6595_p11 = pneg %p6594_p10 }
  0x34   : > { %p6600_p13 = pnand %p6598_p12, %p6595_p11 }
  0x36   : > { %6603 = shalt.err (!%p6600_p13)
}
  0x37   : > { %s6604_s26 = scalar_lea.vmem %s6937_s30, 640  ;;  %p6612_p7 = scmp.lt.s32.totalorder %s6937_s30, %s6937_s30 }
  0x38   : > { %p6605_p0 = scmp.ne.s32.totalorder %s6937_s30, %s6604_s26  ;;  %p6613_p9 = scmp.lt.s32.totalorder %s6604_s26, %s6604_s26 }
  0x3a   : > { %p6607_p2 = pnand %p6605_p0, %p6949_p8  ;;  %p6614_p4 = por %p6613_p9, %p6612_p7 }
  0x3c   : > { %p6608_p5 = pneg %p6607_p2 }
  0x3e   : > { %p6615_p10 = pnand %p6614_p4, %p6608_p5 }
  0x40   : > { %6618 = shalt.err (!%p6615_p10)
}
  0x41   : > { %s6824_s17 = smov 320   ;;  %s6825_s18 = smov 20  }
  0x42   : > { %6087 = dma.hbm_to_vmem [thread:$0]  (!%p6933_p6), %s10194_s3, 640, %s6937_s30, [#allocation12], %s6824_s17, %s6824_s17, %s6825_s18  }
  0x43   : > { %s6619_s8 = scalar_lea.hbm %s10195_s4, 1024 }
  0x44   : > { %p6620_p11 = scmp.ne.s32.totalorder %s10195_s4, %s6619_s8  ;;  %p6626_p0 = scmp.lt.u32.totalorder %s6619_s8, %s10195_s4 }
  0x46   : > { %p6622_p12 = pnand %p6620_p11, %p6949_p8 }
  0x48   : > { %p6623_p13 = pneg %p6622_p12 }
  0x4a   : > { %p6628_p2 = pnand %p6626_p0, %p6623_p13 }
  0x4c   : > { %6631 = shalt.err (!%p6628_p2)
}
  0x4d   : > { %s6632_s14 = scalar_lea.vmem %s233_s9, 1024  ;;  %p6640_p4 = scmp.lt.s32.totalorder %s233_s9, %s233_s9 }
  0x4e   : > { %p6633_p5 = scmp.ne.s32.totalorder %s233_s9, %s6632_s14  ;;  %p6641_p10 = scmp.lt.s32.totalorder %s6632_s14, %s6632_s14 }
  0x50   : > { %p6635_p7 = pnand %p6633_p5, %p6949_p8  ;;  %p6642_p1 = por %p6641_p10, %p6640_p4 }
  0x52   : > { %p6636_p9 = pneg %p6635_p7 }
  0x54   : > { %p6643_p3 = pnand %p6642_p1, %p6636_p9 }
  0x56   : > { %6646 = shalt.err (!%p6643_p3)
}
  0x57   : > { %s6826_s30 = smov 512   ;;  %s6827_s16 = smov 32  }
  0x58   : > { %6090 = dma.hbm_to_vmem [thread:$0]  (!%p6933_p6), %s10195_s4, 1024, %s233_s9, [#allocation12], %s6826_s30, %s6826_s30, %s6827_s16  }
  0x59   : > { %s6828_s18 = smov [#allocation14]   ;;  %s6647_s29 = scalar_lea.hbm %s10196_s5, 4096 }
  0x5a   : > { %s245_s19 = sshll.u32 %s6828_s18, 4  ;;  %p6648_p1 = scmp.ne.s32.totalorder %s10196_s5, %s6647_s29  ;;  %s246_s19 = int_to_ptr.vmem [resolvable:$true] %s245_s19 }
  0x5b   : > { %p6654_p12 = scmp.lt.u32.totalorder %s6647_s29, %s10196_s5 }
  0x5c   : > { %p6650_p3 = pnand %p6648_p1, %p6949_p8 }
  0x5e   : > { %p6651_p11 = pneg %p6650_p3 }
  0x60   : > { %p6656_p13 = pnand %p6654_p12, %p6651_p11 }
  0x62   : > { %6659 = shalt.err (!%p6656_p13)
}
  0x63   : > { %s6660_s9 = scalar_lea.vmem %s246_s19, 4096  ;;  %p6668_p7 = scmp.lt.s32.totalorder %s246_s19, %s246_s19 }
  0x64   : > { %p6661_p0 = scmp.ne.s32.totalorder %s246_s19, %s6660_s9  ;;  %p6669_p9 = scmp.lt.s32.totalorder %s6660_s9, %s6660_s9 }
  0x66   : > { %p6663_p2 = pnand %p6661_p0, %p6949_p8  ;;  %p6670_p4 = por %p6669_p9, %p6668_p7 }
  0x68   : > { %p6664_p5 = pneg %p6663_p2 }
  0x6a   : > { %p6671_p10 = pnand %p6670_p4, %p6664_p5 }
  0x6c   : > { %6674 = shalt.err (!%p6671_p10)
}
  0x6d   : > { %6093 = dma.hbm_to_vmem [thread:$0]  (!%p6933_p6), %s10196_s5, 4096, %s246_s19, [#allocation15], %s6826_s30, %s6826_s30, %s6827_s16  }
  0x6e   : > { %s5742_s15 = sadd.s32 4294967294, %s6817_s24   ;;  %s7032_s7 = sadd.s32 1, %s6817_s24  }
  0x6f   : > { %s31_s26 = ssub.s32 %s6817_s24, %s7032_s7  ;;  %s34_s17 = sadd.s32 1, %s6813_s23 }
  0x70   : > { %p32_p8 = scmp.eq.s32.totalorder %s31_s26, 0  ;;  %p41_p1 = scmp.ne.s32.totalorder %s6813_s23, %s6809_s22 }
  0x71   : > { %p42_p3 = scmp.eq.s32.totalorder %s6817_s24, 0  ;;  %p47_p11 = scmp.ne.s32.totalorder %s6809_s22, %s6805_s21 }
  0x72   : > { %s7043_s18 = scalar_select %p32_p8, %s6813_s23, %s34_s17  }
  0x73   : > { %p43_p12 = por %p42_p3, %p41_p1  ;;  %p10383_p13 = scmp.eq.s32.totalorder %s6917_s27, 0 }
  0x74   : > { %p181_p6 = scmp.eq.s32.totalorder %s6917_s27, 1  ;;  %p187_p2 = scmp.eq.s32.totalorder %s5742_s15, 1 }
  0x75   : > { %p7047_p0 = por %p10383_p13, %p47_p11  ;;  %p6109_p5 = scmp.lt.s32.totalorder %s6817_s24, 2 }
  0x76   : > { %s7054_s30 = sand.u32 1, %s6813_s23   ;;  %p7056_p7 = por %p181_p6, %p41_p1 }
  0x77   : > { %p7060_p9 = por %p187_p2, %p47_p11  ;;  %s6056_s25 = smul.u32 40, %s7054_s30 }
  0x78   : > { %s10385_s16 = scalar_select %p7056_p7, 1, 0 }
  0x79   : > { %s10386_s19 = scalar_select %p7060_p9, 1, 0 }
  0x7a   : > { %s6057_s29 = smul.u32 640, %s6817_s24  ;;  %p7066_p4 = pnand %p6109_p5, %p43_p12 }
  0x7b   : > { %s10388_s0 = sld [smem:[#allocation216_spill]]  ;;  %s263_s13 = scalar_lea.vmem [#allocation5], %s6056_s25 }
  0x7c   : > { %s271_s14 = sshll.u32 %s263_s13, 4  ;;  %s260_s15 = scalar_lea.sflag [#allocation6], %s7054_s30  ;;  %s7076_s14 = int_to_ptr.vmem [resolvable:$true] %s271_s14 }
  0x7d   : > { %p6677_p8 = pneg %p7066_p4 }
  0x81   : > { %s7074_s9 = scalar_lea.hbm %s10388_s0, %s6057_s29  ;;  %s6680_s11 = scalar_lea.hbm %s10388_s0, 1280 }
  0x82   : > { %s6675_s26 = scalar_lea.hbm %s7074_s9, 640  ;;  %p6681_p11 = scmp.lt.u32.totalorder %s7074_s9, %s10388_s0 }
  0x83   : > { %p6676_p10 = scmp.ne.s32.totalorder %s7074_s9, %s6675_s26  ;;  %p6682_p12 = scmp.lt.u32.totalorder %s6680_s11, %s6675_s26 }
  0x84   : > { %p6684_p6 = scmp.lt.u32.totalorder %s6675_s26, %s7074_s9 }
  0x85   : > { %p6678_p1 = pnand %p6677_p8, %p6676_p10  ;;  %p6683_p13 = por %p6682_p12, %p6681_p11 }
  0x87   : > { %p6679_p3 = pneg %p6678_p1  ;;  %p6685_p2 = por %p6684_p6, %p6683_p13 }
  0x89   : > { %p6686_p5 = pnand %p6685_p2, %p6679_p3 }
  0x8b   : > { %6689 = shalt.err (!%p6686_p5)
}
  0x8c   : > { %s6690_s25 = scalar_lea.vmem %s7076_s14, 640  ;;  %s6829_s13 = smov [#allocation5]  }
  0x8d   : > { %p6691_p10 = scmp.ne.s32.totalorder %s7076_s14, %s6690_s25  ;;  %s6695_s17 = sshll.u32 %s6829_s13, 4  ;;  %s6696_s17 = int_to_ptr.vmem [resolvable:$false] %s6695_s17 }
  0x8e   : > { %s6697_s10 = scalar_lea.vmem %s6696_s17, 1280  ;;  %p6698_p7 = scmp.lt.s32.totalorder %s7076_s14, %s6696_s17 }
  0x8f   : > { %p6693_p1 = pnand %p6691_p10, %p6677_p8  ;;  %p6699_p11 = scmp.lt.s32.totalorder %s6697_s10, %s6690_s25 }
  0x91   : > { %p6694_p9 = pneg %p6693_p1  ;;  %p6700_p12 = por %p6699_p11, %p6698_p7 }
  0x93   : > { %p6701_p13 = pnand %p6700_p12, %p6694_p9 }
  0x95   : > { %6704 = shalt.err (!%p6701_p13)
}
  0x96   : > { %6097 = dma.hbm_to_vmem [thread:$0]  (!%p7066_p4), %s7074_s9, 640, %s7076_s14, %s260_s15  }
  0x97   : > { %s278_s26 = sand.u32 1, %s6817_s24   ;;  %s10389_s29 = sshll.u32 %s7054_s30, 5 }
  0x98   : > { %s282_s11 = scalar_lea.vmem [#allocation8], %s10389_s29  ;;  %s5942_s13 = sshll.u32 %s6817_s24, 9 }
  0x99   : > { %s289_s12 = sshll.u32 %s282_s11, 4  ;;  %s7113_s10 = scalar_lea.hbm %s10192_s1, %s5942_s13  ;;  %s7107_s12 = int_to_ptr.vmem [resolvable:$true] %s289_s12 }
  0x9a   : > { %s7115_s0 = scalar_lea.sflag [#allocation9], %s278_s26  ;;  %s6705_s2 = scalar_lea.hbm %s7113_s10, 512 }
  0x9b   : > { %p6706_p7 = scmp.ne.s32.totalorder %s7113_s10, %s6705_s2  ;;  %s6710_s14 = scalar_lea.hbm %s10192_s1, 1024 }
  0x9c   : > { %p6711_p6 = scmp.lt.u32.totalorder %s7113_s10, %s10192_s1  ;;  %p6712_p2 = scmp.lt.u32.totalorder %s6710_s14, %s6705_s2 }
  0x9d   : > { %p6708_p9 = pnand %p6706_p7, %p6677_p8  ;;  %p6714_p10 = scmp.lt.u32.totalorder %s6705_s2, %s7113_s10 }
  0x9e   : > { %p6713_p5 = por %p6712_p2, %p6711_p6 }
  0x9f   : > { %p6709_p3 = pneg %p6708_p9 }
  0xa0   : > { %p6715_p1 = por %p6714_p10, %p6713_p5 }
  0xa2   : > { %p6716_p11 = pnand %p6715_p1, %p6709_p3 }
  0xa4   : > { %6719 = shalt.err (!%p6716_p11)
}
  0xa5   : > { %s6720_s26 = scalar_lea.vmem %s7107_s12, 512  ;;  %s6830_s11 = smov [#allocation8]  }
  0xa6   : > { %p6721_p12 = scmp.ne.s32.totalorder %s7107_s12, %s6720_s26  ;;  %s6725_s13 = sshll.u32 %s6830_s11, 4  ;;  %s6726_s13 = int_to_ptr.vmem [resolvable:$false] %s6725_s13 }
  0xa7   : > { %s6727_s25 = scalar_lea.vmem %s6726_s13, 1024  ;;  %p6728_p9 = scmp.lt.s32.totalorder %s7107_s12, %s6726_s13 }
  0xa8   : > { %p6723_p13 = pnand %p6721_p12, %p6677_p8  ;;  %p6729_p6 = scmp.lt.s32.totalorder %s6727_s25, %s6720_s26 }
  0xaa   : > { %p6724_p7 = pneg %p6723_p13  ;;  %p6730_p2 = por %p6729_p6, %p6728_p9 }
  0xac   : > { %p6731_p5 = pnand %p6730_p2, %p6724_p7 }
  0xae   : > { %6734 = shalt.err (!%p6731_p5)
}
  0xaf   : > { %s6831_s2 = smov 64   ;;  %s6832_s17 = smov 4  }
  0xb0   : > { %6100 = dma.hbm_to_vmem [thread:$0]  (!%p7066_p4), %s7113_s10, 512, %s7107_s12, %s7115_s0, %s6831_s2, %s6831_s2, %s6832_s17  }
  0xb1   : > { %p10390_p8 = scmp.ne.s32.totalorder %s10379_s28, 0 }
  0xb3   : > { %301 = sbr.rel (%p10390_p8) target bundleno = 1475 (0x5c3), region = 44 }
  0xba   : > { %s7144_s30 = sand.u32 1, %s6809_s22  }
  0xbb   : > { %s6058_s9 = smul.u32 40, %s7144_s30  ;;  %s304_s14 = scalar_lea.sflag [#allocation6], %s7144_s30 }
  0xbd   : > { %s307_s15 = scalar_lea.vmem [#allocation5], %s6058_s9 }
  0xbe   : > { %6780 = dma.done.wait (%p7047_p0), %s304_s14, 640  }
  0xbf   : > { %6782 = vsyncadd (%p7047_p0), %s304_s14, 4294966656  ;;  %s312_s0 = sand.u32 1, %s6917_s27   ;;  %s5754_s28 = sshll.u32 %s7144_s30, 5 }
  0xc0   : > { %s313_s8 = scalar_lea.sflag [#allocation9], %s312_s0  ;;  %s7154_s12 = scalar_lea.vmem [#allocation8], %s5754_s28 }
  0xc1   : > { %6784 = dma.done.wait (%p7047_p0), %s313_s8, 512  }
  0xc2   : > { %6786 = vsyncadd (%p7047_p0), %s313_s8, 4294966784  ;;  %p10391_p4 = scmp.eq.s32.totalorder %s6917_s27, 0 }
  0xc4   : > { %6788 = dma.done.wait (%p10391_p4), [#allocation9], 768   ;;  %p10392_p3 = pmov %p10391_p4 }
  0xc6   : > { %6790 = vsyncadd (%p10392_p3), [#allocation9], 4294966528  ;;  %p10393_p10 = pmov %p10392_p3 }
  0xc7   : > { %p10394_p1 = pmov %p10392_p3 }
  0xc8   : > { %6792 = dma.done.wait (%p10393_p10), [#allocation12], 1664  }
  0xc9   : > { %6794 = vsyncadd (%p10394_p1), [#allocation12], 4294965632  ;;  %p10395_p11 = pmov %p10394_p1 }
  0xca   : > { %p10396_p12 = pmov %p10394_p1 }
  0xcb   : > { %6796 = dma.done.wait (%p10395_p11), [#allocation15], 4096  }
  0xcc   : > { %6798 = vsyncadd (%p10396_p12), [#allocation15], 4294963200  ;;  %v7172_v0 = vld [vmem:[%s307_s15] sm:$0xff]  ;;  %v7174_v1 = vld [vmem:[%s307_s15 + $0x8] sm:$0xff]  ;;  %s6833_s20 = smov 127   ;;  %s6834_s10 = smov 126  }
  0xcd   : > { %v7176_v2 = vld [vmem:[%s307_s15 + $0x10] sm:$0xff]  ;;  %381 = vrot.lane.b32.xlu1 %v7172_v0, %s6833_s20  ;;  %v7183_v4 = vld [vmem:[%s307_s15 + $0x18] sm:$0xff]  ;;  %v7185_v5 = vld [vmem:[%s307_s15 + $0x20] sm:$0xff]  ;;  %s6835_s29 = smov 125   ;;  %s6836_s26 = smov 124   ;;  %vm391_vm0 = vcmask 1039360  }
  0xce   : > { %v7181_v3 = vpack.i.bf16 %v7176_v2, %v7174_v1  ;;  %v7190_v6 = vpack.i.bf16 %v7185_v5, %v7183_v4  ;;  %s6837_s11 = smov 108   ;;  %s6838_s13 = smov 107   ;;  %vm414_vm1 = vcmask 1031168   ;;  %vm437_vm2 = vcmask 1022976   ;;  %v934_v41 = vld [vmem:[#allocation10 + $0x8] sm:$0xff] }
  0xcf   : > { %s6839_s25 = smov 106   ;;  %s6840_s2 = smov 105   ;;  %vm1039_vm3 = vcmask 588800   ;;  %vm460_vm4 = vcmask 1014784   ;;  %vm483_vm5 = vcmask 883712   ;;  %vm506_vm6 = vcmask 875520  }
  0xd0   : > { %6187 = vrot.lane.b32.xlu0 %v7181_v3, %s6833_s20  ;;  %s6841_s17 = smov 104   ;;  %s6842_s9 = smov 88   ;;  %5760 = vmatprep.mubr.msk.f32.mxu0 %vm1039_vm3, %v934_v41  ;;  %vm529_vm7 = vcmask 867328   ;;  %vm552_vm8 = vcmask 859136   ;;  %vm575_vm9 = vcmask 850944   ;;  %vm598_vm10 = vcmask 719872  }
  0xd1   : > { %6197 = vrot.lane.b32.xlu1 %v7181_v3, %s6834_s10  ;;  %s6843_s14 = smov 87   ;;  %s6844_s15 = smov 86   ;;  %5763 = vmatprep.mubr.msk.f32.mxu1 %vm1039_vm3, %v934_v41  ;;  %vm621_vm11 = vcmask 711680   ;;  %vm644_vm12 = vcmask 703488   ;;  %vm667_vm13 = vcmask 695296   ;;  %vm690_vm14 = vcmask 687104  }
  0xd2   : > { %s6845_s0 = smov 85   ;;  %s6846_s28 = smov 84   ;;  %vm713_vm15 = vcmask 556032  }
  0xd3   : > { %s6847_s8 = smov 68   ;;  %p11123_p13 = scmp.ne.s32.totalorder %s10385_s16, 0 }
  0xd4   : > { %6192 = vrot.lane.b32.xlu0 %v7190_v6, %s6833_s20  ;;  %s6848_s20 = smov 67  }
  0xd5   : > { %6207 = vrot.lane.b32.xlu1 %v7181_v3, %s6835_s29 }
  0xd8   : > { %6202 = vrot.lane.b32.xlu0 %v7190_v6, %s6834_s10 }
  0xd9   : > { %404 = vrot.lane.b32.xlu1 %v7172_v0, %s6834_s10  ;;  %s6849_s10 = smov 66  }
  0xdc   : > { %6212 = vrot.lane.b32.xlu0 %v7190_v6, %s6835_s29 }
  0xdd   : > { %6217 = vrot.lane.b32.xlu1 %v7181_v3, %s6836_s26 }
  0xe0   : > { %427 = vrot.lane.b32.xlu0 %v7172_v0, %s6835_s29  ;;  %s6850_s29 = smov 65  }
  0xe1   : > { %6227 = vrot.lane.b32.xlu1 %v7181_v3, %s6837_s11 }
  0xe4   : > { %6222 = vrot.lane.b32.xlu0 %v7190_v6, %s6836_s26 }
  0xe5   : > { %450 = vrot.lane.b32.xlu1 %v7172_v0, %s6836_s26  ;;  %s6851_s26 = smov 64  }
  0xe8   : > { %6232 = vrot.lane.b32.xlu0 %v7190_v6, %s6837_s11 }
  0xe9   : > { %6237 = vrot.lane.b32.xlu1 %v7181_v3, %s6838_s13 }
  0xec   : > { %473 = vrot.lane.b32.xlu0 %v7172_v0, %s6837_s11  ;;  %s6852_s11 = smov 48  }
  0xed   : > { %6247 = vrot.lane.b32.xlu1 %v7181_v3, %s6839_s25 }
  0xf0   : > { %6242 = vrot.lane.b32.xlu0 %v7190_v6, %s6838_s13 }
  0xf1   : > { %496 = vrot.lane.b32.xlu1 %v7172_v0, %s6838_s13  ;;  %s6853_s13 = smov 47  }
  0xf4   : > { %6252 = vrot.lane.b32.xlu0 %v7190_v6, %s6839_s25 }
  0xf5   : > { %6257 = vrot.lane.b32.xlu1 %v7181_v3, %s6840_s2 }
  0xf8   : > { %519 = vrot.lane.b32.xlu0 %v7172_v0, %s6839_s25  ;;  %s6854_s25 = smov 46  }
  0xf9   : > { %6267 = vrot.lane.b32.xlu1 %v7181_v3, %s6841_s17 }
  0xfc   : > { %6262 = vrot.lane.b32.xlu0 %v7190_v6, %s6840_s2 }
  0xfd   : > { %542 = vrot.lane.b32.xlu1 %v7172_v0, %s6840_s2  ;;  %s6855_s2 = smov 45  }
 0x100   : > { %6272 = vrot.lane.b32.xlu0 %v7190_v6, %s6841_s17 }
 0x101   : > { %6277 = vrot.lane.b32.xlu1 %v7181_v3, %s6842_s9 }
 0x104   : > { %565 = vrot.lane.b32.xlu0 %v7172_v0, %s6841_s17  ;;  %s6856_s17 = smov 44  }
 0x105   : > { %6287 = vrot.lane.b32.xlu1 %v7181_v3, %s6843_s14 }
 0x108   : > { %6282 = vrot.lane.b32.xlu0 %v7190_v6, %s6842_s9 }
 0x109   : > { %588 = vrot.lane.b32.xlu1 %v7172_v0, %s6842_s9 }
 0x10c   : > { %6292 = vrot.lane.b32.xlu0 %v7190_v6, %s6843_s14 }
 0x10d   : > { %6297 = vrot.lane.b32.xlu1 %v7181_v3, %s6844_s15 }
 0x110   : > { %611 = vrot.lane.b32.xlu0 %v7172_v0, %s6843_s14  ;;  %s5943_s14 = sshll.u32 %s6917_s27, 10  ;;  %s5595_s27 = scalar_lea.sflag [#allocation7], %s7144_s30 }
 0x111   : > { %6307 = vrot.lane.b32.xlu1 %v7181_v3, %s6845_s0 }
 0x114   : > { %6302 = vrot.lane.b32.xlu0 %v7190_v6, %s6844_s15 }
 0x115   : > { %634 = vrot.lane.b32.xlu1 %v7172_v0, %s6844_s15 }
 0x118   : > { %6312 = vrot.lane.b32.xlu0 %v7190_v6, %s6845_s0 }
 0x119   : > { %6317 = vrot.lane.b32.xlu1 %v7181_v3, %s6846_s28 }
 0x11c   : > { %657 = vrot.lane.b32.xlu0 %v7172_v0, %s6845_s0 }
 0x11d   : > { %6327 = vrot.lane.b32.xlu1 %v7181_v3, %s6847_s8 }
 0x120   : > { %6322 = vrot.lane.b32.xlu0 %v7190_v6, %s6846_s28 }
 0x121   : > { %680 = vrot.lane.b32.xlu1 %v7172_v0, %s6846_s28 }
 0x124   : > { %6332 = vrot.lane.b32.xlu0 %v7190_v6, %s6847_s8 }
 0x125   : > { %6337 = vrot.lane.b32.xlu1 %v7181_v3, %s6848_s20 }
 0x128   : > { %703 = vrot.lane.b32.xlu0 %v7172_v0, %s6847_s8  ;;  %s10145_s8 = scalar_lea.hbm %s10197_s6, %s5943_s14 }
 0x129   : > { %6347 = vrot.lane.b32.xlu1 %v7181_v3, %s6849_s10 }
 0x12c   : > { %6342 = vrot.lane.b32.xlu0 %v7190_v6, %s6848_s20 }
 0x12d   : > { %726 = vrot.lane.b32.xlu1 %v7172_v0, %s6848_s20 }
 0x130   : > { %6352 = vrot.lane.b32.xlu0 %v7190_v6, %s6849_s10 }
 0x131   : > { %6357 = vrot.lane.b32.xlu1 %v7181_v3, %s6850_s29 }
 0x134   : > { %749 = vrot.lane.b32.xlu0 %v7172_v0, %s6849_s10  ;;  %s6858_s10 = smov [#allocation16]  }
 0x135   : > { %6367 = vrot.lane.b32.xlu1 %v7181_v3, %s6851_s26 }
 0x138   : > { %6362 = vrot.lane.b32.xlu0 %v7190_v6, %s6850_s29 }
 0x139   : > { %772 = vrot.lane.b32.xlu1 %v7172_v0, %s6850_s29  ;;  %s6739_s29 = sshll.u32 %s6858_s10, 4  ;;  %s6740_s29 = int_to_ptr.vmem [resolvable:$false] %s6739_s29 }
 0x13c   : > { %6372 = vrot.lane.b32.xlu0 %v7190_v6, %s6851_s26 }
 0x13d   : > { %6377 = vrot.lane.b32.xlu1 %v7181_v3, %s6852_s11 }
 0x13f   : > { %v382_v7 = vpop.permute.xlu1 %381 }
 0x140   : > { %795 = vrot.lane.b32.xlu0 %v7172_v0, %s6851_s26  ;;  %s6741_s26 = scalar_lea.vmem %s6740_s29, 2048 }
 0x141   : > { %6387 = vrot.lane.b32.xlu1 %v7181_v3, %s6853_s13 }
 0x142   : > { %v6188_v8 = vpop.permute.xlu0 %6187 }
 0x143   : > { %v6190_v9 = vunpack.i.h.bf16 %v6188_v8  ;;  %v6189_v10 = vunpack.i.l.bf16 %v6188_v8  ;;  %v6198_v11 = vpop.permute.xlu1 %6197 }
 0x144   : > { %6382 = vrot.lane.b32.xlu0 %v7190_v6, %s6852_s11  ;;  %v6200_v12 = vunpack.i.h.bf16 %v6198_v11  ;;  %v6199_v13 = vunpack.i.l.bf16 %v6198_v11 }
 0x145   : > { %v393_v14 = vsel %vm391_vm0, %v6189_v10, %v6190_v9  ;;  %v392_v15 = vsel %vm391_vm0, %v382_v7, %v6189_v10  ;;  %818 = vrot.lane.b32.xlu1 %v7172_v0, %s6852_s11 }
 0x146   : > { %v6193_v16 = vpop.permute.xlu0 %6192  ;;  %v5944_v17 = vpack.c.bf16 %v393_v14, %v7174_v1  ;;  %v5946_v18 = vpack.c.bf16 %v392_v15, %v7172_v0  ;;  %v416_v22 = vsel %vm414_vm1, %v6199_v13, %v6200_v12 }
 0x147   : > { %v6195_v19 = vunpack.i.h.bf16 %v6193_v16  ;;  %v6194_v20 = vunpack.i.l.bf16 %v6193_v16  ;;  %v6208_v21 = vpop.permute.xlu1 %6207 }
 0x148   : > { %5945 = vmatprep.subr.bf16.mxu0 %v5944_v17  ;;  %6392 = vrot.lane.b32.xlu0 %v7190_v6, %s6853_s13  ;;  %v6210_v23 = vunpack.i.h.bf16 %v6208_v21  ;;  %v6209_v24 = vunpack.i.l.bf16 %v6208_v21 }
 0x149   : > { %5947 = vmatpush1.bf16.msra.mxu0 %v5946_v18  ;;  %v395_v25 = vsel %vm391_vm0, %v6194_v20, %v6195_v19  ;;  %v394_v26 = vsel %vm391_vm0, %v6190_v9, %v6194_v20  ;;  %6397 = vrot.lane.b32.xlu1 %v7181_v3, %s6854_s25  ;;  %vm736_vm0 = vcmask 547840  }
 0x14a   : > { %v6203_v27 = vpop.permute.xlu0 %6202  ;;  %v5992_v28 = vpack.c.bf16 %v395_v25, %v7183_v4  ;;  %v5994_v29 = vpack.c.bf16 %v394_v26, %v7176_v2  ;;  %v439_v30 = vsel %vm437_vm2, %v6209_v24, %v6210_v23 }
 0x14b   : > { %v6205_v31 = vunpack.i.h.bf16 %v6203_v27  ;;  %v6204_v32 = vunpack.i.l.bf16 %v6203_v27  ;;  %v405_v33 = vpop.permute.xlu1 %404  ;;  %v5948_v34 = vpack.c.bf16 %v439_v30, %v416_v22 }
 0x14c   : > { %5993 = vmatprep.subr.bf16.mxu1 %v5992_v28  ;;  %841 = vrot.lane.b32.xlu0 %v7172_v0, %s6853_s13  ;;  %v415_v49 = vsel %vm414_vm1, %v405_v33, %v6199_v13 }
 0x14d   : > { %5995 = vmatpush1.bf16.msra.mxu1 %v5994_v29  ;;  %6407 = vrot.lane.b32.xlu1 %v7181_v3, %s6855_s2  ;;  %v418_v39 = vsel %vm414_vm1, %v6204_v32, %v6205_v31  ;;  %v417_v40 = vsel %vm414_vm1, %v6200_v12, %v6204_v32  ;;  %vm759_vm1 = vcmask 539648  }
 0x14e   : > { %v6213_v35 = vpop.permute.xlu0 %6212  ;;  %5949 = vmatprep.subr.bf16.mxu0 %v5948_v34 }
 0x14f   : > { %v6215_v36 = vunpack.i.h.bf16 %v6213_v35  ;;  %v6214_v37 = vunpack.i.l.bf16 %v6213_v35  ;;  %v6218_v38 = vpop.permute.xlu1 %6217 }
 0x150   : > { %6402 = vrot.lane.b32.xlu0 %v7190_v6, %s6854_s25  ;;  %v6220_v42 = vunpack.i.h.bf16 %v6218_v38  ;;  %v6219_v43 = vunpack.i.l.bf16 %v6218_v38 }
 0x151   : > { %v441_v44 = vsel %vm437_vm2, %v6214_v37, %v6215_v36  ;;  %v440_v45 = vsel %vm437_vm2, %v6210_v23, %v6214_v37  ;;  %864 = vrot.lane.b32.xlu1 %v7172_v0, %s6854_s25 }
 0x152   : > { %v428_v46 = vpop.permute.xlu0 %427  ;;  %v5996_v47 = vpack.c.bf16 %v441_v44, %v418_v39  ;;  %v5998_v48 = vpack.c.bf16 %v440_v45, %v417_v40  ;;  %v462_v55 = vsel %vm460_vm4, %v6219_v43, %v6220_v42 }
 0x153   : > { %v438_v50 = vsel %vm437_vm2, %v428_v46, %v6209_v24  ;;  %v6228_v52 = vpop.permute.xlu1 %6227  ;;  %vm782_vm2 = vcmask 531456  }
 0x154   : > { %v5950_v51 = vpack.c.bf16 %v438_v50, %v415_v49  ;;  %5997 = vmatprep.subr.bf16.mxu1 %v5996_v47  ;;  %6412 = vrot.lane.b32.xlu0 %v7190_v6, %s6855_s2  ;;  %v6230_v53 = vunpack.i.h.bf16 %v6228_v52  ;;  %v6229_v54 = vunpack.i.l.bf16 %v6228_v52 }
 0x155   : > { %5999 = vmatpush1.bf16.msra.mxu1 %v5998_v48  ;;  %912 = vrot.lane.b32.xlu1 %v7174_v1, %s6856_s17 }
 0x156   : > { %v6223_v56 = vpop.permute.xlu0 %6222  ;;  %5951 = vmatpush1.bf16.msra.mxu0 %v5950_v51  ;;  %v485_v57 = vsel %vm483_vm5, %v6229_v54, %v6230_v53 }
 0x157   : > { %v6225_v58 = vunpack.i.h.bf16 %v6223_v56  ;;  %v6224_v59 = vunpack.i.l.bf16 %v6223_v56  ;;  %v451_v60 = vpop.permute.xlu1 %450  ;;  %v5952_v61 = vpack.c.bf16 %v485_v57, %v462_v55 }
 0x158   : > { %887 = vrot.lane.b32.xlu0 %v7172_v0, %s6855_s2  ;;  %v461_v14 = vsel %vm460_vm4, %v451_v60, %v6219_v43 }
 0x159   : > { %916 = vrot.lane.b32.xlu1 %v7183_v4, %s6856_s17  ;;  %5953 = vmatprep.subr.bf16.mxu0 %v5952_v61  ;;  %v464_v1 = vsel %vm460_vm4, %v6224_v59, %v6225_v58  ;;  %v463_v7 = vsel %vm460_vm4, %v6220_v42, %v6224_v59  ;;  %vm805_vm4 = vcmask 523264  }
 0x15a   : > { %v6233_v62 = vpop.permute.xlu0 %6232 }
 0x15b   : > { %v6235_v63 = vunpack.i.h.bf16 %v6233_v62  ;;  %v6234_v3 = vunpack.i.l.bf16 %v6233_v62  ;;  %v6238_v6 = vpop.permute.xlu1 %6237 }
 0x15c   : > { %914 = vrot.lane.b32.xlu0 %v7176_v2, %s6856_s17  ;;  %v6240_v8 = vunpack.i.h.bf16 %v6238_v6  ;;  %v6239_v9 = vunpack.i.l.bf16 %v6238_v6 }
 0x15d   : > { %v487_v10 = vsel %vm483_vm5, %v6234_v3, %v6235_v63  ;;  %v486_v11 = vsel %vm483_vm5, %v6230_v53, %v6234_v3  ;;  %910 = vrot.lane.b32.xlu1 %v7172_v0, %s6856_s17 }
 0x15e   : > { %v474_v12 = vpop.permute.xlu0 %473  ;;  %v6000_v4 = vpack.c.bf16 %v487_v10, %v464_v1  ;;  %v6002_v13 = vpack.c.bf16 %v486_v11, %v463_v7  ;;  %v508_v19 = vsel %vm506_vm6, %v6239_v9, %v6240_v8 }
 0x15f   : > { %v484_v2 = vsel %vm483_vm5, %v474_v12, %v6229_v54  ;;  %v6248_v16 = vpop.permute.xlu1 %6247  ;;  %vm828_vm5 = vcmask 392192  }
 0x160   : > { %v5954_v15 = vpack.c.bf16 %v484_v2, %v461_v14  ;;  %918 = vrot.lane.b32.xlu0 %v7185_v5, %s6856_s17  ;;  %6001 = vmatprep.subr.bf16.mxu1 %v6000_v4  ;;  %v6250_v17 = vunpack.i.h.bf16 %v6248_v16  ;;  %v6249_v18 = vunpack.i.l.bf16 %v6248_v16 }
 0x161   : > { %6003 = vmatpush1.bf16.msra.mxu1 %v6002_v13 }
 0x162   : > { %v6243_v20 = vpop.permute.xlu0 %6242  ;;  %5955 = vmatpush1.bf16.msra.mxu0 %v5954_v15  ;;  %v531_v0 = vsel %vm529_vm7, %v6249_v18, %v6250_v17 }
 0x163   : > { %v6245_v21 = vunpack.i.h.bf16 %v6243_v20  ;;  %v6244_v22 = vunpack.i.l.bf16 %v6243_v20  ;;  %v497_v23 = vpop.permute.xlu1 %496  ;;  %v5956_v24 = vpack.c.bf16 %v531_v0, %v508_v19 }
 0x164   : > { %v507_v37 = vsel %vm506_vm6, %v497_v23, %v6239_v9 }
 0x165   : > { %5957 = vmatprep.subr.bf16.mxu0 %v5956_v24  ;;  %v510_v28 = vsel %vm506_vm6, %v6244_v22, %v6245_v21  ;;  %v509_v29 = vsel %vm506_vm6, %v6240_v8, %v6244_v22  ;;  %vm851_vm6 = vcmask 384000  }
 0x166   : > { %v6253_v25 = vpop.permute.xlu0 %6252 }
 0x167   : > { %v6255_v26 = vunpack.i.h.bf16 %v6253_v25  ;;  %v6254_v5 = vunpack.i.l.bf16 %v6253_v25  ;;  %v6258_v27 = vpop.permute.xlu1 %6257 }
 0x168   : > { %v6260_v30 = vunpack.i.h.bf16 %v6258_v27  ;;  %v6259_v31 = vunpack.i.l.bf16 %v6258_v27 }
 0x169   : > { %v533_v32 = vsel %vm529_vm7, %v6254_v5, %v6255_v26  ;;  %v532_v33 = vsel %vm529_vm7, %v6250_v17, %v6254_v5 }
 0x16a   : > { %v520_v34 = vpop.permute.xlu0 %519  ;;  %v6004_v35 = vpack.c.bf16 %v533_v32, %v510_v28  ;;  %v6006_v36 = vpack.c.bf16 %v532_v33, %v509_v29  ;;  %v554_v43 = vsel %vm552_vm8, %v6259_v31, %v6260_v30 }
 0x16b   : > { %v530_v38 = vsel %vm529_vm7, %v520_v34, %v6249_v18  ;;  %v6268_v40 = vpop.permute.xlu1 %6267  ;;  %vm874_vm7 = vcmask 375808  }
 0x16c   : > { %v5958_v39 = vpack.c.bf16 %v530_v38, %v507_v37  ;;  %6005 = vmatprep.subr.bf16.mxu1 %v6004_v35  ;;  %v6270_v41 = vunpack.i.h.bf16 %v6268_v40  ;;  %v6269_v42 = vunpack.i.l.bf16 %v6268_v40 }
 0x16d   : > { %6007 = vmatpush1.bf16.msra.mxu1 %v6006_v36 }
 0x16e   : > { %v6263_v44 = vpop.permute.xlu0 %6262  ;;  %5959 = vmatpush1.bf16.msra.mxu0 %v5958_v39  ;;  %v577_v45 = vsel %vm575_vm9, %v6269_v42, %v6270_v41 }
 0x16f   : > { %v6265_v46 = vunpack.i.h.bf16 %v6263_v44  ;;  %v6264_v47 = vunpack.i.l.bf16 %v6263_v44  ;;  %v543_v48 = vpop.permute.xlu1 %542  ;;  %v5960_v49 = vpack.c.bf16 %v577_v45, %v554_v43 }
 0x170   : > { %v553_v63 = vsel %vm552_vm8, %v543_v48, %v6259_v31 }
 0x171   : > { %5961 = vmatprep.subr.bf16.mxu0 %v5960_v49  ;;  %v556_v54 = vsel %vm552_vm8, %v6264_v47, %v6265_v46  ;;  %v555_v55 = vsel %vm552_vm8, %v6260_v30, %v6264_v47  ;;  %vm897_vm8 = vcmask 367616  }
 0x172   : > { %v6273_v50 = vpop.permute.xlu0 %6272 }
 0x173   : > { %v6275_v51 = vunpack.i.h.bf16 %v6273_v50  ;;  %v6274_v52 = vunpack.i.l.bf16 %v6273_v50  ;;  %v6278_v53 = vpop.permute.xlu1 %6277 }
 0x174   : > { %v6280_v56 = vunpack.i.h.bf16 %v6278_v53  ;;  %v6279_v57 = vunpack.i.l.bf16 %v6278_v53 }
 0x175   : > { %v579_v58 = vsel %vm575_vm9, %v6274_v52, %v6275_v51  ;;  %v578_v59 = vsel %vm575_vm9, %v6270_v41, %v6274_v52 }
 0x176   : > { %v566_v60 = vpop.permute.xlu0 %565  ;;  %v6008_v61 = vpack.c.bf16 %v579_v58, %v556_v54  ;;  %v6010_v62 = vpack.c.bf16 %v578_v59, %v555_v55  ;;  %v600_v9 = vsel %vm598_vm10, %v6279_v57, %v6280_v56 }
 0x177   : > { %v576_v3 = vsel %vm575_vm9, %v566_v60, %v6269_v42  ;;  %v6288_v1 = vpop.permute.xlu1 %6287  ;;  %vm920_vm9 = vcmask 359424  }
 0x178   : > { %v5962_v6 = vpack.c.bf16 %v576_v3, %v553_v63  ;;  %6009 = vmatprep.subr.bf16.mxu1 %v6008_v61  ;;  %v6290_v7 = vunpack.i.h.bf16 %v6288_v1  ;;  %v6289_v8 = vunpack.i.l.bf16 %v6288_v1 }
 0x179   : > { %6011 = vmatpush1.bf16.msra.mxu1 %v6010_v62 }
 0x17a   : > { %v6283_v10 = vpop.permute.xlu0 %6282  ;;  %5963 = vmatpush1.bf16.msra.mxu0 %v5962_v6  ;;  %v623_v11 = vsel %vm621_vm11, %v6289_v8, %v6290_v7 }
 0x17b   : > { %v6285_v12 = vunpack.i.h.bf16 %v6283_v10  ;;  %v6284_v4 = vunpack.i.l.bf16 %v6283_v10  ;;  %v589_v13 = vpop.permute.xlu1 %588  ;;  %v5964_v14 = vpack.c.bf16 %v623_v11, %v600_v9 }
 0x17c   : > { %v599_v26 = vsel %vm598_vm10, %v589_v13, %v6279_v57 }
 0x17d   : > { %5965 = vmatprep.subr.bf16.mxu0 %v5964_v14  ;;  %v602_v18 = vsel %vm598_vm10, %v6284_v4, %v6285_v12  ;;  %v601_v19 = vsel %vm598_vm10, %v6280_v56, %v6284_v4 }
 0x17e   : > { %v6293_v2 = vpop.permute.xlu0 %6292 }
 0x17f   : > { %v6295_v15 = vunpack.i.h.bf16 %v6293_v2  ;;  %v6294_v16 = vunpack.i.l.bf16 %v6293_v2  ;;  %v6298_v17 = vpop.permute.xlu1 %6297 }
 0x180   : > { %v6300_v20 = vunpack.i.h.bf16 %v6298_v17  ;;  %v6299_v0 = vunpack.i.l.bf16 %v6298_v17 }
 0x181   : > { %v625_v21 = vsel %vm621_vm11, %v6294_v16, %v6295_v15  ;;  %v624_v22 = vsel %vm621_vm11, %v6290_v7, %v6294_v16 }
 0x182   : > { %v612_v23 = vpop.permute.xlu0 %611  ;;  %v6012_v24 = vpack.c.bf16 %v625_v21, %v602_v18  ;;  %v6014_v25 = vpack.c.bf16 %v624_v22, %v601_v19  ;;  %v646_v31 = vsel %vm644_vm12, %v6299_v0, %v6300_v20 }
 0x183   : > { %v622_v5 = vsel %vm621_vm11, %v612_v23, %v6289_v8  ;;  %v6308_v28 = vpop.permute.xlu1 %6307 }
 0x184   : > { %v5966_v27 = vpack.c.bf16 %v622_v5, %v599_v26  ;;  %6013 = vmatprep.subr.bf16.mxu1 %v6012_v24  ;;  %v6310_v29 = vunpack.i.h.bf16 %v6308_v28  ;;  %v6309_v30 = vunpack.i.l.bf16 %v6308_v28 }
 0x185   : > { %6015 = vmatpush1.bf16.msra.mxu1 %v6014_v25 }
 0x186   : > { %v6303_v32 = vpop.permute.xlu0 %6302  ;;  %5967 = vmatpush1.bf16.msra.mxu0 %v5966_v27  ;;  %v669_v33 = vsel %vm667_vm13, %v6309_v30, %v6310_v29 }
 0x187   : > { %v6305_v34 = vunpack.i.h.bf16 %v6303_v32  ;;  %v6304_v35 = vunpack.i.l.bf16 %v6303_v32  ;;  %v635_v36 = vpop.permute.xlu1 %634  ;;  %v5968_v37 = vpack.c.bf16 %v669_v33, %v646_v31 }
 0x188   : > { %v645_v51 = vsel %vm644_vm12, %v635_v36, %v6299_v0 }
 0x189   : > { %5969 = vmatprep.subr.bf16.mxu0 %v5968_v37  ;;  %v648_v42 = vsel %vm644_vm12, %v6304_v35, %v6305_v34  ;;  %v647_v43 = vsel %vm644_vm12, %v6300_v20, %v6304_v35 }
 0x18a   : > { %v6313_v38 = vpop.permute.xlu0 %6312 }
 0x18b   : > { %v6315_v39 = vunpack.i.h.bf16 %v6313_v38  ;;  %v6314_v40 = vunpack.i.l.bf16 %v6313_v38  ;;  %v6318_v41 = vpop.permute.xlu1 %6317 }
 0x18c   : > { %v6320_v44 = vunpack.i.h.bf16 %v6318_v41  ;;  %v6319_v45 = vunpack.i.l.bf16 %v6318_v41 }
 0x18d   : > { %v671_v46 = vsel %vm667_vm13, %v6314_v40, %v6315_v39  ;;  %v670_v47 = vsel %vm667_vm13, %v6310_v29, %v6314_v40 }
 0x18e   : > { %v658_v48 = vpop.permute.xlu0 %657  ;;  %v6016_v49 = vpack.c.bf16 %v671_v46, %v648_v42  ;;  %v6018_v50 = vpack.c.bf16 %v670_v47, %v647_v43  ;;  %v692_v57 = vsel %vm690_vm14, %v6319_v45, %v6320_v44 }
 0x18f   : > { %v668_v52 = vsel %vm667_vm13, %v658_v48, %v6309_v30  ;;  %v6328_v54 = vpop.permute.xlu1 %6327 }
 0x190   : > { %v5970_v53 = vpack.c.bf16 %v668_v52, %v645_v51  ;;  %6017 = vmatprep.subr.bf16.mxu1 %v6016_v49  ;;  %v6330_v55 = vunpack.i.h.bf16 %v6328_v54  ;;  %v6329_v56 = vunpack.i.l.bf16 %v6328_v54 }
 0x191   : > { %6019 = vmatpush1.bf16.msra.mxu1 %v6018_v50 }
 0x192   : > { %v6323_v58 = vpop.permute.xlu0 %6322  ;;  %5971 = vmatpush1.bf16.msra.mxu0 %v5970_v53  ;;  %v715_v59 = vsel %vm713_vm15, %v6329_v56, %v6330_v55 }
 0x193   : > { %v6325_v60 = vunpack.i.h.bf16 %v6323_v58  ;;  %v6324_v61 = vunpack.i.l.bf16 %v6323_v58  ;;  %v681_v62 = vpop.permute.xlu1 %680  ;;  %v5972_v63 = vpack.c.bf16 %v715_v59, %v692_v57 }
 0x194   : > { %v691_v15 = vsel %vm690_vm14, %v681_v62, %v6319_v45 }
 0x195   : > { %5973 = vmatprep.subr.bf16.mxu0 %v5972_v63  ;;  %v694_v8 = vsel %vm690_vm14, %v6324_v61, %v6325_v60  ;;  %v693_v9 = vsel %vm690_vm14, %v6320_v44, %v6324_v61 }
 0x196   : > { %v6333_v3 = vpop.permute.xlu0 %6332 }
 0x197   : > { %v6335_v6 = vunpack.i.h.bf16 %v6333_v3  ;;  %v6334_v1 = vunpack.i.l.bf16 %v6333_v3  ;;  %v6338_v7 = vpop.permute.xlu1 %6337 }
 0x198   : > { %v6340_v10 = vunpack.i.h.bf16 %v6338_v7  ;;  %v6339_v11 = vunpack.i.l.bf16 %v6338_v7 }
 0x199   : > { %v717_v12 = vsel %vm713_vm15, %v6334_v1, %v6335_v6  ;;  %v716_v4 = vsel %vm713_vm15, %v6330_v55, %v6334_v1 }
 0x19a   : > { %v704_v13 = vpop.permute.xlu0 %703  ;;  %v6020_v14 = vpack.c.bf16 %v717_v12, %v694_v8  ;;  %v6022_v2 = vpack.c.bf16 %v716_v4, %v693_v9  ;;  %v738_v0 = vsel %vm736_vm0, %v6339_v11, %v6340_v10 }
 0x19b   : > { %v714_v16 = vsel %vm713_vm15, %v704_v13, %v6329_v56  ;;  %v6348_v18 = vpop.permute.xlu1 %6347 }
 0x19c   : > { %v5974_v17 = vpack.c.bf16 %v714_v16, %v691_v15  ;;  %6021 = vmatprep.subr.bf16.mxu1 %v6020_v14  ;;  %v6350_v19 = vunpack.i.h.bf16 %v6348_v18  ;;  %v6349_v20 = vunpack.i.l.bf16 %v6348_v18 }
 0x19d   : > { %6023 = vmatpush1.bf16.msra.mxu1 %v6022_v2 }
 0x19e   : > { %v6343_v21 = vpop.permute.xlu0 %6342  ;;  %5975 = vmatpush1.bf16.msra.mxu0 %v5974_v17  ;;  %v761_v22 = vsel %vm759_vm1, %v6349_v20, %v6350_v19 }
 0x19f   : > { %v6345_v23 = vunpack.i.h.bf16 %v6343_v21  ;;  %v6344_v24 = vunpack.i.l.bf16 %v6343_v21  ;;  %v727_v25 = vpop.permute.xlu1 %726  ;;  %v5976_v26 = vpack.c.bf16 %v761_v22, %v738_v0 }
 0x1a0   : > { %v737_v39 = vsel %vm736_vm0, %v727_v25, %v6339_v11 }
 0x1a1   : > { %5977 = vmatprep.subr.bf16.mxu0 %v5976_v26  ;;  %v740_v30 = vsel %vm736_vm0, %v6344_v24, %v6345_v23  ;;  %v739_v31 = vsel %vm736_vm0, %v6340_v10, %v6344_v24 }
 0x1a2   : > { %v6353_v5 = vpop.permute.xlu0 %6352 }
 0x1a3   : > { %v6355_v27 = vunpack.i.h.bf16 %v6353_v5  ;;  %v6354_v28 = vunpack.i.l.bf16 %v6353_v5  ;;  %v6358_v29 = vpop.permute.xlu1 %6357 }
 0x1a4   : > { %v6360_v32 = vunpack.i.h.bf16 %v6358_v29  ;;  %v6359_v33 = vunpack.i.l.bf16 %v6358_v29 }
 0x1a5   : > { %v763_v34 = vsel %vm759_vm1, %v6354_v28, %v6355_v27  ;;  %v762_v35 = vsel %vm759_vm1, %v6350_v19, %v6354_v28 }
 0x1a6   : > { %v750_v36 = vpop.permute.xlu0 %749  ;;  %v6024_v37 = vpack.c.bf16 %v763_v34, %v740_v30  ;;  %v6026_v38 = vpack.c.bf16 %v762_v35, %v739_v31  ;;  %v784_v45 = vsel %vm782_vm2, %v6359_v33, %v6360_v32 }
 0x1a7   : > { %v760_v40 = vsel %vm759_vm1, %v750_v36, %v6349_v20  ;;  %v6368_v42 = vpop.permute.xlu1 %6367 }
 0x1a8   : > { %v5978_v41 = vpack.c.bf16 %v760_v40, %v737_v39  ;;  %6025 = vmatprep.subr.bf16.mxu1 %v6024_v37  ;;  %v6370_v43 = vunpack.i.h.bf16 %v6368_v42  ;;  %v6369_v44 = vunpack.i.l.bf16 %v6368_v42 }
 0x1a9   : > { %6027 = vmatpush1.bf16.msra.mxu1 %v6026_v38 }
 0x1aa   : > { %v6363_v46 = vpop.permute.xlu0 %6362  ;;  %5979 = vmatpush1.bf16.msra.mxu0 %v5978_v41  ;;  %v807_v47 = vsel %vm805_vm4, %v6369_v44, %v6370_v43 }
 0x1ab   : > { %v6365_v48 = vunpack.i.h.bf16 %v6363_v46  ;;  %v6364_v49 = vunpack.i.l.bf16 %v6363_v46  ;;  %v773_v50 = vpop.permute.xlu1 %772  ;;  %v5980_v51 = vpack.c.bf16 %v807_v47, %v784_v45 }
 0x1ac   : > { %v783_v6 = vsel %vm782_vm2, %v773_v50, %v6359_v33 }
 0x1ad   : > { %5981 = vmatprep.subr.bf16.mxu0 %v5980_v51  ;;  %v786_v56 = vsel %vm782_vm2, %v6364_v49, %v6365_v48  ;;  %v785_v57 = vsel %vm782_vm2, %v6360_v32, %v6364_v49 }
 0x1ae   : > { %v6373_v52 = vpop.permute.xlu0 %6372 }
 0x1af   : > { %v6375_v53 = vunpack.i.h.bf16 %v6373_v52  ;;  %v6374_v54 = vunpack.i.l.bf16 %v6373_v52  ;;  %v6378_v55 = vpop.permute.xlu1 %6377 }
 0x1b0   : > { %v6380_v58 = vunpack.i.h.bf16 %v6378_v55  ;;  %v6379_v59 = vunpack.i.l.bf16 %v6378_v55 }
 0x1b1   : > { %v809_v60 = vsel %vm805_vm4, %v6374_v54, %v6375_v53  ;;  %v808_v61 = vsel %vm805_vm4, %v6370_v43, %v6374_v54 }
 0x1b2   : > { %v796_v62 = vpop.permute.xlu0 %795  ;;  %v6028_v63 = vpack.c.bf16 %v809_v60, %v786_v56  ;;  %v6030_v3 = vpack.c.bf16 %v808_v61, %v785_v57  ;;  %v830_v11 = vsel %vm828_vm5, %v6379_v59, %v6380_v58  ;;  %v936_v60 = vld [vmem:[#allocation10 + $0x18] sm:$0xff] }
 0x1b3   : > { %v806_v1 = vsel %vm805_vm4, %v796_v62, %v6369_v44  ;;  %v6388_v8 = vpop.permute.xlu1 %6387 }
 0x1b4   : > { %v5982_v7 = vpack.c.bf16 %v806_v1, %v783_v6  ;;  %6029 = vmatprep.subr.bf16.mxu1 %v6028_v63  ;;  %v6390_v9 = vunpack.i.h.bf16 %v6388_v8  ;;  %v6389_v10 = vunpack.i.l.bf16 %v6388_v8  ;;  %v938_v6 = vld [vmem:[#allocation10 + $0x28] sm:$0x3]  ;;  %v937_v1 = vld [vmem:[#allocation10 + $0x20] sm:$0x3]  ;;  %v1231_v8 = vlaneseq }
 0x1b5   : > { %6031 = vmatpush1.bf16.msra.mxu1 %v6030_v3  ;;  %v935_v3 = vld [vmem:[#allocation10 + $0x10] sm:$0xff] }
 0x1b6   : > { %v6383_v12 = vpop.permute.xlu0 %6382  ;;  %5983 = vmatpush1.bf16.msra.mxu0 %v5982_v7  ;;  %v853_v4 = vsel %vm851_vm6, %v6389_v10, %v6390_v9  ;;  %v10201_v7 = vmov 0  }
 0x1b7   : > { %v6385_v13 = vunpack.i.h.bf16 %v6383_v12  ;;  %v6384_v14 = vunpack.i.l.bf16 %v6383_v12  ;;  %v819_v2 = vpop.permute.xlu1 %818  ;;  %v5984_v15 = vpack.c.bf16 %v853_v4, %v830_v11  ;;  %v7381_v11 = vld [vmem:[#allocation13 + $0x28] sm:$0xff] }
 0x1b8   : > { %v829_v27 = vsel %vm828_vm5, %v819_v2, %v6379_v59  ;;  %v7394_v2 = vld [vmem:[#allocation13 + $0x20] sm:$0xff] }
 0x1b9   : > { %5985 = vmatprep.subr.bf16.mxu0 %v5984_v15  ;;  %v832_v20 = vsel %vm828_vm5, %v6384_v14, %v6385_v13  ;;  %v831_v0 = vsel %vm828_vm5, %v6380_v58, %v6384_v14  ;;  %v933_v58 = vld [vmem:[#allocation10] sm:$0xff]  ;;  %v7392_v14 = vld [vmem:[#allocation13] sm:$0xff]  ;;  %v7396_v15 = vld [vmem:[#allocation13 + $0x18] sm:$0xff] }
 0x1ba   : > { %v6393_v16 = vpop.permute.xlu0 %6392 }
 0x1bb   : > { %v6395_v17 = vunpack.i.h.bf16 %v6393_v16  ;;  %v6394_v18 = vunpack.i.l.bf16 %v6393_v16  ;;  %v6398_v19 = vpop.permute.xlu1 %6397  ;;  %v7398_v16 = vld [vmem:[#allocation13 + $0x38] sm:$0xff] }
 0x1bc   : > { %v6400_v21 = vunpack.i.h.bf16 %v6398_v19  ;;  %v6399_v22 = vunpack.i.l.bf16 %v6398_v19 }
 0x1bd   : > { %v855_v23 = vsel %vm851_vm6, %v6394_v18, %v6395_v17  ;;  %v854_v24 = vsel %vm851_vm6, %v6390_v9, %v6394_v18  ;;  %v7377_v9 = vshrl.u32 %v1231_v8, 7 }
 0x1be   : > { %v842_v25 = vpop.permute.xlu0 %841  ;;  %v6032_v26 = vpack.c.bf16 %v855_v23, %v832_v20  ;;  %v6034_v5 = vpack.c.bf16 %v854_v24, %v831_v0  ;;  %v876_v33 = vsel %vm874_vm7, %v6399_v22, %v6400_v21  ;;  %v7409_v20 = vld [vmem:[#allocation13 + $0x10] sm:$0xff]  ;;  %v7420_v23 = vadd.f32 1.0, %v7394_v2 }
 0x1bf   : > { %v852_v28 = vsel %vm851_vm6, %v842_v25, %v6389_v10  ;;  %v6408_v30 = vpop.permute.xlu1 %6407  ;;  %v7379_v10 = vld [vmem:[#allocation13 + $0x8] sm:$0xff]  ;;  %v7384_v12 = vsub.s32 3, %v7377_v9  ;;  %v7387_v4 = vsub.s32 5, %v7377_v9  ;;  %v7390_v13 = vsub.s32 7, %v7377_v9  ;;  %v7425_v25 = vld [vmem:[#allocation13 + $0x30] sm:$0xff] }
 0x1c0   : > { %v5986_v29 = vpack.c.bf16 %v852_v28, %v829_v27  ;;  %6033 = vmatprep.subr.bf16.mxu1 %v6032_v26  ;;  %v6410_v31 = vunpack.i.h.bf16 %v6408_v30  ;;  %v6409_v32 = vunpack.i.l.bf16 %v6408_v30  ;;  %v7401_v17 = vadd.f32 1.0, %v7379_v10 }
 0x1c1   : > { %6035 = vmatpush1.bf16.msra.mxu1 %v6034_v5  ;;  %v7404_v18 = vsub.s32 0, %v7377_v9  ;;  %v7407_v19 = vsub.s32 2, %v7377_v9  ;;  %v7423_v24 = vadd.f32 1.0, %v7396_v15 }
 0x1c2   : > { %v6403_v34 = vpop.permute.xlu0 %6402  ;;  %5987 = vmatpush1.bf16.msra.mxu0 %v5986_v29  ;;  %v899_v35 = vsel %vm897_vm8, %v6409_v32, %v6410_v31  ;;  %v7442_v29 = vadd.f32 1.0, %v7398_v16 }
 0x1c3   : > { %v865_v36 = vpop.permute.xlu1 %864  ;;  %v5988_v37 = vpack.c.bf16 %v899_v35, %v876_v33  ;;  %v6405_v38 = vunpack.i.h.bf16 %v6403_v34  ;;  %v6404_v39 = vunpack.i.l.bf16 %v6403_v34  ;;  %v7457_v33 = vadd.f32 1.0, %v7409_v20 }
 0x1c4   : > { %v875_v51 = vsel %vm874_vm7, %v865_v36, %v6399_v22  ;;  %v7417_v22 = vadd.f32 1.0, %v7392_v14 }
 0x1c5   : > { %5989 = vmatprep.subr.bf16.mxu0 %v5988_v37  ;;  %v878_v44 = vsel %vm874_vm7, %v6404_v39, %v6405_v38  ;;  %v877_v46 = vsel %vm874_vm7, %v6400_v21, %v6404_v39  ;;  %v7414_v21 = vadd.f32 1.0, %v7381_v11  ;;  %v7468_v38 = vadd.f32 1.0, %v7425_v25 }
 0x1c6   : > { %v6413_v40 = vpop.permute.xlu0 %6412 }
 0x1c7   : > { %v6415_v41 = vunpack.i.h.bf16 %v6413_v40  ;;  %v6414_v42 = vunpack.i.l.bf16 %v6413_v40  ;;  %v913_v43 = vpop.permute.xlu1 %912 }
 0x1c9   : > { %v901_v45 = vsel %vm897_vm8, %v6414_v42, %v6415_v41  ;;  %v900_v47 = vsel %vm897_vm8, %v6410_v31, %v6414_v42 }
 0x1ca   : > { %v888_v48 = vpop.permute.xlu0 %887  ;;  %v6036_v49 = vpack.c.bf16 %v901_v45, %v878_v44  ;;  %v6038_v50 = vpack.c.bf16 %v900_v47, %v877_v46 }
 0x1cb   : > { %v898_v52 = vsel %vm897_vm8, %v888_v48, %v6409_v32  ;;  %v917_v54 = vpop.permute.xlu1 %916  ;;  %v7501_v48 = vsub.s32 4, %v7377_v9 }
 0x1cc   : > { %v5990_v53 = vpack.c.bf16 %v898_v52, %v875_v51  ;;  %6037 = vmatprep.subr.bf16.mxu1 %v6036_v49 }
 0x1cd   : > { %6039 = vmatpush1.bf16.msra.mxu1 %v6038_v50 }
 0x1ce   : > { %v915_v55 = vpop.permute.xlu0 %914  ;;  %5991 = vmatpush1.bf16.msra.mxu0 %v5990_v53 }
 0x1cf   : > { %v922_v56 = vsel %vm920_vm9, %v913_v43, %v915_v55  ;;  %v911_v57 = vpop.permute.xlu1 %910  ;;  %v923_v63 = vsel %vm920_vm9, %v915_v55, %v917_v54 }
 0x1d0   : > { %1097 = vmatprep.subr.mxu0 %v922_v56  ;;  %v921_v59 = vsel %vm920_vm9, %v911_v57, %v913_v43 }
 0x1d2   : > { %v919_v61 = vpop.permute.xlu0 %918  ;;  %1098 = vmatpush1.msra.mxu0 %v921_v59 }
 0x1d3   : > { %1114 = vmatmul.mubr.f32.vlgmr.msra.gmra.mrb[0].mxu0 %v933_v58  ;;  %v924_v62 = vsel %vm920_vm9, %v917_v54, %v919_v61 }
 0x1d4   : > { %1180 = vmatprep.subr.mxu1 %v924_v62  ;;  %5761 = vmatprep.mubr.msk.f32.mxu0 %vm1039_vm3, %v936_v60 }
 0x1d5   : > { %1181 = vmatpush1.msra.mxu1 %v923_v63 }
 0x1d6   : > { %1197 = vmatmul.mubr.f32.vlgmr.msra.gmra.mrb[0].mxu1 %v933_v58 }
 0x1d7   : > { %5764 = vmatprep.mubr.msk.f32.mxu1 %vm1039_vm3, %v936_v60  ;;  %1120 = vmatmul.mubr.f32.gmra.mrb[2].mxu0 %v935_v3 }
 0x1d8   : > { %5762 = vmatprep.mubr.msk.f32.mxu0 %vm1039_vm3, %v938_v6 }
 0x1da   : > { %1203 = vmatmul.mubr.f32.gmra.mrb[2].mxu1 %v935_v3 }
 0x1db   : > { %5765 = vmatprep.mubr.msk.f32.mxu1 %vm1039_vm3, %v938_v6  ;;  %1126 = vmatmul.mubr.f32.gmra.mrb[4].mxu0 %v937_v1  ;;  %vm1807_vm3 = vcmask 130048  }
 0x1dc   : > { %1852 = vmatprep.mubr.bf16.mxu0 %v10201_v7 }
 0x1de   : > { %1209 = vmatmul.mubr.f32.gmra.mrb[4].mxu1 %v937_v1 }
 0x1df   : > { %1925 = vmatprep.mubr.bf16.mxu1 %v10201_v7 }
 0x2a6   : > { %v7411_v0 = vpop.f32.mrb[0].mxu0 }
 0x2a7   : > { %v7429_v26 = vrot.slane %v7411_v0, %v7384_v12  ;;  %v7433_v5 = vrot.slane %v7411_v0, %v7387_v4  ;;  %v7437_v27 = vrot.slane %v7411_v0, %v7390_v13  ;;  %v7439_v28 = vpop.f32.mrb[1].mxu0  ;;  %v1234_v36 = vrot.slane %v7411_v0, %v7404_v18 }
 0x2a8   : > { %v7446_v30 = vrot.slane %v7439_v28, %v7384_v12  ;;  %v7450_v31 = vrot.slane %v7439_v28, %v7387_v4  ;;  %v7454_v32 = vrot.slane %v7439_v28, %v7390_v13  ;;  %v1238_v35 = vrot.slane %v7439_v28, %v7404_v18 }
 0x2a9   : > { %10397 = vst [vmem:[#allocation23_spill] sm:$0xff] %v7429_v26  ;;  %10398 = vst [vmem:[#allocation24_spill] sm:$0xff] %v7433_v5  ;;  %v7459_v34 = vpop.f32.mrb[0].mxu1  ;;  %v1294_v37 = vrot.slane %v7439_v28, %v7407_v19  ;;  %v1290_v43 = vrot.slane %v7411_v0, %v7407_v19  ;;  %v1247_v52 = vsub.f32 %v7417_v22, %v1234_v36  ;;  %v3154_v5 = vld [vmem:[#allocation14 + $0xa0] sm:$0xff] }
 0x2aa   : > { %10399 = vst [vmem:[#allocation25_spill] sm:$0xff] %v7437_v27  ;;  %10400 = vst [vmem:[#allocation26_spill] sm:$0xff] %v7446_v30  ;;  %v7472_v39 = vrot.slane %v7459_v34, %v7384_v12  ;;  %v7476_v40 = vrot.slane %v7459_v34, %v7387_v4  ;;  %v7480_v41 = vrot.slane %v7459_v34, %v7390_v13  ;;  %v7482_v42 = vpop.f32.mrb[1].mxu1  ;;  %v7486_v44 = vpop.f32.mrb[2].mxu0 }
 0x2ab   : > { %10401 = vst [vmem:[#allocation27_spill] sm:$0xff] %v7450_v31  ;;  %10402 = vst [vmem:[#allocation28_spill] sm:$0xff] %v7454_v32  ;;  %v7490_v45 = vrot.slane %v7482_v42, %v7384_v12  ;;  %v7494_v46 = vrot.slane %v7482_v42, %v7387_v4  ;;  %v7498_v47 = vrot.slane %v7482_v42, %v7390_v13  ;;  %v7503_v49 = vpop.f32.mrb[3].mxu0  ;;  %v1255_v61 = vand.u32 2147483647, %v1247_v52 }
 0x2ac   : > { %10403 = vst [vmem:[#allocation29_spill] sm:$0xff] %v7472_v39  ;;  %10404 = vst [vmem:[#allocation30_spill] sm:$0xff] %v7476_v40  ;;  %v1248_v50 = vsub.f32 %v7401_v17, %v1238_v35  ;;  %v1252_v51 = vsub.f32 %v7414_v21, %v1238_v35  ;;  %v1251_v53 = vsub.f32 %v7420_v23, %v1234_v36  ;;  %v3152_v39 = vld [vmem:[#allocation14 + $0x90] sm:$0xff] }
 0x2ad   : > { %10405 = vst [vmem:[#allocation31_spill] sm:$0xff] %v7480_v41  ;;  %10406 = vst [vmem:[#allocation32_spill] sm:$0xff] %v7490_v45  ;;  %v1304_v54 = vsub.f32 %v7401_v17, %v1294_v37  ;;  %v1308_v55 = vsub.f32 %v7414_v21, %v1294_v37  ;;  %v1246_v56 = vrot.slane %v7482_v42, %v7404_v18  ;;  %v7515_v58 = vpop.f32.mrb[2].mxu1  ;;  %v1263_v36 = vsub.f32 1.0, %v1255_v61  ;;  %v3155_v45 = vld [vmem:[#allocation14 + $0xa8] sm:$0xff] }
 0x2ae   : > { %10407 = vst [vmem:[#allocation33_spill] sm:$0xff] %v7494_v46  ;;  %10408 = vst [vmem:[#allocation34_spill] sm:$0xff] %v7498_v47  ;;  %v1242_v57 = vrot.slane %v7459_v34, %v7404_v18  ;;  %v1256_v59 = vand.u32 2147483647, %v1248_v50  ;;  %v1260_v60 = vand.u32 2147483647, %v1252_v51  ;;  %v1303_v62 = vsub.f32 %v7417_v22, %v1290_v43 }
 0x2af   : > { %v1259_v63 = vand.u32 2147483647, %v1251_v53  ;;  %v1312_v3 = vand.u32 2147483647, %v1304_v54  ;;  %v1316_v6 = vand.u32 2147483647, %v1308_v55  ;;  %v1250_v1 = vsub.f32 %v7423_v24, %v1246_v56 }
 0x2b0   : > { %v1264_v8 = vsub.f32 1.0, %v1256_v59  ;;  %v1268_v35 = vsub.f32 1.0, %v1260_v60  ;;  %v1254_v37 = vsub.f32 %v7442_v29, %v1246_v56  ;;  %v7520_v7 = vpop.f32.mrb[3].mxu1  ;;  %v1271_v27 = vmax.f32 %v1263_v36, 0.0 }
 0x2b1   : > { %10409 = vst [vmem:[#allocation35_spill] sm:$0xff] %v7520_v7  ;;  %v1267_v47 = vsub.f32 1.0, %v1259_v63  ;;  %v1320_v41 = vsub.f32 1.0, %v1312_v3  ;;  %v1324_v50 = vsub.f32 1.0, %v1316_v6  ;;  %v1258_v51 = vand.u32 2147483647, %v1250_v1 }
 0x2b2   : > { %v1272_v52 = vmax.f32 %v1264_v8, 0.0  ;;  %v1276_v32 = vmax.f32 %v1268_v35, 0.0  ;;  %v1262_v53 = vand.u32 2147483647, %v1254_v37  ;;  %v1249_v61 = vsub.f32 %v7457_v33, %v1242_v57  ;;  %v7526_v8 = vld [vmem:[%s7154_s12] sm:$0xff]  }
 0x2b3   : > { %v1275_v54 = vmax.f32 %v1267_v47, 0.0  ;;  %v1328_v55 = vmax.f32 %v1320_v41, 0.0  ;;  %v1332_v46 = vmax.f32 %v1324_v50, 0.0  ;;  %v1266_v40 = vsub.f32 1.0, %v1258_v51 }
 0x2b4   : > { %v1280_v59 = vpack.c.bf16 %v1276_v32, %v1272_v52  ;;  %v1270_v60 = vsub.f32 1.0, %v1262_v53  ;;  %v1253_v56 = vsub.f32 %v7468_v38, %v1242_v57  ;;  %v1307_v6 = vsub.f32 %v7420_v23, %v1290_v43 }
 0x2b5   : > { %v1279_v31 = vpack.c.bf16 %v1275_v54, %v1271_v27  ;;  %v1336_v63 = vpack.c.bf16 %v1332_v46, %v1328_v55  ;;  %v1274_v3 = vmax.f32 %v1266_v40, 0.0  ;;  %v1257_v35 = vand.u32 2147483647, %v1249_v61 }
 0x2b6   : > { %1820 = vmatprep.subr.bf16.mxu0 %v1280_v59  ;;  %v1278_v1 = vmax.f32 %v1270_v60, 0.0  ;;  %v1261_v47 = vand.u32 2147483647, %v1253_v56  ;;  %v1302_v41 = vrot.slane %v7482_v42, %v7407_v19  ;;  %v1311_v32 = vand.u32 2147483647, %v1303_v62 }
 0x2b7   : > { %1821 = vmatpush1.bf16.msra.mxu0 %v1279_v31  ;;  %v1315_v36 = vand.u32 2147483647, %v1307_v6  ;;  %v1350_v57 = vrot.slane %v7439_v28, %v7501_v48  ;;  %v1298_v27 = vrot.slane %v7459_v34, %v7407_v19  ;;  %v1265_v43 = vsub.f32 1.0, %v1257_v35 }
 0x2b8   : > { %1966 = vmatprep.subr.bf16.mxu0 %v1336_v63  ;;  %v1282_v40 = vpack.c.bf16 %v1278_v1, %v1274_v3  ;;  %v1269_v46 = vsub.f32 1.0, %v1261_v47  ;;  %v1306_v37 = vsub.f32 %v7423_v24, %v1302_v41  ;;  %v1319_v50 = vsub.f32 1.0, %v1311_v32 }
 0x2b9   : > { %v1323_v51 = vsub.f32 1.0, %v1315_v36  ;;  %v1310_v52 = vsub.f32 %v7442_v29, %v1302_v41  ;;  %v1360_v31 = vsub.f32 %v7401_v17, %v1350_v57  ;;  %v1273_v62 = vmax.f32 %v1265_v43, 0.0  ;;  %v7546_v43 = vld [vmem:[%s7154_s12 + $0x8] sm:$0xff]  }
 0x2ba   : > { %1893 = vmatprep.subr.bf16.mxu1 %v1282_v40  ;;  %5786 = vmatmul.mubr.msk.bf16.vlgmr.msra.gmra.mrb[8].mxu0 %vm1807_vm3, %v7526_v8  ;;  %v1277_v53 = vmax.f32 %v1269_v46, 0.0  ;;  %v1314_v54 = vand.u32 2147483647, %v1306_v37  ;;  %v1364_v55 = vsub.f32 %v7414_v21, %v1350_v57  ;;  %v1327_v59 = vmax.f32 %v1319_v50, 0.0 }
 0x2bb   : > { %v1331_v60 = vmax.f32 %v1323_v51, 0.0  ;;  %v1318_v61 = vand.u32 2147483647, %v1310_v52  ;;  %v1368_v56 = vand.u32 2147483647, %v1360_v31  ;;  %v10410_v63 = vmov 0  }
 0x2bc   : > { %1862 = vmatprep.mubr.bf16.mxu0 %v10410_v63  ;;  %v1281_v3 = vpack.c.bf16 %v1277_v53, %v1273_v62  ;;  %v1322_v6 = vsub.f32 1.0, %v1314_v54  ;;  %v1372_v1 = vand.u32 2147483647, %v1364_v55  ;;  %v1305_v17 = vsub.f32 %v7457_v33, %v1298_v27 }
 0x2bd   : > { %v1335_v35 = vpack.c.bf16 %v1331_v60, %v1327_v59  ;;  %v1326_v47 = vsub.f32 1.0, %v1318_v61  ;;  %v1376_v41 = vsub.f32 1.0, %v1368_v56  ;;  %v1309_v32 = vsub.f32 %v7468_v38, %v1298_v27  ;;  %v3134_v59 = vld [vmem:[#allocation14] sm:$0xff] }
 0x2be   : > { %1894 = vmatpush1.bf16.msra.mxu1 %v1281_v3  ;;  %v1330_v36 = vmax.f32 %v1322_v6, 0.0  ;;  %v1380_v21 = vsub.f32 1.0, %v1372_v1  ;;  %v1313_v57 = vand.u32 2147483647, %v1305_v17  ;;  %v1358_v40 = vrot.slane %v7482_v42, %v7501_v48  ;;  %v3138_v6 = vld [vmem:[#allocation14 + $0x20] sm:$0xff] }
 0x2bf   : > { %1967 = vmatpush1.bf16.msra.mxu0 %v1335_v35  ;;  %v1334_v46 = vmax.f32 %v1326_v47, 0.0  ;;  %v1384_v37 = vmax.f32 %v1376_v41, 0.0  ;;  %v1317_v50 = vand.u32 2147483647, %v1309_v32  ;;  %v1346_v54 = vrot.slane %v7411_v0, %v7501_v48  ;;  %v7565_v47 = vld [vmem:[%s7154_s12 + $0x10] sm:$0xff]   ;;  %v3139_v41 = vld [vmem:[#allocation14 + $0x28] sm:$0xff] }
 0x2c0   : > { %v1388_v51 = vmax.f32 %v1380_v21, 0.0  ;;  %v1321_v52 = vsub.f32 1.0, %v1313_v57  ;;  %v1362_v31 = vsub.f32 %v7423_v24, %v1358_v40  ;;  %v1366_v62 = vsub.f32 %v7442_v29, %v1358_v40  ;;  %v3135_v24 = vld [vmem:[#allocation14 + $0x8] sm:$0xff]  ;;  %v3136_v32 = vld [vmem:[#allocation14 + $0x10] sm:$0xff] }
 0x2c1   : > { %v1338_v27 = vpack.c.bf16 %v1334_v46, %v1330_v36  ;;  %5790 = vmatmul.mubr.msk.bf16.vlgmr.msra.gmra.mrb[8].mxu1 %vm1807_vm3, %v7526_v8  ;;  %v1325_v53 = vsub.f32 1.0, %v1317_v50  ;;  %v7555_v55 = vsub.s32 6, %v7377_v9  ;;  %v7562_v1 = vsub.s32 1, %v7377_v9  ;;  %v3140_v36 = vld [vmem:[#allocation14 + $0x30] sm:$0xff]  ;;  %v3141_v50 = vld [vmem:[#allocation14 + $0x38] sm:$0xff]  ;;  %v3142_v9 = vld [vmem:[#allocation14 + $0x40] sm:$0xff] }
 0x2c2   : > { %v1392_v60 = vpack.c.bf16 %v1388_v51, %v1384_v37  ;;  %v1329_v61 = vmax.f32 %v1321_v52, 0.0  ;;  %v1370_v56 = vand.u32 2147483647, %v1362_v31  ;;  %v1374_v3 = vand.u32 2147483647, %v1366_v62  ;;  %5787 = vmatmul.mubr.msk.bf16.gmra.mrb[12].mxu0 %vm1807_vm3, %v7546_v43  ;;  %1935 = vmatprep.mubr.bf16.mxu1 %v10410_v63  ;;  %v3137_v37 = vld [vmem:[#allocation14 + $0x18] sm:$0xff] }
 0x2c3   : > { %2039 = vmatprep.subr.bf16.mxu1 %v1338_v27  ;;  %v1333_v29 = vmax.f32 %v1325_v53, 0.0  ;;  %1872 = vmatprep.mubr.bf16.mxu0 %v10410_v63  ;;  %10411 = vst [vmem:[#allocation36_spill] sm:$0xff] %v7562_v1  ;;  %v1406_v57 = vrot.slane %v7439_v28, %v7555_v55  ;;  %v7569_v40 = vadd.f32 1.0, %v3134_v59  ;;  %v7571_v46 = vadd.f32 1.0, %v3135_v24  ;;  %v3143_v27 = vld [vmem:[#allocation14 + $0x48] sm:$0xff]  ;;  %v3146_v53 = vld [vmem:[#allocation14 + $0x60] sm:$0xff] }
 0x2c4   : > { %2112 = vmatprep.subr.bf16.mxu0 %v1392_v60  ;;  %v1378_v17 = vsub.f32 1.0, %v1370_v56  ;;  %v1382_v35 = vsub.f32 1.0, %v1374_v3  ;;  %v1359_v31 = vsub.f32 %v7417_v22, %v1346_v54  ;;  %v1363_v62 = vsub.f32 %v7420_v23, %v1346_v54  ;;  %v3147_v60 = vld [vmem:[#allocation14 + $0x68] sm:$0xff]  ;;  %v3144_v23 = vld [vmem:[#allocation14 + $0x50] sm:$0xff]  ;;  %v3145_v54 = vld [vmem:[#allocation14 + $0x58] sm:$0xff] }
 0x2c5   : > { %v1337_v21 = vpack.c.bf16 %v1333_v29, %v1329_v61  ;;  %10412 = vst [vmem:[#allocation37_spill] sm:$0xff] %v7569_v40  ;;  %10413 = vst [vmem:[#allocation38_spill] sm:$0xff] %v7571_v46  ;;  %v7575_v61 = vadd.f32 1.0, %v3138_v6  ;;  %v7577_v56 = vadd.f32 1.0, %v3139_v41  ;;  %v7579_v59 = vadd.f32 1.0, %v3136_v32 }
 0x2c6   : > { %v1386_v51 = vmax.f32 %v1378_v17, 0.0  ;;  %v1390_v52 = vmax.f32 %v1382_v35, 0.0  ;;  %v7581_v3 = vadd.f32 1.0, %v3140_v36  ;;  %v7583_v29 = vadd.f32 1.0, %v3137_v37  ;;  %v3148_v35 = vld [vmem:[#allocation14 + $0x70] sm:$0xff]  ;;  %v3150_v37 = vld [vmem:[#allocation14 + $0x80] sm:$0xff] }
 0x2c7   : > { %2040 = vmatpush1.bf16.msra.mxu1 %v1337_v21  ;;  %10414 = vst [vmem:[#allocation39_spill] sm:$0xff] %v7575_v61  ;;  %10415 = vst [vmem:[#allocation40_spill] sm:$0xff] %v7577_v56  ;;  %v7585_v17 = vadd.f32 1.0, %v3141_v50  ;;  %v7587_v22 = vadd.f32 1.0, %v3142_v9  ;;  %v1416_v6 = vsub.f32 %v7379_v10, %v1406_v57  ;;  %v7592_v41 = vadd.f32 1.0, %v3143_v27  ;;  %v3149_v21 = vld [vmem:[#allocation14 + $0x78] sm:$0xff] }
 0x2c8   : > { %10416 = vst [vmem:[#allocation41_spill] sm:$0xff] %v7579_v59  ;;  %10417 = vst [vmem:[#allocation42_spill] sm:$0xff] %v7581_v3  ;;  %v1394_v24 = vpack.c.bf16 %v1390_v52, %v1386_v51  ;;  %v7594_v32 = vadd.f32 1.0, %v3146_v53  ;;  %v7596_v36 = vadd.f32 1.0, %v3147_v60  ;;  %v3151_v50 = vld [vmem:[#allocation14 + $0x88] sm:$0xff]  ;;  %v1420_v52 = vsub.f32 %v7381_v11, %v1406_v57 }
 0x2c9   : > { %10418 = vst [vmem:[#allocation43_spill] sm:$0xff] %v7583_v29  ;;  %10419 = vst [vmem:[#allocation44_spill] sm:$0xff] %v7585_v17  ;;  %5791 = vmatmul.mubr.msk.bf16.gmra.mrb[12].mxu1 %vm1807_vm3, %v7546_v43  ;;  %v1367_v9 = vand.u32 2147483647, %v1359_v31  ;;  %v1371_v51 = vand.u32 2147483647, %v1363_v62  ;;  %v1354_v27 = vrot.slane %v7459_v34, %v7501_v48  ;;  %v1414_v57 = vrot.slane %v7482_v42, %v7555_v55 }
 0x2ca   : > { %10420 = vst [vmem:[#allocation45_spill] sm:$0xff] %v7587_v22  ;;  %10421 = vst [vmem:[#allocation46_spill] sm:$0xff] %v7592_v41  ;;  %2185 = vmatprep.subr.bf16.mxu1 %v1394_v24  ;;  %5788 = vmatmul.mubr.msk.bf16.gmra.mrb[16].mxu0 %vm1807_vm3, %v7565_v47  ;;  %v7605_v53 = vadd.f32 1.0, %v3144_v23  ;;  %v7607_v60 = vadd.f32 1.0, %v3145_v54  ;;  %v7609_v24 = vadd.f32 1.0, %v3148_v35  ;;  %v7612_v31 = vld [vmem:[%s7154_s12 + $0x18] sm:$0xff]  }
 0x2cb   : > { %10422 = vst [vmem:[#allocation47_spill] sm:$0xff] %v7594_v32  ;;  %10423 = vst [vmem:[#allocation48_spill] sm:$0xff] %v7596_v36  ;;  %1945 = vmatprep.mubr.bf16.mxu1 %v10410_v63  ;;  %1882 = vmatprep.mubr.bf16.mxu0 %v10410_v63  ;;  %v7616_v62 = vadd.f32 1.0, %v3149_v21  ;;  %v7618_v30 = vadd.f32 1.0, %v3150_v37  ;;  %v7620_v26 = vadd.f32 1.0, %v3151_v50  ;;  %v3153_v36 = vld [vmem:[#allocation14 + $0x98] sm:$0xff]  ;;  %v1361_v37 = vsub.f32 %v7457_v33, %v1354_v27 }
 0x2cc   : > { %10424 = vst [vmem:[#allocation49_spill] sm:$0xff] %v7605_v53  ;;  %10425 = vst [vmem:[#allocation50_spill] sm:$0xff] %v7607_v60  ;;  %v3156_v32 = vld [vmem:[#allocation14 + $0xb0] sm:$0xff]  ;;  %v1424_v23 = vand.u32 2147483647, %v1416_v6  ;;  %v7622_v53 = vadd.f32 1.0, %v3154_v5  ;;  %v1365_v50 = vsub.f32 %v7468_v38, %v1354_v27  ;;  %v1418_v5 = vsub.f32 %v7396_v15, %v1414_v57 }
 0x2cd   : > { %10426 = vst [vmem:[#allocation51_spill] sm:$0xff] %v7609_v24  ;;  %10427 = vst [vmem:[#allocation52_spill] sm:$0xff] %v7616_v62  ;;  %v7624_v54 = vadd.f32 1.0, %v3155_v45  ;;  %v3157_v35 = vld [vmem:[#allocation14 + $0xb8] sm:$0xff]  ;;  %v3158_v24 = vld [vmem:[#allocation14 + $0xc0] sm:$0xff]  ;;  %v1375_v60 = vsub.f32 1.0, %v1367_v9  ;;  %v7637_v45 = vrot.slane %v7486_v44, %v7384_v12  ;;  %v1422_v38 = vsub.f32 %v7398_v16, %v1414_v57 }
 0x2ce   : > { %10428 = vst [vmem:[#allocation53_spill] sm:$0xff] %v7618_v30  ;;  %10429 = vst [vmem:[#allocation54_spill] sm:$0xff] %v7620_v26  ;;  %v1379_v41 = vsub.f32 1.0, %v1371_v51  ;;  %v1428_v22 = vand.u32 2147483647, %v1420_v52  ;;  %v7626_v17 = vadd.f32 1.0, %v3152_v39  ;;  %v7648_v39 = vrot.slane %v7486_v44, %v7387_v4 }
 0x2cf   : > { %10430 = vst [vmem:[#allocation55_spill] sm:$0xff] %v7622_v53  ;;  %10431 = vst [vmem:[#allocation56_spill] sm:$0xff] %v7624_v54  ;;  %v3159_v21 = vld [vmem:[#allocation14 + $0xc8] sm:$0xff]  ;;  %v7630_v26 = vadd.f32 1.0, %v3153_v36  ;;  %v7632_v30 = vadd.f32 1.0, %v3156_v32  ;;  %v7639_v6 = vadd.f32 1.0, %v3157_v35  ;;  %v7657_v27 = vrot.slane %v7486_v44, %v7390_v13 }
 0x2d0   : > { %10432 = vst [vmem:[#allocation57_spill] sm:$0xff] %v7626_v17  ;;  %10435 = vst [vmem:[#allocation60_spill] sm:$0xff] %v7637_v45  ;;  %v7641_v9 = vadd.f32 1.0, %v3158_v24  ;;  %v1432_v33 = vsub.f32 1.0, %v1424_v23  ;;  %v7650_v32 = vadd.f32 1.0, %v3159_v21  ;;  %v1383_v36 = vmax.f32 %v1375_v60, 0.0 }
 0x2d1   : > { %10433 = vst [vmem:[#allocation58_spill] sm:$0xff] %v7630_v26  ;;  %10434 = vst [vmem:[#allocation59_spill] sm:$0xff] %v7632_v30  ;;  %5792 = vmatmul.mubr.msk.bf16.gmra.mrb[16].mxu1 %vm1807_vm3, %v7565_v47  ;;  %v1387_v51 = vmax.f32 %v1379_v41, 0.0  ;;  %v1436_v52 = vsub.f32 1.0, %v1428_v22  ;;  %v1369_v24 = vand.u32 2147483647, %v1361_v37  ;;  %v7662_v23 = vrot.slane %v7515_v58, %v7384_v12 }
 0x2d2   : > { %10436 = vst [vmem:[#allocation61_spill] sm:$0xff] %v7639_v6  ;;  %10437 = vst [vmem:[#allocation62_spill] sm:$0xff] %v7641_v9  ;;  %5789 = vmatmul.mubr.msk.bf16.gmra.mrb[20].mxu0 %vm1807_vm3, %v7612_v31  ;;  %1955 = vmatprep.mubr.bf16.mxu1 %v10410_v63  ;;  %v1373_v57 = vand.u32 2147483647, %v1365_v50  ;;  %v7666_v35 = vrot.slane %v7515_v58, %v7387_v4  ;;  %v1426_v21 = vand.u32 2147483647, %v1418_v5 }
 0x2d3   : > { %10438 = vst [vmem:[#allocation63_spill] sm:$0xff] %v7648_v39  ;;  %10439 = vst [vmem:[#allocation64_spill] sm:$0xff] %v7650_v32  ;;  %1998 = vmatprep.mubr.bf16.mxu0 %v10410_v63  ;;  %v1402_v22 = vrot.slane %v7411_v0, %v7555_v55  ;;  %v7672_v41 = vrot.slane %v7515_v58, %v7390_v13  ;;  %v7676_v60 = vrot.slane %v7503_v49, %v7384_v12  ;;  %v3162_v37 = vld [vmem:[#allocation14 + $0xe0] sm:$0xff] }
 0x2d4   : > { %10440 = vst [vmem:[#allocation65_spill] sm:$0xff] %v7657_v27  ;;  %10441 = vst [vmem:[#allocation66_spill] sm:$0xff] %v7662_v23  ;;  %v1440_v50 = vmax.f32 %v1432_v33, 0.0  ;;  %v1430_v27 = vand.u32 2147483647, %v1422_v38  ;;  %v7680_v39 = vrot.slane %v7503_v49, %v7387_v4  ;;  %v7684_v5 = vrot.slane %v7503_v49, %v7390_v13 }
 0x2d5   : > { %10442 = vst [vmem:[#allocation67_spill] sm:$0xff] %v7666_v35  ;;  %10443 = vst [vmem:[#allocation68_spill] sm:$0xff] %v7672_v41  ;;  %v1444_v35 = vmax.f32 %v1436_v52, 0.0  ;;  %v7688_v23 = vrot.slane %v7520_v7, %v7384_v12  ;;  %v7692_v41 = vrot.slane %v7520_v7, %v7387_v4  ;;  %v7696_v33 = vrot.slane %v7520_v7, %v7390_v13  ;;  %v3163_v52 = vld [vmem:[#allocation14 + $0xe8] sm:$0xff] }
 0x2d6   : > { %10444 = vst [vmem:[#allocation69_spill] sm:$0xff] %v7676_v60  ;;  %10445 = vst [vmem:[#allocation70_spill] sm:$0xff] %v7680_v39  ;;  %v1377_v38 = vsub.f32 1.0, %v1369_v24  ;;  %v1381_v60 = vsub.f32 1.0, %v1373_v57  ;;  %v1410_v39 = vrot.slane %v7459_v34, %v7555_v55  ;;  %v7700_v45 = vadd.f32 1.0, %v3162_v37  ;;  %v3160_v24 = vld [vmem:[#allocation14 + $0xd0] sm:$0xff] }
 0x2d7   : > { %10446 = vst [vmem:[#allocation71_spill] sm:$0xff] %v7684_v5  ;;  %10447 = vst [vmem:[#allocation72_spill] sm:$0xff] %v7688_v23  ;;  %v1434_v5 = vsub.f32 1.0, %v1426_v21  ;;  %v7704_v12 = vrot.slane %v7503_v49, %v7407_v19  ;;  %v7708_v4 = vrot.slane %v7520_v7, %v7407_v19  ;;  %v7712_v13 = vrot.slane %v7486_v44, %v7407_v19  ;;  %v3161_v57 = vld [vmem:[#allocation14 + $0xd8] sm:$0xff] }
 0x2d8   : > { %10448 = vst [vmem:[#allocation73_spill] sm:$0xff] %v7692_v41  ;;  %10449 = vst [vmem:[#allocation74_spill] sm:$0xff] %v7696_v33  ;;  %v3164_v33 = vld [vmem:[#allocation14 + $0xf0] sm:$0xff]  ;;  %v1391_v37 = vpack.c.bf16 %v1387_v51, %v1383_v36  ;;  %v1438_v21 = vsub.f32 1.0, %v1430_v27  ;;  %v1415_v41 = vsub.f32 %v7392_v14, %v1402_v22  ;;  %v1419_v23 = vsub.f32 %v7394_v2, %v1402_v22  ;;  %v3165_v22 = vld [vmem:[#allocation14 + $0xf8] sm:$0xff] }
 0x2d9   : > { %10450 = vst [vmem:[#allocation75_spill] sm:$0xff] %v7700_v45  ;;  %5793 = vmatmul.mubr.msk.bf16.gmra.mrb[20].mxu1 %vm1807_vm3, %v7612_v31  ;;  %v1448_v45 = vpack.c.bf16 %v1444_v35, %v1440_v50  ;;  %v1462_v32 = vrot.slane %v7503_v49, %v7404_v18  ;;  %v1470_v9 = vrot.slane %v7520_v7, %v7404_v18  ;;  %v7725_v6 = vadd.f32 1.0, %v3163_v52 }
 0x2da   : > { %5794 = vmatmul.mubr.msk.bf16.vlgmr.msra.gmra.mrb[24].mxu0 %vm1807_vm3, %v7526_v8  ;;  %2071 = vmatprep.mubr.bf16.mxu1 %v10410_v63  ;;  %v1458_v36 = vrot.slane %v7486_v44, %v7404_v18  ;;  %v7730_v51 = vadd.f32 1.0, %v3160_v24  ;;  %v7732_v27 = vadd.f32 1.0, %v3161_v57  ;;  %v7734_v35 = vadd.f32 1.0, %v3164_v33 }
 0x2db   : > { %10451 = vst [vmem:[#allocation76_spill] sm:$0xff] %v7725_v6  ;;  %2113 = vmatpush1.bf16.msra.mxu0 %v1391_v37  ;;  %2008 = vmatprep.mubr.bf16.mxu0 %v10410_v63  ;;  %v1385_v50 = vmax.f32 %v1377_v38, 0.0  ;;  %v1389_v30 = vmax.f32 %v1381_v60, 0.0  ;;  %v1442_v26 = vmax.f32 %v1434_v5, 0.0  ;;  %v1417_v52 = vsub.f32 %v7409_v20, %v1410_v39 }
 0x2dc   : > { %10452 = vst [vmem:[#allocation77_spill] sm:$0xff] %v7730_v51  ;;  %10453 = vst [vmem:[#allocation78_spill] sm:$0xff] %v7732_v27  ;;  %2258 = vmatprep.subr.bf16.mxu0 %v1448_v45  ;;  %v1446_v6 = vmax.f32 %v1438_v21, 0.0  ;;  %v1423_v37 = vand.u32 2147483647, %v1415_v41  ;;  %v1421_v54 = vsub.f32 %v7425_v25, %v1410_v39  ;;  %v1472_v53 = vsub.f32 %v7379_v10, %v1462_v32 }
 0x2dd   : > { %10454 = vst [vmem:[#allocation79_spill] sm:$0xff] %v7734_v35  ;;  %v1427_v17 = vand.u32 2147483647, %v1419_v23  ;;  %v1476_v24 = vsub.f32 %v7381_v11, %v1462_v32  ;;  %v1474_v57 = vsub.f32 %v7396_v15, %v1470_v9  ;;  %v7741_v33 = vadd.f32 1.0, %v3165_v22 }
 0x2de   : > { %v7745_v45 = vrot.slane %v7411_v0, %v7562_v1  ;;  %v1478_v60 = vsub.f32 %v7398_v16, %v1470_v9  ;;  %v1471_v5 = vsub.f32 %v7392_v14, %v1458_v36  ;;  %v1466_v23 = vrot.slane %v7515_v58, %v7404_v18 }
 0x2df   : > { %10455 = vst [vmem:[#allocation80_spill] sm:$0xff] %v7741_v33  ;;  %v7753_v39 = vrot.slane %v7439_v28, %v7562_v1  ;;  %v1393_v32 = vpack.c.bf16 %v1389_v30, %v1385_v50  ;;  %v1425_v41 = vand.u32 2147483647, %v1417_v52  ;;  %v1475_v38 = vsub.f32 %v7394_v2, %v1458_v36 }
 0x2e0   : > { %v1450_v0 = vpack.c.bf16 %v1446_v6, %v1442_v26  ;;  %v1431_v21 = vsub.f32 1.0, %v1423_v37  ;;  %v1435_v22 = vsub.f32 1.0, %v1427_v17  ;;  %v1429_v9 = vand.u32 2147483647, %v1421_v54 }
 0x2e1   : > { %5798 = vmatmul.mubr.msk.bf16.vlgmr.msra.gmra.mrb[24].mxu1 %vm1807_vm3, %v7526_v8  ;;  %v7760_v33 = vrot.slane %v7459_v34, %v7562_v1  ;;  %v1480_v28 = vand.u32 2147483647, %v1472_v53  ;;  %v1484_v30 = vand.u32 2147483647, %v1476_v24  ;;  %v1482_v50 = vand.u32 2147483647, %v1474_v57 }
 0x2e2   : > { %2186 = vmatpush1.bf16.msra.mxu1 %v1393_v32  ;;  %5795 = vmatmul.mubr.msk.bf16.gmra.mrb[28].mxu0 %vm1807_vm3, %v7546_v43  ;;  %v7766_v36 = vrot.slane %v7482_v42, %v7562_v1  ;;  %v1486_v26 = vand.u32 2147483647, %v1478_v60  ;;  %v1479_v17 = vand.u32 2147483647, %v1471_v5  ;;  %v1473_v54 = vsub.f32 %v7409_v20, %v1466_v23 }
 0x2e3   : > { %2331 = vmatprep.subr.bf16.mxu1 %v1450_v0  ;;  %2081 = vmatprep.mubr.bf16.mxu1 %v10410_v63  ;;  %v7773_v34 = vrot.slane %v7486_v44, %v7562_v1  ;;  %v1483_v53 = vand.u32 2147483647, %v1475_v38  ;;  %v1477_v6 = vsub.f32 %v7425_v25, %v1466_v23  ;;  %v7778_v42 = vrot.slane %v7503_v49, %v7501_v48 }
 0x2e4   : > { %2018 = vmatprep.mubr.bf16.mxu0 %v10410_v63  ;;  %v7780_v52 = vmax.f32 %v1431_v21, 0.0  ;;  %v1433_v37 = vsub.f32 1.0, %v1425_v41  ;;  %v1437_v24 = vsub.f32 1.0, %v1429_v9  ;;  %v7784_v57 = vrot.slane %v7515_v58, %v7562_v1 }
 0x2e5   : > { %10456 = vst [vmem:[#allocation81_spill] sm:$0xff] %v7773_v34  ;;  %v7786_v60 = vmax.f32 %v1435_v22, 0.0  ;;  %v1488_v5 = vsub.f32 1.0, %v1480_v28  ;;  %v1492_v32 = vsub.f32 1.0, %v1484_v30  ;;  %v1490_v0 = vsub.f32 1.0, %v1482_v50 }
 0x2e6   : > { %10457 = vst [vmem:[#allocation82_spill] sm:$0xff] %v7784_v57  ;;  %v1494_v38 = vsub.f32 1.0, %v1486_v26  ;;  %v1487_v34 = vsub.f32 1.0, %v1479_v17  ;;  %v1481_v23 = vand.u32 2147483647, %v1473_v54  ;;  %v7790_v35 = vrot.slane %v7515_v58, %v7407_v19 }
 0x2e7   : > { %v1491_v21 = vsub.f32 1.0, %v1483_v53  ;;  %v1485_v27 = vand.u32 2147483647, %v1477_v6  ;;  %v1528_v41 = vsub.f32 %v7379_v10, %v7704_v12  ;;  %v1532_v9 = vsub.f32 %v7381_v11, %v7704_v12 }
 0x2e8   : > { %v7798_v22 = vmax.f32 %v1433_v37, 0.0  ;;  %v7800_v28 = vmax.f32 %v1437_v24, 0.0  ;;  %v1530_v30 = vsub.f32 %v7396_v15, %v7708_v4  ;;  %v7805_v19 = vadd.f32 -1.0, %v7379_v10 }
 0x2e9   : > { %5799 = vmatmul.mubr.msk.bf16.gmra.mrb[28].mxu1 %vm1807_vm3, %v7546_v43  ;;  %v7810_v50 = vmax.f32 %v1488_v5, 0.0  ;;  %v7812_v12 = vmax.f32 %v1492_v32, 0.0  ;;  %v1534_v26 = vsub.f32 %v7398_v16, %v7708_v4  ;;  %v7817_v17 = vadd.f32 -1.0, %v7381_v11 }
 0x2ea   : > { %5796 = vmatmul.mubr.msk.bf16.gmra.mrb[32].mxu0 %vm1807_vm3, %v7565_v47  ;;  %2091 = vmatprep.mubr.bf16.mxu1 %v10410_v63  ;;  %v7820_v54 = vmax.f32 %v1490_v0, 0.0  ;;  %v7822_v10 = vmax.f32 %v1494_v38, 0.0  ;;  %v7824_v53 = vmax.f32 %v1487_v34, 0.0  ;;  %v1489_v6 = vsub.f32 1.0, %v1481_v23 }
 0x2eb   : > { %2028 = vmatprep.mubr.bf16.mxu0 %v10410_v63  ;;  %v7826_v37 = vmax.f32 %v1491_v21, 0.0  ;;  %v1493_v24 = vsub.f32 1.0, %v1485_v27  ;;  %v1536_v5 = vand.u32 2147483647, %v1528_v41  ;;  %v1540_v32 = vand.u32 2147483647, %v1532_v9 }
 0x2ec   : > { %v1538_v57 = vand.u32 2147483647, %v1530_v30  ;;  %v1527_v4 = vsub.f32 %v7392_v14, %v7712_v13  ;;  %v1531_v11 = vsub.f32 %v7394_v2, %v7712_v13  ;;  %v7834_v0 = vrot.slane %v7520_v7, %v7501_v48 }
 0x2ed   : > { %v1542_v38 = vand.u32 2147483647, %v1534_v26  ;;  %v1592_v34 = vsub.f32 %v7805_v19, %v7778_v42  ;;  %v7840_v27 = vrot.slane %v7486_v44, %v7501_v48  ;;  %v7844_v23 = vrot.slane %v7503_v49, %v7555_v55 }
 0x2ee   : > { %v1447_v21 = vpack.c.bf16 %v7786_v60, %v7780_v52  ;;  %v7852_v41 = vrot.slane %v7503_v49, %v7562_v1  ;;  %v1596_v9 = vsub.f32 %v7817_v17, %v7778_v42  ;;  %v1504_v30 = vpack.c.bf16 %v7812_v12, %v7810_v50 }
 0x2ef   : > { %v7860_v51 = vmax.f32 %v1489_v6, 0.0  ;;  %v7862_v62 = vmax.f32 %v1493_v24, 0.0  ;;  %v1544_v52 = vsub.f32 1.0, %v1536_v5  ;;  %v1548_v60 = vsub.f32 1.0, %v1540_v32 }
 0x2f0   : > { %10458 = vst [vmem:[#allocation83_spill] sm:$0xff] %v7852_v41  ;;  %v1535_v13 = vand.u32 2147483647, %v1527_v4  ;;  %v1546_v42 = vsub.f32 1.0, %v1538_v57  ;;  %v1550_v50 = vsub.f32 1.0, %v1542_v38  ;;  %v1529_v26 = vsub.f32 %v7409_v20, %v7790_v35 }
 0x2f1   : > { %10459 = vst [vmem:[#allocation84_spill] sm:$0xff] %v7860_v51  ;;  %10460 = vst [vmem:[#allocation85_spill] sm:$0xff] %v7862_v62  ;;  %5800 = vmatmul.mubr.msk.bf16.gmra.mrb[32].mxu1 %vm1807_vm3, %v7565_v47  ;;  %v1539_v12 = vand.u32 2147483647, %v1531_v11  ;;  %v1600_v6 = vand.u32 2147483647, %v1592_v34  ;;  %v1533_v5 = vsub.f32 %v7425_v25, %v7790_v35  ;;  %v7878_v32 = vrot.slane %v7515_v58, %v7501_v48 }
 0x2f2   : > { %5797 = vmatmul.mubr.msk.bf16.gmra.mrb[36].mxu0 %vm1807_vm3, %v7612_v31  ;;  %2101 = vmatprep.mubr.bf16.mxu1 %v10410_v63  ;;  %v1604_v24 = vand.u32 2147483647, %v1596_v9  ;;  %v7883_v57 = vadd.f32 -1.0, %v7396_v15  ;;  %v7886_v11 = vadd.f32 -1.0, %v7398_v16  ;;  %v7890_v38 = vrot.slane %v7520_v7, %v7555_v55 }
 0x2f3   : > { %2144 = vmatprep.mubr.bf16.mxu0 %v10410_v63  ;;  %v7892_v34 = vmax.f32 %v1544_v52, 0.0  ;;  %v7894_v35 = vmax.f32 %v1548_v60, 0.0  ;;  %v7897_v48 = vadd.f32 -1.0, %v7392_v14  ;;  %v7900_v9 = vadd.f32 -1.0, %v7394_v2 }
 0x2f4   : > { %v7902_v4 = vmax.f32 %v1546_v42, 0.0  ;;  %v7904_v15 = vmax.f32 %v1550_v50, 0.0  ;;  %v1543_v16 = vsub.f32 1.0, %v1535_v13  ;;  %v1547_v49 = vsub.f32 1.0, %v1539_v12 }
 0x2f5   : > { %v1608_v41 = vsub.f32 1.0, %v1600_v6  ;;  %v1612_v1 = vsub.f32 1.0, %v1604_v24  ;;  %v1537_v7 = vand.u32 2147483647, %v1529_v26  ;;  %v1541_v51 = vand.u32 2147483647, %v1533_v5 }
 0x2f6   : > { %10461 = vst [vmem:[#allocation86_spill] sm:$0xff] %v7902_v4  ;;  %v1594_v52 = vsub.f32 %v7883_v57, %v7834_v0  ;;  %v1598_v14 = vsub.f32 %v7886_v11, %v7834_v0  ;;  %v7911_v60 = vadd.f32 -1.0, %v7409_v20  ;;  %v1634_v2 = vrot.slane %v7486_v44, %v7555_v55 }
 0x2f7   : > { %v1591_v13 = vsub.f32 %v7897_v48, %v7840_v27  ;;  %v1595_v26 = vsub.f32 %v7900_v9, %v7840_v27  ;;  %v7922_v42 = vadd.f32 -1.0, %v7425_v25  ;;  %v1642_v0 = vrot.slane %v7515_v58, %v7555_v55 }
 0x2f8   : > { %v7931_v44 = vmax.f32 %v1543_v16, 0.0  ;;  %v1648_v50 = vsub.f32 %v7805_v19, %v7844_v23  ;;  %v1652_v25 = vsub.f32 %v7817_v17, %v7844_v23  ;;  %v7940_v55 = vmax.f32 %v1547_v49, 0.0 }
 0x2f9   : > { %5801 = vmatmul.mubr.msk.bf16.gmra.mrb[36].mxu1 %vm1807_vm3, %v7612_v31  ;;  %v7942_v27 = vmax.f32 %v1608_v41, 0.0  ;;  %v1545_v12 = vsub.f32 1.0, %v1537_v7  ;;  %v7944_v6 = vmax.f32 %v1612_v1, 0.0  ;;  %v1549_v24 = vsub.f32 1.0, %v1541_v51 }
 0x2fa   : > { %5802 = vmatmul.mubr.msk.bf16.vlgmr.msra.gmra.mrb[40].mxu0 %vm1807_vm3, %v7526_v8  ;;  %2217 = vmatprep.mubr.bf16.mxu1 %v10410_v63  ;;  %v1602_v5 = vand.u32 2147483647, %v1594_v52  ;;  %v1606_v16 = vand.u32 2147483647, %v1598_v14  ;;  %v1599_v20 = vand.u32 2147483647, %v1591_v13  ;;  %v1593_v23 = vsub.f32 %v7911_v60, %v7878_v32 }
 0x2fb   : > { %2259 = vmatpush1.bf16.msra.mxu0 %v1447_v21  ;;  %2154 = vmatprep.mubr.bf16.mxu0 %v10410_v63  ;;  %v1603_v62 = vand.u32 2147483647, %v1595_v26  ;;  %v1597_v21 = vsub.f32 %v7922_v42, %v7878_v32  ;;  %v1656_v58 = vand.u32 2147483647, %v1648_v50  ;;  %v1660_v49 = vand.u32 2147483647, %v1652_v25 }
 0x2fc   : > { %2404 = vmatprep.subr.bf16.mxu0 %v1504_v30  ;;  %v1650_v41 = vsub.f32 %v7883_v57, %v7890_v38  ;;  %v1654_v7 = vsub.f32 %v7886_v11, %v7890_v38  ;;  %v7954_v1 = vmax.f32 %v1545_v12, 0.0  ;;  %v1647_v51 = vsub.f32 %v7897_v48, %v1634_v2 }
 0x2fd   : > { %v1651_v30 = vsub.f32 %v7900_v9, %v1634_v2  ;;  %v1649_v52 = vsub.f32 %v7911_v60, %v1642_v0  ;;  %v7959_v14 = vmax.f32 %v1549_v24, 0.0  ;;  %v1610_v13 = vsub.f32 1.0, %v1602_v5 }
 0x2fe   : > { %v1614_v32 = vsub.f32 1.0, %v1606_v16  ;;  %v1653_v26 = vsub.f32 %v7922_v42, %v1642_v0  ;;  %v1607_v50 = vsub.f32 1.0, %v1599_v20  ;;  %v1611_v25 = vsub.f32 1.0, %v1603_v62 }
 0x2ff   : > { %v1601_v38 = vand.u32 2147483647, %v1593_v23  ;;  %v1605_v12 = vand.u32 2147483647, %v1597_v21  ;;  %v10462_v4 = vpack.c.bf16 %v7800_v28, %v7798_v22  ;;  %v1664_v2 = vsub.f32 1.0, %v1656_v58 }
 0x300   : > { %v1668_v24 = vsub.f32 1.0, %v1660_v49  ;;  %v1658_v5 = vand.u32 2147483647, %v1650_v41  ;;  %v1662_v16 = vand.u32 2147483647, %v1654_v7  ;;  %v10463_v22 = vpack.c.bf16 %v7822_v10, %v7820_v54 }
 0x301   : > { %5806 = vmatmul.mubr.msk.bf16.vlgmr.msra.gmra.mrb[40].mxu1 %vm1807_vm3, %v7526_v8  ;;  %v1655_v0 = vand.u32 2147483647, %v1647_v51  ;;  %v1659_v20 = vand.u32 2147483647, %v1651_v30  ;;  %v1657_v23 = vand.u32 2147483647, %v1649_v52  ;;  %v3214_v21 = vsub.f32 %v7569_v40, %v7745_v45 }
 0x302   : > { %2332 = vmatpush1.bf16.msra.mxu1 %v10462_v4  ;;  %5803 = vmatmul.mubr.msk.bf16.gmra.mrb[44].mxu0 %vm1807_vm3, %v7546_v43  ;;  %v7976_v28 = vmax.f32 %v1610_v13, 0.0  ;;  %v7978_v4 = vmax.f32 %v1614_v32, 0.0  ;;  %v1661_v58 = vand.u32 2147483647, %v1653_v26  ;;  %v7982_v49 = vmax.f32 %v1607_v50, 0.0  ;;  %v8396_v40 = vld [vmem:[#allocation14 + $0xb8] sm:$0xff] }
 0x303   : > { %2227 = vmatprep.mubr.bf16.mxu1 %v10410_v63  ;;  %2164 = vmatprep.mubr.bf16.mxu0 %v10410_v63  ;;  %v7984_v41 = vmax.f32 %v1611_v25, 0.0  ;;  %v1609_v7 = vsub.f32 1.0, %v1601_v38  ;;  %v1613_v51 = vsub.f32 1.0, %v1605_v12  ;;  %v7986_v30 = vmax.f32 %v1664_v2, 0.0  ;;  %10563 = vst [vmem:[#allocation139_spill] sm:$0xff] %v8396_v40 }
 0x304   : > { %2477 = vmatprep.subr.bf16.mxu1 %v10463_v22  ;;  %v7988_v52 = vmax.f32 %v1668_v24, 0.0  ;;  %v1666_v54 = vsub.f32 1.0, %v1658_v5  ;;  %v1670_v10 = vsub.f32 1.0, %v1662_v16  ;;  %v1663_v32 = vsub.f32 1.0, %v1655_v0 }
 0x305   : > { %v1667_v26 = vsub.f32 1.0, %v1659_v20  ;;  %v1665_v22 = vsub.f32 1.0, %v1657_v23  ;;  %v1669_v62 = vsub.f32 1.0, %v1661_v58  ;;  %v3246_v25 = vand.u32 2147483647, %v3214_v21  ;;  %v8017_v58 = vpop.f32.mrb[4].mxu0 }
 0x306   : > { %v3215_v38 = vsub.f32 %v7571_v46, %v7753_v39  ;;  %v8000_v2 = vmax.f32 %v1609_v7, 0.0  ;;  %v8002_v24 = vmax.f32 %v1613_v51, 0.0  ;;  %v3218_v5 = vsub.f32 %v7575_v61, %v7745_v45  ;;  %10464 = vst [vmem:[#allocation87_spill] sm:$0xff] %v8017_v58  ;;  %v8028_v12 = vpop.f32.mrb[5].mxu0 }
 0x307   : > { %v8013_v20 = vmax.f32 %v1666_v54, 0.0  ;;  %v8015_v23 = vmax.f32 %v1670_v10, 0.0  ;;  %v8020_v21 = vmax.f32 %v1663_v32, 0.0  ;;  %v8022_v7 = vmax.f32 %v1667_v26, 0.0  ;;  %10468 = vst [vmem:[#allocation91_spill] sm:$0xff] %v8028_v12 }
 0x308   : > { %v8024_v51 = vmax.f32 %v1665_v22, 0.0  ;;  %v1690_v16 = vrot.slane %v8017_v58, %v7404_v18  ;;  %v8030_v0 = vmax.f32 %v1669_v62, 0.0  ;;  %v1694_v54 = vrot.slane %v8028_v12, %v7404_v18 }
 0x309   : > { %5807 = vmatmul.mubr.msk.bf16.gmra.mrb[44].mxu1 %vm1807_vm3, %v7546_v43  ;;  %10465 = vst [vmem:[#allocation88_spill] sm:$0xff] %v8020_v21  ;;  %10466 = vst [vmem:[#allocation89_spill] sm:$0xff] %v8022_v7  ;;  %v3278_v10 = vsub.f32 1.0, %v3246_v25  ;;  %v3247_v50 = vand.u32 2147483647, %v3215_v38  ;;  %v3219_v62 = vsub.f32 %v7577_v56, %v7753_v39  ;;  %v3216_v12 = vsub.f32 %v7579_v59, %v7760_v33  ;;  %v8054_v56 = vpop.f32.mrb[4].mxu1 }
 0x30a   : > { %5804 = vmatmul.mubr.msk.bf16.gmra.mrb[48].mxu0 %vm1807_vm3, %v7565_v47  ;;  %2237 = vmatprep.mubr.bf16.mxu1 %v10410_v63  ;;  %10467 = vst [vmem:[#allocation90_spill] sm:$0xff] %v8024_v51  ;;  %10469 = vst [vmem:[#allocation92_spill] sm:$0xff] %v8030_v0  ;;  %v1703_v26 = vsub.f32 %v7897_v48, %v1690_v16  ;;  %v1707_v22 = vsub.f32 %v7900_v9, %v1690_v16  ;;  %v3250_v13 = vand.u32 2147483647, %v3218_v5  ;;  %v10476_v0 = vld [vmem:[#allocation44_spill] sm:$0xff] }
 0x30b   : > { %2174 = vmatprep.mubr.bf16.mxu0 %v10410_v63  ;;  %v1704_v61 = vsub.f32 %v7805_v19, %v1694_v54  ;;  %v1708_v58 = vsub.f32 %v7817_v17, %v1694_v54  ;;  %v8050_v5 = vmax.f32 %v3278_v10, 0.0  ;;  %v3279_v17 = vsub.f32 1.0, %v3247_v50  ;;  %10471 = vst [vmem:[#allocation94_spill] sm:$0xff] %v8054_v56  ;;  %v8063_v50 = vpop.f32.mrb[5].mxu1 }
 0x30c   : > { %v1711_v48 = vand.u32 2147483647, %v1703_v26  ;;  %v1715_v32 = vand.u32 2147483647, %v1707_v22  ;;  %v3217_v38 = vsub.f32 %v7583_v29, %v7766_v36  ;;  %10472 = vst [vmem:[#allocation95_spill] sm:$0xff] %v8063_v50  ;;  %v3282_v10 = vsub.f32 1.0, %v3250_v13 }
 0x30d   : > { %v1712_v19 = vand.u32 2147483647, %v1704_v61  ;;  %10470 = vst [vmem:[#allocation93_spill] sm:$0xff] %v8050_v5  ;;  %v1716_v59 = vand.u32 2147483647, %v1708_v58  ;;  %v1698_v61 = vrot.slane %v8054_v56, %v7404_v18  ;;  %v3220_v9 = vsub.f32 %v7581_v3, %v7760_v33 }
 0x30e   : > { %v1719_v16 = vsub.f32 1.0, %v1711_v48  ;;  %v1723_v54 = vsub.f32 1.0, %v1715_v32  ;;  %v3251_v26 = vand.u32 2147483647, %v3219_v62  ;;  %v3248_v22 = vand.u32 2147483647, %v3216_v12 }
 0x30f   : > { %v1702_v48 = vrot.slane %v8063_v50, %v7404_v18  ;;  %v1720_v25 = vsub.f32 1.0, %v1712_v19  ;;  %v1705_v56 = vsub.f32 %v7911_v60, %v1698_v61  ;;  %v1709_v5 = vsub.f32 %v7922_v42, %v1698_v61  ;;  %v10478_v42 = vld [vmem:[#allocation45_spill] sm:$0xff] }
 0x310   : > { %v8066_v58 = vmax.f32 %v1719_v16, 0.0  ;;  %v8068_v32 = vmax.f32 %v1723_v54, 0.0  ;;  %v8076_v13 = vmax.f32 %v3279_v17, 0.0  ;;  %v1724_v62 = vsub.f32 1.0, %v1716_v59 }
 0x311   : > { %5808 = vmatmul.mubr.msk.bf16.gmra.mrb[48].mxu1 %vm1807_vm3, %v7565_v47  ;;  %v1706_v16 = vsub.f32 %v7883_v57, %v1702_v48  ;;  %v1710_v54 = vsub.f32 %v7886_v11, %v1702_v48  ;;  %v1713_v51 = vand.u32 2147483647, %v1705_v56  ;;  %v1717_v18 = vand.u32 2147483647, %v1709_v5  ;;  %v10481_v11 = vld [vmem:[#allocation46_spill] sm:$0xff]  ;;  %v10482_v5 = vld [vmem:[#allocation47_spill] sm:$0xff] }
 0x312   : > { %5805 = vmatmul.mubr.msk.bf16.gmra.mrb[52].mxu0 %vm1807_vm3, %v7612_v31  ;;  %2247 = vmatprep.mubr.bf16.mxu1 %v10410_v63  ;;  %10473 = vst [vmem:[#allocation96_spill] sm:$0xff] %v8066_v58  ;;  %10474 = vst [vmem:[#allocation97_spill] sm:$0xff] %v8068_v32  ;;  %v3249_v50 = vand.u32 2147483647, %v3217_v38  ;;  %v3221_v19 = vsub.f32 %v10476_v0, %v7766_v36  ;;  %v8084_v29 = vmax.f32 %v3282_v10, 0.0  ;;  %v3283_v59 = vsub.f32 1.0, %v3251_v26 }
 0x313   : > { %2290 = vmatprep.mubr.bf16.mxu0 %v10410_v63  ;;  %10475 = vst [vmem:[#allocation98_spill] sm:$0xff] %v8076_v13  ;;  %v1714_v3 = vand.u32 2147483647, %v1706_v16  ;;  %v1718_v60 = vand.u32 2147483647, %v1710_v54  ;;  %v3222_v17 = vsub.f32 %v10478_v42, %v7745_v45  ;;  %v1721_v61 = vsub.f32 1.0, %v1713_v51 }
 0x314   : > { %10477 = vst [vmem:[#allocation99_spill] sm:$0xff] %v8084_v29  ;;  %v1725_v12 = vsub.f32 1.0, %v1717_v18  ;;  %v3252_v58 = vand.u32 2147483647, %v3220_v9  ;;  %v8090_v56 = vmax.f32 %v1720_v25, 0.0  ;;  %v8092_v57 = vmax.f32 %v1724_v62, 0.0 }
 0x315   : > { %v3223_v38 = vsub.f32 %v10481_v11, %v7753_v39  ;;  %v3226_v10 = vsub.f32 %v10482_v5, %v7745_v45  ;;  %v8101_v51 = vmax.f32 %v1721_v61, 0.0  ;;  %v1722_v26 = vsub.f32 1.0, %v1714_v3  ;;  %v8141_v13 = vld [vmem:[%s7154_s12] sm:$0xff]   ;;  %v8273_v5 = vld [vmem:[#allocation14 + $0x38] sm:$0xff] }
 0x316   : > { %10479 = vst [vmem:[#allocation100_spill] sm:$0xff] %v8090_v56  ;;  %10480 = vst [vmem:[#allocation101_spill] sm:$0xff] %v8092_v57  ;;  %v8103_v9 = vmax.f32 %v1725_v12, 0.0  ;;  %v1726_v25 = vsub.f32 1.0, %v1718_v60  ;;  %v10485_v48 = vpack.c.bf16 %v7826_v37, %v7824_v53  ;;  %v3280_v62 = vsub.f32 1.0, %v3248_v22  ;;  %v10488_v60 = vld [vmem:[#allocation48_spill] sm:$0xff] }
 0x317   : > { %10483 = vst [vmem:[#allocation102_spill] sm:$0xff] %v8101_v51  ;;  %v3281_v16 = vsub.f32 1.0, %v3249_v50  ;;  %v3253_v54 = vand.u32 2147483647, %v3221_v19  ;;  %v3254_v18 = vand.u32 2147483647, %v3222_v17  ;;  %v3227_v32 = vsub.f32 %v10488_v60, %v7753_v39 }
 0x318   : > { %10484 = vst [vmem:[#allocation103_spill] sm:$0xff] %v8103_v9  ;;  %v8114_v61 = vmax.f32 %v3283_v59, 0.0  ;;  %v3284_v3 = vsub.f32 1.0, %v3252_v58  ;;  %v3255_v29 = vand.u32 2147483647, %v3223_v38  ;;  %v10489_v37 = vld [vmem:[#allocation49_spill] sm:$0xff] }
 0x319   : > { %5809 = vmatmul.mubr.msk.bf16.gmra.mrb[52].mxu1 %vm1807_vm3, %v7612_v31  ;;  %v3258_v53 = vand.u32 2147483647, %v3226_v10  ;;  %v3224_v50 = vsub.f32 %v10489_v37, %v7760_v33  ;;  %v10490_v22 = vld [vmem:[#allocation50_spill] sm:$0xff]  ;;  %v10493_v58 = vld [vmem:[#allocation51_spill] sm:$0xff]  ;;  %v3285_v38 = vsub.f32 1.0, %v3253_v54  ;;  %v3286_v10 = vsub.f32 1.0, %v3254_v18 }
 0x31a   : > { %5810 = vmatmul.mubr.msk.bf16.vlgmr.msra.gmra.mrb[56].mxu0 %vm1807_vm3, %v7526_v8  ;;  %2363 = vmatprep.mubr.bf16.mxu1 %v10410_v63  ;;  %v10486_v8 = vpack.c.bf16 %v7894_v35, %v7892_v34  ;;  %10487 = vst [vmem:[#allocation104_spill] sm:$0xff] %v8114_v61  ;;  %v3225_v19 = vsub.f32 %v10490_v22, %v7766_v36  ;;  %v8122_v34 = vmax.f32 %v1722_v26, 0.0  ;;  %v8124_v35 = vmax.f32 %v1726_v25, 0.0  ;;  %v10498_v25 = vld [vmem:[#allocation53_spill] sm:$0xff]  ;;  %v10499_v18 = vld [vmem:[#allocation54_spill] sm:$0xff]  ;;  %v8292_v11 = vld [vmem:[#allocation14 + $0x48] sm:$0xff] }
 0x31b   : > { %2300 = vmatprep.mubr.bf16.mxu0 %v10410_v63  ;;  %2405 = vmatpush1.bf16.msra.mxu0 %v10485_v48  ;;  %v3228_v59 = vsub.f32 %v10493_v58, %v7760_v33  ;;  %v8130_v48 = vmax.f32 %v3280_v62, 0.0  ;;  %v8134_v51 = vmax.f32 %v3281_v16, 0.0  ;;  %v8136_v9 = vmax.f32 %v3284_v3, 0.0  ;;  %v10500_v16 = vld [vmem:[#allocation85_spill] sm:$0xff]  ;;  %v10501_v3 = vld [vmem:[#allocation84_spill] sm:$0xff]  ;;  %v10510_v58 = vld [vmem:[#allocation58_spill] sm:$0xff] }
 0x31c   : > { %2550 = vmatprep.subr.bf16.mxu0 %v10486_v8  ;;  %10491 = vst [vmem:[#allocation105_spill] sm:$0xff] %v8122_v34  ;;  %10492 = vst [vmem:[#allocation106_spill] sm:$0xff] %v8124_v35  ;;  %v10495_v8 = vld [vmem:[#allocation52_spill] sm:$0xff]  ;;  %v3259_v26 = vand.u32 2147483647, %v3227_v32  ;;  %v3230_v61 = vsub.f32 %v10498_v25, %v7745_v45  ;;  %v3287_v62 = vsub.f32 1.0, %v3255_v29  ;;  %v10502_v32 = vpack.c.bf16 %v10500_v16, %v10501_v3 }
 0x31d   : > { %10494 = vst [vmem:[#allocation107_spill] sm:$0xff] %v8130_v48  ;;  %v3229_v12 = vsub.f32 %v10495_v8, %v7766_v36  ;;  %10496 = vst [vmem:[#allocation108_spill] sm:$0xff] %v8134_v51  ;;  %v3256_v17 = vand.u32 2147483647, %v3224_v50  ;;  %v3257_v54 = vand.u32 2147483647, %v3225_v19  ;;  %v3231_v48 = vsub.f32 %v10499_v18, %v7753_v39 }
 0x31e   : > { %10497 = vst [vmem:[#allocation109_spill] sm:$0xff] %v8136_v9  ;;  %v3290_v9 = vsub.f32 1.0, %v3258_v53  ;;  %v3260_v51 = vand.u32 2147483647, %v3228_v59  ;;  %v10503_v8 = vld [vmem:[#allocation55_spill] sm:$0xff]  ;;  %v10504_v50 = vld [vmem:[#allocation86_spill] sm:$0xff]  ;;  %v3233_v22 = vsub.f32 %v10510_v58, %v7766_v36 }
 0x31f   : > { %v3234_v29 = vsub.f32 %v10503_v8, %v7745_v45  ;;  %v10505_v19 = vpack.c.bf16 %v7904_v15, %v10504_v50  ;;  %v8160_v18 = vmax.f32 %v3285_v38, 0.0  ;;  %v3261_v16 = vand.u32 2147483647, %v3229_v12  ;;  %v10508_v53 = vld [vmem:[#allocation56_spill] sm:$0xff]  ;;  %v10509_v25 = vld [vmem:[#allocation57_spill] sm:$0xff]  ;;  %v10515_v58 = vld [vmem:[#allocation62_spill] sm:$0xff] }
 0x320   : > { %v3235_v59 = vsub.f32 %v10508_v53, %v7753_v39  ;;  %v3291_v3 = vsub.f32 1.0, %v3259_v26  ;;  %v3232_v8 = vsub.f32 %v10509_v25, %v7760_v33  ;;  %v8171_v15 = vmax.f32 %v3287_v62, 0.0  ;;  %v10514_v25 = vld [vmem:[#allocation61_spill] sm:$0xff]  ;;  %v8316_v0 = vld [vmem:[#allocation14 + $0x68] sm:$0xff]  ;;  %v8363_v56 = vld [vmem:[#allocation14 + $0xa0] sm:$0xff] }
 0x321   : > { %5814 = vmatmul.mubr.msk.bf16.vlgmr.msra.gmra.mrb[56].mxu1 %vm1807_vm3, %v8141_v13  ;;  %10506 = vst [vmem:[#allocation85_spill] sm:$0xff] %v8160_v18  ;;  %v3288_v38 = vsub.f32 1.0, %v3256_v17  ;;  %v3263_v50 = vand.u32 2147483647, %v3231_v48  ;;  %v8173_v12 = vmax.f32 %v3290_v9, 0.0  ;;  %v3237_v37 = vsub.f32 %v10514_v25, %v7766_v36  ;;  %v8184_v9 = vld [vmem:[%s7154_s12 + $0x8] sm:$0xff]  }
 0x322   : > { %5811 = vmatmul.mubr.msk.bf16.gmra.mrb[60].mxu0 %vm1807_vm3, %v7546_v43  ;;  %2478 = vmatpush1.bf16.msra.mxu1 %v10502_v32  ;;  %v8162_v43 = vmax.f32 %v3286_v10, 0.0  ;;  %v3262_v32 = vand.u32 2147483647, %v3230_v61  ;;  %10511 = vst [vmem:[#allocation86_spill] sm:$0xff] %v8171_v15  ;;  %v3289_v10 = vsub.f32 1.0, %v3257_v54  ;;  %v3293_v61 = vsub.f32 1.0, %v3261_v16 }
 0x323   : > { %2373 = vmatprep.mubr.bf16.mxu1 %v10410_v63  ;;  %2623 = vmatprep.subr.bf16.mxu1 %v10505_v19  ;;  %10512 = vst [vmem:[#allocation110_spill] sm:$0xff] %v8173_v12  ;;  %v3292_v19 = vsub.f32 1.0, %v3260_v51  ;;  %v3266_v18 = vand.u32 2147483647, %v3234_v29  ;;  %v3267_v53 = vand.u32 2147483647, %v3235_v59  ;;  %v3238_v62 = vsub.f32 %v10515_v58, %v7745_v45 }
 0x324   : > { %10507 = vst [vmem:[#allocation84_spill] sm:$0xff] %v8162_v43  ;;  %2310 = vmatprep.mubr.bf16.mxu0 %v10410_v63  ;;  %v10513_v43 = vld [vmem:[#allocation59_spill] sm:$0xff]  ;;  %v8181_v15 = vmax.f32 %v3291_v3, 0.0  ;;  %v3294_v17 = vsub.f32 1.0, %v3262_v32  ;;  %v3264_v54 = vand.u32 2147483647, %v3232_v8 }
 0x325   : > { %v3236_v26 = vsub.f32 %v10513_v43, %v7760_v33  ;;  %v3265_v48 = vand.u32 2147483647, %v3233_v22  ;;  %v8188_v51 = vmax.f32 %v3288_v38, 0.0  ;;  %v8190_v29 = vmax.f32 %v3289_v10, 0.0  ;;  %v10519_v59 = vld [vmem:[#allocation64_spill] sm:$0xff]  ;;  %v10521_v32 = vld [vmem:[#allocation75_spill] sm:$0xff] }
 0x326   : > { %10516 = vst [vmem:[#allocation111_spill] sm:$0xff] %v8181_v15  ;;  %v3295_v16 = vsub.f32 1.0, %v3263_v50  ;;  %v3239_v12 = vsub.f32 %v10519_v59, %v7753_v39  ;;  %v8197_v8 = vmax.f32 %v3292_v19, 0.0  ;;  %v3298_v22 = vsub.f32 1.0, %v3266_v18  ;;  %v10524_v58 = vld [vmem:[#allocation76_spill] sm:$0xff]  ;;  %v8269_v43 = vld [vmem:[#allocation14 + $0x30] sm:$0xff] }
 0x327   : > { %10517 = vst [vmem:[#allocation112_spill] sm:$0xff] %v8188_v51  ;;  %10518 = vst [vmem:[#allocation113_spill] sm:$0xff] %v8190_v29  ;;  %v3268_v3 = vand.u32 2147483647, %v3236_v26  ;;  %v3242_v15 = vsub.f32 %v10521_v32, %v7745_v45  ;;  %v8202_v38 = vmax.f32 %v3293_v61, 0.0  ;;  %v3299_v10 = vsub.f32 1.0, %v3267_v53 }
 0x328   : > { %10520 = vst [vmem:[#allocation114_spill] sm:$0xff] %v8197_v8  ;;  %v3269_v50 = vand.u32 2147483647, %v3237_v37  ;;  %v3270_v29 = vand.u32 2147483647, %v3238_v62  ;;  %v8204_v51 = vmax.f32 %v3294_v17, 0.0  ;;  %v3243_v19 = vsub.f32 %v10524_v58, %v7753_v39 }
 0x329   : > { %5815 = vmatmul.mubr.msk.bf16.gmra.mrb[60].mxu1 %vm1807_vm3, %v8184_v9  ;;  %10522 = vst [vmem:[#allocation115_spill] sm:$0xff] %v8202_v38  ;;  %v3296_v59 = vsub.f32 1.0, %v3264_v54  ;;  %v8208_v8 = vmax.f32 %v3295_v16, 0.0  ;;  %v3271_v18 = vand.u32 2147483647, %v3239_v12  ;;  %v10526_v26 = vld [vmem:[#allocation77_spill] sm:$0xff] }
 0x32a   : > { %5812 = vmatmul.mubr.msk.bf16.gmra.mrb[64].mxu0 %vm1807_vm3, %v7565_v47  ;;  %2383 = vmatprep.mubr.bf16.mxu1 %v10410_v63  ;;  %10523 = vst [vmem:[#allocation116_spill] sm:$0xff] %v8204_v51  ;;  %v3297_v47 = vsub.f32 1.0, %v3265_v48  ;;  %v3240_v45 = vsub.f32 %v10526_v26, %v7760_v33  ;;  %v10527_v61 = vld [vmem:[#allocation78_spill] sm:$0xff]  ;;  %v8214_v53 = vmax.f32 %v3298_v22, 0.0  ;;  %v3300_v37 = vsub.f32 1.0, %v3268_v3  ;;  %v10529_v17 = vld [vmem:[#allocation79_spill] sm:$0xff] }
 0x32b   : > { %2320 = vmatprep.mubr.bf16.mxu0 %v10410_v63  ;;  %10525 = vst [vmem:[#allocation117_spill] sm:$0xff] %v8208_v8  ;;  %v3241_v38 = vsub.f32 %v10527_v61, %v7766_v36  ;;  %v3274_v62 = vand.u32 2147483647, %v3242_v15  ;;  %v3244_v54 = vsub.f32 %v10529_v17, %v7760_v33  ;;  %v8218_v48 = vmax.f32 %v3299_v10, 0.0  ;;  %v10531_v12 = vld [vmem:[#allocation80_spill] sm:$0xff]  ;;  %v8226_v61 = vld [vmem:[#allocation14] sm:$0xff] }
 0x32c   : > { %10528 = vst [vmem:[#allocation118_spill] sm:$0xff] %v8214_v53  ;;  %v3301_v39 = vsub.f32 1.0, %v3269_v50  ;;  %v3302_v16 = vsub.f32 1.0, %v3270_v29  ;;  %v3245_v8 = vsub.f32 %v10531_v12, %v7766_v36  ;;  %v8222_v51 = vmax.f32 %v3296_v59, 0.0  ;;  %v10534_v22 = vld [vmem:[#allocation23_spill] sm:$0xff]  ;;  %v8231_v3 = vld [vmem:[%s7154_s12 + $0x10] sm:$0xff]  }
 0x32d   : > { %10530 = vst [vmem:[#allocation119_spill] sm:$0xff] %v8218_v48  ;;  %v8224_v26 = vmax.f32 %v3297_v47, 0.0  ;;  %v3275_v58 = vand.u32 2147483647, %v3243_v19  ;;  %v3422_v15 = vsub.f32 %v8226_v61, %v10534_v22  ;;  %v3303_v33 = vsub.f32 1.0, %v3271_v18  ;;  %v8235_v50 = vld [vmem:[#allocation14 + $0x8] sm:$0xff] }
 0x32e   : > { %10532 = vst [vmem:[#allocation120_spill] sm:$0xff] %v8222_v51  ;;  %v3272_v29 = vand.u32 2147483647, %v3240_v45  ;;  %v3273_v10 = vand.u32 2147483647, %v3241_v38  ;;  %v10535_v36 = vld [vmem:[#allocation26_spill] sm:$0xff] }
 0x32f   : > { %10533 = vst [vmem:[#allocation121_spill] sm:$0xff] %v8224_v26  ;;  %v3423_v59 = vsub.f32 %v8235_v50, %v10535_v36  ;;  %v8242_v47 = vmax.f32 %v3300_v37, 0.0  ;;  %v3306_v19 = vsub.f32 1.0, %v3274_v62  ;;  %v3276_v26 = vand.u32 2147483647, %v3244_v54  ;;  %v8244_v51 = vld [vmem:[#allocation14 + $0x20] sm:$0xff] }
 0x330   : > { %v3426_v18 = vsub.f32 %v8244_v51, %v10534_v22  ;;  %v8249_v38 = vmax.f32 %v3301_v39, 0.0  ;;  %v8251_v45 = vmax.f32 %v3302_v16, 0.0  ;;  %v3277_v12 = vand.u32 2147483647, %v3245_v8  ;;  %v8253_v48 = vld [vmem:[#allocation14 + $0x28] sm:$0xff]  ;;  %v8257_v54 = vld [vmem:[#allocation14 + $0x10] sm:$0xff] }
 0x331   : > { %5816 = vmatmul.mubr.msk.bf16.gmra.mrb[64].mxu1 %vm1807_vm3, %v8231_v3  ;;  %10536 = vst [vmem:[#allocation23_spill] sm:$0xff] %v8242_v47  ;;  %v3307_v37 = vsub.f32 1.0, %v3275_v58  ;;  %v3454_v62 = vand.u32 2147483647, %v3422_v15  ;;  %v10539_v47 = vld [vmem:[#allocation29_spill] sm:$0xff]  ;;  %v8261_v17 = vld [vmem:[#allocation14 + $0x18] sm:$0xff]  ;;  %v3431_v42 = vsub.f32 %v8292_v11, %v10535_v36 }
 0x332   : > { %5813 = vmatmul.mubr.msk.bf16.gmra.mrb[68].mxu0 %vm1807_vm3, %v7612_v31  ;;  %2393 = vmatprep.mubr.bf16.mxu1 %v10410_v63  ;;  %10537 = vst [vmem:[#allocation26_spill] sm:$0xff] %v8249_v38  ;;  %10538 = vst [vmem:[#allocation122_spill] sm:$0xff] %v8251_v45  ;;  %v3427_v31 = vsub.f32 %v8253_v48, %v10535_v36  ;;  %v3424_v53 = vsub.f32 %v8257_v54, %v10539_v47  ;;  %v10540_v32 = vld [vmem:[#allocation32_spill] sm:$0xff]  ;;  %v8265_v16 = vmax.f32 %v3303_v33, 0.0 }
 0x333   : > { %2436 = vmatprep.mubr.bf16.mxu0 %v10410_v63  ;;  %v3425_v39 = vsub.f32 %v8261_v17, %v10540_v32  ;;  %v3304_v8 = vsub.f32 1.0, %v3272_v29  ;;  %v3305_v38 = vsub.f32 1.0, %v3273_v10  ;;  %v3455_v45 = vand.u32 2147483647, %v3423_v59  ;;  %v8277_v29 = vld [vmem:[#allocation14 + $0x40] sm:$0xff] }
 0x334   : > { %10541 = vst [vmem:[#allocation29_spill] sm:$0xff] %v8265_v16  ;;  %v8267_v25 = vmax.f32 %v3306_v19, 0.0  ;;  %v3308_v58 = vsub.f32 1.0, %v3276_v26  ;;  %v3458_v15 = vand.u32 2147483647, %v3426_v18  ;;  %v3428_v60 = vsub.f32 %v8269_v43, %v10539_v47 }
 0x335   : > { %v3309_v34 = vsub.f32 1.0, %v3277_v12  ;;  %v3459_v35 = vand.u32 2147483647, %v3427_v31  ;;  %v3429_v33 = vsub.f32 %v8273_v5, %v10540_v32  ;;  %v3430_v10 = vsub.f32 %v8277_v29, %v10534_v22 }
 0x336   : > { %10542 = vst [vmem:[#allocation32_spill] sm:$0xff] %v8267_v25  ;;  %v8281_v59 = vmax.f32 %v3307_v37, 0.0  ;;  %v3486_v26 = vsub.f32 1.0, %v3454_v62  ;;  %v3456_v19 = vand.u32 2147483647, %v3424_v53  ;;  %v8284_v25 = vld [vmem:[%s7154_s12 + $0x18] sm:$0xff]  }
 0x337   : > { %v3457_v18 = vand.u32 2147483647, %v3425_v39  ;;  %v8288_v12 = vmax.f32 %v3304_v8, 0.0  ;;  %v8290_v31 = vmax.f32 %v3305_v38, 0.0  ;;  %v3487_v16 = vsub.f32 1.0, %v3455_v45  ;;  %v8301_v39 = vld [vmem:[#allocation14 + $0x60] sm:$0xff] }
 0x338   : > { %10543 = vst [vmem:[#allocation123_spill] sm:$0xff] %v8281_v59  ;;  %v8299_v53 = vmax.f32 %v3308_v58, 0.0  ;;  %v3490_v37 = vsub.f32 1.0, %v3458_v15  ;;  %v3460_v62 = vand.u32 2147483647, %v3428_v60  ;;  %v3434_v38 = vsub.f32 %v8301_v39, %v10534_v22 }
 0x339   : > { %5817 = vmatmul.mubr.msk.bf16.gmra.mrb[68].mxu1 %vm1807_vm3, %v8284_v25  ;;  %10544 = vst [vmem:[#allocation124_spill] sm:$0xff] %v8288_v12  ;;  %10545 = vst [vmem:[#allocation125_spill] sm:$0xff] %v8290_v31  ;;  %v10547_v45 = vpack.c.bf16 %v7940_v55, %v7931_v44  ;;  %v8309_v8 = vmax.f32 %v3309_v34, 0.0  ;;  %v3491_v31 = vsub.f32 1.0, %v3459_v35  ;;  %v3461_v12 = vand.u32 2147483647, %v3429_v33 }
 0x33a   : > { %5818 = vmatmul.mubr.msk.bf16.vlgmr.msra.gmra.mrb[72].mxu0 %vm1807_vm3, %v8141_v13  ;;  %2509 = vmatprep.mubr.bf16.mxu1 %v10410_v63  ;;  %10546 = vst [vmem:[#allocation126_spill] sm:$0xff] %v8299_v53  ;;  %v3462_v59 = vand.u32 2147483647, %v3430_v10  ;;  %v10549_v58 = vpack.c.bf16 %v7944_v6, %v7942_v27  ;;  %v8314_v60 = vmax.f32 %v3486_v26, 0.0  ;;  %v3488_v15 = vsub.f32 1.0, %v3456_v19  ;;  %v8326_v33 = vld [vmem:[#allocation14 + $0x58] sm:$0xff] }
 0x33b   : > { %2551 = vmatpush1.bf16.msra.mxu0 %v10547_v45  ;;  %2446 = vmatprep.mubr.bf16.mxu0 %v10410_v63  ;;  %10548 = vst [vmem:[#allocation127_spill] sm:$0xff] %v8309_v8  ;;  %v3489_v53 = vsub.f32 1.0, %v3457_v18  ;;  %v3435_v44 = vsub.f32 %v8316_v0, %v10535_v36  ;;  %v8320_v55 = vmax.f32 %v3487_v16, 0.0  ;;  %v3463_v34 = vand.u32 2147483647, %v3431_v42  ;;  %v8322_v45 = vld [vmem:[#allocation14 + $0x50] sm:$0xff] }
 0x33c   : > { %2696 = vmatprep.subr.bf16.mxu0 %v10549_v58  ;;  %10550 = vst [vmem:[#allocation128_spill] sm:$0xff] %v8314_v60  ;;  %v3432_v35 = vsub.f32 %v8322_v45, %v10539_v47  ;;  %v3433_v27 = vsub.f32 %v8326_v33, %v10540_v32  ;;  %v8330_v6 = vmax.f32 %v3490_v37, 0.0  ;;  %v3492_v10 = vsub.f32 1.0, %v3460_v62  ;;  %v8332_v19 = vld [vmem:[#allocation14 + $0x70] sm:$0xff]  ;;  %v8338_v8 = vld [vmem:[#allocation14 + $0x78] sm:$0xff] }
 0x33d   : > { %10551 = vst [vmem:[#allocation129_spill] sm:$0xff] %v8320_v55  ;;  %v3466_v26 = vand.u32 2147483647, %v3434_v38  ;;  %v3436_v16 = vsub.f32 %v8332_v19, %v10539_v47  ;;  %v8336_v42 = vmax.f32 %v3491_v31, 0.0  ;;  %v3493_v18 = vsub.f32 1.0, %v3461_v12  ;;  %v8346_v38 = vld [vmem:[#allocation14 + $0x80] sm:$0xff] }
 0x33e   : > { %10552 = vst [vmem:[#allocation130_spill] sm:$0xff] %v8330_v6  ;;  %v3494_v58 = vsub.f32 1.0, %v3462_v59  ;;  %v3437_v55 = vsub.f32 %v8338_v8, %v10540_v32  ;;  %v8342_v60 = vmax.f32 %v3488_v15, 0.0  ;;  %v8344_v37 = vmax.f32 %v3489_v53, 0.0 }
 0x33f   : > { %10553 = vst [vmem:[#allocation131_spill] sm:$0xff] %v8336_v42  ;;  %v3467_v62 = vand.u32 2147483647, %v3435_v44  ;;  %v3438_v6 = vsub.f32 %v8346_v38, %v10534_v22  ;;  %v3495_v12 = vsub.f32 1.0, %v3463_v34  ;;  %v3464_v59 = vand.u32 2147483647, %v3432_v35 }
 0x340   : > { %10554 = vst [vmem:[#allocation132_spill] sm:$0xff] %v8342_v60  ;;  %10555 = vst [vmem:[#allocation133_spill] sm:$0xff] %v8344_v37  ;;  %v3465_v31 = vand.u32 2147483647, %v3433_v27  ;;  %v8352_v42 = vld [vmem:[#allocation14 + $0x88] sm:$0xff]  ;;  %v10556_v53 = vpack.c.bf16 %v7959_v14, %v7954_v1  ;;  %v8361_v44 = vmax.f32 %v3492_v10, 0.0  ;;  %v3442_v34 = vsub.f32 %v8363_v56, %v10534_v22 }
 0x341   : > { %5822 = vmatmul.mubr.msk.bf16.vlgmr.msra.gmra.mrb[72].mxu1 %vm1807_vm3, %v8141_v13  ;;  %v3439_v15 = vsub.f32 %v8352_v42, %v10535_v36  ;;  %v3498_v37 = vsub.f32 1.0, %v3466_v26  ;;  %v3468_v60 = vand.u32 2147483647, %v3436_v16  ;;  %v10558_v35 = vpack.c.bf16 %v7978_v4, %v7976_v28  ;;  %v8375_v10 = vld [vmem:[#allocation14 + $0xa8] sm:$0xff]  ;;  %v8384_v4 = vld [vmem:[#allocation14 + $0x98] sm:$0xff] }
 0x342   : > { %2624 = vmatpush1.bf16.msra.mxu1 %v10556_v53  ;;  %5819 = vmatmul.mubr.msk.bf16.gmra.mrb[76].mxu0 %vm1807_vm3, %v8184_v9  ;;  %10557 = vst [vmem:[#allocation134_spill] sm:$0xff] %v8361_v44  ;;  %v8371_v1 = vmax.f32 %v3493_v18, 0.0  ;;  %v8373_v14 = vmax.f32 %v3494_v58, 0.0  ;;  %v3469_v27 = vand.u32 2147483647, %v3437_v55  ;;  %v3443_v26 = vsub.f32 %v8375_v10, %v10535_v36  ;;  %v8380_v44 = vld [vmem:[#allocation14 + $0x90] sm:$0xff] }
 0x343   : > { %2769 = vmatprep.subr.bf16.mxu1 %v10558_v35  ;;  %2519 = vmatprep.mubr.bf16.mxu1 %v10410_v63  ;;  %v3499_v16 = vsub.f32 1.0, %v3467_v62  ;;  %v3470_v53 = vand.u32 2147483647, %v3438_v6  ;;  %v3440_v28 = vsub.f32 %v8380_v44, %v10539_v47  ;;  %v3441_v18 = vsub.f32 %v8384_v4, %v10540_v32  ;;  %v8392_v6 = vld [vmem:[#allocation14 + $0xb0] sm:$0xff] }
 0x344   : > { %10559 = vst [vmem:[#allocation135_spill] sm:$0xff] %v8371_v1  ;;  %10560 = vst [vmem:[#allocation136_spill] sm:$0xff] %v8373_v14  ;;  %2456 = vmatprep.mubr.bf16.mxu0 %v10410_v63  ;;  %v8388_v55 = vmax.f32 %v3495_v12, 0.0  ;;  %v3496_v58 = vsub.f32 1.0, %v3464_v59  ;;  %v3497_v35 = vsub.f32 1.0, %v3465_v31  ;;  %v8390_v14 = vmax.f32 %v3498_v37, 0.0 }
 0x345   : > { %v3471_v1 = vand.u32 2147483647, %v3439_v15  ;;  %v3500_v57 = vsub.f32 1.0, %v3468_v60  ;;  %v3474_v62 = vand.u32 2147483647, %v3442_v34  ;;  %v3444_v21 = vsub.f32 %v8392_v6, %v10539_v47 }
 0x346   : > { %10561 = vst [vmem:[#allocation137_spill] sm:$0xff] %v8388_v55  ;;  %10562 = vst [vmem:[#allocation138_spill] sm:$0xff] %v8390_v14  ;;  %v3501_v7 = vsub.f32 1.0, %v3469_v27  ;;  %v3475_v46 = vand.u32 2147483647, %v3443_v26  ;;  %v3445_v12 = vsub.f32 %v8396_v40, %v10540_v32  ;;  %v8400_v55 = vld [vmem:[#allocation14 + $0xc0] sm:$0xff] }
 0x347   : > { %10564 = vst [vmem:[#allocation140_spill] sm:$0xff] %v8400_v55  ;;  %v3446_v37 = vsub.f32 %v8400_v55, %v10534_v22  ;;  %v8404_v59 = vmax.f32 %v3499_v16, 0.0  ;;  %v3502_v60 = vsub.f32 1.0, %v3470_v53  ;;  %v3472_v31 = vand.u32 2147483647, %v3440_v28  ;;  %v8412_v14 = vld [vmem:[#allocation14 + $0xc8] sm:$0xff] }
 0x348   : > { %v3473_v15 = vand.u32 2147483647, %v3441_v18  ;;  %v8408_v34 = vmax.f32 %v3496_v58, 0.0  ;;  %v8410_v27 = vmax.f32 %v3497_v35, 0.0  ;;  %v3503_v26 = vsub.f32 1.0, %v3471_v1  ;;  %10568 = vst [vmem:[#allocation144_spill] sm:$0xff] %v8412_v14 }
 0x349   : > { %10565 = vst [vmem:[#allocation141_spill] sm:$0xff] %v8404_v59  ;;  %5823 = vmatmul.mubr.msk.bf16.gmra.mrb[76].mxu1 %vm1807_vm3, %v8184_v9  ;;  %v3447_v40 = vsub.f32 %v8412_v14, %v10535_v36  ;;  %v8419_v16 = vmax.f32 %v3500_v57, 0.0  ;;  %v3506_v53 = vsub.f32 1.0, %v3474_v62  ;;  %v3476_v28 = vand.u32 2147483647, %v3444_v21  ;;  %v8421_v18 = vld [vmem:[#allocation14 + $0xe0] sm:$0xff] }
 0x34a   : > { %10566 = vst [vmem:[#allocation142_spill] sm:$0xff] %v8408_v34  ;;  %10567 = vst [vmem:[#allocation143_spill] sm:$0xff] %v8410_v27  ;;  %5820 = vmatmul.mubr.msk.bf16.gmra.mrb[80].mxu0 %vm1807_vm3, %v8231_v3  ;;  %2529 = vmatprep.mubr.bf16.mxu1 %v10410_v63  ;;  %v3450_v58 = vsub.f32 %v8421_v18, %v10534_v22  ;;  %v8426_v1 = vmax.f32 %v3501_v7, 0.0  ;;  %v3507_v35 = vsub.f32 1.0, %v3475_v46  ;;  %v3477_v27 = vand.u32 2147483647, %v3445_v12 }
 0x34b   : > { %10569 = vst [vmem:[#allocation145_spill] sm:$0xff] %v8419_v16  ;;  %2466 = vmatprep.mubr.bf16.mxu0 %v10410_v63  ;;  %v3478_v34 = vand.u32 2147483647, %v3446_v37  ;;  %v8428_v59 = vmax.f32 %v3502_v60, 0.0  ;;  %v3504_v14 = vsub.f32 1.0, %v3472_v31  ;;  %v3505_v55 = vsub.f32 1.0, %v3473_v15 }
 0x34c   : > { %10570 = vst [vmem:[#allocation146_spill] sm:$0xff] %v8426_v1  ;;  %v8430_v57 = vld [vmem:[#allocation14 + $0xe8] sm:$0xff]  ;;  %v8434_v62 = vmax.f32 %v3503_v26, 0.0  ;;  %v3479_v16 = vand.u32 2147483647, %v3447_v40  ;;  %v8436_v22 = vld [vmem:[#allocation14 + $0xd0] sm:$0xff] }
 0x34d   : > { %10571 = vst [vmem:[#allocation147_spill] sm:$0xff] %v8428_v59  ;;  %v3451_v21 = vsub.f32 %v8430_v57, %v10535_v36  ;;  %10573 = vst [vmem:[#allocation149_spill] sm:$0xff] %v8436_v22  ;;  %v3448_v7 = vsub.f32 %v8436_v22, %v10539_v47  ;;  %v8440_v46 = vld [vmem:[#allocation14 + $0xd8] sm:$0xff]  ;;  %v8444_v37 = vmax.f32 %v3506_v53, 0.0  ;;  %v3508_v60 = vsub.f32 1.0, %v3476_v28  ;;  %v8446_v15 = vld [vmem:[#allocation14 + $0xf0] sm:$0xff] }
 0x34e   : > { %10572 = vst [vmem:[#allocation148_spill] sm:$0xff] %v8434_v62  ;;  %v3449_v12 = vsub.f32 %v8440_v46, %v10540_v32  ;;  %v3482_v31 = vand.u32 2147483647, %v3450_v58  ;;  %v3452_v36 = vsub.f32 %v8446_v15, %v10539_v47  ;;  %v8450_v40 = vmax.f32 %v3507_v35, 0.0  ;;  %v8452_v62 = vld [vmem:[#allocation14 + $0xf8] sm:$0xff] }
 0x34f   : > { %v3509_v26 = vsub.f32 1.0, %v3477_v27  ;;  %v3510_v1 = vsub.f32 1.0, %v3478_v34  ;;  %v3453_v59 = vsub.f32 %v8452_v62, %v10540_v32  ;;  %v8456_v22 = vmax.f32 %v3504_v14, 0.0 }
 0x350   : > { %v8458_v53 = vmax.f32 %v3505_v55, 0.0  ;;  %v3483_v28 = vand.u32 2147483647, %v3451_v21  ;;  %v8461_v58 = vadd.f32 -1.0, %v8226_v61  ;;  %v3511_v47 = vsub.f32 1.0, %v3479_v16 }
 0x351   : > { %5824 = vmatmul.mubr.msk.bf16.gmra.mrb[80].mxu1 %vm1807_vm3, %v8231_v3  ;;  %v3480_v35 = vand.u32 2147483647, %v3448_v7  ;;  %v3481_v27 = vand.u32 2147483647, %v3449_v12  ;;  %v8466_v34 = vadd.f32 -1.0, %v8235_v50  ;;  %v8471_v32 = vmax.f32 %v3508_v60, 0.0 }
 0x352   : > { %10574 = vst [vmem:[#allocation150_spill] sm:$0xff] %v8458_v53  ;;  %10575 = vst [vmem:[#allocation151_spill] sm:$0xff] %v8461_v58  ;;  %5821 = vmatmul.mubr.msk.bf16.gmra.mrb[84].mxu0 %vm1807_vm3, %v8284_v25  ;;  %2539 = vmatprep.mubr.bf16.mxu1 %v10410_v63  ;;  %v3514_v14 = vsub.f32 1.0, %v3482_v31  ;;  %v3484_v55 = vand.u32 2147483647, %v3452_v36  ;;  %v8474_v61 = vadd.f32 -1.0, %v8244_v51 }
 0x353   : > { %10576 = vst [vmem:[#allocation152_spill] sm:$0xff] %v8466_v34  ;;  %10577 = vst [vmem:[#allocation153_spill] sm:$0xff] %v8471_v32  ;;  %2582 = vmatprep.mubr.bf16.mxu0 %v10410_v63  ;;  %v8477_v16 = vmax.f32 %v3509_v26, 0.0  ;;  %v8479_v21 = vmax.f32 %v3510_v1, 0.0  ;;  %v3485_v50 = vand.u32 2147483647, %v3453_v59 }
 0x354   : > { %10578 = vst [vmem:[#allocation154_spill] sm:$0xff] %v8474_v61  ;;  %v8482_v7 = vadd.f32 -1.0, %v8253_v48  ;;  %v3515_v12 = vsub.f32 1.0, %v3483_v28  ;;  %v10581_v53 = vld [vmem:[#allocation24_spill] sm:$0xff]  ;;  %v8487_v31 = vadd.f32 -1.0, %v8257_v54  ;;  %v8490_v51 = vadd.f32 -1.0, %v8261_v17 }
 0x355   : > { %10579 = vst [vmem:[#allocation155_spill] sm:$0xff] %v8477_v16  ;;  %v3662_v60 = vsub.f32 %v8461_v58, %v10581_v53  ;;  %v8492_v36 = vmax.f32 %v3511_v47, 0.0  ;;  %v3512_v26 = vsub.f32 1.0, %v3480_v35  ;;  %v3513_v16 = vsub.f32 1.0, %v3481_v27  ;;  %v10584_v1 = vld [vmem:[#allocation27_spill] sm:$0xff] }
 0x356   : > { %10580 = vst [vmem:[#allocation156_spill] sm:$0xff] %v8482_v7  ;;  %10582 = vst [vmem:[#allocation24_spill] sm:$0xff] %v8487_v31  ;;  %v3663_v59 = vsub.f32 %v8466_v34, %v10584_v1  ;;  %v8496_v32 = vmax.f32 %v3514_v14, 0.0  ;;  %v3516_v48 = vsub.f32 1.0, %v3484_v55  ;;  %v3666_v28 = vsub.f32 %v8474_v61, %v10581_v53  ;;  %v10590_v55 = vld [vmem:[#allocation30_spill] sm:$0xff]  ;;  %v10591_v61 = vld [vmem:[#allocation33_spill] sm:$0xff] }
 0x357   : > { %10583 = vst [vmem:[#allocation157_spill] sm:$0xff] %v8490_v51  ;;  %v8501_v58 = vadd.f32 -1.0, %v8269_v43  ;;  %v3517_v54 = vsub.f32 1.0, %v3485_v50  ;;  %v3667_v17 = vsub.f32 %v8482_v7, %v10584_v1  ;;  %v8506_v47 = vadd.f32 -1.0, %v8273_v5 }
 0x358   : > { %10585 = vst [vmem:[#allocation27_spill] sm:$0xff] %v8496_v32  ;;  %v8509_v35 = vadd.f32 -1.0, %v8277_v29  ;;  %v8511_v27 = vmax.f32 %v3515_v12, 0.0  ;;  %v3694_v14 = vand.u32 2147483647, %v3662_v60  ;;  %v3664_v34 = vsub.f32 %v8487_v31, %v10590_v55 }
 0x359   : > { %10586 = vst [vmem:[#allocation158_spill] sm:$0xff] %v8501_v58  ;;  %10587 = vst [vmem:[#allocation159_spill] sm:$0xff] %v8506_v47  ;;  %v3665_v43 = vsub.f32 %v8490_v51, %v10591_v61  ;;  %5825 = vmatmul.mubr.msk.bf16.gmra.mrb[84].mxu1 %vm1807_vm3, %v8284_v25  ;;  %v8519_v50 = vmax.f32 %v3512_v26, 0.0  ;;  %v8521_v7 = vmax.f32 %v3513_v16, 0.0  ;;  %v3695_v5 = vand.u32 2147483647, %v3663_v59 }
 0x35a   : > { %10588 = vst [vmem:[#allocation160_spill] sm:$0xff] %v8509_v35  ;;  %10589 = vst [vmem:[#allocation161_spill] sm:$0xff] %v8511_v27  ;;  %v8524_v29 = vadd.f32 -1.0, %v8292_v11  ;;  %5826 = vmatmul.mubr.msk.bf16.vlgmr.msra.gmra.mrb[88].mxu0 %vm1807_vm3, %v8141_v13  ;;  %2655 = vmatprep.mubr.bf16.mxu1 %v10410_v63  ;;  %v8529_v12 = vmax.f32 %v3516_v48, 0.0  ;;  %v3698_v60 = vand.u32 2147483647, %v3666_v28  ;;  %v3668_v51 = vsub.f32 %v8501_v58, %v10590_v55 }
 0x35b   : > { %10592 = vst [vmem:[#allocation30_spill] sm:$0xff] %v8519_v50  ;;  %10593 = vst [vmem:[#allocation33_spill] sm:$0xff] %v8521_v7  ;;  %v8534_v26 = vadd.f32 -1.0, %v8301_v39  ;;  %v10597_v16 = vpack.c.bf16 %v7984_v41, %v7982_v49  ;;  %2592 = vmatprep.mubr.bf16.mxu0 %v10410_v63  ;;  %v8540_v11 = vmax.f32 %v3517_v54, 0.0  ;;  %v3699_v59 = vand.u32 2147483647, %v3667_v17 }
 0x35c   : > { %10594 = vst [vmem:[#allocation162_spill] sm:$0xff] %v8524_v29  ;;  %10595 = vst [vmem:[#allocation163_spill] sm:$0xff] %v8529_v12  ;;  %v3669_v48 = vsub.f32 %v8506_v47, %v10591_v61  ;;  %v3670_v28 = vsub.f32 %v8509_v35, %v10581_v53  ;;  %v10599_v58 = vpack.c.bf16 %v7988_v52, %v7986_v30  ;;  %v3726_v39 = vsub.f32 1.0, %v3694_v14 }
 0x35d   : > { %10596 = vst [vmem:[#allocation164_spill] sm:$0xff] %v8534_v26  ;;  %2697 = vmatpush1.bf16.msra.mxu0 %v10597_v16  ;;  %10598 = vst [vmem:[#allocation165_spill] sm:$0xff] %v8540_v11  ;;  %v3696_v31 = vand.u32 2147483647, %v3664_v34  ;;  %v3697_v12 = vand.u32 2147483647, %v3665_v43  ;;  %v3671_v54 = vsub.f32 %v8524_v29, %v10584_v1  ;;  %v3674_v30 = vsub.f32 %v8534_v26, %v10581_v53 }
 0x35e   : > { %2842 = vmatprep.subr.bf16.mxu0 %v10599_v58  ;;  %v8550_v49 = vadd.f32 -1.0, %v8316_v0  ;;  %v3727_v41 = vsub.f32 1.0, %v3695_v5  ;;  %v8555_v17 = vadd.f32 -1.0, %v8322_v45  ;;  %v8558_v16 = vadd.f32 -1.0, %v8326_v33  ;;  %v10664_v29 = vld [vmem:[#allocation31_spill] sm:$0xff] }
 0x35f   : > { %v3730_v35 = vsub.f32 1.0, %v3698_v60  ;;  %v3700_v47 = vand.u32 2147483647, %v3668_v51  ;;  %v8563_v52 = vadd.f32 -1.0, %v8332_v19  ;;  %v3731_v0 = vsub.f32 1.0, %v3699_v59 }
 0x360   : > { %10600 = vst [vmem:[#allocation166_spill] sm:$0xff] %v8550_v49  ;;  %10601 = vst [vmem:[#allocation167_spill] sm:$0xff] %v8555_v17  ;;  %v3701_v58 = vand.u32 2147483647, %v3669_v48  ;;  %v3702_v34 = vand.u32 2147483647, %v3670_v28  ;;  %v3675_v33 = vsub.f32 %v8550_v49, %v10584_v1  ;;  %v3672_v60 = vsub.f32 %v8555_v17, %v10590_v55 }
 0x361   : > { %10602 = vst [vmem:[#allocation168_spill] sm:$0xff] %v8558_v16  ;;  %10603 = vst [vmem:[#allocation169_spill] sm:$0xff] %v8563_v52  ;;  %v8566_v14 = vadd.f32 -1.0, %v8338_v8  ;;  %v8568_v43 = vmax.f32 %v3726_v39, 0.0  ;;  %v3728_v45 = vsub.f32 1.0, %v3696_v31  ;;  %v3729_v5 = vsub.f32 1.0, %v3697_v12  ;;  %5830 = vmatmul.mubr.msk.bf16.vlgmr.msra.gmra.mrb[88].mxu1 %vm1807_vm3, %v8141_v13 }
 0x362   : > { %v8574_v51 = vmax.f32 %v3727_v41, 0.0  ;;  %v3703_v19 = vand.u32 2147483647, %v3671_v54  ;;  %v3673_v8 = vsub.f32 %v8558_v16, %v10591_v61  ;;  %v10607_v59 = vpack.c.bf16 %v8002_v24, %v8000_v2  ;;  %5827 = vmatmul.mubr.msk.bf16.gmra.mrb[92].mxu0 %vm1807_vm3, %v8184_v9  ;;  %2665 = vmatprep.mubr.bf16.mxu1 %v10410_v63 }
 0x363   : > { %10604 = vst [vmem:[#allocation170_spill] sm:$0xff] %v8566_v14  ;;  %10605 = vst [vmem:[#allocation171_spill] sm:$0xff] %v8568_v43  ;;  %v8585_v31 = vmax.f32 %v3730_v35, 0.0  ;;  %v3732_v12 = vsub.f32 1.0, %v3700_v47  ;;  %v3706_v48 = vand.u32 2147483647, %v3674_v30  ;;  %v3676_v28 = vsub.f32 %v8563_v52, %v10590_v55  ;;  %2602 = vmatprep.mubr.bf16.mxu0 %v10410_v63 }
 0x364   : > { %10606 = vst [vmem:[#allocation172_spill] sm:$0xff] %v8574_v51  ;;  %2770 = vmatpush1.bf16.msra.mxu1 %v10607_v59  ;;  %v10609_v39 = vpack.c.bf16 %v8015_v23, %v8013_v20  ;;  %v8593_v41 = vmax.f32 %v3731_v0, 0.0  ;;  %v3733_v2 = vsub.f32 1.0, %v3701_v58  ;;  %v3734_v24 = vsub.f32 1.0, %v3702_v34  ;;  %v10784_v43 = vld [vmem:[#allocation125_spill] sm:$0xff] }
 0x365   : > { %10608 = vst [vmem:[#allocation173_spill] sm:$0xff] %v8585_v31  ;;  %v3677_v54 = vsub.f32 %v8566_v14, %v10591_v61  ;;  %v8598_v47 = vmax.f32 %v3728_v45, 0.0  ;;  %v8600_v35 = vmax.f32 %v3729_v5, 0.0  ;;  %v3707_v30 = vand.u32 2147483647, %v3675_v33 }
 0x366   : > { %2915 = vmatprep.subr.bf16.mxu1 %v10609_v39  ;;  %10610 = vst [vmem:[#allocation174_spill] sm:$0xff] %v8593_v41  ;;  %v8603_v59 = vadd.f32 -1.0, %v8346_v38  ;;  %v3735_v20 = vsub.f32 1.0, %v3703_v19  ;;  %v3704_v23 = vand.u32 2147483647, %v3672_v60  ;;  %v8606_v0 = vadd.f32 -1.0, %v8352_v42 }
 0x367   : > { %10611 = vst [vmem:[#allocation175_spill] sm:$0xff] %v8598_v47  ;;  %10612 = vst [vmem:[#allocation176_spill] sm:$0xff] %v8600_v35  ;;  %v3705_v39 = vand.u32 2147483647, %v3673_v8  ;;  %v8608_v58 = vmax.f32 %v3732_v12, 0.0  ;;  %v3738_v34 = vsub.f32 1.0, %v3706_v48 }
 0x368   : > { %10613 = vst [vmem:[#allocation177_spill] sm:$0xff] %v8603_v59  ;;  %10614 = vst [vmem:[#allocation178_spill] sm:$0xff] %v8606_v0  ;;  %v3708_v14 = vand.u32 2147483647, %v3676_v28  ;;  %v8611_v52 = vadd.f32 -1.0, %v8363_v56  ;;  %v8613_v45 = vmax.f32 %v3733_v2, 0.0  ;;  %v3678_v42 = vsub.f32 %v8603_v59, %v10581_v53 }
 0x369   : > { %10615 = vst [vmem:[#allocation179_spill] sm:$0xff] %v8608_v58  ;;  %v8615_v5 = vmax.f32 %v3734_v24, 0.0  ;;  %v3709_v33 = vand.u32 2147483647, %v3677_v54  ;;  %v8618_v38 = vadd.f32 -1.0, %v8375_v10  ;;  %v3739_v19 = vsub.f32 1.0, %v3707_v30  ;;  %5831 = vmatmul.mubr.msk.bf16.gmra.mrb[92].mxu1 %vm1807_vm3, %v8184_v9 }
 0x36a   : > { %10616 = vst [vmem:[#allocation180_spill] sm:$0xff] %v8611_v52  ;;  %10617 = vst [vmem:[#allocation181_spill] sm:$0xff] %v8613_v45  ;;  %v8623_v60 = vadd.f32 -1.0, %v8380_v44  ;;  %v8626_v8 = vadd.f32 -1.0, %v8384_v4  ;;  %v8630_v56 = vmax.f32 %v3735_v20, 0.0  ;;  %v3736_v12 = vsub.f32 1.0, %v3704_v23  ;;  %5828 = vmatmul.mubr.msk.bf16.gmra.mrb[96].mxu0 %vm1807_vm3, %v8231_v3  ;;  %2675 = vmatprep.mubr.bf16.mxu1 %v10410_v63 }
 0x36b   : > { %10618 = vst [vmem:[#allocation182_spill] sm:$0xff] %v8615_v5  ;;  %10619 = vst [vmem:[#allocation183_spill] sm:$0xff] %v8618_v38  ;;  %v3737_v48 = vsub.f32 1.0, %v3705_v39  ;;  %v3679_v10 = vsub.f32 %v8606_v0, %v10584_v1  ;;  %v8637_v44 = vmax.f32 %v3738_v34, 0.0  ;;  %v3740_v28 = vsub.f32 1.0, %v3708_v14  ;;  %2612 = vmatprep.mubr.bf16.mxu0 %v10410_v63  ;;  %v10625_v30 = vld [vmem:[#allocation139_spill] sm:$0xff] }
 0x36c   : > { %10620 = vst [vmem:[#allocation184_spill] sm:$0xff] %v8623_v60  ;;  %10621 = vst [vmem:[#allocation185_spill] sm:$0xff] %v8626_v8  ;;  %v3682_v4 = vsub.f32 %v8611_v52, %v10581_v53  ;;  %v8642_v2 = vadd.f32 -1.0, %v8392_v6  ;;  %v3741_v24 = vsub.f32 1.0, %v3709_v33  ;;  %v3683_v54 = vsub.f32 %v8618_v38, %v10584_v1  ;;  %v10627_v23 = vld [vmem:[#allocation140_spill] sm:$0xff] }
 0x36d   : > { %10622 = vst [vmem:[#allocation186_spill] sm:$0xff] %v8630_v56  ;;  %10623 = vst [vmem:[#allocation187_spill] sm:$0xff] %v8637_v44  ;;  %v8648_v20 = vadd.f32 -1.0, %v10625_v30  ;;  %v8651_v39 = vadd.f32 -1.0, %v10627_v23  ;;  %v8653_v34 = vmax.f32 %v3739_v19, 0.0  ;;  %v3680_v52 = vsub.f32 %v8623_v60, %v10590_v55  ;;  %v10632_v59 = vld [vmem:[#allocation144_spill] sm:$0xff] }
 0x36e   : > { %10624 = vst [vmem:[#allocation188_spill] sm:$0xff] %v8642_v2  ;;  %v3710_v14 = vand.u32 2147483647, %v3678_v42  ;;  %v3681_v6 = vsub.f32 %v8626_v8, %v10591_v61  ;;  %v8659_v0 = vmax.f32 %v3736_v12, 0.0  ;;  %v8661_v33 = vmax.f32 %v3737_v48, 0.0 }
 0x36f   : > { %10626 = vst [vmem:[#allocation139_spill] sm:$0xff] %v8648_v20  ;;  %10628 = vst [vmem:[#allocation140_spill] sm:$0xff] %v8651_v39  ;;  %v3711_v38 = vand.u32 2147483647, %v3679_v10  ;;  %v8664_v30 = vadd.f32 -1.0, %v10632_v59  ;;  %v8666_v16 = vmax.f32 %v3740_v28, 0.0  ;;  %v3684_v19 = vsub.f32 %v8642_v2, %v10590_v55 }
 0x370   : > { %10629 = vst [vmem:[#allocation189_spill] sm:$0xff] %v8653_v34  ;;  %10630 = vst [vmem:[#allocation190_spill] sm:$0xff] %v8659_v0  ;;  %v3714_v23 = vand.u32 2147483647, %v3682_v4  ;;  %v8671_v42 = vadd.f32 -1.0, %v8421_v18  ;;  %v8673_v60 = vmax.f32 %v3741_v24, 0.0  ;;  %v3685_v12 = vsub.f32 %v8648_v20, %v10591_v61 }
 0x371   : > { %10631 = vst [vmem:[#allocation191_spill] sm:$0xff] %v8661_v33  ;;  %10633 = vst [vmem:[#allocation144_spill] sm:$0xff] %v8664_v30  ;;  %v3715_v8 = vand.u32 2147483647, %v3683_v54  ;;  %v3686_v48 = vsub.f32 %v8651_v39, %v10581_v53  ;;  %v3742_v59 = vsub.f32 1.0, %v3710_v14  ;;  %v8680_v4 = vadd.f32 -1.0, %v8430_v57  ;;  %5832 = vmatmul.mubr.msk.bf16.gmra.mrb[96].mxu1 %vm1807_vm3, %v8231_v3 }
 0x372   : > { %10634 = vst [vmem:[#allocation192_spill] sm:$0xff] %v8666_v16  ;;  %10635 = vst [vmem:[#allocation193_spill] sm:$0xff] %v8671_v42  ;;  %v3712_v10 = vand.u32 2147483647, %v3680_v52  ;;  %v3713_v28 = vand.u32 2147483647, %v3681_v6  ;;  %v3687_v24 = vsub.f32 %v8664_v30, %v10584_v1  ;;  %5829 = vmatmul.mubr.msk.bf16.gmra.mrb[100].mxu0 %vm1807_vm3, %v8284_v25  ;;  %2685 = vmatprep.mubr.bf16.mxu1 %v10410_v63 }
 0x373   : > { %10636 = vst [vmem:[#allocation194_spill] sm:$0xff] %v8673_v60  ;;  %10637 = vst [vmem:[#allocation195_spill] sm:$0xff] %v8680_v4  ;;  %v3743_v18 = vsub.f32 1.0, %v3711_v38  ;;  %v10638_v54 = vld [vmem:[#allocation149_spill] sm:$0xff]  ;;  %v8690_v20 = vadd.f32 -1.0, %v8440_v46  ;;  %v3746_v57 = vsub.f32 1.0, %v3714_v23  ;;  %v3690_v14 = vsub.f32 %v8671_v42, %v10581_v53  ;;  %2728 = vmatprep.mubr.bf16.mxu0 %v10410_v63 }
 0x374   : > { %v8687_v2 = vadd.f32 -1.0, %v10638_v54  ;;  %v3716_v52 = vand.u32 2147483647, %v3684_v19  ;;  %v8698_v38 = vadd.f32 -1.0, %v8446_v15  ;;  %v3747_v6 = vsub.f32 1.0, %v3715_v8  ;;  %v10672_v60 = vld [vmem:[#allocation45_spill] sm:$0xff] }
 0x375   : > { %10640 = vst [vmem:[#allocation196_spill] sm:$0xff] %v8690_v20  ;;  %v3717_v54 = vand.u32 2147483647, %v3685_v12  ;;  %v3718_v30 = vand.u32 2147483647, %v3686_v48  ;;  %v8702_v46 = vadd.f32 -1.0, %v8452_v62  ;;  %v3691_v23 = vsub.f32 %v8680_v4, %v10584_v1 }
 0x376   : > { %10639 = vst [vmem:[#allocation149_spill] sm:$0xff] %v8687_v2  ;;  %10641 = vst [vmem:[#allocation197_spill] sm:$0xff] %v8698_v38  ;;  %v8704_v39 = vmax.f32 %v3742_v59, 0.0  ;;  %v3744_v17 = vsub.f32 1.0, %v3712_v10  ;;  %v3745_v49 = vsub.f32 1.0, %v3713_v28  ;;  %v8708_v19 = vmax.f32 %v3743_v18, 0.0 }
 0x377   : > { %10642 = vst [vmem:[#allocation198_spill] sm:$0xff] %v8702_v46  ;;  %v3719_v53 = vand.u32 2147483647, %v3687_v24  ;;  %v3688_v15 = vsub.f32 %v8687_v2, %v10590_v55  ;;  %v3689_v8 = vsub.f32 %v8690_v20, %v10591_v61  ;;  %v8714_v12 = vmax.f32 %v3746_v57, 0.0  ;;  %v10649_v20 = vld [vmem:[#allocation25_spill] sm:$0xff] }
 0x378   : > { %10643 = vst [vmem:[#allocation199_spill] sm:$0xff] %v8704_v39  ;;  %10644 = vst [vmem:[#allocation200_spill] sm:$0xff] %v8708_v19  ;;  %v3748_v62 = vsub.f32 1.0, %v3716_v52  ;;  %v3722_v48 = vand.u32 2147483647, %v3690_v14  ;;  %v3692_v59 = vsub.f32 %v8698_v38, %v10590_v55  ;;  %v8718_v10 = vmax.f32 %v3747_v6, 0.0 }
 0x379   : > { %10645 = vst [vmem:[#allocation201_spill] sm:$0xff] %v8714_v12  ;;  %v3749_v28 = vsub.f32 1.0, %v3717_v54  ;;  %v3750_v1 = vsub.f32 1.0, %v3718_v30  ;;  %v3693_v18 = vsub.f32 %v8702_v46, %v10591_v61  ;;  %v8722_v24 = vmax.f32 %v3744_v17, 0.0  ;;  %v10650_v57 = vld [vmem:[#allocation37_spill] sm:$0xff]  ;;  %5833 = vmatmul.mubr.msk.bf16.gmra.mrb[100].mxu1 %vm1807_vm3, %v8284_v25  ;;  %v10651_v6 = vld [vmem:[#allocation28_spill] sm:$0xff] }
 0x37a   : > { %10646 = vst [vmem:[#allocation202_spill] sm:$0xff] %v8718_v10  ;;  %v8724_v2 = vmax.f32 %v3745_v49, 0.0  ;;  %v3723_v4 = vand.u32 2147483647, %v3691_v23  ;;  %v3870_v42 = vsub.f32 %v10650_v57, %v10649_v20  ;;  %v3751_v52 = vsub.f32 1.0, %v3719_v53  ;;  %v10652_v54 = vld [vmem:[#allocation38_spill] sm:$0xff]  ;;  %5834 = vmatmul.mubr.msk.bf16.vlgmr.msra.gmra.mrb[104].mxu0 %vm1807_vm3, %v8141_v13  ;;  %2801 = vmatprep.mubr.bf16.mxu1 %v10410_v63 }
 0x37b   : > { %10647 = vst [vmem:[#allocation203_spill] sm:$0xff] %v8722_v24  ;;  %v3720_v55 = vand.u32 2147483647, %v3688_v15  ;;  %v3721_v14 = vand.u32 2147483647, %v3689_v8  ;;  %v3871_v30 = vsub.f32 %v10652_v54, %v10651_v6  ;;  %v8735_v61 = vmax.f32 %v3748_v62, 0.0  ;;  %2738 = vmatprep.mubr.bf16.mxu0 %v10410_v63 }
 0x37c   : > { %10648 = vst [vmem:[#allocation204_spill] sm:$0xff] %v8724_v2  ;;  %v3754_v49 = vsub.f32 1.0, %v3722_v48  ;;  %v3724_v17 = vand.u32 2147483647, %v3692_v59  ;;  %v10654_v23 = vld [vmem:[#allocation39_spill] sm:$0xff]  ;;  %v10655_v46 = vld [vmem:[#allocation89_spill] sm:$0xff] }
 0x37d   : > { %10653 = vst [vmem:[#allocation25_spill] sm:$0xff] %v8735_v61  ;;  %v3874_v57 = vsub.f32 %v10654_v23, %v10649_v20  ;;  %v10656_v38 = vld [vmem:[#allocation88_spill] sm:$0xff]  ;;  %v8743_v15 = vmax.f32 %v3749_v28, 0.0  ;;  %v8745_v8 = vmax.f32 %v3750_v1, 0.0  ;;  %v3725_v54 = vand.u32 2147483647, %v3693_v18 }
 0x37e   : > { %v10657_v53 = vpack.c.bf16 %v10655_v46, %v10656_v38  ;;  %v10660_v2 = vld [vmem:[#allocation40_spill] sm:$0xff]  ;;  %v10661_v61 = vld [vmem:[#allocation101_spill] sm:$0xff]  ;;  %v3755_v26 = vsub.f32 1.0, %v3723_v4  ;;  %v3902_v23 = vand.u32 2147483647, %v3870_v42  ;;  %v10666_v46 = vld [vmem:[#allocation34_spill] sm:$0xff] }
 0x37f   : > { %10658 = vst [vmem:[#allocation28_spill] sm:$0xff] %v8743_v15  ;;  %10659 = vst [vmem:[#allocation89_spill] sm:$0xff] %v8745_v8  ;;  %v3875_v62 = vsub.f32 %v10660_v2, %v10651_v6  ;;  %v10662_v48 = vld [vmem:[#allocation100_spill] sm:$0xff]  ;;  %v10665_v24 = vld [vmem:[#allocation41_spill] sm:$0xff]  ;;  %v8756_v28 = vmax.f32 %v3751_v52, 0.0  ;;  %v3752_v1 = vsub.f32 1.0, %v3720_v55 }
 0x380   : > { %2843 = vmatpush1.bf16.msra.mxu0 %v10657_v53  ;;  %v10663_v59 = vpack.c.bf16 %v10661_v61, %v10662_v48  ;;  %v3872_v38 = vsub.f32 %v10665_v24, %v10664_v29  ;;  %v10667_v53 = vld [vmem:[#allocation43_spill] sm:$0xff]  ;;  %v3753_v15 = vsub.f32 1.0, %v3721_v14  ;;  %v3903_v18 = vand.u32 2147483647, %v3871_v30  ;;  %v10670_v61 = vld [vmem:[#allocation42_spill] sm:$0xff]  ;;  %v10747_v19 = vld [vmem:[#allocation113_spill] sm:$0xff] }
 0x381   : > { %v3873_v10 = vsub.f32 %v10667_v53, %v10666_v46  ;;  %10668 = vst [vmem:[#allocation88_spill] sm:$0xff] %v8756_v28  ;;  %v8758_v8 = vmax.f32 %v3754_v49, 0.0  ;;  %v3756_v2 = vsub.f32 1.0, %v3724_v17  ;;  %v3906_v12 = vand.u32 2147483647, %v3874_v57  ;;  %5838 = vmatmul.mubr.msk.bf16.vlgmr.msra.gmra.mrb[104].mxu1 %vm1807_vm3, %v8141_v13  ;;  %v10676_v17 = vld [vmem:[#allocation46_spill] sm:$0xff] }
 0x382   : > { %2988 = vmatprep.subr.bf16.mxu0 %v10663_v59  ;;  %v3876_v48 = vsub.f32 %v10670_v61, %v10664_v29  ;;  %v3757_v4 = vsub.f32 1.0, %v3725_v54  ;;  %v3907_v42 = vand.u32 2147483647, %v3875_v62  ;;  %v10671_v59 = vld [vmem:[#allocation44_spill] sm:$0xff]  ;;  %v3878_v53 = vsub.f32 %v10672_v60, %v10649_v20  ;;  %v10678_v61 = vld [vmem:[#allocation90_spill] sm:$0xff]  ;;  %5835 = vmatmul.mubr.msk.bf16.gmra.mrb[108].mxu0 %vm1807_vm3, %v8184_v9  ;;  %v10681_v13 = vld [vmem:[#allocation47_spill] sm:$0xff] }
 0x383   : > { %10669 = vst [vmem:[#allocation101_spill] sm:$0xff] %v8758_v8  ;;  %v3877_v24 = vsub.f32 %v10671_v59, %v10666_v46  ;;  %v8766_v52 = vmax.f32 %v3755_v26, 0.0  ;;  %v3934_v55 = vsub.f32 1.0, %v3902_v23  ;;  %v3904_v14 = vand.u32 2147483647, %v3872_v38  ;;  %v10677_v59 = vld [vmem:[#allocation92_spill] sm:$0xff]  ;;  %2811 = vmatprep.mubr.bf16.mxu1 %v10410_v63  ;;  %2748 = vmatprep.mubr.bf16.mxu0 %v10410_v63 }
 0x384   : > { %v3905_v30 = vand.u32 2147483647, %v3873_v10  ;;  %v8770_v57 = vmax.f32 %v3752_v1, 0.0  ;;  %v8772_v49 = vmax.f32 %v3753_v15, 0.0  ;;  %v3935_v54 = vsub.f32 1.0, %v3903_v18  ;;  %v10687_v60 = vld [vmem:[#allocation48_spill] sm:$0xff] }
 0x385   : > { %10673 = vst [vmem:[#allocation100_spill] sm:$0xff] %v8766_v52  ;;  %v3879_v62 = vsub.f32 %v10676_v17, %v10651_v6  ;;  %v10679_v8 = vpack.c.bf16 %v10677_v59, %v10678_v61  ;;  %v8781_v26 = vmax.f32 %v3756_v2, 0.0  ;;  %v3938_v10 = vsub.f32 1.0, %v3906_v12  ;;  %v10684_v59 = vld [vmem:[#allocation105_spill] sm:$0xff] }
 0x386   : > { %10674 = vst [vmem:[#allocation31_spill] sm:$0xff] %v8770_v57  ;;  %10675 = vst [vmem:[#allocation34_spill] sm:$0xff] %v8772_v49  ;;  %v3908_v23 = vand.u32 2147483647, %v3876_v48  ;;  %v3882_v38 = vsub.f32 %v10681_v13, %v10649_v20  ;;  %v8787_v15 = vmax.f32 %v3757_v4, 0.0  ;;  %v3939_v1 = vsub.f32 1.0, %v3907_v42 }
 0x387   : > { %2916 = vmatpush1.bf16.msra.mxu1 %v10679_v8  ;;  %10680 = vst [vmem:[#allocation92_spill] sm:$0xff] %v8781_v26  ;;  %v3909_v18 = vand.u32 2147483647, %v3877_v24  ;;  %v3910_v61 = vand.u32 2147483647, %v3878_v53  ;;  %v10683_v8 = vld [vmem:[#allocation106_spill] sm:$0xff]  ;;  %v3883_v13 = vsub.f32 %v10687_v60, %v10651_v6 }
 0x388   : > { %10682 = vst [vmem:[#allocation90_spill] sm:$0xff] %v8787_v15  ;;  %v10685_v17 = vpack.c.bf16 %v10683_v8, %v10684_v59  ;;  %v8792_v2 = vmax.f32 %v3934_v55, 0.0  ;;  %v3936_v12 = vsub.f32 1.0, %v3904_v14  ;;  %v3937_v48 = vsub.f32 1.0, %v3905_v30  ;;  %v10689_v4 = vld [vmem:[#allocation49_spill] sm:$0xff]  ;;  %v10690_v24 = vld [vmem:[#allocation50_spill] sm:$0xff] }
 0x389   : > { %v8796_v26 = vmax.f32 %v3935_v54, 0.0  ;;  %v3911_v49 = vand.u32 2147483647, %v3879_v62  ;;  %v3880_v15 = vsub.f32 %v10689_v4, %v10664_v29  ;;  %v3881_v53 = vsub.f32 %v10690_v24, %v10666_v46  ;;  %v10692_v55 = vld [vmem:[#allocation51_spill] sm:$0xff]  ;;  %v10694_v54 = vld [vmem:[#allocation52_spill] sm:$0xff]  ;;  %5839 = vmatmul.mubr.msk.bf16.gmra.mrb[108].mxu1 %vm1807_vm3, %v8184_v9  ;;  %v9000_v33 = vld [vmem:[%s7154_s12 + $0x8] sm:$0xff]  }
 0x38a   : > { %3061 = vmatprep.subr.bf16.mxu1 %v10685_v17  ;;  %10686 = vst [vmem:[#allocation106_spill] sm:$0xff] %v8792_v2  ;;  %v8802_v42 = vmax.f32 %v3938_v10, 0.0  ;;  %v3940_v8 = vsub.f32 1.0, %v3908_v23  ;;  %v3914_v17 = vand.u32 2147483647, %v3882_v38  ;;  %v3884_v14 = vsub.f32 %v10692_v55, %v10664_v29  ;;  %v10697_v10 = vld [vmem:[#allocation53_spill] sm:$0xff]  ;;  %5836 = vmatmul.mubr.msk.bf16.gmra.mrb[112].mxu0 %vm1807_vm3, %v8231_v3 }
 0x38b   : > { %10688 = vst [vmem:[#allocation105_spill] sm:$0xff] %v8796_v26  ;;  %v8806_v30 = vmax.f32 %v3939_v1, 0.0  ;;  %v3941_v59 = vsub.f32 1.0, %v3909_v18  ;;  %v3942_v60 = vsub.f32 1.0, %v3910_v61  ;;  %v3885_v62 = vsub.f32 %v10694_v54, %v10666_v46  ;;  %v10698_v18 = vld [vmem:[#allocation54_spill] sm:$0xff]  ;;  %2821 = vmatprep.mubr.bf16.mxu1 %v10410_v63  ;;  %2758 = vmatprep.mubr.bf16.mxu0 %v10410_v63 }
 0x38c   : > { %10691 = vst [vmem:[#allocation205_spill] sm:$0xff] %v8802_v42  ;;  %v8810_v26 = vmax.f32 %v3936_v12, 0.0  ;;  %v8812_v4 = vmax.f32 %v3937_v48, 0.0  ;;  %v3915_v2 = vand.u32 2147483647, %v3883_v13  ;;  %v3886_v24 = vsub.f32 %v10697_v10, %v10649_v20  ;;  %v10700_v10 = vld [vmem:[#allocation55_spill] sm:$0xff] }
 0x38d   : > { %10693 = vst [vmem:[#allocation206_spill] sm:$0xff] %v8806_v30  ;;  %v3943_v23 = vsub.f32 1.0, %v3911_v49  ;;  %v3912_v38 = vand.u32 2147483647, %v3880_v15  ;;  %v3913_v1 = vand.u32 2147483647, %v3881_v53  ;;  %v3887_v61 = vsub.f32 %v10698_v18, %v10651_v6 }
 0x38e   : > { %10695 = vst [vmem:[#allocation207_spill] sm:$0xff] %v8810_v26  ;;  %10696 = vst [vmem:[#allocation208_spill] sm:$0xff] %v8812_v4  ;;  %v8823_v12 = vmax.f32 %v3940_v8, 0.0  ;;  %v3946_v13 = vsub.f32 1.0, %v3914_v17  ;;  %v3916_v48 = vand.u32 2147483647, %v3884_v14  ;;  %v3890_v54 = vsub.f32 %v10700_v10, %v10649_v20 }
 0x38f   : > { %v8828_v9 = vmax.f32 %v3941_v59, 0.0  ;;  %v8830_v49 = vmax.f32 %v3942_v60, 0.0  ;;  %v3917_v15 = vand.u32 2147483647, %v3885_v62  ;;  %v10703_v53 = vld [vmem:[#allocation56_spill] sm:$0xff]  ;;  %v3947_v55 = vsub.f32 1.0, %v3915_v2 }
 0x390   : > { %10699 = vst [vmem:[#allocation209_spill] sm:$0xff] %v8823_v12  ;;  %v3891_v18 = vsub.f32 %v10703_v53, %v10651_v6  ;;  %v3918_v4 = vand.u32 2147483647, %v3886_v24  ;;  %v10704_v8 = vld [vmem:[#allocation57_spill] sm:$0xff]  ;;  %v10705_v17 = vld [vmem:[#allocation58_spill] sm:$0xff]  ;;  %v1854_v26 = vpop.f32.mrb[8].mxu0 }
 0x391   : > { %10701 = vst [vmem:[#allocation210_spill] sm:$0xff] %v8828_v9  ;;  %10702 = vst [vmem:[#allocation211_spill] sm:$0xff] %v8830_v49  ;;  %v3888_v12 = vsub.f32 %v10704_v8, %v10664_v29  ;;  %v3889_v14 = vsub.f32 %v10705_v17, %v10666_v46  ;;  %v8838_v10 = vmax.f32 %v3943_v23, 0.0  ;;  %v3944_v30 = vsub.f32 1.0, %v3912_v38  ;;  %v10707_v60 = vld [vmem:[#allocation93_spill] sm:$0xff]  ;;  %v1856_v62 = vpop.f32.mrb[9].mxu0  ;;  %5840 = vmatmul.mubr.msk.bf16.gmra.mrb[112].mxu1 %vm1807_vm3, %v8231_v3 }
 0x392   : > { %v3945_v59 = vsub.f32 1.0, %v3913_v1  ;;  %v3919_v9 = vand.u32 2147483647, %v3887_v61  ;;  %v8841_v49 = vmul.f32 %v10707_v60, %v1854_v26  ;;  %v8843_v42 = vmax.f32 %v3946_v13, 0.0  ;;  %v10709_v53 = vld [vmem:[#allocation98_spill] sm:$0xff]  ;;  %v1858_v8 = vpop.f32.mrb[10].mxu0  ;;  %5837 = vmatmul.mubr.msk.bf16.gmra.mrb[116].mxu0 %vm1807_vm3, %v8284_v25  ;;  %2831 = vmatprep.mubr.bf16.mxu1 %v10410_v63 }
 0x393   : > { %10706 = vst [vmem:[#allocation212_spill] sm:$0xff] %v8838_v10  ;;  %v3948_v2 = vsub.f32 1.0, %v3916_v48  ;;  %v3922_v24 = vand.u32 2147483647, %v3890_v54  ;;  %v8846_v57 = vmul.f32 %v10709_v53, %v1856_v62  ;;  %v3949_v52 = vsub.f32 1.0, %v3917_v15  ;;  %v10710_v23 = vld [vmem:[#allocation59_spill] sm:$0xff]  ;;  %2874 = vmatprep.mubr.bf16.mxu0 %v10410_v63 }
 0x394   : > { %10708 = vst [vmem:[#allocation93_spill] sm:$0xff] %v8843_v42  ;;  %v3923_v17 = vand.u32 2147483647, %v3891_v18  ;;  %v3892_v10 = vsub.f32 %v10710_v23, %v10664_v29  ;;  %v10711_v38 = vld [vmem:[#allocation99_spill] sm:$0xff]  ;;  %v1860_v61 = vpop.f32.mrb[11].mxu0  ;;  %v3950_v26 = vsub.f32 1.0, %v3918_v4 }
 0x395   : > { %v8851_v1 = vmul.f32 %v10711_v38, %v1858_v8  ;;  %v3920_v60 = vand.u32 2147483647, %v3888_v12  ;;  %v8853_v28 = vand.u32 2147483647, %v3889_v14  ;;  %v10712_v54 = vld [vmem:[#allocation104_spill] sm:$0xff]  ;;  %v8860_v48 = vmax.f32 %v3947_v55, 0.0 }
 0x396   : > { %v8858_v13 = vmul.f32 %v10712_v54, %v1860_v61  ;;  %v3951_v18 = vsub.f32 1.0, %v3919_v9  ;;  %v10714_v15 = vld [vmem:[#allocation61_spill] sm:$0xff]  ;;  %v8869_v4 = vmax.f32 %v3944_v30, 0.0  ;;  %v8871_v3 = vmax.f32 %v3945_v59, 0.0  ;;  %v1927_v38 = vpop.f32.mrb[8].mxu1  ;;  %v10720_v59 = vld [vmem:[#allocation107_spill] sm:$0xff] }
 0x397   : > { %10713 = vst [vmem:[#allocation98_spill] sm:$0xff] %v8860_v48  ;;  %v3893_v53 = vsub.f32 %v10714_v15, %v10666_v46  ;;  %v3954_v12 = vsub.f32 1.0, %v3922_v24  ;;  %v8876_v9 = vmax.f32 %v3948_v2, 0.0  ;;  %v8878_v14 = vmax.f32 %v3949_v52, 0.0  ;;  %v1929_v24 = vpop.f32.mrb[9].mxu1  ;;  %v1864_v23 = vpop.f32.mrb[12].mxu0 }
 0x398   : > { %10715 = vst [vmem:[#allocation99_spill] sm:$0xff] %v8869_v4  ;;  %10716 = vst [vmem:[#allocation104_spill] sm:$0xff] %v8871_v3  ;;  %v3375_v55 = vpack.c.bf16 %v8858_v13, %v8846_v57  ;;  %v3924_v62 = vand.u32 2147483647, %v3892_v10  ;;  %v8880_v61 = vmax.f32 %v3950_v26, 0.0  ;;  %v3955_v54 = vsub.f32 1.0, %v3923_v17 }
 0x399   : > { %10717 = vst [vmem:[#allocation213_spill] sm:$0xff] %v8876_v9  ;;  %10718 = vst [vmem:[#allocation214_spill] sm:$0xff] %v8878_v14  ;;  %v3952_v8 = vsub.f32 1.0, %v3920_v60  ;;  %v3953_v30 = vsub.f32 1.0, %v8853_v28  ;;  %v8884_v15 = vmul.f32 %v10720_v59, %v1927_v38  ;;  %v8886_v57 = vmax.f32 %v3951_v18, 0.0  ;;  %v10722_v2 = vld [vmem:[#allocation62_spill] sm:$0xff]  ;;  %5841 = vmatmul.mubr.msk.bf16.gmra.mrb[116].mxu1 %vm1807_vm3, %v8284_v25 }
 0x39a   : > { %10719 = vst [vmem:[#allocation215_spill] sm:$0xff] %v8880_v61  ;;  %v3925_v13 = vand.u32 2147483647, %v3893_v53  ;;  %v3894_v52 = vsub.f32 %v10722_v2, %v10649_v20  ;;  %v10723_v14 = vld [vmem:[#allocation108_spill] sm:$0xff]  ;;  %v1931_v26 = vpop.f32.mrb[10].mxu1  ;;  %v1866_v60 = vpop.f32.mrb[13].mxu0  ;;  %2947 = vmatprep.mubr.bf16.mxu1 %v10410_v63 }
 0x39b   : > { %10721 = vst [vmem:[#allocation107_spill] sm:$0xff] %v8886_v57  ;;  %v8891_v10 = vmul.f32 %v10723_v14, %v1929_v24  ;;  %v10724_v9 = vld [vmem:[#allocation84_spill] sm:$0xff]  ;;  %v8896_v28 = vmax.f32 %v3954_v12, 0.0  ;;  %v10727_v61 = vld [vmem:[#allocation109_spill] sm:$0xff]  ;;  %v1933_v53 = vpop.f32.mrb[11].mxu1  ;;  %v10728_v57 = vld [vmem:[#allocation86_spill] sm:$0xff] }
 0x39c   : > { %v8894_v17 = vmul.f32 %v10724_v9, %v1864_v23  ;;  %v10726_v38 = vld [vmem:[#allocation64_spill] sm:$0xff]  ;;  %v8901_v18 = vmul.f32 %v10727_v61, %v1931_v26  ;;  %v8904_v3 = vmul.f32 %v10728_v57, %v1866_v60  ;;  %v1868_v14 = vpop.f32.mrb[14].mxu0  ;;  %v3956_v24 = vsub.f32 1.0, %v3924_v62  ;;  %v10729_v2 = vld [vmem:[#allocation75_spill] sm:$0xff]  ;;  %v10730_v9 = vld [vmem:[#allocation85_spill] sm:$0xff] }
 0x39d   : > { %10725 = vst [vmem:[#allocation108_spill] sm:$0xff] %v8896_v28  ;;  %v3895_v59 = vsub.f32 %v10726_v38, %v10651_v6  ;;  %v3898_v23 = vsub.f32 %v10729_v2, %v10649_v20  ;;  %v8909_v4 = vmul.f32 %v10730_v9, %v1933_v53  ;;  %v10731_v12 = vld [vmem:[#allocation110_spill] sm:$0xff]  ;;  %v1870_v38 = vpop.f32.mrb[15].mxu0  ;;  %v10732_v61 = vld [vmem:[#allocation76_spill] sm:$0xff]  ;;  %v10733_v48 = vld [vmem:[#allocation77_spill] sm:$0xff]  ;;  %v3957_v53 = vsub.f32 1.0, %v3925_v13 }
 0x39e   : > { %v8912_v28 = vmul.f32 %v10731_v12, %v1868_v14  ;;  %v3899_v26 = vsub.f32 %v10732_v61, %v10651_v6  ;;  %v3896_v57 = vsub.f32 %v10733_v48, %v10664_v29  ;;  %v10734_v20 = vld [vmem:[#allocation111_spill] sm:$0xff]  ;;  %v3926_v9 = vand.u32 2147483647, %v3894_v52  ;;  %v8930_v12 = vld [vmem:[%s7154_s12] sm:$0xff]   ;;  %v10736_v52 = vld [vmem:[#allocation97_spill] sm:$0xff] }
 0x39f   : > { %v8923_v62 = vmul.f32 %v10734_v20, %v1870_v38  ;;  %v3377_v14 = vpack.c.bf16 %v8909_v4, %v8891_v10  ;;  %5842 = vmatmul.mubr.msk.bf16.vlgmr.msra.gmra.mrb[120].mxu0 %vm1807_vm3, %v8930_v12  ;;  %v8935_v60 = vmax.f32 %v3955_v54, 0.0  ;;  %v3927_v25 = vand.u32 2147483647, %v3895_v59  ;;  %v10737_v38 = vld [vmem:[#allocation96_spill] sm:$0xff]  ;;  %v10740_v6 = vld [vmem:[#allocation78_spill] sm:$0xff]  ;;  %v10742_v2 = vld [vmem:[#allocation35_spill] sm:$0xff] }
 0x3a0   : > { %v10738_v20 = vpack.c.bf16 %v10736_v52, %v10737_v38  ;;  %2884 = vmatprep.mubr.bf16.mxu0 %v10410_v63  ;;  %v8943_v4 = vmax.f32 %v3952_v8, 0.0  ;;  %v3930_v10 = vand.u32 2147483647, %v3898_v23  ;;  %v3897_v48 = vsub.f32 %v10740_v6, %v10666_v46  ;;  %v10741_v61 = vld [vmem:[#allocation36_spill] sm:$0xff]  ;;  %v1937_v59 = vpop.f32.mrb[12].mxu1  ;;  %v1874_v8 = vpop.f32.mrb[16].mxu0 }
 0x3a1   : > { %10735 = vst [vmem:[#allocation84_spill] sm:$0xff] %v8935_v60  ;;  %v8949_v54 = vrot.slane %v10742_v2, %v10741_v61  ;;  %v8951_v60 = vmax.f32 %v3953_v30, 0.0  ;;  %v3931_v13 = vand.u32 2147483647, %v3899_v26  ;;  %v3928_v42 = vand.u32 2147483647, %v3896_v57  ;;  %5846 = vmatmul.mubr.msk.bf16.vlgmr.msra.gmra.mrb[120].mxu1 %vm1807_vm3, %v8930_v12 }
 0x3a2   : > { %2989 = vmatpush1.bf16.msra.mxu0 %v10738_v20  ;;  %10739 = vst [vmem:[#allocation109_spill] sm:$0xff] %v8943_v4  ;;  %v10744_v52 = vld [vmem:[#allocation112_spill] sm:$0xff]  ;;  %v1939_v20 = vpop.f32.mrb[13].mxu1  ;;  %v8956_v4 = vmax.f32 %v3956_v24, 0.0  ;;  %v8958_v23 = vmax.f32 %v3957_v53, 0.0  ;;  %v3958_v6 = vsub.f32 1.0, %v3926_v9  ;;  %2957 = vmatprep.mubr.bf16.mxu1 %v10410_v63 }
 0x3a3   : > { %5280 = vmatprep.subr.bf16.mxu0 %v3375_v55  ;;  %10743 = vst [vmem:[#allocation86_spill] sm:$0xff] %v8951_v60  ;;  %v8954_v38 = vmul.f32 %v10744_v52, %v1937_v59  ;;  %v8961_v16 = vmul.f32 %v10747_v19, %v1939_v20  ;;  %v1941_v2 = vpop.f32.mrb[14].mxu1  ;;  %v10748_v61 = vld [vmem:[#allocation116_spill] sm:$0xff]  ;;  %v1876_v30 = vpop.f32.mrb[17].mxu0  ;;  %v3959_v26 = vsub.f32 1.0, %v3927_v25  ;;  %v10749_v57 = vld [vmem:[#allocation79_spill] sm:$0xff] }
 0x3a4   : > { %10745 = vst [vmem:[#allocation85_spill] sm:$0xff] %v8956_v4  ;;  %10746 = vst [vmem:[#allocation110_spill] sm:$0xff] %v8958_v23  ;;  %v8964_v55 = vmul.f32 %v10748_v61, %v1874_v8  ;;  %v3900_v59 = vsub.f32 %v10749_v57, %v10664_v29  ;;  %v10750_v52 = vld [vmem:[#allocation114_spill] sm:$0xff]  ;;  %v1943_v24 = vpop.f32.mrb[15].mxu1  ;;  %v10751_v4 = vld [vmem:[#allocation117_spill] sm:$0xff]  ;;  %v1878_v9 = vpop.f32.mrb[18].mxu0 }
 0x3a5   : > { %v8969_v60 = vmul.f32 %v10750_v52, %v1941_v2  ;;  %v8972_v53 = vmul.f32 %v10751_v4, %v1876_v30  ;;  %v3962_v23 = vsub.f32 1.0, %v3930_v10  ;;  %v8974_v19 = vand.u32 2147483647, %v3897_v48  ;;  %v10752_v20 = vld [vmem:[#allocation115_spill] sm:$0xff]  ;;  %v10753_v8 = vld [vmem:[#allocation118_spill] sm:$0xff]  ;;  %v1880_v39 = vpop.f32.mrb[19].mxu0 }
 0x3a6   : > { %v8977_v61 = vmul.f32 %v10752_v20, %v1943_v24  ;;  %v8980_v25 = vmul.f32 %v10753_v8, %v1878_v9  ;;  %v3963_v29 = vsub.f32 1.0, %v3931_v13  ;;  %v3960_v57 = vsub.f32 1.0, %v3928_v42  ;;  %v10754_v4 = vld [vmem:[#allocation119_spill] sm:$0xff]  ;;  %v10755_v48 = vld [vmem:[#allocation80_spill] sm:$0xff]  ;;  %v10756_v24 = vld [vmem:[#allocation81_spill] sm:$0xff]  ;;  %v1947_v9 = vpop.f32.mrb[16].mxu1 }
 0x3a7   : > { %v8987_v10 = vmul.f32 %v10754_v4, %v1880_v39  ;;  %v3901_v30 = vsub.f32 %v10755_v48, %v10666_v46  ;;  %v6496_v52 = vld [vmem:[#allocation14] sm:$0xff]  ;;  %v10758_v42 = vld [vmem:[#allocation102_spill] sm:$0xff]  ;;  %5843 = vmatmul.mubr.msk.bf16.gmra.mrb[124].mxu0 %vm1807_vm3, %v9000_v33  ;;  %v9004_v39 = vmax.f32 %v3958_v6, 0.0  ;;  %v3932_v46 = vand.u32 2147483647, %v3900_v59 }
 0x3a8   : > { %v4078_v20 = vsub.f32 %v6496_v52, %v10756_v24  ;;  %v10757_v13 = vld [vmem:[#allocation103_spill] sm:$0xff]  ;;  %v9009_v52 = vmax.f32 %v3959_v26, 0.0  ;;  %2894 = vmatprep.mubr.bf16.mxu0 %v10410_v63  ;;  %v9015_v48 = vmax.f32 %v3963_v29, 0.0  ;;  %v9017_v6 = vmax.f32 %v3960_v57, 0.0  ;;  %v10769_v29 = vld [vmem:[#allocation122_spill] sm:$0xff] }
 0x3a9   : > { %v10759_v8 = vpack.c.bf16 %v10757_v13, %v10758_v42  ;;  %10760 = vst [vmem:[#allocation111_spill] sm:$0xff] %v9004_v39  ;;  %v9011_v13 = vmax.f32 %v3962_v23, 0.0  ;;  %v6498_v42 = vld [vmem:[#allocation14 + $0x8] sm:$0xff]  ;;  %v6499_v59 = vld [vmem:[#allocation14 + $0x20] sm:$0xff]  ;;  %v1949_v23 = vpop.f32.mrb[17].mxu1  ;;  %5847 = vmatmul.mubr.msk.bf16.gmra.mrb[124].mxu1 %vm1807_vm3, %v9000_v33 }
 0x3aa   : > { %10761 = vst [vmem:[#allocation97_spill] sm:$0xff] %v9009_v52  ;;  %10764 = vst [vmem:[#allocation35_spill] sm:$0xff] %v9015_v48  ;;  %v4082_v4 = vsub.f32 %v6499_v59, %v10756_v24  ;;  %v10766_v39 = vld [vmem:[#allocation120_spill] sm:$0xff]  ;;  %v3933_v52 = vand.u32 2147483647, %v3901_v30  ;;  %v1951_v44 = vpop.f32.mrb[18].mxu1  ;;  %2967 = vmatprep.mubr.bf16.mxu1 %v10410_v63 }
 0x3ab   : > { %3062 = vmatpush1.bf16.msra.mxu1 %v10759_v8  ;;  %10762 = vst [vmem:[#allocation96_spill] sm:$0xff] %v9011_v13  ;;  %v10763_v8 = vld [vmem:[#allocation83_spill] sm:$0xff]  ;;  %10765 = vst [vmem:[#allocation112_spill] sm:$0xff] %v9017_v6  ;;  %v9022_v26 = vmul.f32 %v10766_v39, %v1947_v9  ;;  %v1884_v13 = vpop.f32.mrb[20].mxu0  ;;  %v4110_v0 = vand.u32 2147483647, %v4078_v20 }
 0x3ac   : > { %5409 = vmatprep.subr.bf16.mxu1 %v3377_v14  ;;  %v4079_v2 = vsub.f32 %v6498_v42, %v10763_v8  ;;  %v3961_v14 = vsub.f32 1.0, %v8974_v19  ;;  %v10768_v42 = vld [vmem:[#allocation121_spill] sm:$0xff]  ;;  %v9028_v48 = vmul.f32 %v10769_v29, %v1884_v13  ;;  %v1886_v57 = vpop.f32.mrb[21].mxu0  ;;  %v3964_v6 = vsub.f32 1.0, %v3932_v46  ;;  %v6500_v19 = vld [vmem:[#allocation14 + $0x28] sm:$0xff]  ;;  %v10770_v59 = vld [vmem:[#allocation23_spill] sm:$0xff] }
 0x3ad   : > { %10767 = vst [vmem:[#allocation113_spill] sm:$0xff] %v9022_v26  ;;  %v9025_v34 = vmul.f32 %v10768_v42, %v1949_v23  ;;  %v4083_v45 = vsub.f32 %v6500_v19, %v10763_v8  ;;  %v9032_v56 = vmul.f32 %v10770_v59, %v1951_v44  ;;  %v1953_v9 = vpop.f32.mrb[19].mxu1  ;;  %v10772_v39 = vld [vmem:[#allocation29_spill] sm:$0xff]  ;;  %v1888_v30 = vpop.f32.mrb[22].mxu0  ;;  %v10773_v42 = vld [vmem:[#allocation82_spill] sm:$0xff]  ;;  %v10775_v46 = vld [vmem:[#allocation32_spill] sm:$0xff] }
 0x3ae   : > { %v9035_v58 = vmul.f32 %v10772_v39, %v1886_v57  ;;  %v9037_v20 = vand.u32 2147483647, %v4079_v2  ;;  %v6501_v23 = vld [vmem:[#allocation14 + $0x10] sm:$0xff]  ;;  %v10774_v29 = vld [vmem:[#allocation26_spill] sm:$0xff]  ;;  %v9044_v35 = vmul.f32 %v10775_v46, %v1888_v30  ;;  %v1890_v19 = vpop.f32.mrb[23].mxu0  ;;  %v10776_v39 = vld [vmem:[#allocation123_spill] sm:$0xff] }
 0x3af   : > { %10771 = vst [vmem:[#allocation116_spill] sm:$0xff] %v9032_v56  ;;  %v4080_v13 = vsub.f32 %v6501_v23, %v10773_v42  ;;  %v9041_v5 = vmul.f32 %v10774_v29, %v1953_v9  ;;  %v9046_v44 = vand.u32 2147483647, %v4082_v4  ;;  %v6502_v59 = vld [vmem:[#allocation14 + $0x18] sm:$0xff]  ;;  %v9054_v23 = vmul.f32 %v10776_v39, %v1890_v19  ;;  %v6504_v39 = vld [vmem:[#allocation14 + $0x30] sm:$0xff]  ;;  %v1957_v30 = vpop.f32.mrb[20].mxu1 }
 0x3b0   : > { %v4081_v57 = vsub.f32 %v6502_v59, %v8949_v54  ;;  %v3965_v9 = vsub.f32 1.0, %v3933_v52  ;;  %v4142_v29 = vsub.f32 1.0, %v4110_v0  ;;  %v9061_v46 = vld [vmem:[%s7154_s12 + $0x10] sm:$0xff]   ;;  %v9066_v59 = vmax.f32 %v3961_v14, 0.0  ;;  %v1959_v52 = vpop.f32.mrb[21].mxu1  ;;  %v2000_v51 = vpop.f32.mrb[24].mxu0 }
 0x3b1   : > { %10777 = vst [vmem:[#allocation114_spill] sm:$0xff] %v9061_v46  ;;  %5844 = vmatmul.mubr.msk.bf16.gmra.mrb[128].mxu0 %vm1807_vm3, %v9061_v46  ;;  %v4115_v2 = vand.u32 2147483647, %v4083_v45  ;;  %v9071_v0 = vmax.f32 %v3964_v6, 0.0  ;;  %v4112_v19 = vand.u32 2147483647, %v4080_v13  ;;  %v4084_v4 = vsub.f32 %v6504_v39, %v10773_v42  ;;  %5848 = vmatmul.mubr.msk.bf16.gmra.mrb[128].mxu1 %vm1807_vm3, %v9061_v46 }
 0x3b2   : > { %10778 = vst [vmem:[#allocation117_spill] sm:$0xff] %v9066_v59  ;;  %2904 = vmatprep.mubr.bf16.mxu0 %v10410_v63  ;;  %v4143_v47 = vsub.f32 1.0, %v9037_v20  ;;  %v4146_v41 = vsub.f32 1.0, %v9046_v44  ;;  %v4113_v31 = vand.u32 2147483647, %v4081_v57  ;;  %v6505_v14 = vld [vmem:[#allocation14 + $0x38] sm:$0xff]  ;;  %v9086_v20 = vmul.f32 %v10784_v43, %v1959_v52  ;;  %2977 = vmatprep.mubr.bf16.mxu1 %v10410_v63 }
 0x3b3   : > { %10779 = vst [vmem:[#allocation115_spill] sm:$0xff] %v9071_v0  ;;  %v4085_v45 = vsub.f32 %v6505_v14, %v8949_v54  ;;  %v10780_v59 = vld [vmem:[#allocation124_spill] sm:$0xff]  ;;  %v9080_v6 = vmax.f32 %v3965_v9, 0.0  ;;  %v9082_v13 = vmax.f32 %v4142_v29, 0.0  ;;  %v6506_v0 = vld [vmem:[#allocation14 + $0x40] sm:$0xff]  ;;  %v1961_v44 = vpop.f32.mrb[22].mxu1 }
 0x3b4   : > { %v9078_v11 = vmul.f32 %v10780_v59, %v1957_v30  ;;  %v4086_v39 = vsub.f32 %v6506_v0, %v10756_v24  ;;  %10785 = vst [vmem:[#allocation103_spill] sm:$0xff] %v9086_v20  ;;  %v10786_v57 = vld [vmem:[#allocation128_spill] sm:$0xff]  ;;  %v2002_v14 = vpop.f32.mrb[25].mxu0  ;;  %v4147_v50 = vsub.f32 1.0, %v4115_v2  ;;  %v10788_v26 = vld [vmem:[#allocation126_spill] sm:$0xff]  ;;  %v1963_v29 = vpop.f32.mrb[23].mxu1 }
 0x3b5   : > { %10782 = vst [vmem:[#allocation119_spill] sm:$0xff] %v9080_v6  ;;  %10783 = vst [vmem:[#allocation81_spill] sm:$0xff] %v9082_v13  ;;  %v9089_v7 = vmul.f32 %v10786_v57, %v2000_v51  ;;  %v6507_v30 = vld [vmem:[#allocation14 + $0x48] sm:$0xff]  ;;  %v9093_v9 = vmul.f32 %v10788_v26, %v1961_v44  ;;  %v10790_v6 = vld [vmem:[#allocation129_spill] sm:$0xff]  ;;  %v2004_v0 = vpop.f32.mrb[26].mxu0  ;;  %v4144_v43 = vsub.f32 1.0, %v4112_v19 }
 0x3b6   : > { %10781 = vst [vmem:[#allocation118_spill] sm:$0xff] %v9078_v11  ;;  %v4087_v59 = vsub.f32 %v6507_v30, %v10763_v8  ;;  %v9096_v13 = vmul.f32 %v10790_v6, %v2002_v14  ;;  %v9098_v52 = vand.u32 2147483647, %v4084_v4  ;;  %v10792_v56 = vld [vmem:[#allocation127_spill] sm:$0xff]  ;;  %v10794_v57 = vld [vmem:[#allocation130_spill] sm:$0xff]  ;;  %v2006_v27 = vpop.f32.mrb[27].mxu0 }
 0x3b7   : > { %10787 = vst [vmem:[#allocation102_spill] sm:$0xff] %v9089_v7  ;;  %10789 = vst [vmem:[#allocation83_spill] sm:$0xff] %v9093_v9  ;;  %v9101_v51 = vmul.f32 %v10792_v56, %v1963_v29  ;;  %v9104_v2 = vmul.f32 %v10794_v57, %v2004_v0  ;;  %v4145_v30 = vsub.f32 1.0, %v4113_v31  ;;  %v9106_v32 = vand.u32 2147483647, %v4085_v45  ;;  %v10796_v6 = vld [vmem:[#allocation131_spill] sm:$0xff] }
 0x3b8   : > { %10791 = vst [vmem:[#allocation120_spill] sm:$0xff] %v9096_v13  ;;  %v9113_v19 = vmul.f32 %v10796_v6, %v2006_v27  ;;  %v9115_v4 = vand.u32 2147483647, %v4086_v39  ;;  %v6508_v56 = vld [vmem:[#allocation14 + $0x60] sm:$0xff]  ;;  %v9128_v27 = vmax.f32 %v4143_v47, 0.0  ;;  %v9133_v0 = vmax.f32 %v4146_v41, 0.0 }
 0x3b9   : > { %10793 = vst [vmem:[#allocation121_spill] sm:$0xff] %v9101_v51  ;;  %10795 = vst [vmem:[#allocation122_spill] sm:$0xff] %v9104_v2  ;;  %v4090_v44 = vsub.f32 %v6508_v56, %v10756_v24  ;;  %v9123_v45 = vld [vmem:[%s7154_s12 + $0x18] sm:$0xff]   ;;  %v4119_v39 = vand.u32 2147483647, %v4087_v59  ;;  %v9135_v57 = vmax.f32 %v4147_v50, 0.0 }
 0x3ba   : > { %10797 = vst [vmem:[#allocation23_spill] sm:$0xff] %v9123_v45  ;;  %5845 = vmatmul.mubr.msk.bf16.gmra.mrb[132].mxu0 %vm1807_vm3, %v9123_v45  ;;  %10798 = vst [vmem:[#allocation29_spill] sm:$0xff] %v9128_v27  ;;  %v4148_v6 = vsub.f32 1.0, %v9098_v52  ;;  %v2073_v56 = vpop.f32.mrb[24].mxu1  ;;  %v9138_v26 = vmax.f32 %v4144_v43, 0.0  ;;  %v9140_v31 = vmax.f32 %v4145_v30, 0.0  ;;  %5849 = vmatmul.mubr.msk.bf16.gmra.mrb[132].mxu1 %vm1807_vm3, %v9123_v45 }
 0x3bb   : > { %3020 = vmatprep.mubr.bf16.mxu0 %v10410_v63  ;;  %10799 = vst [vmem:[#allocation82_spill] sm:$0xff] %v9133_v0  ;;  %10800 = vst [vmem:[#allocation26_spill] sm:$0xff] %v9135_v57  ;;  %v4149_v47 = vsub.f32 1.0, %v9106_v32  ;;  %v6510_v14 = vld [vmem:[#allocation14 + $0x68] sm:$0xff]  ;;  %v2075_v11 = vpop.f32.mrb[25].mxu1  ;;  %v2010_v41 = vpop.f32.mrb[28].mxu0  ;;  %3093 = vmatprep.mubr.bf16.mxu1 %v10410_v63 }
 0x3bc   : > { %10801 = vst [vmem:[#allocation32_spill] sm:$0xff] %v9138_v26  ;;  %10802 = vst [vmem:[#allocation123_spill] sm:$0xff] %v9140_v31  ;;  %v4091_v59 = vsub.f32 %v6510_v14, %v10763_v8  ;;  %v10803_v27 = vld [vmem:[#allocation132_spill] sm:$0xff]  ;;  %v4150_v50 = vsub.f32 1.0, %v9115_v4  ;;  %v4122_v57 = vand.u32 2147483647, %v4090_v44 }
 0x3bd   : > { %v9145_v29 = vmul.f32 %v10803_v27, %v2073_v56  ;;  %v6511_v0 = vld [vmem:[#allocation14 + $0x50] sm:$0xff]  ;;  %v2077_v30 = vpop.f32.mrb[26].mxu1  ;;  %v10806_v31 = vld [vmem:[#allocation136_spill] sm:$0xff]  ;;  %v2012_v9 = vpop.f32.mrb[29].mxu0  ;;  %v4151_v14 = vsub.f32 1.0, %v4119_v39  ;;  %v6512_v7 = vld [vmem:[#allocation14 + $0x58] sm:$0xff] }
 0x3be   : > { %v4088_v52 = vsub.f32 %v6511_v0, %v10773_v42  ;;  %v10805_v43 = vld [vmem:[#allocation133_spill] sm:$0xff]  ;;  %v9153_v32 = vmul.f32 %v10806_v31, %v2010_v41  ;;  %v4089_v27 = vsub.f32 %v6512_v7, %v8949_v54  ;;  %v10807_v56 = vld [vmem:[#allocation134_spill] sm:$0xff]  ;;  %v2079_v4 = vpop.f32.mrb[27].mxu1  ;;  %v2014_v0 = vpop.f32.mrb[30].mxu0  ;;  %v10809_v41 = vld [vmem:[#allocation135_spill] sm:$0xff]  ;;  %s5759_s12 = sshll.u32 %s7144_s30, 6 }
 0x3bf   : > { %10804 = vst [vmem:[#allocation124_spill] sm:$0xff] %v9145_v29  ;;  %v9150_v26 = vmul.f32 %v10805_v43, %v2075_v11  ;;  %v9157_v2 = vmul.f32 %v10807_v56, %v2077_v30  ;;  %v10808_v44 = vld [vmem:[#allocation137_spill] sm:$0xff]  ;;  %v6514_v43 = vld [vmem:[#allocation14 + $0x78] sm:$0xff]  ;;  %v9165_v46 = vmul.f32 %v10809_v41, %v2079_v4  ;;  %v2016_v7 = vpop.f32.mrb[31].mxu0  ;;  %v9170_v30 = vand.u32 2147483647, %v4091_v59 }
 0x3c0   : > { %v9160_v20 = vmul.f32 %v10808_v44, %v2012_v9  ;;  %v6513_v51 = vld [vmem:[#allocation14 + $0x70] sm:$0xff]  ;;  %v4093_v31 = vsub.f32 %v6514_v43, %v8949_v54  ;;  %v10810_v39 = vld [vmem:[#allocation138_spill] sm:$0xff]  ;;  %v6515_v56 = vld [vmem:[#allocation14 + $0x80] sm:$0xff]  ;;  %v4154_v4 = vsub.f32 1.0, %v4122_v57  ;;  %v4120_v41 = vand.u32 2147483647, %v4088_v52 }
 0x3c1   : > { %v4092_v11 = vsub.f32 %v6513_v51, %v10773_v42  ;;  %v9168_v13 = vmul.f32 %v10810_v39, %v2014_v0  ;;  %v4094_v9 = vsub.f32 %v6515_v56, %v10756_v24  ;;  %v10811_v51 = vld [vmem:[#allocation141_spill] sm:$0xff]  ;;  %v9187_v39 = vmax.f32 %v4148_v6, 0.0  ;;  %v2083_v59 = vpop.f32.mrb[28].mxu1  ;;  %s365_s9 = scalar_lea.vmem [#allocation16], %s5759_s12 }
 0x3c2   : > { %v9178_v43 = vmul.f32 %v10811_v51, %v2016_v7  ;;  %5850 = vmatmul.mubr.msk.bf16.vlgmr.msra.gmra.mrb[136].mxu0 %vm1807_vm3, %v8930_v12  ;;  %v4121_v56 = vand.u32 2147483647, %v4089_v27  ;;  %v10813_v57 = vpack.c.bf16 %v8851_v1, %v8841_v49  ;;  %v9195_v52 = vmax.f32 %v4149_v47, 0.0  ;;  %v10818_v1 = vld [vmem:[#allocation142_spill] sm:$0xff]  ;;  %v2085_v47 = vpop.f32.mrb[29].mxu1  ;;  %5854 = vmatmul.mubr.msk.bf16.vlgmr.msra.gmra.mrb[136].mxu1 %vm1807_vm3, %v8930_v12  ;;  %s5608_s15 = sshll.u32 %s365_s9, 4  ;;  %s10147_s15 = int_to_ptr.vmem [resolvable:$true] %s5608_s15 }
 0x3c3   : > { %10812 = vst [vmem:[#allocation125_spill] sm:$0xff] %v9187_v39  ;;  %3030 = vmatprep.mubr.bf16.mxu0 %v10410_v63  ;;  %v4124_v51 = vand.u32 2147483647, %v4092_v11  ;;  %v4125_v44 = vand.u32 2147483647, %v4093_v31  ;;  %v10815_v0 = vpack.c.bf16 %v8923_v62, %v8904_v3  ;;  %v9200_v6 = vmax.f32 %v4150_v50, 0.0  ;;  %3103 = vmatprep.mubr.bf16.mxu1 %v10410_v63  ;;  %p6742_p6 = scmp.lt.s32.totalorder %s10147_s15, %s6740_s29 }
 0x3c4   : > { %5281 = vmatpush1.bf16.msra.mxu0 %v10813_v57  ;;  %10814 = vst [vmem:[#allocation128_spill] sm:$0xff] %v9195_v52  ;;  %v9202_v27 = vmax.f32 %v4151_v14, 0.0  ;;  %v4126_v7 = vand.u32 2147483647, %v4094_v9  ;;  %v6516_v39 = vld [vmem:[#allocation14 + $0x88] sm:$0xff]  ;;  %v9206_v57 = vmul.f32 %v10818_v1, %v2083_v59  ;;  %v2020_v52 = vpop.f32.mrb[32].mxu0 }
 0x3c5   : > { %5282 = vmatprep.subr.bf16.mxu0 %v10815_v0  ;;  %10816 = vst [vmem:[#allocation126_spill] sm:$0xff] %v9200_v6  ;;  %v4095_v49 = vsub.f32 %v6516_v39, %v10763_v8  ;;  %v9208_v11 = vmax.f32 %v4154_v4, 0.0  ;;  %v4155_v31 = vsub.f32 1.0, %v9170_v30  ;;  %v4152_v45 = vsub.f32 1.0, %v4120_v41  ;;  %v10820_v3 = vld [vmem:[#allocation143_spill] sm:$0xff]  ;;  %v2087_v50 = vpop.f32.mrb[30].mxu1 }
 0x3c6   : > { %10817 = vst [vmem:[#allocation129_spill] sm:$0xff] %v9202_v27  ;;  %v9212_v62 = vmul.f32 %v10820_v3, %v2085_v47  ;;  %v10821_v14 = vld [vmem:[#allocation147_spill] sm:$0xff]  ;;  %v2022_v9 = vpop.f32.mrb[33].mxu0  ;;  %v4153_v27 = vsub.f32 1.0, %v4121_v56  ;;  %v10822_v1 = vld [vmem:[#allocation145_spill] sm:$0xff]  ;;  %v2089_v4 = vpop.f32.mrb[31].mxu1  ;;  %v10824_v30 = vpack.c.bf16 %v8912_v28, %v8894_v17 }
 0x3c7   : > { %10819 = vst [vmem:[#allocation127_spill] sm:$0xff] %v9208_v11  ;;  %v9215_v0 = vmul.f32 %v10821_v14, %v2020_v52  ;;  %v6517_v39 = vld [vmem:[#allocation14 + $0xa0] sm:$0xff]  ;;  %v9219_v6 = vmul.f32 %v10822_v1, %v2087_v50  ;;  %v10823_v11 = vld [vmem:[#allocation148_spill] sm:$0xff]  ;;  %v2024_v41 = vpop.f32.mrb[34].mxu0  ;;  %v4156_v47 = vsub.f32 1.0, %v4124_v51  ;;  %v4157_v52 = vsub.f32 1.0, %v4125_v44 }
 0x3c8   : > { %v4098_v59 = vsub.f32 %v6517_v39, %v10756_v24  ;;  %v9222_v29 = vmul.f32 %v10823_v11, %v2022_v9  ;;  %5283 = vmatpush1.bf16.msra.mxu0 %v10824_v30  ;;  %v10825_v3 = vld [vmem:[#allocation146_spill] sm:$0xff]  ;;  %v9231_v56 = vmul.f32 %v8444_v37, %v2024_v41  ;;  %v10826_v50 = vpack.c.bf16 %v8987_v10, %v8972_v53  ;;  %v2026_v39 = vpop.f32.mrb[35].mxu0  ;;  %v6518_v44 = vld [vmem:[#allocation14 + $0xa8] sm:$0xff]  ;;  %v6519_v51 = vld [vmem:[#allocation14 + $0x90] sm:$0xff]  ;;  %s6735_s20 = scalar_lea.vmem %s10147_s15, 1024 }
 0x3c9   : > { %v9228_v14 = vmul.f32 %v10825_v3, %v2089_v4  ;;  %v4158_v11 = vsub.f32 1.0, %v4126_v7  ;;  %v9236_v9 = vand.u32 2147483647, %v4095_v49  ;;  %v3588_v17 = vpack.c.bf16 %v9219_v6, %v9206_v57  ;;  %v6520_v41 = vld [vmem:[#allocation14 + $0x98] sm:$0xff]  ;;  %v2093_v3 = vpop.f32.mrb[32].mxu1  ;;  %p6736_p0 = scmp.ne.s32.totalorder %s10147_s15, %s6735_s20  ;;  %p6743_p2 = scmp.lt.s32.totalorder %s6741_s26, %s6735_s20 }
 0x3ca   : > { %5284 = vmatprep.subr.bf16.mxu0 %v10826_v50  ;;  %v9243_v28 = vmul.f32 %v8450_v40, %v2026_v39  ;;  %v4099_v37 = vsub.f32 %v6518_v44, %v10763_v8  ;;  %v4096_v53 = vsub.f32 %v6519_v51, %v10773_v42  ;;  %v10827_v7 = vpack.c.bf16 %v8901_v18, %v8884_v15  ;;  %v2030_v50 = vpop.f32.mrb[36].mxu0 }
 0x3cb   : > { %v3589_v10 = vpack.c.bf16 %v9228_v14, %v9212_v62  ;;  %v3590_v49 = vpack.c.bf16 %v9231_v56, %v9215_v0  ;;  %5851 = vmatmul.mubr.msk.bf16.gmra.mrb[140].mxu0 %vm1807_vm3, %v9000_v33  ;;  %v9256_v40 = vmax.f32 %v4155_v31, 0.0  ;;  %v4130_v12 = vand.u32 2147483647, %v4098_v59  ;;  %5855 = vmatmul.mubr.msk.bf16.gmra.mrb[140].mxu1 %vm1807_vm3, %v9000_v33  ;;  %v10868_v56 = vld [vmem:[#allocation175_spill] sm:$0xff]  ;;  %p6737_p7 = pnand %p6736_p0, %p11123_p13  ;;  %p6744_p5 = por %p6743_p2, %p6742_p6 }
 0x3cc   : > { %5410 = vmatpush1.bf16.msra.mxu1 %v10827_v7  ;;  %v10828_v1 = vpack.c.bf16 %v8977_v61, %v8961_v16  ;;  %v3591_v4 = vpack.c.bf16 %v9243_v28, %v9222_v29  ;;  %v10829_v15 = vpack.c.bf16 %v8980_v25, %v8964_v55  ;;  %v9266_v18 = vmax.f32 %v4152_v45, 0.0  ;;  %3040 = vmatprep.mubr.bf16.mxu0 %v10410_v63  ;;  %v10865_v28 = vld [vmem:[#allocation124_spill] sm:$0xff] }
 0x3cd   : > { %v9268_v30 = vmax.f32 %v4153_v27, 0.0  ;;  %v4097_v31 = vsub.f32 %v6520_v41, %v8949_v54  ;;  %v10830_v59 = vpack.c.bf16 %v9054_v23, %v9035_v58  ;;  %v9275_v16 = vmax.f32 %v4156_v47, 0.0  ;;  %v2095_v27 = vpop.f32.mrb[33].mxu1  ;;  %v6521_v23 = vld [vmem:[#allocation14 + $0xb0] sm:$0xff]  ;;  %v10831_v47 = vld [vmem:[#allocation150_spill] sm:$0xff]  ;;  %3113 = vmatprep.mubr.bf16.mxu1 %v10410_v63  ;;  %p6738_p9 = pneg %p6737_p7 }
 0x3ce   : > { %5411 = vmatprep.subr.bf16.mxu1 %v10828_v1  ;;  %5285 = vmatpush1.bf16.msra.mxu0 %v10829_v15  ;;  %v9277_v61 = vmax.f32 %v4157_v52, 0.0  ;;  %v9279_v55 = vmax.f32 %v4158_v11, 0.0  ;;  %v4159_v25 = vsub.f32 1.0, %v9236_v9  ;;  %v9283_v45 = vmul.f32 %v8456_v22, %v2093_v3  ;;  %v2097_v11 = vpop.f32.mrb[34].mxu1  ;;  %v2032_v9 = vpop.f32.mrb[37].mxu0  ;;  %v6522_v1 = vld [vmem:[#allocation14 + $0xb8] sm:$0xff] }
 0x3cf   : > { %5286 = vmatprep.subr.bf16.mxu0 %v10830_v59  ;;  %v4131_v39 = vand.u32 2147483647, %v4099_v37  ;;  %v4128_v58 = vand.u32 2147483647, %v4096_v53  ;;  %v4100_v44 = vsub.f32 %v6521_v23, %v10773_v42  ;;  %v9288_v51 = vmul.f32 %v10831_v47, %v2095_v27  ;;  %v10833_v53 = vld [vmem:[#allocation153_spill] sm:$0xff]  ;;  %v2099_v3 = vpop.f32.mrb[35].mxu1  ;;  %p6745_p8 = pnand %p6744_p5, %p6738_p9 }
 0x3d0   : > { %v10832_v52 = vpack.c.bf16 %v8969_v60, %v8954_v38  ;;  %v9294_v22 = vmul.f32 %v8479_v21, %v2030_v50  ;;  %v4162_v7 = vsub.f32 1.0, %v4130_v12  ;;  %v4101_v37 = vsub.f32 %v6522_v1, %v8949_v54  ;;  %v2034_v38 = vpop.f32.mrb[38].mxu0  ;;  %v6523_v59 = vld [vmem:[#allocation14 + $0xc0] sm:$0xff]  ;;  %v10840_v1 = vld [vmem:[#allocation161_spill] sm:$0xff] }
 0x3d1   : > { %v9298_v15 = vmul.f32 %v10833_v53, %v2097_v11  ;;  %v10834_v41 = vpack.c.bf16 %v9041_v5, %v9025_v34  ;;  %v9304_v60 = vmul.f32 %v8492_v36, %v2032_v9  ;;  %v10835_v21 = vpack.c.bf16 %v9044_v35, %v9028_v48  ;;  %v10836_v50 = vld [vmem:[#allocation155_spill] sm:$0xff]  ;;  %v10838_v34 = vld [vmem:[#allocation120_spill] sm:$0xff] }
 0x3d2   : > { %5412 = vmatpush1.bf16.msra.mxu1 %v10832_v52  ;;  %v9309_v12 = vand.u32 2147483647, %v4097_v31  ;;  %v4102_v27 = vsub.f32 %v6523_v59, %v10756_v24  ;;  %v9313_v23 = vmul.f32 %v10836_v50, %v2099_v3  ;;  %v10837_v47 = vld [vmem:[#allocation27_spill] sm:$0xff]  ;;  %v10839_v36 = vpack.c.bf16 %v9113_v19, %v10838_v34  ;;  %v2036_v52 = vpop.f32.mrb[39].mxu0  ;;  %v6524_v11 = vld [vmem:[#allocation14 + $0xc8] sm:$0xff]  ;;  %v10844_v50 = vld [vmem:[#allocation114_spill] sm:$0xff] }
 0x3d3   : > { %5413 = vmatprep.subr.bf16.mxu1 %v10834_v41  ;;  %5287 = vmatpush1.bf16.msra.mxu0 %v10835_v21  ;;  %v9316_v5 = vmul.f32 %v10837_v47, %v2034_v38  ;;  %v4103_v35 = vsub.f32 %v6524_v11, %v10763_v8  ;;  %v6525_v48 = vld [vmem:[#allocation14 + $0xe0] sm:$0xff]  ;;  %v9328_v53 = vmul.f32 %v10840_v1, %v2036_v52  ;;  %v4163_v41 = vsub.f32 1.0, %v4131_v39  ;;  %v10841_v21 = vld [vmem:[#allocation116_spill] sm:$0xff]  ;;  %v10842_v38 = vld [vmem:[#allocation113_spill] sm:$0xff] }
 0x3d4   : > { %5288 = vmatprep.subr.bf16.mxu0 %v10839_v36  ;;  %v4106_v31 = vsub.f32 %v6525_v48, %v10756_v24  ;;  %v4160_v3 = vsub.f32 1.0, %v4128_v58  ;;  %v10843_v59 = vpack.c.bf16 %v10841_v21, %v10842_v38  ;;  %5852 = vmatmul.mubr.msk.bf16.gmra.mrb[144].mxu0 %vm1807_vm3, %v10844_v50  ;;  %v9339_v47 = vmax.f32 %v4159_v25, 0.0  ;;  %v10845_v34 = vld [vmem:[#allocation121_spill] sm:$0xff]  ;;  %v10846_v36 = vld [vmem:[#allocation103_spill] sm:$0xff]  ;;  %v10848_v52 = vld [vmem:[#allocation122_spill] sm:$0xff] }
 0x3d5   : > { %v4132_v33 = vand.u32 2147483647, %v4100_v44  ;;  %v10847_v39 = vpack.c.bf16 %v10845_v34, %v10846_v36  ;;  %v3595_v58 = vpack.c.bf16 %v9328_v53, %v9304_v60  ;;  %v10849_v11 = vld [vmem:[#allocation102_spill] sm:$0xff]  ;;  %v9349_v1 = vmax.f32 %v4162_v7, 0.0  ;;  %3050 = vmatprep.mubr.bf16.mxu0 %v10410_v63  ;;  %v10858_v24 = vld [vmem:[#allocation163_spill] sm:$0xff]  ;;  %5856 = vmatmul.mubr.msk.bf16.gmra.mrb[144].mxu1 %vm1807_vm3, %v10844_v50 }
 0x3d6   : > { %5414 = vmatpush1.bf16.msra.mxu1 %v10843_v59  ;;  %v10850_v48 = vpack.c.bf16 %v10848_v52, %v10849_v11  ;;  %v4133_v21 = vand.u32 2147483647, %v4101_v37  ;;  %v4134_v38 = vand.u32 2147483647, %v4102_v27  ;;  %v2103_v59 = vpop.f32.mrb[36].mxu1  ;;  %v10851_v25 = vpack.c.bf16 %v9178_v43, %v9160_v20  ;;  %v10852_v60 = vld [vmem:[#allocation30_spill] sm:$0xff]  ;;  %3123 = vmatprep.mubr.bf16.mxu1 %v10410_v63 }
 0x3d7   : > { %5415 = vmatprep.subr.bf16.mxu1 %v10847_v39  ;;  %v4161_v44 = vsub.f32 1.0, %v9309_v12  ;;  %v4135_v34 = vand.u32 2147483647, %v4103_v35  ;;  %v4138_v36 = vand.u32 2147483647, %v4106_v31  ;;  %v9357_v53 = vmul.f32 %v10852_v60, %v2103_v59  ;;  %v2105_v39 = vpop.f32.mrb[37].mxu1 }
 0x3d8   : > { %5289 = vmatpush1.bf16.msra.mxu0 %v10850_v48  ;;  %v2146_v52 = vpop.f32.mrb[40].mxu0  ;;  %v9360_v7 = vmax.f32 %v4163_v41, 0.0  ;;  %v9362_v37 = vmax.f32 %v4160_v3, 0.0  ;;  %v6526_v27 = vld [vmem:[#allocation14 + $0xe8] sm:$0xff]  ;;  %v10853_v43 = vld [vmem:[#allocation33_spill] sm:$0xff]  ;;  %v10854_v12 = vld [vmem:[#allocation83_spill] sm:$0xff]  ;;  %v10878_v6 = vpack.c.bf16 %v9316_v5, %v9294_v22 }
 0x3d9   : > { %5290 = vmatprep.subr.bf16.mxu0 %v10851_v25  ;;  %v4107_v20 = vsub.f32 %v6526_v27, %v10763_v8  ;;  %v9366_v11 = vmul.f32 %v10853_v43, %v2105_v39  ;;  %v10855_v35 = vld [vmem:[#allocation118_spill] sm:$0xff]  ;;  %v2107_v48 = vpop.f32.mrb[38].mxu1  ;;  %v10857_v59 = vld [vmem:[#allocation171_spill] sm:$0xff]  ;;  %v2148_v60 = vpop.f32.mrb[41].mxu0  ;;  %v4164_v9 = vsub.f32 1.0, %v4132_v33  ;;  %v6527_v41 = vld [vmem:[#allocation14 + $0xd0] sm:$0xff]  ;;  %v10859_v8 = vpack.c.bf16 %v9165_v46, %v9150_v26 }
 0x3da   : > { %v10856_v31 = vpack.c.bf16 %v10854_v12, %v10855_v35  ;;  %v9372_v25 = vmul.f32 %v10857_v59, %v2146_v52  ;;  %v4104_v3 = vsub.f32 %v6527_v41, %v10773_v42  ;;  %v9376_v19 = vmul.f32 %v10858_v24, %v2107_v48  ;;  %v2109_v39 = vpop.f32.mrb[39].mxu1  ;;  %v10860_v27 = vld [vmem:[#allocation172_spill] sm:$0xff]  ;;  %v2150_v12 = vpop.f32.mrb[42].mxu0  ;;  %v10863_v24 = vld [vmem:[#allocation173_spill] sm:$0xff] }
 0x3db   : > { %v9382_v43 = vmul.f32 %v10860_v27, %v2148_v60  ;;  %v10861_v52 = vpack.c.bf16 %v9168_v13, %v9153_v32  ;;  %v4165_v33 = vsub.f32 1.0, %v4133_v21  ;;  %v4166_v35 = vsub.f32 1.0, %v4134_v38  ;;  %v2152_v46 = vpop.f32.mrb[43].mxu0  ;;  %v10864_v32 = vld [vmem:[#allocation174_spill] sm:$0xff]  ;;  %v10883_v22 = vld [vmem:[#allocation189_spill] sm:$0xff] }
 0x3dc   : > { %5416 = vmatpush1.bf16.msra.mxu1 %v10856_v31  ;;  %v10862_v31 = vld [vmem:[#allocation165_spill] sm:$0xff]  ;;  %v9391_v48 = vmul.f32 %v10863_v24, %v2150_v12  ;;  %v4167_v26 = vsub.f32 1.0, %v4135_v34  ;;  %v4170_v60 = vsub.f32 1.0, %v4138_v36  ;;  %v3596_v13 = vpack.c.bf16 %v9376_v19, %v9357_v53  ;;  %v10867_v36 = vld [vmem:[#allocation23_spill] sm:$0xff]  ;;  %v2219_v12 = vpop.f32.mrb[40].mxu1  ;;  %v10872_v24 = vld [vmem:[#allocation182_spill] sm:$0xff] }
 0x3dd   : > { %5417 = vmatprep.subr.bf16.mxu1 %v10859_v8  ;;  %5291 = vmatpush1.bf16.msra.mxu0 %v10861_v52  ;;  %v9388_v59 = vmul.f32 %v10862_v31, %v2109_v39  ;;  %v3795_v21 = vmul.f32 %v10864_v32, %v2152_v46  ;;  %v6422_v38 = vld [vmem:[#allocation11 + $0x4] ss:$20 sps:$4 sm:$0x1f]   ;;  %v4139_v41 = vand.u32 2147483647, %v4107_v20  ;;  %v9411_v50 = vmax.f32 %v4161_v44, 0.0 }
 0x3de   : > { %5292 = vmatprep.subr.bf16.mxu0 %v3591_v4  ;;  %v6528_v8 = vld [vmem:[#allocation14 + $0xd8] sm:$0xff]  ;;  %v10866_v4 = vpack.c.bf16 %v9157_v2, %v10865_v28  ;;  %v3822_v34 = vpack.c.bf16 %v9391_v48, %v9372_v25  ;;  %5853 = vmatmul.mubr.msk.bf16.gmra.mrb[148].mxu0 %vm1807_vm3, %v10867_v36  ;;  %v4136_v27 = vand.u32 2147483647, %v4104_v3  ;;  %v9420_v2 = vmax.f32 %v4164_v9, 0.0  ;;  %v2221_v9 = vpop.f32.mrb[41].mxu1  ;;  %v10874_v32 = vld [vmem:[#allocation152_spill] sm:$0xff] }
 0x3df   : > { %v4105_v39 = vsub.f32 %v6528_v8, %v8949_v54  ;;  %v3597_v29 = vpack.c.bf16 %v9388_v59, %v9366_v11  ;;  %v3823_v20 = vpack.c.bf16 %v3795_v21, %v9382_v43  ;;  %v6529_v11 = vld [vmem:[#allocation14 + $0xf0] sm:$0xff]  ;;  %v6530_v52 = vld [vmem:[#allocation14 + $0xf8] sm:$0xff]  ;;  %v9425_v62 = vmax.f32 %v4165_v33, 0.0  ;;  %5312 = vmatprep.mubr.bf16.mxu0 %v6422_v38  ;;  %v10869_v43 = vld [vmem:[#allocation60_spill] sm:$0xff]  ;;  %5857 = vmatmul.mubr.msk.bf16.gmra.mrb[148].mxu1 %vm1807_vm3, %v10867_v36 }
 0x3e0   : > { %5418 = vmatpush1.bf16.msra.mxu1 %v10866_v4  ;;  %v4108_v25 = vsub.f32 %v6529_v11, %v10773_v42  ;;  %v4109_v44 = vsub.f32 %v6530_v52, %v8949_v54  ;;  %v9427_v14 = vmax.f32 %v4166_v35, 0.0  ;;  %v9431_v0 = vmax.f32 %v4170_v60, 0.0  ;;  %v2156_v42 = vpop.f32.mrb[44].mxu0  ;;  %v10871_v59 = vld [vmem:[#allocation176_spill] sm:$0xff]  ;;  %v2223_v35 = vpop.f32.mrb[42].mxu1  ;;  %v10873_v60 = vld [vmem:[#allocation69_spill] sm:$0xff]  ;;  %5441 = vmatprep.mubr.bf16.mxu1 %v6422_v38 }
 0x3e1   : > { %5419 = vmatprep.subr.bf16.mxu1 %v3589_v10  ;;  %5293 = vmatpush1.bf16.msra.mxu0 %v3590_v49  ;;  %v9429_v10 = vmax.f32 %v4167_v26, 0.0  ;;  %v9434_v49 = vmul.f32 %v10868_v56, %v2219_v12  ;;  %v4171_v3 = vsub.f32 1.0, %v4139_v41  ;;  %v4137_v54 = vand.u32 2147483647, %v4105_v39  ;;  %v2158_v46 = vpop.f32.mrb[45].mxu0  ;;  %v10875_v8 = vld [vmem:[#allocation179_spill] sm:$0xff] }
 0x3e2   : > { %5294 = vmatprep.subr.bf16.mxu0 %v3595_v58  ;;  %v10870_v58 = vld [vmem:[#allocation151_spill] sm:$0xff]  ;;  %v3793_v33 = vmul.f32 %v10871_v59, %v2221_v9  ;;  %v3798_v48 = vmul.f32 %v10872_v24, %v2156_v42  ;;  %v4168_v26 = vsub.f32 1.0, %v4136_v27  ;;  %v4287_v21 = vsub.f32 %v10874_v32, %v10873_v60  ;;  %v2225_v28 = vpop.f32.mrb[43].mxu1  ;;  %v10877_v4 = vld [vmem:[#allocation186_spill] sm:$0xff]  ;;  %v2160_v57 = vpop.f32.mrb[46].mxu0  ;;  %v10879_v52 = vld [vmem:[#allocation181_spill] sm:$0xff] }
 0x3e3   : > { %v4286_v31 = vsub.f32 %v10870_v58, %v10869_v43  ;;  %v9446_v41 = vmul.f32 %v10875_v8, %v2223_v35  ;;  %v10876_v39 = vpack.c.bf16 %v9313_v23, %v9288_v51  ;;  %v3799_v11 = vmul.f32 %v10877_v4, %v2158_v46  ;;  %v10880_v56 = vld [vmem:[#allocation187_spill] sm:$0xff]  ;;  %v2162_v42 = vpop.f32.mrb[47].mxu0  ;;  %v10881_v59 = vld [vmem:[#allocation154_spill] sm:$0xff]  ;;  %v10882_v23 = vld [vmem:[#allocation156_spill] sm:$0xff] }
 0x3e4   : > { %5420 = vmatpush1.bf16.msra.mxu1 %v3588_v17  ;;  %v4140_v17 = vand.u32 2147483647, %v4108_v25  ;;  %v4141_v27 = vand.u32 2147483647, %v4109_v44  ;;  %v3797_v12 = vmul.f32 %v10879_v52, %v2225_v28  ;;  %v3802_v9 = vmul.f32 %v10880_v56, %v2160_v57  ;;  %v2166_v38 = vpop.f32.mrb[48].mxu0  ;;  %v10895_v19 = vld [vmem:[#allocation159_spill] sm:$0xff] }
 0x3e5   : > { %5421 = vmatprep.subr.bf16.mxu1 %v10876_v39  ;;  %5295 = vmatpush1.bf16.msra.mxu0 %v10878_v6  ;;  %v4290_v51 = vsub.f32 %v10881_v59, %v10869_v43  ;;  %v4291_v35 = vsub.f32 %v10882_v23, %v10873_v60  ;;  %v3824_v24 = vpack.c.bf16 %v9446_v41, %v9434_v49  ;;  %v4169_v25 = vsub.f32 1.0, %v4137_v54  ;;  %v10885_v41 = vld [vmem:[#allocation66_spill] sm:$0xff]  ;;  %v10886_v6 = vld [vmem:[#allocation24_spill] sm:$0xff] }
 0x3e6   : > { %5296 = vmatprep.subr.bf16.mxu0 %v3823_v20  ;;  %v3803_v5 = vmul.f32 %v10883_v22, %v2162_v42  ;;  %v4318_v44 = vand.u32 2147483647, %v4286_v31  ;;  %v3825_v46 = vpack.c.bf16 %v3797_v12, %v3793_v33  ;;  %v10884_v20 = vpack.c.bf16 %v9298_v15, %v9283_v45  ;;  %v2229_v31 = vpop.f32.mrb[44].mxu1  ;;  %v10887_v45 = vld [vmem:[#allocation190_spill] sm:$0xff]  ;;  %v10891_v12 = vld [vmem:[#allocation199_spill] sm:$0xff]  ;;  %v10893_v22 = vld [vmem:[#allocation192_spill] sm:$0xff] }
 0x3e7   : > { %v3826_v8 = vpack.c.bf16 %v3802_v9, %v3798_v48  ;;  %v9469_v39 = vmax.f32 %v4171_v3, 0.0  ;;  %v4319_v28 = vand.u32 2147483647, %v4287_v21  ;;  %v9471_v49 = vmax.f32 %v4168_v26, 0.0  ;;  %v2231_v48 = vpop.f32.mrb[45].mxu1  ;;  %v10888_v21 = vld [vmem:[#allocation72_spill] sm:$0xff] }
 0x3e8   : > { %5422 = vmatpush1.bf16.msra.mxu1 %v10884_v20  ;;  %v3827_v4 = vpack.c.bf16 %v3803_v5, %v3799_v11  ;;  %v4172_v36 = vsub.f32 1.0, %v4140_v17  ;;  %v4288_v54 = vsub.f32 %v10886_v6, %v10885_v41  ;;  %v4173_v33 = vsub.f32 1.0, %v4141_v27  ;;  %v10890_v11 = vld [vmem:[#allocation191_spill] sm:$0xff]  ;;  %v2233_v27 = vpop.f32.mrb[46].mxu1  ;;  %v2168_v9 = vpop.f32.mrb[49].mxu0  ;;  %v10912_v23 = vld [vmem:[#allocation100_spill] sm:$0xff] }
 0x3e9   : > { %5423 = vmatprep.subr.bf16.mxu1 %v3597_v29  ;;  %5297 = vmatpush1.bf16.msra.mxu0 %v3822_v34  ;;  %v4322_v57 = vand.u32 2147483647, %v4290_v51  ;;  %v4323_v52 = vand.u32 2147483647, %v4291_v35  ;;  %v3800_v15 = vmul.f32 %v10887_v45, %v2229_v31  ;;  %v9476_v3 = vmax.f32 %v4169_v25, 0.0  ;;  %v10889_v34 = vld [vmem:[#allocation157_spill] sm:$0xff] }
 0x3ea   : > { %5298 = vmatprep.subr.bf16.mxu0 %v3827_v4  ;;  %v4350_v29 = vsub.f32 1.0, %v4318_v44  ;;  %v4289_v26 = vsub.f32 %v10889_v34, %v10888_v21  ;;  %v3801_v17 = vmul.f32 %v10890_v11, %v2231_v48  ;;  %v3806_v56 = vmul.f32 %v10891_v12, %v2166_v38  ;;  %v10892_v51 = vld [vmem:[#allocation158_spill] sm:$0xff]  ;;  %v2235_v25 = vpop.f32.mrb[47].mxu1  ;;  %v10894_v44 = vld [vmem:[#allocation200_spill] sm:$0xff]  ;;  %v2170_v4 = vpop.f32.mrb[50].mxu0  ;;  %v10897_v48 = vld [vmem:[#allocation201_spill] sm:$0xff] }
 0x3eb   : > { %v4351_v42 = vsub.f32 1.0, %v4319_v28  ;;  %v4292_v35 = vsub.f32 %v10892_v51, %v10885_v41  ;;  %v3804_v5 = vmul.f32 %v10893_v22, %v2233_v27  ;;  %v3807_v20 = vmul.f32 %v10894_v44, %v2168_v9  ;;  %v2172_v28 = vpop.f32.mrb[51].mxu0  ;;  %v10898_v51 = vld [vmem:[#allocation202_spill] sm:$0xff] }
 0x3ec   : > { %5424 = vmatpush1.bf16.msra.mxu1 %v3596_v13  ;;  %v4320_v31 = vand.u32 2147483647, %v4288_v54  ;;  %v4293_v53 = vsub.f32 %v10895_v19, %v10888_v21  ;;  %v10896_v13 = vld [vmem:[#allocation194_spill] sm:$0xff]  ;;  %v3810_v38 = vmul.f32 %v10897_v48, %v2170_v4  ;;  %v4354_v11 = vsub.f32 1.0, %v4322_v57  ;;  %v10899_v4 = vld [vmem:[#allocation160_spill] sm:$0xff]  ;;  %v10904_v48 = vld [vmem:[#allocation89_spill] sm:$0xff] }
 0x3ed   : > { %5425 = vmatprep.subr.bf16.mxu1 %v3825_v46  ;;  %5299 = vmatpush1.bf16.msra.mxu0 %v3826_v8  ;;  %v3805_v45 = vmul.f32 %v10896_v13, %v2235_v25  ;;  %v4355_v12 = vsub.f32 1.0, %v4323_v52  ;;  %v3828_v63 = vpack.c.bf16 %v3804_v5, %v3800_v15  ;;  %v3811_v27 = vmul.f32 %v10898_v51, %v2172_v28  ;;  %v2239_v52 = vpop.f32.mrb[48].mxu1  ;;  %v2176_v51 = vpop.f32.mrb[52].mxu0  ;;  %v10903_v13 = vld [vmem:[#allocation204_spill] sm:$0xff] }
 0x3ee   : > { %v9494_v46 = vmax.f32 %v4172_v36, 0.0  ;;  %v4321_v22 = vand.u32 2147483647, %v4289_v26  ;;  %v3830_v8 = vpack.c.bf16 %v3810_v38, %v3806_v56  ;;  %v9496_v54 = vmax.f32 %v4173_v33, 0.0  ;;  %v2241_v56 = vpop.f32.mrb[49].mxu1  ;;  %v2178_v28 = vpop.f32.mrb[53].mxu0 }
 0x3ef   : > { %v3829_v9 = vpack.c.bf16 %v3805_v45, %v3801_v17  ;;  %v4324_v44 = vand.u32 2147483647, %v4292_v35  ;;  %v3831_v19 = vpack.c.bf16 %v3811_v27, %v3807_v20  ;;  %v9498_v34 = vmax.f32 %v4350_v29, 0.0  ;;  %v10900_v17 = vld [vmem:[#allocation203_spill] sm:$0xff]  ;;  %v10901_v35 = vld [vmem:[#allocation162_spill] sm:$0xff]  ;;  %v10902_v20 = vld [vmem:[#allocation164_spill] sm:$0xff] }
 0x3f0   : > { %5426 = vmatpush1.bf16.msra.mxu1 %v3824_v24  ;;  %v4325_v25 = vand.u32 2147483647, %v4293_v53  ;;  %v4294_v57 = vsub.f32 %v10899_v4, %v10869_v43  ;;  %v9502_v15 = vmax.f32 %v4351_v42, 0.0  ;;  %v9504_v36 = vmax.f32 %v4354_v11, 0.0  ;;  %v2243_v45 = vpop.f32.mrb[50].mxu1  ;;  %v10905_v11 = vld [vmem:[#allocation166_spill] sm:$0xff] }
 0x3f1   : > { %5427 = vmatprep.subr.bf16.mxu1 %v3829_v9  ;;  %v9506_v26 = vmax.f32 %v4355_v12, 0.0  ;;  %v4352_v24 = vsub.f32 1.0, %v4320_v31  ;;  %v3808_v33 = vmul.f32 %v10900_v17, %v2239_v52  ;;  %5300 = vmatprep.subr.bf16.mxu0 %v3831_v19  ;;  %v4353_v29 = vsub.f32 1.0, %v4321_v22  ;;  %v10906_v19 = vld [vmem:[#allocation25_spill] sm:$0xff]  ;;  %v2245_v22 = vpop.f32.mrb[51].mxu1  ;;  %v10907_v9 = vld [vmem:[#allocation88_spill] sm:$0xff] }
 0x3f2   : > { %v4295_v5 = vsub.f32 %v10901_v35, %v10873_v60  ;;  %v4298_v53 = vsub.f32 %v10902_v20, %v10869_v43  ;;  %v3809_v42 = vmul.f32 %v10903_v13, %v2241_v56  ;;  %v3814_v38 = vmul.f32 %v10904_v48, %v2176_v51  ;;  %5301 = vmatpush1.bf16.msra.mxu0 %v3830_v8  ;;  %v2180_v17 = vpop.f32.mrb[54].mxu0  ;;  %v10908_v4 = vld [vmem:[#allocation28_spill] sm:$0xff]  ;;  %v10910_v51 = vld [vmem:[#allocation167_spill] sm:$0xff]  ;;  %v2249_v32 = vpop.f32.mrb[52].mxu1 }
 0x3f3   : > { %v4356_v31 = vsub.f32 1.0, %v4324_v44  ;;  %v4299_v12 = vsub.f32 %v10905_v11, %v10873_v60  ;;  %v3812_v27 = vmul.f32 %v10906_v19, %v2243_v45  ;;  %v3815_v52 = vmul.f32 %v10907_v9, %v2178_v28  ;;  %v2182_v6 = vpop.f32.mrb[55].mxu0  ;;  %v10911_v44 = vld [vmem:[#allocation168_spill] sm:$0xff] }
 0x3f4   : > { %5428 = vmatpush1.bf16.msra.mxu1 %v3828_v63  ;;  %v4357_v35 = vsub.f32 1.0, %v4325_v25  ;;  %v4326_v20 = vand.u32 2147483647, %v4294_v57  ;;  %v3813_v56 = vmul.f32 %v10908_v4, %v2245_v22  ;;  %v10909_v63 = vld [vmem:[#allocation101_spill] sm:$0xff]  ;;  %v4296_v8 = vsub.f32 %v10910_v51, %v10885_v41 }
 0x3f5   : > { %v3818_v13 = vmul.f32 %v10909_v63, %v2180_v17  ;;  %v4297_v48 = vsub.f32 %v10911_v44, %v10888_v21  ;;  %v3832_v11 = vpack.c.bf16 %v3812_v27, %v3808_v33  ;;  %v3819_v45 = vmul.f32 %v10912_v23, %v2182_v6  ;;  %v10915_v63 = vld [vmem:[#allocation169_spill] sm:$0xff]  ;;  %v10916_v6 = vld [vmem:[#allocation31_spill] sm:$0xff] }
 0x3f6   : > { %v4327_v19 = vand.u32 2147483647, %v4295_v5  ;;  %v4330_v59 = vand.u32 2147483647, %v4298_v53  ;;  %v3833_v28 = vpack.c.bf16 %v3813_v56, %v3809_v42  ;;  %v9526_v25 = vmax.f32 %v4352_v24, 0.0  ;;  %v2251_v53 = vpop.f32.mrb[53].mxu1 }
 0x3f7   : > { %v3834_v9 = vpack.c.bf16 %v3818_v13, %v3814_v38  ;;  %v4331_v57 = vand.u32 2147483647, %v4299_v12  ;;  %v3835_v4 = vpack.c.bf16 %v3819_v45, %v3815_v52  ;;  %v9528_v22 = vmax.f32 %v4353_v29, 0.0  ;;  %v2292_v24 = vpop.f32.mrb[56].mxu0  ;;  %v2253_v52 = vpop.f32.mrb[54].mxu1  ;;  %v10919_v56 = vld [vmem:[#allocation106_spill] sm:$0xff] }
 0x3f8   : > { %v9530_v17 = vmax.f32 %v4356_v31, 0.0  ;;  %v4300_v51 = vsub.f32 %v10915_v63, %v10885_v41  ;;  %5429 = vmatprep.subr.bf16.mxu1 %v3833_v28  ;;  %v4358_v33 = vsub.f32 1.0, %v4326_v20  ;;  %v4328_v27 = vand.u32 2147483647, %v4296_v8  ;;  %v10918_v31 = vld [vmem:[#allocation34_spill] sm:$0xff]  ;;  %v2294_v45 = vpop.f32.mrb[57].mxu0 }
 0x3f9   : > { %10913 = vst [vmem:[#allocation130_spill] sm:$0xff] %v9528_v22  ;;  %v4329_v23 = vand.u32 2147483647, %v4297_v48  ;;  %v3816_v5 = vmul.f32 %v10916_v6, %v2249_v32  ;;  %5430 = vmatpush1.bf16.msra.mxu1 %v3832_v11  ;;  %5302 = vmatprep.subr.bf16.mxu0 %v3835_v4  ;;  %v9535_v42 = vmax.f32 %v4357_v35, 0.0  ;;  %v4359_v29 = vsub.f32 1.0, %v4327_v19  ;;  %v10920_v8 = vld [vmem:[#allocation170_spill] sm:$0xff] }
 0x3fa   : > { %10914 = vst [vmem:[#allocation131_spill] sm:$0xff] %v9530_v17  ;;  %v4362_v38 = vsub.f32 1.0, %v4330_v59  ;;  %v3817_v12 = vmul.f32 %v10918_v31, %v2251_v53  ;;  %v3998_v13 = vmul.f32 %v10919_v56, %v2292_v24  ;;  %5303 = vmatpush1.bf16.msra.mxu0 %v3834_v9  ;;  %v4363_v20 = vsub.f32 1.0, %v4331_v57  ;;  %v10921_v32 = vld [vmem:[#allocation92_spill] sm:$0xff]  ;;  %v2255_v11 = vpop.f32.mrb[55].mxu1  ;;  %v10922_v6 = vld [vmem:[#allocation105_spill] sm:$0xff] }
 0x3fb   : > { %10917 = vst [vmem:[#allocation132_spill] sm:$0xff] %v9535_v42  ;;  %v4301_v48 = vsub.f32 %v10920_v8, %v10888_v21  ;;  %v3820_v28 = vmul.f32 %v10921_v32, %v2253_v52  ;;  %v3999_v4 = vmul.f32 %v10922_v6, %v2294_v45  ;;  %v2296_v35 = vpop.f32.mrb[58].mxu0  ;;  %v4332_v63 = vand.u32 2147483647, %v4300_v51  ;;  %v10923_v59 = vld [vmem:[#allocation177_spill] sm:$0xff]  ;;  %v10924_v53 = vld [vmem:[#allocation90_spill] sm:$0xff] }
 0x3fc   : > { %v4302_v19 = vsub.f32 %v10923_v59, %v10869_v43  ;;  %v3821_v31 = vmul.f32 %v10924_v53, %v2255_v11  ;;  %v10925_v44 = vld [vmem:[#allocation205_spill] sm:$0xff]  ;;  %v2298_v56 = vpop.f32.mrb[59].mxu0  ;;  %v4360_v9 = vsub.f32 1.0, %v4328_v27  ;;  %v4361_v57 = vsub.f32 1.0, %v4329_v23  ;;  %v10926_v42 = vld [vmem:[#allocation206_spill] sm:$0xff]  ;;  %v10931_v27 = vld [vmem:[#allocation180_spill] sm:$0xff] }
 0x3fd   : > { %v4002_v24 = vmul.f32 %v10925_v44, %v2296_v35  ;;  %v3836_v58 = vpack.c.bf16 %v3820_v28, %v3816_v5  ;;  %v4003_v8 = vmul.f32 %v10926_v42, %v2298_v56  ;;  %v9548_v17 = vmax.f32 %v4358_v33, 0.0  ;;  %v10928_v52 = vld [vmem:[#allocation178_spill] sm:$0xff]  ;;  %v2365_v5 = vpop.f32.mrb[56].mxu1  ;;  %v10939_v56 = vld [vmem:[#allocation211_spill] sm:$0xff] }
 0x3fe   : > { %v4303_v45 = vsub.f32 %v10928_v52, %v10873_v60  ;;  %v3837_v32 = vpack.c.bf16 %v3821_v31, %v3817_v12  ;;  %v9552_v6 = vmax.f32 %v4359_v29, 0.0  ;;  %v4333_v59 = vand.u32 2147483647, %v4301_v48  ;;  %v2367_v35 = vpop.f32.mrb[57].mxu1  ;;  %v10936_v48 = vld [vmem:[#allocation183_spill] sm:$0xff] }
 0x3ff   : > { %10927 = vst [vmem:[#allocation133_spill] sm:$0xff] %v9548_v17  ;;  %v4030_v51 = vpack.c.bf16 %v4002_v24, %v3998_v13  ;;  %v4031_v22 = vpack.c.bf16 %v4003_v8, %v3999_v4  ;;  %v9554_v11 = vmax.f32 %v4362_v38, 0.0  ;;  %v4334_v44 = vand.u32 2147483647, %v4302_v19  ;;  %v10935_v13 = vld [vmem:[#allocation207_spill] sm:$0xff]  ;;  %v2302_v8 = vpop.f32.mrb[60].mxu0 }
 0x400   : > { %10929 = vst [vmem:[#allocation136_spill] sm:$0xff] %v9552_v6  ;;  %v4306_v23 = vsub.f32 %v10931_v27, %v10869_v43  ;;  %5431 = vmatprep.subr.bf16.mxu1 %v3837_v32  ;;  %v9558_v42 = vmax.f32 %v4363_v20, 0.0  ;;  %v9560_v33 = vmax.f32 %v4360_v9, 0.0  ;;  %v9562_v28 = vmax.f32 %v4361_v57, 0.0  ;;  %v10937_v19 = vld [vmem:[#allocation184_spill] sm:$0xff]  ;;  %v2369_v24 = vpop.f32.mrb[58].mxu1 }
 0x401   : > { %10930 = vst [vmem:[#allocation134_spill] sm:$0xff] %v9554_v11  ;;  %v4364_v12 = vsub.f32 1.0, %v4332_v63  ;;  %v4000_v29 = vmul.f32 %v10935_v13, %v2365_v5  ;;  %5432 = vmatpush1.bf16.msra.mxu1 %v3836_v58  ;;  %5304 = vmatprep.subr.bf16.mxu0 %v4031_v22  ;;  %v4335_v38 = vand.u32 2147483647, %v4303_v45  ;;  %v4307_v4 = vsub.f32 %v10936_v48, %v10873_v60  ;;  %v10938_v20 = vld [vmem:[#allocation208_spill] sm:$0xff]  ;;  %v2304_v57 = vpop.f32.mrb[61].mxu0 }
 0x402   : > { %10932 = vst [vmem:[#allocation137_spill] sm:$0xff] %v9558_v42  ;;  %10933 = vst [vmem:[#allocation135_spill] sm:$0xff] %v9560_v33  ;;  %v4304_v53 = vsub.f32 %v10937_v19, %v10885_v41  ;;  %v4001_v31 = vmul.f32 %v10938_v20, %v2367_v35  ;;  %v4006_v9 = vmul.f32 %v10939_v56, %v2302_v8  ;;  %5305 = vmatpush1.bf16.msra.mxu0 %v4030_v51  ;;  %v10940_v32 = vld [vmem:[#allocation185_spill] sm:$0xff]  ;;  %v2371_v45 = vpop.f32.mrb[59].mxu1  ;;  %v10942_v13 = vld [vmem:[#allocation212_spill] sm:$0xff]  ;;  %v2306_v48 = vpop.f32.mrb[62].mxu0 }
 0x403   : > { %10934 = vst [vmem:[#allocation138_spill] sm:$0xff] %v9562_v28  ;;  %v4365_v63 = vsub.f32 1.0, %v4333_v59  ;;  %v4305_v58 = vsub.f32 %v10940_v32, %v10888_v21  ;;  %v10941_v5 = vld [vmem:[#allocation209_spill] sm:$0xff]  ;;  %v4007_v27 = vmul.f32 %v10942_v13, %v2304_v57  ;;  %v4366_v52 = vsub.f32 1.0, %v4334_v44  ;;  %v10943_v19 = vld [vmem:[#allocation210_spill] sm:$0xff]  ;;  %v2308_v42 = vpop.f32.mrb[63].mxu0 }
 0x404   : > { %v4004_v22 = vmul.f32 %v10941_v5, %v2369_v24  ;;  %v4338_v28 = vand.u32 2147483647, %v4306_v23  ;;  %v4005_v33 = vmul.f32 %v10943_v19, %v2371_v45  ;;  %v10944_v35 = vld [vmem:[#allocation93_spill] sm:$0xff]  ;;  %v10945_v8 = vld [vmem:[#allocation188_spill] sm:$0xff]  ;;  %v10946_v59 = vld [vmem:[#allocation139_spill] sm:$0xff]  ;;  %v9582_v5 = vmax.f32 %v4364_v12, 0.0 }
 0x405   : > { %v4010_v20 = vmul.f32 %v10944_v35, %v2306_v48  ;;  %v4308_v51 = vsub.f32 %v10945_v8, %v10885_v41  ;;  %v4309_v56 = vsub.f32 %v10946_v59, %v10888_v21  ;;  %v10947_v11 = vld [vmem:[#allocation98_spill] sm:$0xff]  ;;  %v4367_v57 = vsub.f32 1.0, %v4335_v38  ;;  %v2375_v17 = vpop.f32.mrb[60].mxu1  ;;  %v2312_v12 = vpop.f32.mrb[64].mxu0 }
 0x406   : > { %v4032_v32 = vpack.c.bf16 %v4004_v22, %v4000_v29  ;;  %v4011_v24 = vmul.f32 %v10947_v11, %v2308_v42  ;;  %10948 = vst [vmem:[#allocation141_spill] sm:$0xff] %v9582_v5  ;;  %v4033_v13 = vpack.c.bf16 %v4005_v33, %v4001_v31  ;;  %v4339_v23 = vand.u32 2147483647, %v4307_v4  ;;  %v10951_v22 = vld [vmem:[#allocation99_spill] sm:$0xff]  ;;  %v2377_v42 = vpop.f32.mrb[61].mxu1 }
 0x407   : > { %v4034_v44 = vpack.c.bf16 %v4010_v20, %v4006_v9  ;;  %v4336_v6 = vand.u32 2147483647, %v4304_v53  ;;  %v9584_v45 = vmax.f32 %v4365_v63, 0.0  ;;  %v4370_v48 = vsub.f32 1.0, %v4338_v28  ;;  %v10954_v28 = vld [vmem:[#allocation144_spill] sm:$0xff]  ;;  %v10956_v9 = vld [vmem:[#allocation215_spill] sm:$0xff] }
 0x408   : > { %v4035_v19 = vpack.c.bf16 %v4011_v24, %v4007_v27  ;;  %v4337_v35 = vand.u32 2147483647, %v4305_v58  ;;  %5433 = vmatprep.subr.bf16.mxu1 %v4033_v13  ;;  %v9586_v8 = vmax.f32 %v4366_v52, 0.0  ;;  %v4340_v59 = vand.u32 2147483647, %v4308_v51  ;;  %v10953_v27 = vld [vmem:[#allocation140_spill] sm:$0xff] }
 0x409   : > { %10949 = vst [vmem:[#allocation142_spill] sm:$0xff] %v9584_v45  ;;  %v4341_v29 = vand.u32 2147483647, %v4309_v56  ;;  %v4008_v11 = vmul.f32 %v10951_v22, %v2375_v17  ;;  %5434 = vmatpush1.bf16.msra.mxu1 %v4032_v32  ;;  %v9589_v33 = vmax.f32 %v4367_v57, 0.0  ;;  %v4310_v38 = vsub.f32 %v10953_v27, %v10869_v43  ;;  %v10955_v53 = vld [vmem:[#allocation104_spill] sm:$0xff]  ;;  %v2379_v52 = vpop.f32.mrb[62].mxu1 }
 0x40a   : > { %10950 = vst [vmem:[#allocation143_spill] sm:$0xff] %v9586_v8  ;;  %5306 = vmatprep.subr.bf16.mxu0 %v4035_v19  ;;  %v4311_v4 = vsub.f32 %v10954_v28, %v10873_v60  ;;  %v4009_v31 = vmul.f32 %v10955_v53, %v2377_v42  ;;  %v4014_v63 = vmul.f32 %v10956_v9, %v2312_v12  ;;  %v2314_v58 = vpop.f32.mrb[65].mxu0  ;;  %v4371_v17 = vsub.f32 1.0, %v4339_v23  ;;  %v10957_v32 = vld [vmem:[#allocation213_spill] sm:$0xff]  ;;  %v2381_v56 = vpop.f32.mrb[63].mxu1  ;;  %v10958_v24 = vld [vmem:[#allocation107_spill] sm:$0xff] }
 0x40b   : > { %10952 = vst [vmem:[#allocation147_spill] sm:$0xff] %v9589_v33  ;;  %5307 = vmatpush1.bf16.msra.mxu0 %v4034_v44  ;;  %v4368_v20 = vsub.f32 1.0, %v4336_v6  ;;  %v4012_v51 = vmul.f32 %v10957_v32, %v2379_v52  ;;  %v4015_v57 = vmul.f32 %v10958_v24, %v2314_v58  ;;  %v2316_v13 = vpop.f32.mrb[66].mxu0  ;;  %v4369_v19 = vsub.f32 1.0, %v4337_v35  ;;  %v10959_v22 = vld [vmem:[#allocation193_spill] sm:$0xff]  ;;  %v10960_v28 = vld [vmem:[#allocation214_spill] sm:$0xff] }
 0x40c   : > { %v4314_v27 = vsub.f32 %v10959_v22, %v10869_v43  ;;  %v4013_v45 = vmul.f32 %v10960_v28, %v2381_v56  ;;  %v10961_v42 = vld [vmem:[#allocation108_spill] sm:$0xff]  ;;  %v2318_v33 = vpop.f32.mrb[67].mxu0  ;;  %v4372_v12 = vsub.f32 1.0, %v4340_v59  ;;  %v4373_v9 = vsub.f32 1.0, %v4341_v29  ;;  %v10964_v35 = vld [vmem:[#allocation195_spill] sm:$0xff]  ;;  %v10966_v56 = vld [vmem:[#allocation149_spill] sm:$0xff] }
 0x40d   : > { %v4018_v53 = vmul.f32 %v10961_v42, %v2316_v13  ;;  %v4036_v44 = vpack.c.bf16 %v4012_v51, %v4008_v11  ;;  %v10962_v23 = vld [vmem:[#allocation84_spill] sm:$0xff]  ;;  %v4342_v5 = vand.u32 2147483647, %v4310_v38  ;;  %v4343_v52 = vand.u32 2147483647, %v4311_v4  ;;  %v2385_v29 = vpop.f32.mrb[64].mxu1 }
 0x40e   : > { %v4019_v6 = vmul.f32 %v10962_v23, %v2318_v33  ;;  %v4037_v32 = vpack.c.bf16 %v4013_v45, %v4009_v31  ;;  %v9604_v58 = vmax.f32 %v4370_v48, 0.0  ;;  %v4315_v24 = vsub.f32 %v10964_v35, %v10873_v60  ;;  %v10971_v38 = vld [vmem:[#allocation109_spill] sm:$0xff]  ;;  %v2387_v60 = vpop.f32.mrb[65].mxu1  ;;  %v2322_v31 = vpop.f32.mrb[68].mxu0 }
 0x40f   : > { %v4038_v8 = vpack.c.bf16 %v4018_v53, %v4014_v63  ;;  %v9608_v22 = vmax.f32 %v4371_v17, 0.0  ;;  %v4346_v28 = vand.u32 2147483647, %v4314_v27  ;;  %v4312_v59 = vsub.f32 %v10966_v56, %v10885_v41  ;;  %v10972_v17 = vld [vmem:[#allocation196_spill] sm:$0xff]  ;;  %v2389_v13 = vpop.f32.mrb[66].mxu1  ;;  %v2324_v53 = vpop.f32.mrb[69].mxu0 }
 0x410   : > { %10963 = vst [vmem:[#allocation145_spill] sm:$0xff] %v9604_v58  ;;  %v4039_v43 = vpack.c.bf16 %v4019_v6, %v4015_v57  ;;  %5435 = vmatprep.subr.bf16.mxu1 %v4037_v32  ;;  %v9612_v11 = vmax.f32 %v4368_v20, 0.0  ;;  %v9614_v33 = vmax.f32 %v4369_v19, 0.0  ;;  %v9616_v45 = vmax.f32 %v4372_v12, 0.0  ;;  %v10973_v57 = vld [vmem:[#allocation86_spill] sm:$0xff]  ;;  %v10974_v19 = vld [vmem:[#allocation111_spill] sm:$0xff] }
 0x411   : > { %10965 = vst [vmem:[#allocation148_spill] sm:$0xff] %v9608_v22  ;;  %v9618_v48 = vmax.f32 %v4373_v9, 0.0  ;;  %v4016_v4 = vmul.f32 %v10971_v38, %v2385_v29  ;;  %5436 = vmatpush1.bf16.msra.mxu1 %v4036_v44  ;;  %v4374_v27 = vsub.f32 1.0, %v4342_v5  ;;  %v4375_v63 = vsub.f32 1.0, %v4343_v52  ;;  %v10975_v9 = vld [vmem:[#allocation197_spill] sm:$0xff]  ;;  %v2391_v32 = vpop.f32.mrb[67].mxu1 }
 0x412   : > { %10967 = vst [vmem:[#allocation146_spill] sm:$0xff] %v9612_v11  ;;  %10968 = vst [vmem:[#allocation150_spill] sm:$0xff] %v9614_v33  ;;  %5308 = vmatprep.subr.bf16.mxu0 %v4039_v43  ;;  %v4313_v51 = vsub.f32 %v10972_v17, %v10888_v21  ;;  %v4017_v20 = vmul.f32 %v10973_v57, %v2387_v60  ;;  %v4022_v42 = vmul.f32 %v10974_v19, %v2322_v31  ;;  %v10976_v6 = vld [vmem:[#allocation85_spill] sm:$0xff]  ;;  %v2326_v52 = vpop.f32.mrb[70].mxu0  ;;  %v10978_v17 = vld [vmem:[#allocation110_spill] sm:$0xff] }
 0x413   : > { %10969 = vst [vmem:[#allocation153_spill] sm:$0xff] %v9616_v45  ;;  %10970 = vst [vmem:[#allocation155_spill] sm:$0xff] %v9618_v48  ;;  %5309 = vmatpush1.bf16.msra.mxu0 %v4038_v8  ;;  %v4347_v12 = vand.u32 2147483647, %v4315_v24  ;;  %v4316_v23 = vsub.f32 %v10975_v9, %v10885_v41  ;;  %v4020_v44 = vmul.f32 %v10976_v6, %v2389_v13  ;;  %v10977_v43 = vld [vmem:[#allocation97_spill] sm:$0xff]  ;;  %v4378_v29 = vsub.f32 1.0, %v4346_v28 }
 0x414   : > { %v4023_v5 = vmul.f32 %v10977_v43, %v2324_v53  ;;  %v4344_v38 = vand.u32 2147483647, %v4312_v59  ;;  %v4021_v56 = vmul.f32 %v10978_v17, %v2391_v32  ;;  %v10979_v60 = vld [vmem:[#allocation96_spill] sm:$0xff]  ;;  %v2328_v35 = vpop.f32.mrb[71].mxu0  ;;  %v10980_v31 = vld [vmem:[#allocation198_spill] sm:$0xff]  ;;  %v10981_v24 = vld [vmem:[#allocation63_spill] sm:$0xff] }
 0x415   : > { %v4026_v57 = vmul.f32 %v10979_v60, %v2326_v52  ;;  %v4317_v8 = vsub.f32 %v10980_v31, %v10888_v21  ;;  %v10982_v19 = vld [vmem:[#allocation37_spill] sm:$0xff]  ;;  %v4040_v41 = vpack.c.bf16 %v4020_v44, %v4016_v4  ;;  %v10983_v9 = vld [vmem:[#allocation35_spill] sm:$0xff]  ;;  %v4345_v6 = vand.u32 2147483647, %v4313_v51  ;;  %v10984_v45 = vld [vmem:[#allocation70_spill] sm:$0xff]  ;;  %v2395_v44 = vpop.f32.mrb[68].mxu1 }
 0x416   : > { %v4494_v48 = vsub.f32 %v10982_v19, %v10981_v24  ;;  %v4027_v13 = vmul.f32 %v10983_v9, %v2328_v35  ;;  %v10985_v53 = vld [vmem:[#allocation38_spill] sm:$0xff]  ;;  %v4041_v28 = vpack.c.bf16 %v4021_v56, %v4017_v20  ;;  %v9638_v33 = vmax.f32 %v4374_v27, 0.0  ;;  %v10987_v17 = vld [vmem:[#allocation39_spill] sm:$0xff]  ;;  %v2397_v20 = vpop.f32.mrb[69].mxu1  ;;  %v2438_v27 = vpop.f32.mrb[72].mxu0 }
 0x417   : > { %v4495_v43 = vsub.f32 %v10985_v53, %v10984_v45  ;;  %v4042_v59 = vpack.c.bf16 %v4026_v57, %v4022_v42  ;;  %v4498_v32 = vsub.f32 %v10987_v17, %v10981_v24  ;;  %v9642_v60 = vld [vmem:[#allocation11] ss:$20 sps:$4 sm:$0x1f]   ;;  %v9644_v21 = vmax.f32 %v4375_v63, 0.0  ;;  %v2399_v17 = vpop.f32.mrb[70].mxu1  ;;  %v2440_v31 = vpop.f32.mrb[73].mxu0 }
 0x418   : > { %10986 = vst [vmem:[#allocation27_spill] sm:$0xff] %v9638_v33  ;;  %v4043_v52 = vpack.c.bf16 %v4027_v13, %v4023_v5  ;;  %v4379_v19 = vsub.f32 1.0, %v4347_v12  ;;  %v4348_v4 = vand.u32 2147483647, %v4316_v23  ;;  %5437 = vmatprep.subr.bf16.mxu1 %v4041_v28  ;;  %v4376_v35 = vsub.f32 1.0, %v4344_v38  ;;  %v10989_v53 = vld [vmem:[#allocation112_spill] sm:$0xff] }
 0x419   : > { %10988 = vst [vmem:[#allocation120_spill] sm:$0xff] %v9644_v21  ;;  %v4349_v51 = vand.u32 2147483647, %v4317_v8  ;;  %v4526_v9 = vand.u32 2147483647, %v4494_v48  ;;  %v4024_v56 = vmul.f32 %v10989_v53, %v2395_v44  ;;  %5438 = vmatpush1.bf16.msra.mxu1 %v4040_v41  ;;  %v9647_v42 = vmax.f32 %v4378_v29, 0.0 }
 0x41a   : > { %5310 = vmatprep.subr.bf16.mxu0 %v4043_v52  ;;  %v4377_v5 = vsub.f32 1.0, %v4345_v6  ;;  %v4527_v57 = vand.u32 2147483647, %v4495_v43  ;;  %v10991_v13 = vld [vmem:[#allocation117_spill] sm:$0xff]  ;;  %v4530_v38 = vand.u32 2147483647, %v4498_v32 }
 0x41b   : > { %10990 = vst [vmem:[#allocation161_spill] sm:$0xff] %v9647_v42  ;;  %v4025_v63 = vmul.f32 %v10991_v13, %v2397_v20  ;;  %v10992_v12 = vld [vmem:[#allocation81_spill] sm:$0xff]  ;;  %5311 = vmatpush1.bf16.msra.mxu0 %v4042_v59  ;;  %v10993_v48 = vld [vmem:[#allocation40_spill] sm:$0xff]  ;;  %v10994_v28 = vld [vmem:[#allocation115_spill] sm:$0xff]  ;;  %v2401_v41 = vpop.f32.mrb[71].mxu1  ;;  %v2442_v29 = vpop.f32.mrb[74].mxu0 }
 0x41c   : > { %v4206_v23 = vmul.f32 %v10992_v12, %v2438_v27  ;;  %v4499_v8 = vsub.f32 %v10993_v48, %v10984_v45  ;;  %v4028_v44 = vmul.f32 %v10994_v28, %v2399_v17  ;;  %v10995_v53 = vld [vmem:[#allocation29_spill] sm:$0xff]  ;;  %v4380_v42 = vsub.f32 1.0, %v4348_v4  ;;  %v10996_v6 = vld [vmem:[#allocation67_spill] sm:$0xff]  ;;  %v10999_v33 = vld [vmem:[#allocation82_spill] sm:$0xff]  ;;  %v2444_v12 = vpop.f32.mrb[75].mxu0 }
 0x41d   : > { %v4207_v52 = vmul.f32 %v10995_v53, %v2440_v31  ;;  %v10997_v43 = vld [vmem:[#allocation41_spill] sm:$0xff]  ;;  %v10998_v20 = vld [vmem:[#allocation119_spill] sm:$0xff]  ;;  %v4210_v27 = vmul.f32 %v10999_v33, %v2442_v29  ;;  %v4381_v59 = vsub.f32 1.0, %v4349_v51  ;;  %v4558_v32 = vsub.f32 1.0, %v4526_v9  ;;  %v11000_v22 = vld [vmem:[#allocation26_spill] sm:$0xff]  ;;  %v2511_v51 = vpop.f32.mrb[72].mxu1 }
 0x41e   : > { %v4496_v21 = vsub.f32 %v10997_v43, %v10996_v6  ;;  %v4029_v13 = vmul.f32 %v10998_v20, %v2401_v41  ;;  %v4044_v11 = vpack.c.bf16 %v4028_v44, %v4024_v56  ;;  %v4211_v48 = vmul.f32 %v11000_v22, %v2444_v12  ;;  %5313 = vmatmul.mubr.bf16.vlgmr.msra.gmra.mrb[152].mxu0 %v9642_v60  ;;  %v2513_v44 = vpop.f32.mrb[73].mxu1  ;;  %v11009_v20 = vld [vmem:[#allocation123_spill] sm:$0xff]  ;;  %v11010_v12 = vld [vmem:[#allocation126_spill] sm:$0xff] }
 0x41f   : > { %v9661_v17 = vmax.f32 %v4379_v19, 0.0  ;;  %v4559_v31 = vsub.f32 1.0, %v4527_v57  ;;  %v4238_v4 = vpack.c.bf16 %v4210_v27, %v4206_v23  ;;  %v9663_v53 = vmax.f32 %v4376_v35, 0.0  ;;  %v11003_v19 = vld [vmem:[#allocation73_spill] sm:$0xff]  ;;  %v11004_v57 = vld [vmem:[#allocation43_spill] sm:$0xff]  ;;  %v11005_v23 = vld [vmem:[#allocation32_spill] sm:$0xff] }
 0x420   : > { %v4045_v28 = vpack.c.bf16 %v4029_v13, %v4025_v63  ;;  %v4562_v43 = vsub.f32 1.0, %v4530_v38  ;;  %v4239_v58 = vpack.c.bf16 %v4211_v48, %v4207_v52  ;;  %v9665_v41 = vmax.f32 %v4377_v5, 0.0  ;;  %v2448_v38 = vpop.f32.mrb[76].mxu0  ;;  %v2515_v27 = vpop.f32.mrb[74].mxu1 }
 0x421   : > { %v4531_v33 = vand.u32 2147483647, %v4499_v8  ;;  %v4528_v29 = vand.u32 2147483647, %v4496_v21  ;;  %v9667_v9 = vmax.f32 %v4380_v42, 0.0  ;;  %v9669_v22 = vmax.f32 %v4381_v59, 0.0 }
 0x422   : > { %5439 = vmatprep.subr.bf16.mxu1 %v4045_v28  ;;  %v9671_v56 = vmax.f32 %v4558_v32, 0.0  ;;  %v4497_v63 = vsub.f32 %v11004_v57, %v11003_v19  ;;  %v4208_v35 = vmul.f32 %v11005_v23, %v2511_v51  ;;  %5323 = vmatprep.subr.bf16.mxu0 %v4239_v58  ;;  %v9676_v5 = vmax.f32 %v4559_v31, 0.0  ;;  %v11007_v21 = vld [vmem:[#allocation42_spill] sm:$0xff]  ;;  %v11008_v42 = vld [vmem:[#allocation44_spill] sm:$0xff]  ;;  %v2450_v32 = vpop.f32.mrb[77].mxu0  ;;  %v11013_v31 = vld [vmem:[#allocation125_spill] sm:$0xff] }
 0x423   : > { %11001 = vst [vmem:[#allocation116_spill] sm:$0xff] %v9667_v9  ;;  %11002 = vst [vmem:[#allocation113_spill] sm:$0xff] %v9669_v22  ;;  %5440 = vmatpush1.bf16.msra.mxu1 %v4044_v11  ;;  %v4500_v8 = vsub.f32 %v11007_v21, %v10996_v6  ;;  %v4501_v52 = vsub.f32 %v11008_v42, %v11003_v19  ;;  %v4209_v13 = vmul.f32 %v11009_v20, %v2513_v44  ;;  %v11012_v11 = vld [vmem:[#allocation45_spill] sm:$0xff]  ;;  %v2517_v51 = vpop.f32.mrb[75].mxu1  ;;  %v2452_v21 = vpop.f32.mrb[78].mxu0  ;;  %v11016_v20 = vld [vmem:[#allocation127_spill] sm:$0xff] }
 0x424   : > { %11006 = vst [vmem:[#allocation114_spill] sm:$0xff] %v9676_v5  ;;  %v4214_v59 = vmul.f32 %v11010_v12, %v2448_v38  ;;  %5324 = vmatpush1.bf16.msra.mxu0 %v4238_v4  ;;  %v9684_v48 = vmax.f32 %v4562_v43, 0.0  ;;  %v4502_v58 = vsub.f32 %v11012_v11, %v10981_v24  ;;  %v4212_v28 = vmul.f32 %v11013_v31, %v2515_v27  ;;  %v11014_v57 = vld [vmem:[#allocation129_spill] sm:$0xff]  ;;  %v11015_v5 = vld [vmem:[#allocation128_spill] sm:$0xff]  ;;  %v2454_v38 = vpop.f32.mrb[79].mxu0  ;;  %v11017_v43 = vld [vmem:[#allocation46_spill] sm:$0xff] }
 0x425   : > { %v4215_v23 = vmul.f32 %v11014_v57, %v2450_v32  ;;  %v4563_v22 = vsub.f32 1.0, %v4531_v33  ;;  %v4560_v42 = vsub.f32 1.0, %v4528_v29  ;;  %v4213_v44 = vmul.f32 %v11015_v5, %v2517_v51  ;;  %v11018_v32 = vld [vmem:[#allocation47_spill] sm:$0xff] }
 0x426   : > { %11011 = vst [vmem:[#allocation121_spill] sm:$0xff] %v9684_v48  ;;  %v4218_v9 = vmul.f32 %v11016_v20, %v2452_v21  ;;  %5442 = vmatmul.mubr.bf16.vlgmr.msra.gmra.mrb[152].mxu1 %v9642_v60  ;;  %v4529_v4 = vand.u32 2147483647, %v4497_v63  ;;  %v4503_v12 = vsub.f32 %v11017_v43, %v10984_v45  ;;  %v4240_v11 = vpack.c.bf16 %v4212_v28, %v4208_v35  ;;  %v11019_v60 = vld [vmem:[#allocation48_spill] sm:$0xff]  ;;  %v11021_v35 = vld [vmem:[#allocation87_spill] sm:$0xff] }
 0x427   : > { %v4219_v27 = vmul.f32 %v9256_v40, %v2454_v38  ;;  %v4532_v31 = vand.u32 2147483647, %v4500_v8  ;;  %v4506_v57 = vsub.f32 %v11018_v32, %v10981_v24  ;;  %v4241_v33 = vpack.c.bf16 %v4213_v44, %v4209_v13  ;;  %v11020_v43 = vld [vmem:[#allocation36_spill] sm:$0xff]  ;;  %v11023_v40 = vld [vmem:[#allocation91_spill] sm:$0xff]  ;;  %v2521_v13 = vpop.f32.mrb[76].mxu1 }
 0x428   : > { %v4242_v29 = vpack.c.bf16 %v4218_v9, %v4214_v59  ;;  %v4533_v48 = vand.u32 2147483647, %v4501_v52  ;;  %v4534_v5 = vand.u32 2147483647, %v4502_v58  ;;  %v9698_v21 = vmax.f32 %v4563_v22, 0.0  ;;  %v11025_v52 = vld [vmem:[#allocation49_spill] sm:$0xff] }
 0x429   : > { %v4243_v51 = vpack.c.bf16 %v4219_v27, %v4215_v23  ;;  %v9700_v20 = vmax.f32 %v4560_v42, 0.0  ;;  %v4507_v63 = vsub.f32 %v11019_v60, %v10984_v45  ;;  %v9706_v28 = vrot.slane %v11021_v35, %v11020_v43  ;;  %5452 = vmatprep.subr.bf16.mxu1 %v4241_v33  ;;  %v6425_v59 = vld [vmem:[#allocation11 + $0xc] ss:$20 sps:$4 sm:$0x1f]   ;;  %v2523_v23 = vpop.f32.mrb[77].mxu1  ;;  %v2458_v42 = vpop.f32.mrb[80].mxu0 }
 0x42a   : > { %v9710_v8 = vrot.slane %v11023_v40, %v11020_v43  ;;  %v4535_v9 = vand.u32 2147483647, %v4503_v12  ;;  %v4504_v22 = vsub.f32 %v11025_v52, %v10996_v6  ;;  %v4216_v58 = vmul.f32 %v9266_v18, %v2521_v13  ;;  %5453 = vmatpush1.bf16.msra.mxu1 %v4240_v11  ;;  %v2525_v60 = vpop.f32.mrb[78].mxu1  ;;  %v2460_v33 = vpop.f32.mrb[81].mxu0  ;;  %5355 = vmatprep.mubr.bf16.mxu0 %v6425_v59 }
 0x42b   : > { %11022 = vst [vmem:[#allocation103_spill] sm:$0xff] %v9706_v28  ;;  %5325 = vmatprep.subr.bf16.mxu0 %v4243_v51  ;;  %v4561_v44 = vsub.f32 1.0, %v4529_v4  ;;  %v4564_v38 = vsub.f32 1.0, %v4532_v31  ;;  %v4538_v27 = vand.u32 2147483647, %v4506_v57  ;;  %v4217_v32 = vmul.f32 %v9268_v30, %v2523_v23  ;;  %v2527_v18 = vpop.f32.mrb[79].mxu1  ;;  %5484 = vmatprep.mubr.bf16.mxu1 %v6425_v59 }
 0x42c   : > { %11024 = vst [vmem:[#allocation122_spill] sm:$0xff] %v9710_v8  ;;  %v4222_v35 = vmul.f32 %v9279_v55, %v2458_v42  ;;  %5326 = vmatpush1.bf16.msra.mxu0 %v4242_v29  ;;  %v4565_v12 = vsub.f32 1.0, %v4533_v48  ;;  %v4566_v40 = vsub.f32 1.0, %v4534_v5  ;;  %v4220_v52 = vmul.f32 %v9275_v16, %v2525_v60  ;;  %v2462_v13 = vpop.f32.mrb[82].mxu0  ;;  %v11026_v4 = vld [vmem:[#allocation50_spill] sm:$0xff]  ;;  %v11027_v42 = vld [vmem:[#allocation51_spill] sm:$0xff] }
 0x42d   : > { %v4223_v11 = vmul.f32 %v9339_v47, %v2460_v33  ;;  %v4539_v51 = vand.u32 2147483647, %v4507_v63  ;;  %v4505_v31 = vsub.f32 %v11026_v4, %v11003_v19  ;;  %v4221_v30 = vmul.f32 %v9277_v61, %v2527_v18  ;;  %v2464_v57 = vpop.f32.mrb[83].mxu0  ;;  %v11029_v18 = vld [vmem:[#allocation53_spill] sm:$0xff] }
 0x42e   : > { %v4226_v55 = vmul.f32 %v9349_v1, %v2462_v13  ;;  %v4567_v29 = vsub.f32 1.0, %v4535_v9  ;;  %v4536_v48 = vand.u32 2147483647, %v4504_v22  ;;  %v4244_v5 = vpack.c.bf16 %v4220_v52, %v4216_v58  ;;  %v2531_v22 = vpop.f32.mrb[80].mxu1  ;;  %v11028_v52 = vld [vmem:[#allocation52_spill] sm:$0xff] }
 0x42f   : > { %v4227_v23 = vmul.f32 %v9360_v7, %v2464_v57  ;;  %v4570_v16 = vsub.f32 1.0, %v4538_v27  ;;  %v4508_v47 = vsub.f32 %v11027_v42, %v10996_v6  ;;  %v4245_v60 = vpack.c.bf16 %v4221_v30, %v4217_v32  ;;  %v11031_v57 = vld [vmem:[#allocation55_spill] sm:$0xff] }
 0x430   : > { %v4246_v63 = vpack.c.bf16 %v4226_v55, %v4222_v35  ;;  %v9726_v33 = vmax.f32 %v4561_v44, 0.0  ;;  %v9728_v4 = vmax.f32 %v4564_v38, 0.0  ;;  %v9730_v61 = vmax.f32 %v4565_v12, 0.0  ;;  %v2533_v35 = vpop.f32.mrb[81].mxu1  ;;  %v2468_v38 = vpop.f32.mrb[84].mxu0  ;;  %v11030_v55 = vld [vmem:[#allocation54_spill] sm:$0xff] }
 0x431   : > { %v4247_v59 = vpack.c.bf16 %v4227_v23, %v4223_v11  ;;  %v9732_v1 = vmax.f32 %v4566_v40, 0.0  ;;  %v4537_v9 = vand.u32 2147483647, %v4505_v31  ;;  %5454 = vmatprep.subr.bf16.mxu1 %v4245_v60  ;;  %v9734_v58 = vmax.f32 %v4567_v29, 0.0  ;;  %v2535_v31 = vpop.f32.mrb[82].mxu1  ;;  %v2470_v30 = vpop.f32.mrb[85].mxu0 }
 0x432   : > { %v4571_v7 = vsub.f32 1.0, %v4539_v51  ;;  %v4568_v27 = vsub.f32 1.0, %v4536_v48  ;;  %v4509_v32 = vsub.f32 %v11028_v52, %v11003_v19  ;;  %v4224_v44 = vmul.f32 %v9362_v37, %v2531_v22  ;;  %5455 = vmatpush1.bf16.msra.mxu1 %v4244_v5  ;;  %v2537_v5 = vpop.f32.mrb[83].mxu1  ;;  %v11033_v22 = vld [vmem:[#allocation57_spill] sm:$0xff] }
 0x433   : > { %5327 = vmatprep.subr.bf16.mxu0 %v4247_v59  ;;  %v9739_v12 = vmax.f32 %v4570_v16, 0.0  ;;  %v4540_v40 = vand.u32 2147483647, %v4508_v47  ;;  %v4510_v11 = vsub.f32 %v11029_v18, %v10981_v24  ;;  %v4225_v13 = vmul.f32 %v9411_v50, %v2533_v35  ;;  %v2472_v16 = vpop.f32.mrb[86].mxu0  ;;  %v11032_v50 = vld [vmem:[#allocation56_spill] sm:$0xff] }
 0x434   : > { %v4230_v51 = vmul.f32 %v9427_v14, %v2468_v38  ;;  %5328 = vmatpush1.bf16.msra.mxu0 %v4246_v63  ;;  %v4511_v37 = vsub.f32 %v11030_v55, %v10984_v45  ;;  %v4514_v29 = vsub.f32 %v11031_v57, %v10981_v24  ;;  %v4228_v48 = vmul.f32 %v9420_v2, %v2535_v31  ;;  %v2474_v63 = vpop.f32.mrb[87].mxu0 }
 0x435   : > { %v4231_v23 = vmul.f32 %v9429_v10, %v2470_v30  ;;  %v4569_v42 = vsub.f32 1.0, %v4537_v9  ;;  %v4515_v47 = vsub.f32 %v11032_v50, %v10984_v45  ;;  %v4229_v14 = vmul.f32 %v9425_v62, %v2537_v5  ;;  %v2541_v5 = vpop.f32.mrb[84].mxu1 }
 0x436   : > { %v4234_v60 = vmul.f32 %v9431_v0, %v2472_v16  ;;  %v4541_v59 = vand.u32 2147483647, %v4509_v32  ;;  %v4512_v52 = vsub.f32 %v11033_v22, %v10996_v6  ;;  %v4248_v35 = vpack.c.bf16 %v4228_v48, %v4224_v44 }
 0x437   : > { %v4235_v2 = vmul.f32 %v9469_v39, %v2474_v63  ;;  %v4572_v38 = vsub.f32 1.0, %v4540_v40  ;;  %v4542_v18 = vand.u32 2147483647, %v4510_v11  ;;  %v4249_v10 = vpack.c.bf16 %v4229_v14, %v4225_v13  ;;  %v11034_v39 = vld [vmem:[#allocation58_spill] sm:$0xff]  ;;  %v2543_v13 = vpop.f32.mrb[85].mxu1 }
 0x438   : > { %v4250_v31 = vpack.c.bf16 %v4234_v60, %v4230_v51  ;;  %v9758_v9 = vmax.f32 %v4571_v7, 0.0  ;;  %v4543_v30 = vand.u32 2147483647, %v4511_v37  ;;  %v9760_v57 = vmax.f32 %v4568_v27, 0.0  ;;  %v2584_v7 = vpop.f32.mrb[88].mxu0  ;;  %v11035_v37 = vld [vmem:[#allocation59_spill] sm:$0xff] }
 0x439   : > { %v4251_v55 = vpack.c.bf16 %v4235_v2, %v4231_v23  ;;  %v4546_v62 = vand.u32 2147483647, %v4514_v29  ;;  %v4547_v0 = vand.u32 2147483647, %v4515_v47  ;;  %5456 = vmatprep.subr.bf16.mxu1 %v4249_v10  ;;  %v9762_v32 = vmax.f32 %v4569_v42, 0.0  ;;  %v2545_v23 = vpop.f32.mrb[86].mxu1 }
 0x43a   : > { %v4573_v16 = vsub.f32 1.0, %v4541_v59  ;;  %v4544_v44 = vand.u32 2147483647, %v4512_v52  ;;  %v4513_v40 = vsub.f32 %v11034_v39, %v11003_v19  ;;  %v4232_v11 = vmul.f32 %v9471_v49, %v2541_v5  ;;  %5457 = vmatpush1.bf16.msra.mxu1 %v4248_v35  ;;  %v2586_v50 = vpop.f32.mrb[89].mxu0  ;;  %v11036_v49 = vld [vmem:[#allocation61_spill] sm:$0xff]  ;;  %v2547_v63 = vpop.f32.mrb[87].mxu1 }
 0x43b   : > { %5329 = vmatprep.subr.bf16.mxu0 %v4251_v55  ;;  %v9767_v51 = vmax.f32 %v4572_v38, 0.0  ;;  %v4574_v27 = vsub.f32 1.0, %v4542_v18  ;;  %v4516_v29 = vsub.f32 %v11035_v37, %v10996_v6  ;;  %v4233_v48 = vmul.f32 %v9476_v3, %v2543_v13  ;;  %v2588_v22 = vpop.f32.mrb[90].mxu0  ;;  %v11037_v55 = vld [vmem:[#allocation62_spill] sm:$0xff]  ;;  %v11039_v37 = vld [vmem:[#allocation75_spill] sm:$0xff] }
 0x43c   : > { %v4414_v42 = vmul.f32 %v9498_v34, %v2584_v7  ;;  %5330 = vmatpush1.bf16.msra.mxu0 %v4250_v31  ;;  %v4575_v47 = vsub.f32 1.0, %v4543_v30  ;;  %v4517_v14 = vsub.f32 %v11036_v49, %v11003_v19  ;;  %v4236_v60 = vmul.f32 %v9494_v46, %v2545_v23  ;;  %v2590_v38 = vpop.f32.mrb[91].mxu0 }
 0x43d   : > { %v4415_v59 = vmul.f32 %v9502_v15, %v2586_v50  ;;  %v4578_v52 = vsub.f32 1.0, %v4546_v62  ;;  %v4579_v35 = vsub.f32 1.0, %v4547_v0  ;;  %v4237_v2 = vmul.f32 %v9496_v54, %v2547_v63 }
 0x43e   : > { %v4418_v3 = vmul.f32 %v9504_v36, %v2588_v22  ;;  %v4576_v34 = vsub.f32 1.0, %v4544_v44  ;;  %v4545_v18 = vand.u32 2147483647, %v4513_v40  ;;  %v4252_v10 = vpack.c.bf16 %v4236_v60, %v4232_v11  ;;  %v11038_v36 = vld [vmem:[#allocation64_spill] sm:$0xff]  ;;  %v2657_v40 = vpop.f32.mrb[88].mxu1  ;;  %v11041_v60 = vld [vmem:[#allocation133_spill] sm:$0xff] }
 0x43f   : > { %v4419_v31 = vmul.f32 %v9506_v26, %v2590_v38  ;;  %v4548_v30 = vand.u32 2147483647, %v4516_v29  ;;  %v4518_v46 = vsub.f32 %v11037_v55, %v10981_v24  ;;  %v4253_v5 = vpack.c.bf16 %v4237_v2, %v4233_v48  ;;  %v2659_v48 = vpop.f32.mrb[89].mxu1 }
 0x440   : > { %v4446_v39 = vpack.c.bf16 %v4418_v3, %v4414_v42  ;;  %v9782_v15 = vmax.f32 %v4573_v16, 0.0  ;;  %v4549_v62 = vand.u32 2147483647, %v4517_v14  ;;  %v9784_v13 = vmax.f32 %v4574_v27, 0.0  ;;  %v2594_v27 = vpop.f32.mrb[92].mxu0  ;;  %v2661_v14 = vpop.f32.mrb[90].mxu1 }
 0x441   : > { %v4447_v0 = vpack.c.bf16 %v4419_v31, %v4415_v59  ;;  %v9786_v54 = vmax.f32 %v4575_v47, 0.0  ;;  %v4519_v44 = vsub.f32 %v11038_v36, %v10984_v45  ;;  %5458 = vmatprep.subr.bf16.mxu1 %v4253_v5  ;;  %v9790_v26 = vmax.f32 %v4578_v52, 0.0  ;;  %v11040_v47 = vld [vmem:[#allocation130_spill] sm:$0xff]  ;;  %v2596_v59 = vpop.f32.mrb[93].mxu0  ;;  %v2663_v2 = vpop.f32.mrb[91].mxu1  ;;  %v11044_v3 = vld [vmem:[#allocation136_spill] sm:$0xff] }
 0x442   : > { %v9792_v11 = vmax.f32 %v4579_v35, 0.0  ;;  %v4577_v7 = vsub.f32 1.0, %v4545_v18  ;;  %v4522_v16 = vsub.f32 %v11039_v37, %v10981_v24  ;;  %v4416_v29 = vmul.f32 %v9526_v25, %v2657_v40  ;;  %5459 = vmatpush1.bf16.msra.mxu1 %v4252_v10  ;;  %v11042_v24 = vld [vmem:[#allocation76_spill] sm:$0xff]  ;;  %v11043_v25 = vld [vmem:[#allocation131_spill] sm:$0xff]  ;;  %v11045_v10 = vld [vmem:[#allocation77_spill] sm:$0xff] }
 0x443   : > { %5331 = vmatprep.subr.bf16.mxu0 %v4447_v0  ;;  %v9797_v23 = vmax.f32 %v4576_v34, 0.0  ;;  %v4580_v42 = vsub.f32 1.0, %v4548_v30  ;;  %v4550_v50 = vand.u32 2147483647, %v4518_v46  ;;  %v4417_v49 = vmul.f32 %v11040_v47, %v2659_v48  ;;  %v2598_v34 = vpop.f32.mrb[94].mxu0  ;;  %v11046_v30 = vld [vmem:[#allocation132_spill] sm:$0xff] }
 0x444   : > { %v4422_v63 = vmul.f32 %v11041_v60, %v2594_v27  ;;  %5332 = vmatpush1.bf16.msra.mxu0 %v4446_v39  ;;  %v4581_v22 = vsub.f32 1.0, %v4549_v62  ;;  %v4523_v52 = vsub.f32 %v11042_v24, %v10984_v45  ;;  %v4420_v35 = vmul.f32 %v11043_v25, %v2661_v14  ;;  %v11047_v46 = vld [vmem:[#allocation134_spill] sm:$0xff]  ;;  %v2600_v0 = vpop.f32.mrb[95].mxu0  ;;  %v11049_v40 = vld [vmem:[#allocation137_spill] sm:$0xff]  ;;  %v11050_v27 = vld [vmem:[#allocation79_spill] sm:$0xff] }
 0x445   : > { %v4423_v38 = vmul.f32 %v11044_v3, %v2596_v59  ;;  %v4551_v18 = vand.u32 2147483647, %v4519_v44  ;;  %v4520_v31 = vsub.f32 %v11045_v10, %v10996_v6  ;;  %v4421_v55 = vmul.f32 %v11046_v30, %v2663_v2  ;;  %v11048_v62 = vld [vmem:[#allocation78_spill] sm:$0xff]  ;;  %v2667_v3 = vpop.f32.mrb[92].mxu1 }
 0x446   : > { %v4426_v5 = vmul.f32 %v11047_v46, %v2598_v34  ;;  %v4554_v39 = vand.u32 2147483647, %v4522_v16  ;;  %v4521_v36 = vsub.f32 %v11048_v62, %v11003_v19  ;;  %v4448_v45 = vpack.c.bf16 %v4420_v35, %v4416_v29  ;;  %v11054_v30 = vld [vmem:[#allocation138_spill] sm:$0xff]  ;;  %v11055_v46 = vld [vmem:[#allocation143_spill] sm:$0xff] }
 0x447   : > { %v4427_v37 = vmul.f32 %v11049_v40, %v2600_v0  ;;  %v4582_v48 = vsub.f32 1.0, %v4550_v50  ;;  %v4524_v47 = vsub.f32 %v11050_v27, %v10996_v6  ;;  %v4449_v44 = vpack.c.bf16 %v4421_v55, %v4417_v49  ;;  %v11051_v50 = vld [vmem:[#allocation80_spill] sm:$0xff]  ;;  %v11052_v6 = vld [vmem:[#allocation135_spill] sm:$0xff] }
 0x448   : > { %v4450_v14 = vpack.c.bf16 %v4426_v5, %v4422_v63  ;;  %v9814_v60 = vmax.f32 %v4577_v7, 0.0  ;;  %v4555_v59 = vand.u32 2147483647, %v4523_v52  ;;  %v9816_v25 = vmax.f32 %v4580_v42, 0.0  ;;  %v2669_v63 = vpop.f32.mrb[93].mxu1  ;;  %v2604_v7 = vpop.f32.mrb[96].mxu0 }
 0x449   : > { %v4451_v24 = vpack.c.bf16 %v4427_v37, %v4423_v38  ;;  %v9818_v2 = vmax.f32 %v4581_v22, 0.0  ;;  %v4552_v16 = vand.u32 2147483647, %v4520_v31  ;;  %5460 = vmatprep.subr.bf16.mxu1 %v4449_v44  ;;  %v4583_v29 = vsub.f32 1.0, %v4551_v18  ;;  %v6531_v22 = vld [vmem:[#allocation14] sm:$0xff]  ;;  %v11053_v38 = vld [vmem:[#allocation65_spill] sm:$0xff] }
 0x44a   : > { %v4586_v35 = vsub.f32 1.0, %v4554_v39  ;;  %v4553_v34 = vand.u32 2147483647, %v4521_v36  ;;  %v4525_v10 = vsub.f32 %v11051_v50, %v11003_v19  ;;  %v4424_v49 = vmul.f32 %v11052_v6, %v2667_v3  ;;  %5461 = vmatpush1.bf16.msra.mxu1 %v4448_v45  ;;  %v2671_v18 = vpop.f32.mrb[94].mxu1  ;;  %v2606_v0 = vpop.f32.mrb[97].mxu0  ;;  %v6532_v39 = vld [vmem:[#allocation14 + $0x8] sm:$0xff] }
 0x44b   : > { %5333 = vmatprep.subr.bf16.mxu0 %v4451_v24  ;;  %v9823_v52 = vmax.f32 %v4582_v48, 0.0  ;;  %v4556_v42 = vand.u32 2147483647, %v4524_v47  ;;  %v4702_v31 = vsub.f32 %v6531_v22, %v11053_v38  ;;  %v4425_v55 = vmul.f32 %v11054_v30, %v2669_v63  ;;  %v11056_v62 = vld [vmem:[#allocation71_spill] sm:$0xff]  ;;  %v11057_v45 = vld [vmem:[#allocation141_spill] sm:$0xff]  ;;  %v2673_v37 = vpop.f32.mrb[95].mxu1 }
 0x44c   : > { %v4430_v5 = vmul.f32 %v11055_v46, %v2604_v7  ;;  %5334 = vmatpush1.bf16.msra.mxu0 %v4450_v14  ;;  %v4587_v19 = vsub.f32 1.0, %v4555_v59  ;;  %v4703_v36 = vsub.f32 %v6532_v39, %v11056_v62  ;;  %v4428_v40 = vmul.f32 %v11057_v45, %v2671_v18  ;;  %v11058_v48 = vld [vmem:[#allocation147_spill] sm:$0xff]  ;;  %v2608_v47 = vpop.f32.mrb[98].mxu0  ;;  %v11059_v50 = vld [vmem:[#allocation142_spill] sm:$0xff]  ;;  %v11060_v63 = vld [vmem:[#allocation145_spill] sm:$0xff] }
 0x44d   : > { %v4431_v27 = vmul.f32 %v11058_v48, %v2606_v0  ;;  %v4584_v44 = vsub.f32 1.0, %v4552_v16  ;;  %v6533_v24 = vld [vmem:[#allocation14 + $0x20] sm:$0xff]  ;;  %v4429_v6 = vmul.f32 %v11059_v50, %v2673_v37  ;;  %v4434_v7 = vmul.f32 %v11060_v63, %v2608_v47  ;;  %v2610_v22 = vpop.f32.mrb[99].mxu0  ;;  %v11061_v46 = vld [vmem:[#allocation148_spill] sm:$0xff]  ;;  %v2677_v47 = vpop.f32.mrb[96].mxu1 }
 0x44e   : > { %v4706_v3 = vsub.f32 %v6533_v24, %v11053_v38  ;;  %v4585_v14 = vsub.f32 1.0, %v4553_v34  ;;  %v4557_v59 = vand.u32 2147483647, %v4525_v10  ;;  %v4452_v30 = vpack.c.bf16 %v4428_v40, %v4424_v49  ;;  %v6535_v40 = vld [vmem:[#allocation14 + $0x10] sm:$0xff] }
 0x44f   : > { %v4435_v39 = vmul.f32 %v11061_v46, %v2610_v22  ;;  %v4588_v8 = vsub.f32 1.0, %v4556_v42  ;;  %v4734_v18 = vand.u32 2147483647, %v4702_v31  ;;  %v4453_v45 = vpack.c.bf16 %v4429_v6, %v4425_v55  ;;  %v6534_v42 = vld [vmem:[#allocation14 + $0x28] sm:$0xff]  ;;  %v11066_v55 = vld [vmem:[#allocation146_spill] sm:$0xff] }
 0x450   : > { %v4454_v28 = vpack.c.bf16 %v4434_v7, %v4430_v5  ;;  %v9835_v0 = vmax.f32 %v4583_v29, 0.0  ;;  %v9837_v16 = vmax.f32 %v4586_v35, 0.0  ;;  %v9839_v24 = vmax.f32 %v4587_v19, 0.0  ;;  %v2679_v5 = vpop.f32.mrb[97].mxu1  ;;  %v2614_v35 = vpop.f32.mrb[100].mxu0  ;;  %v11070_v7 = vld [vmem:[#allocation27_spill] sm:$0xff] }
 0x451   : > { %v4455_v48 = vpack.c.bf16 %v4435_v39, %v4431_v27  ;;  %v4735_v37 = vand.u32 2147483647, %v4703_v36  ;;  %v4738_v50 = vand.u32 2147483647, %v4706_v3  ;;  %5462 = vmatprep.subr.bf16.mxu1 %v4453_v45  ;;  %v9841_v34 = vmax.f32 %v4584_v44, 0.0  ;;  %v11068_v27 = vld [vmem:[#allocation68_spill] sm:$0xff] }
 0x452   : > { %11062 = vst [vmem:[#allocation102_spill] sm:$0xff] %v9837_v16  ;;  %11063 = vst [vmem:[#allocation30_spill] sm:$0xff] %v9839_v24  ;;  %v9843_v10 = vmax.f32 %v4585_v14, 0.0  ;;  %v4589_v49 = vsub.f32 1.0, %v4557_v59  ;;  %v4707_v31 = vsub.f32 %v6534_v42, %v11056_v62  ;;  %v4432_v29 = vmul.f32 %v11066_v55, %v2677_v47  ;;  %5463 = vmatpush1.bf16.msra.mxu1 %v4452_v30  ;;  %v11069_v44 = vld [vmem:[#allocation150_spill] sm:$0xff]  ;;  %v2681_v63 = vpop.f32.mrb[98].mxu1 }
 0x453   : > { %11064 = vst [vmem:[#allocation33_spill] sm:$0xff] %v9841_v34  ;;  %5335 = vmatprep.subr.bf16.mxu0 %v4455_v48  ;;  %v9847_v19 = vmax.f32 %v4588_v8, 0.0  ;;  %v4766_v36 = vsub.f32 1.0, %v4734_v18  ;;  %v4704_v3 = vsub.f32 %v6535_v40, %v11068_v27  ;;  %v4433_v6 = vmul.f32 %v11069_v44, %v2679_v5  ;;  %v2616_v14 = vpop.f32.mrb[101].mxu0  ;;  %v6536_v59 = vld [vmem:[#allocation14 + $0x18] sm:$0xff]  ;;  %v6537_v45 = vld [vmem:[#allocation14 + $0x30] sm:$0xff] }
 0x454   : > { %11065 = vst [vmem:[#allocation83_spill] sm:$0xff] %v9843_v10  ;;  %v4438_v22 = vmul.f32 %v11070_v7, %v2614_v35  ;;  %5336 = vmatpush1.bf16.msra.mxu0 %v4454_v28  ;;  %v11071_v46 = vld [vmem:[#allocation74_spill] sm:$0xff]  ;;  %v4708_v30 = vsub.f32 %v6537_v45, %v11068_v27  ;;  %v11072_v48 = vld [vmem:[#allocation153_spill] sm:$0xff]  ;;  %v2683_v47 = vpop.f32.mrb[99].mxu1  ;;  %v11073_v18 = vld [vmem:[#allocation120_spill] sm:$0xff]  ;;  %v2618_v55 = vpop.f32.mrb[102].mxu0 }
 0x455   : > { %11067 = vst [vmem:[#allocation118_spill] sm:$0xff] %v9847_v19  ;;  %v4705_v39 = vsub.f32 %v6536_v59, %v11071_v46  ;;  %v4436_v8 = vmul.f32 %v11072_v48, %v2681_v63  ;;  %v4439_v42 = vmul.f32 %v11073_v18, %v2616_v14  ;;  %v4767_v40 = vsub.f32 1.0, %v4735_v37  ;;  %v11074_v5 = vld [vmem:[#allocation155_spill] sm:$0xff]  ;;  %v11075_v10 = vld [vmem:[#allocation161_spill] sm:$0xff]  ;;  %v2620_v7 = vpop.f32.mrb[103].mxu0  ;;  %v6538_v34 = vld [vmem:[#allocation14 + $0x38] sm:$0xff] }
 0x456   : > { %v4770_v19 = vsub.f32 1.0, %v4738_v50  ;;  %v4437_v44 = vmul.f32 %v11074_v5, %v2683_v47  ;;  %v4442_v35 = vmul.f32 %v11075_v10, %v2618_v55  ;;  %v4739_v28 = vand.u32 2147483647, %v4707_v31  ;;  %v6539_v63 = vld [vmem:[#allocation14 + $0x40] sm:$0xff]  ;;  %v6540_v31 = vld [vmem:[#allocation14 + $0x48] sm:$0xff] }
 0x457   : > { %v4709_v59 = vsub.f32 %v6538_v34, %v11071_v46  ;;  %v4456_v43 = vpack.c.bf16 %v4436_v8, %v4432_v29  ;;  %v4443_v45 = vmul.f32 %v9661_v17, %v2620_v7  ;;  %v4736_v24 = vand.u32 2147483647, %v4704_v3  ;;  %v2687_v34 = vpop.f32.mrb[100].mxu1  ;;  %v6541_v8 = vld [vmem:[#allocation14 + $0x60] sm:$0xff] }
 0x458   : > { %v4710_v48 = vsub.f32 %v6539_v63, %v11053_v38  ;;  %v4457_v14 = vpack.c.bf16 %v4437_v44, %v4433_v6  ;;  %v4458_v18 = vpack.c.bf16 %v4442_v35, %v4438_v22  ;;  %v4737_v37 = vand.u32 2147483647, %v4705_v39  ;;  %v2689_v39 = vpop.f32.mrb[101].mxu1 }
 0x459   : > { %v4740_v50 = vand.u32 2147483647, %v4708_v30  ;;  %v4459_v16 = vpack.c.bf16 %v4443_v45, %v4439_v42  ;;  %v9861_v47 = vmax.f32 %v4589_v49, 0.0  ;;  %v9863_v10 = vmax.f32 %v4766_v36, 0.0  ;;  %v2730_v49 = vpop.f32.mrb[104].mxu0  ;;  %v2691_v44 = vpop.f32.mrb[102].mxu1 }
 0x45a   : > { %v4711_v55 = vsub.f32 %v6540_v31, %v11056_v62  ;;  %5464 = vmatprep.subr.bf16.mxu1 %v4457_v14  ;;  %v9866_v29 = vmax.f32 %v4767_v40, 0.0  ;;  %v9868_v17 = vmax.f32 %v4770_v19, 0.0  ;;  %v4741_v3 = vand.u32 2147483647, %v4709_v59  ;;  %v2732_v19 = vpop.f32.mrb[105].mxu0  ;;  %v11076_v59 = vld [vmem:[#allocation116_spill] sm:$0xff] }
 0x45b   : > { %v4714_v6 = vsub.f32 %v6541_v8, %v11053_v38  ;;  %v4440_v22 = vmul.f32 %v9663_v53, %v2687_v34  ;;  %5465 = vmatpush1.bf16.msra.mxu1 %v4456_v43  ;;  %5337 = vmatprep.subr.bf16.mxu0 %v4459_v16  ;;  %v4771_v36 = vsub.f32 1.0, %v4739_v28  ;;  %v4768_v30 = vsub.f32 1.0, %v4736_v24  ;;  %v2693_v63 = vpop.f32.mrb[103].mxu1  ;;  %v11077_v53 = vld [vmem:[#allocation114_spill] sm:$0xff]  ;;  %v2734_v43 = vpop.f32.mrb[106].mxu0  ;;  %v6542_v16 = vld [vmem:[#allocation14 + $0x68] sm:$0xff] }
 0x45c   : > { %v4742_v42 = vand.u32 2147483647, %v4710_v48  ;;  %v4441_v5 = vmul.f32 %v9665_v41, %v2689_v39  ;;  %v4622_v40 = vmul.f32 %v9671_v56, %v2730_v49  ;;  %5338 = vmatpush1.bf16.msra.mxu0 %v4458_v18  ;;  %v4769_v35 = vsub.f32 1.0, %v4737_v37  ;;  %v11078_v28 = vld [vmem:[#allocation113_spill] sm:$0xff]  ;;  %v2736_v56 = vpop.f32.mrb[107].mxu0 }
 0x45d   : > { %v4772_v7 = vsub.f32 1.0, %v4740_v50  ;;  %v4444_v45 = vmul.f32 %v11076_v59, %v2691_v44  ;;  %v4623_v14 = vmul.f32 %v11077_v53, %v2732_v19  ;;  %v9876_v31 = vand.u32 2147483647, %v4711_v55  ;;  %v11079_v48 = vld [vmem:[#allocation121_spill] sm:$0xff] }
 0x45e   : > { %v4715_v24 = vsub.f32 %v6542_v16, %v11056_v62  ;;  %v4445_v41 = vmul.f32 %v11078_v28, %v2693_v63  ;;  %v4626_v34 = vmul.f32 %v11079_v48, %v2734_v43  ;;  %v4773_v8 = vsub.f32 1.0, %v4741_v3  ;;  %v6543_v49 = vld [vmem:[#allocation14 + $0x50] sm:$0xff] }
 0x45f   : > { %v4746_v18 = vand.u32 2147483647, %v4714_v6  ;;  %v4460_v37 = vpack.c.bf16 %v4444_v45, %v4440_v22  ;;  %v4627_v50 = vmul.f32 %v9698_v21, %v2736_v56  ;;  %v4774_v39 = vsub.f32 1.0, %v4742_v42  ;;  %v2803_v6 = vpop.f32.mrb[104].mxu1  ;;  %v6544_v42 = vld [vmem:[#allocation14 + $0x58] sm:$0xff] }
 0x460   : > { %v4712_v44 = vsub.f32 %v6543_v49, %v11068_v27  ;;  %v4461_v19 = vpack.c.bf16 %v4445_v41, %v4441_v5  ;;  %v4654_v55 = vpack.c.bf16 %v4626_v34, %v4622_v40  ;;  %v9883_v59 = vmax.f32 %v4771_v36, 0.0  ;;  %v6545_v40 = vld [vmem:[#allocation14 + $0x70] sm:$0xff]  ;;  %v2805_v45 = vpop.f32.mrb[105].mxu1  ;;  %v6546_v34 = vld [vmem:[#allocation14 + $0x78] sm:$0xff] }
 0x461   : > { %v9885_v53 = vmax.f32 %v4768_v30, 0.0  ;;  %v4655_v16 = vpack.c.bf16 %v4627_v50, %v4623_v14  ;;  %v9887_v63 = vmax.f32 %v4769_v35, 0.0  ;;  %v9889_v43 = vmax.f32 %v4772_v7, 0.0  ;;  %v2740_v35 = vpop.f32.mrb[108].mxu0  ;;  %v2807_v41 = vpop.f32.mrb[106].mxu1 }
 0x462   : > { %v4747_v3 = vand.u32 2147483647, %v4715_v24  ;;  %5466 = vmatprep.subr.bf16.mxu1 %v4461_v19  ;;  %v9891_v22 = vmax.f32 %v4773_v8, 0.0  ;;  %v4775_v21 = vsub.f32 1.0, %v9876_v31  ;;  %v4713_v5 = vsub.f32 %v6544_v42, %v11071_v46  ;;  %v2742_v48 = vpop.f32.mrb[109].mxu0  ;;  %v6547_v8 = vld [vmem:[#allocation14 + $0x80] sm:$0xff] }
 0x463   : > { %v4716_v36 = vsub.f32 %v6545_v40, %v11068_v27  ;;  %v4624_v30 = vmul.f32 %v9700_v20, %v2803_v6  ;;  %5467 = vmatpush1.bf16.msra.mxu1 %v4460_v37  ;;  %5339 = vmatprep.subr.bf16.mxu0 %v4655_v16  ;;  %v9897_v7 = vmax.f32 %v4774_v39, 0.0  ;;  %v4778_v14 = vsub.f32 1.0, %v4746_v18  ;;  %v2809_v50 = vpop.f32.mrb[107].mxu1  ;;  %v2744_v18 = vpop.f32.mrb[110].mxu0 }
 0x464   : > { %v4744_v24 = vand.u32 2147483647, %v4712_v44  ;;  %v4625_v28 = vmul.f32 %v9726_v33, %v2805_v45  ;;  %v4630_v31 = vmul.f32 %v9732_v1, %v2740_v35  ;;  %5340 = vmatpush1.bf16.msra.mxu0 %v4654_v55  ;;  %v4717_v56 = vsub.f32 %v6546_v34, %v11071_v46  ;;  %v6548_v44 = vld [vmem:[#allocation14 + $0x88] sm:$0xff]  ;;  %v2746_v55 = vpop.f32.mrb[111].mxu0 }
 0x465   : > { %v4718_v20 = vsub.f32 %v6547_v8, %v11053_v38  ;;  %v4628_v37 = vmul.f32 %v9728_v4, %v2807_v41  ;;  %v4631_v39 = vmul.f32 %v9734_v58, %v2742_v48  ;;  %v4779_v49 = vsub.f32 1.0, %v4747_v3  ;;  %v6549_v4 = vld [vmem:[#allocation14 + $0xa0] sm:$0xff] }
 0x466   : > { %v4719_v33 = vsub.f32 %v6548_v44, %v11056_v62  ;;  %v4629_v1 = vmul.f32 %v9730_v61, %v2809_v50  ;;  %v4634_v19 = vmul.f32 %v9739_v12, %v2744_v18  ;;  %v4745_v16 = vand.u32 2147483647, %v4713_v5  ;;  %v2813_v50 = vpop.f32.mrb[108].mxu1 }
 0x467   : > { %v4748_v6 = vand.u32 2147483647, %v4716_v36  ;;  %v4656_v42 = vpack.c.bf16 %v4628_v37, %v4624_v30  ;;  %v4635_v40 = vmul.f32 %v9758_v9, %v2746_v55  ;;  %v4776_v45 = vsub.f32 1.0, %v4744_v24  ;;  %v6550_v30 = vld [vmem:[#allocation14 + $0xa8] sm:$0xff] }
 0x468   : > { %v4722_v35 = vsub.f32 %v6549_v4, %v11053_v38  ;;  %v4657_v58 = vpack.c.bf16 %v4629_v1, %v4625_v28  ;;  %v4658_v41 = vpack.c.bf16 %v4634_v19, %v4630_v31  ;;  %v9910_v3 = vmax.f32 %v4775_v21, 0.0  ;;  %v2815_v31 = vpop.f32.mrb[109].mxu1  ;;  %v2750_v21 = vpop.f32.mrb[112].mxu0  ;;  %v6552_v1 = vld [vmem:[#allocation14 + $0x98] sm:$0xff] }
 0x469   : > { %v4749_v48 = vand.u32 2147483647, %v4717_v56  ;;  %v4659_v34 = vpack.c.bf16 %v4635_v40, %v4631_v39  ;;  %v9912_v8 = vmax.f32 %v4778_v14, 0.0  ;;  %v4750_v61 = vand.u32 2147483647, %v4718_v20  ;;  %v6551_v20 = vld [vmem:[#allocation14 + $0x90] sm:$0xff] }
 0x46a   : > { %v4751_v12 = vand.u32 2147483647, %v4719_v33  ;;  %5468 = vmatprep.subr.bf16.mxu1 %v4657_v58  ;;  %v9914_v5 = vmax.f32 %v4779_v49, 0.0  ;;  %v4777_v36 = vsub.f32 1.0, %v4745_v16  ;;  %v4780_v9 = vsub.f32 1.0, %v4748_v6  ;;  %v2817_v18 = vpop.f32.mrb[110].mxu1 }
 0x46b   : > { %v4723_v24 = vsub.f32 %v6550_v30, %v11056_v62  ;;  %v4632_v28 = vmul.f32 %v9760_v57, %v2813_v50  ;;  %5469 = vmatpush1.bf16.msra.mxu1 %v4656_v42  ;;  %5341 = vmatprep.subr.bf16.mxu0 %v4659_v34  ;;  %v9918_v56 = vmax.f32 %v4776_v45, 0.0  ;;  %v4754_v14 = vand.u32 2147483647, %v4722_v35  ;;  %v2752_v44 = vpop.f32.mrb[113].mxu0  ;;  %v2819_v55 = vpop.f32.mrb[111].mxu1  ;;  %v6553_v35 = vld [vmem:[#allocation14 + $0xb0] sm:$0xff] }
 0x46c   : > { %v4720_v37 = vsub.f32 %v6551_v20, %v11068_v27  ;;  %v4633_v39 = vmul.f32 %v9762_v32, %v2815_v31  ;;  %v4638_v49 = vmul.f32 %v9784_v13, %v2750_v21  ;;  %5342 = vmatpush1.bf16.msra.mxu0 %v4658_v41  ;;  %v4781_v33 = vsub.f32 1.0, %v4749_v48  ;;  %v2754_v6 = vpop.f32.mrb[114].mxu0  ;;  %v2823_v21 = vpop.f32.mrb[112].mxu1  ;;  %v6555_v20 = vld [vmem:[#allocation14 + $0xc0] sm:$0xff] }
 0x46d   : > { %v4721_v57 = vsub.f32 %v6552_v1, %v11071_v46  ;;  %v4636_v19 = vmul.f32 %v9767_v51, %v2817_v18  ;;  %v4639_v16 = vmul.f32 %v9786_v54, %v2752_v44  ;;  %v4782_v42 = vsub.f32 1.0, %v4750_v61  ;;  %v2756_v4 = vpop.f32.mrb[115].mxu0 }
 0x46e   : > { %v4783_v40 = vsub.f32 1.0, %v4751_v12  ;;  %v4637_v45 = vmul.f32 %v9782_v15, %v2819_v55  ;;  %v4642_v32 = vmul.f32 %v9790_v26, %v2754_v6  ;;  %v4755_v13 = vand.u32 2147483647, %v4723_v24  ;;  %v6554_v26 = vld [vmem:[#allocation14 + $0xb8] sm:$0xff] }
 0x46f   : > { %v4724_v58 = vsub.f32 %v6553_v35, %v11068_v27  ;;  %v4660_v41 = vpack.c.bf16 %v4636_v19, %v4632_v28  ;;  %v4643_v48 = vmul.f32 %v9792_v11, %v2756_v4  ;;  %v4786_v34 = vsub.f32 1.0, %v4754_v14  ;;  %v6557_v4 = vld [vmem:[#allocation14 + $0xe0] sm:$0xff] }
 0x470   : > { %v4752_v51 = vand.u32 2147483647, %v4720_v37  ;;  %v4661_v50 = vpack.c.bf16 %v4637_v45, %v4633_v39  ;;  %v4662_v30 = vpack.c.bf16 %v4642_v32, %v4638_v49  ;;  %v9930_v54 = vmax.f32 %v4777_v36, 0.0  ;;  %v2825_v39 = vpop.f32.mrb[113].mxu1 }
 0x471   : > { %v4753_v61 = vand.u32 2147483647, %v4721_v57  ;;  %v4663_v12 = vpack.c.bf16 %v4643_v48, %v4639_v16  ;;  %v9932_v31 = vmax.f32 %v4780_v9, 0.0  ;;  %v9934_v15 = vmax.f32 %v4781_v33, 0.0  ;;  %v2760_v9 = vpop.f32.mrb[116].mxu0  ;;  %v2827_v1 = vpop.f32.mrb[114].mxu1 }
 0x472   : > { %v4725_v24 = vsub.f32 %v6554_v26, %v11071_v46  ;;  %5470 = vmatprep.subr.bf16.mxu1 %v4661_v50  ;;  %v9937_v28 = vmax.f32 %v4782_v42, 0.0  ;;  %v9939_v11 = vmax.f32 %v4783_v40, 0.0  ;;  %v4756_v14 = vand.u32 2147483647, %v4724_v58  ;;  %v2762_v19 = vpop.f32.mrb[117].mxu0  ;;  %v6556_v16 = vld [vmem:[#allocation14 + $0xc8] sm:$0xff] }
 0x473   : > { %v4726_v36 = vsub.f32 %v6555_v20, %v11053_v38  ;;  %v4640_v37 = vmul.f32 %v9797_v23, %v2823_v21  ;;  %5471 = vmatpush1.bf16.msra.mxu1 %v4660_v41  ;;  %5343 = vmatprep.subr.bf16.mxu0 %v4663_v12  ;;  %v9943_v18 = vmax.f32 %v4786_v34, 0.0  ;;  %v4787_v49 = vsub.f32 1.0, %v4755_v13  ;;  %v2829_v42 = vpop.f32.mrb[115].mxu1  ;;  %v2764_v45 = vpop.f32.mrb[118].mxu0 }
 0x474   : > { %v4784_v44 = vsub.f32 1.0, %v4752_v51  ;;  %v4641_v33 = vmul.f32 %v9814_v60, %v2825_v39  ;;  %v4646_v57 = vmul.f32 %v9823_v52, %v2760_v9  ;;  %5344 = vmatpush1.bf16.msra.mxu0 %v4662_v30  ;;  %v4785_v55 = vsub.f32 1.0, %v4753_v61  ;;  %v11080_v52 = vld [vmem:[#allocation102_spill] sm:$0xff]  ;;  %v2766_v58 = vpop.f32.mrb[119].mxu0 }
 0x475   : > { %v4727_v6 = vsub.f32 %v6556_v16, %v11056_v62  ;;  %v4644_v23 = vmul.f32 %v9816_v25, %v2827_v1  ;;  %v4647_v40 = vmul.f32 %v9835_v0, %v2762_v19  ;;  %v9950_v32 = vand.u32 2147483647, %v4725_v24  ;;  %v11081_v51 = vld [vmem:[#allocation30_spill] sm:$0xff]  ;;  %v6558_v25 = vld [vmem:[#allocation14 + $0xe8] sm:$0xff]  ;;  %v6559_v0 = vld [vmem:[#allocation14 + $0xd0] sm:$0xff] }
 0x476   : > { %v4730_v60 = vsub.f32 %v6557_v4, %v11053_v38  ;;  %v4645_v13 = vmul.f32 %v9818_v2, %v2829_v42  ;;  %v4650_v35 = vmul.f32 %v11080_v52, %v2764_v45  ;;  %v4788_v41 = vsub.f32 1.0, %v4756_v14  ;;  %v6560_v9 = vld [vmem:[#allocation14 + $0xd8] sm:$0xff]  ;;  %v11082_v1 = vld [vmem:[#allocation36_spill] sm:$0xff]  ;;  %v11084_v19 = vld [vmem:[#allocation33_spill] sm:$0xff] }
 0x477   : > { %v4758_v48 = vand.u32 2147483647, %v4726_v36  ;;  %v4664_v34 = vpack.c.bf16 %v4644_v23, %v4640_v37  ;;  %v4651_v50 = vmul.f32 %v11081_v51, %v2766_v58  ;;  %v4731_v30 = vsub.f32 %v6558_v25, %v11056_v62  ;;  %v2833_v36 = vpop.f32.mrb[116].mxu1  ;;  %v11085_v42 = vld [vmem:[#allocation83_spill] sm:$0xff] }
 0x478   : > { %v4728_v61 = vsub.f32 %v6559_v0, %v11068_v27  ;;  %v4665_v12 = vpack.c.bf16 %v4645_v13, %v4641_v33  ;;  %v4666_v26 = vpack.c.bf16 %v4650_v35, %v4646_v57  ;;  %v9958_v24 = vmax.f32 %v4787_v49, 0.0  ;;  %v11083_v49 = vld [vmem:[#allocation94_spill] sm:$0xff]  ;;  %v2835_v16 = vpop.f32.mrb[117].mxu1  ;;  %v6561_v13 = vld [vmem:[#allocation14 + $0xf0] sm:$0xff] }
 0x479   : > { %v4759_v38 = vand.u32 2147483647, %v4727_v6  ;;  %v4667_v2 = vpack.c.bf16 %v4651_v50, %v4647_v40  ;;  %v9960_v21 = vmax.f32 %v4784_v44, 0.0  ;;  %v9962_v20 = vmax.f32 %v4785_v55, 0.0  ;;  %v2876_v55 = vpop.f32.mrb[120].mxu0  ;;  %v2837_v45 = vpop.f32.mrb[118].mxu1 }
 0x47a   : > { %v4762_v14 = vand.u32 2147483647, %v4730_v60  ;;  %5472 = vmatprep.subr.bf16.mxu1 %v4665_v12  ;;  %v9964_v37 = vmax.f32 %v4788_v41, 0.0  ;;  %v4789_v62 = vsub.f32 1.0, %v9950_v32  ;;  %v4790_v39 = vsub.f32 1.0, %v4758_v48  ;;  %v2878_v4 = vpop.f32.mrb[121].mxu0 }
 0x47b   : > { %v4729_v33 = vsub.f32 %v6560_v9, %v11071_v46  ;;  %v9970_v57 = vrot.slane %v11083_v49, %v11082_v1  ;;  %v4648_v44 = vmul.f32 %v11084_v19, %v2833_v36  ;;  %5473 = vmatpush1.bf16.msra.mxu1 %v4664_v34  ;;  %5345 = vmatprep.subr.bf16.mxu0 %v4667_v2  ;;  %v4763_v6 = vand.u32 2147483647, %v4731_v30  ;;  %v11086_v35 = vld [vmem:[#allocation118_spill] sm:$0xff]  ;;  %v2839_v41 = vpop.f32.mrb[119].mxu1  ;;  %v2880_v34 = vpop.f32.mrb[122].mxu0  ;;  %v11087_v12 = vld [vmem:[#allocation103_spill] sm:$0xff] }
 0x47c   : > { %v4760_v23 = vand.u32 2147483647, %v4728_v61  ;;  %v4649_v40 = vmul.f32 %v11085_v42, %v2835_v16  ;;  %v4830_v32 = vmul.f32 %v9863_v10, %v2876_v55  ;;  %5346 = vmatpush1.bf16.msra.mxu0 %v4666_v26  ;;  %v4791_v60 = vsub.f32 1.0, %v4759_v38  ;;  %v6562_v50 = vld [vmem:[#allocation14 + $0xf8] sm:$0xff]  ;;  %v2882_v0 = vpop.f32.mrb[123].mxu0  ;;  %v11088_v26 = vld [vmem:[#allocation151_spill] sm:$0xff] }
 0x47d   : > { %v4732_v52 = vsub.f32 %v6561_v13, %v11068_v27  ;;  %v4652_v58 = vmul.f32 %v11086_v35, %v2837_v45  ;;  %v4831_v48 = vmul.f32 %v9866_v29, %v2878_v4  ;;  %v4794_v51 = vsub.f32 1.0, %v4762_v14  ;;  %v11089_v16 = vld [vmem:[#allocation95_spill] sm:$0xff]  ;;  %v11091_v4 = vld [vmem:[#allocation152_spill] sm:$0xff] }
 0x47e   : > { %v4733_v25 = vsub.f32 %v6562_v50, %v11071_v46  ;;  %v4653_v30 = vmul.f32 %v9861_v47, %v2839_v41  ;;  %v4834_v10 = vmul.f32 %v9868_v17, %v2880_v34  ;;  %v4761_v61 = vand.u32 2147483647, %v4729_v33  ;;  %v11093_v41 = vld [vmem:[#allocation156_spill] sm:$0xff] }
 0x47f   : > { %v4910_v38 = vsub.f32 %v11088_v26, %v11087_v12  ;;  %v4668_v27 = vpack.c.bf16 %v4652_v58, %v4648_v44  ;;  %v4835_v2 = vmul.f32 %v9883_v59, %v2882_v0  ;;  %v4795_v36 = vsub.f32 1.0, %v4763_v6  ;;  %v2949_v44 = vpop.f32.mrb[120].mxu1 }
 0x480   : > { %v4792_v9 = vsub.f32 1.0, %v4760_v23  ;;  %v4669_v29 = vpack.c.bf16 %v4653_v30, %v4649_v40  ;;  %v4862_v49 = vpack.c.bf16 %v4834_v10, %v4830_v32  ;;  %v9984_v14 = vmax.f32 %v4789_v62, 0.0  ;;  %v2951_v42 = vpop.f32.mrb[121].mxu1  ;;  %v11090_v32 = vld [vmem:[#allocation122_spill] sm:$0xff] }
 0x481   : > { %v9986_v19 = vmax.f32 %v4790_v39, 0.0  ;;  %v4863_v46 = vpack.c.bf16 %v4835_v2, %v4831_v48  ;;  %v9988_v47 = vmax.f32 %v4791_v60, 0.0  ;;  %v9990_v17 = vmax.f32 %v4794_v51, 0.0  ;;  %v2886_v39 = vpop.f32.mrb[124].mxu0  ;;  %v2953_v13 = vpop.f32.mrb[122].mxu1 }
 0x482   : > { %v4764_v33 = vand.u32 2147483647, %v4732_v52  ;;  %v9994_v55 = vrot.slane %v11089_v16, %v11082_v1  ;;  %5474 = vmatprep.subr.bf16.mxu1 %v4669_v29  ;;  %v4793_v59 = vsub.f32 1.0, %v4761_v61  ;;  %v4765_v6 = vand.u32 2147483647, %v4733_v25  ;;  %v2888_v35 = vpop.f32.mrb[125].mxu0 }
 0x483   : > { %v4942_v23 = vand.u32 2147483647, %v4910_v38  ;;  %v4832_v62 = vmul.f32 %v9885_v53, %v2949_v44  ;;  %5475 = vmatpush1.bf16.msra.mxu1 %v4668_v27  ;;  %5347 = vmatprep.subr.bf16.mxu0 %v4863_v46  ;;  %v9997_v40 = vmax.f32 %v4795_v36, 0.0  ;;  %v9999_v45 = vmax.f32 %v4792_v9, 0.0  ;;  %v11092_v53 = vld [vmem:[#allocation154_spill] sm:$0xff]  ;;  %v2955_v51 = vpop.f32.mrb[123].mxu1 }
 0x484   : > { %v4911_v60 = vsub.f32 %v11091_v4, %v11090_v32  ;;  %v4833_v1 = vmul.f32 %v9887_v63, %v2951_v42  ;;  %v4838_v52 = vmul.f32 %v9897_v7, %v2886_v39  ;;  %5348 = vmatpush1.bf16.msra.mxu0 %v4862_v49  ;;  %v4914_v58 = vsub.f32 %v11092_v53, %v11087_v12  ;;  %v2890_v25 = vpop.f32.mrb[126].mxu0  ;;  %v11094_v63 = vld [vmem:[#allocation24_spill] sm:$0xff]  ;;  %v2959_v44 = vpop.f32.mrb[124].mxu1  ;;  %v11097_v42 = vld [vmem:[#allocation159_spill] sm:$0xff] }
 0x485   : > { %v4915_v48 = vsub.f32 %v11093_v41, %v11090_v32  ;;  %v4836_v34 = vmul.f32 %v9889_v43, %v2953_v13  ;;  %v4839_v50 = vmul.f32 %v9910_v3, %v2888_v35  ;;  %v4796_v30 = vsub.f32 1.0, %v4764_v33  ;;  %v2892_v61 = vpop.f32.mrb[127].mxu0  ;;  %v11095_v43 = vld [vmem:[#allocation157_spill] sm:$0xff] }
 0x486   : > { %v4912_v10 = vsub.f32 %v11094_v63, %v9970_v57  ;;  %v4837_v7 = vmul.f32 %v9891_v22, %v2955_v51  ;;  %v4842_v0 = vmul.f32 %v9912_v8, %v2890_v25  ;;  %v4797_v26 = vsub.f32 1.0, %v4765_v6 }
 0x487   : > { %v4974_v38 = vsub.f32 1.0, %v4942_v23  ;;  %v4864_v27 = vpack.c.bf16 %v4836_v34, %v4832_v62  ;;  %v4843_v2 = vmul.f32 %v9914_v5, %v2892_v61  ;;  %v4943_v36 = vand.u32 2147483647, %v4911_v60  ;;  %v11096_v5 = vld [vmem:[#allocation158_spill] sm:$0xff]  ;;  %v2961_v60 = vpop.f32.mrb[125].mxu1 }
 0x488   : > { %v4913_v9 = vsub.f32 %v11095_v43, %v9994_v55  ;;  %v4865_v3 = vpack.c.bf16 %v4837_v7, %v4833_v1  ;;  %v4866_v29 = vpack.c.bf16 %v4842_v0, %v4838_v52  ;;  %v4946_v49 = vand.u32 2147483647, %v4914_v58  ;;  %v11098_v52 = vld [vmem:[#allocation160_spill] sm:$0xff]  ;;  %v2963_v58 = vpop.f32.mrb[126].mxu1 }
 0x489   : > { %v4947_v46 = vand.u32 2147483647, %v4915_v48  ;;  %v4867_v33 = vpack.c.bf16 %v4843_v2, %v4839_v50  ;;  %v10018_v16 = vmax.f32 %v4793_v59, 0.0  ;;  %v10020_v22 = vmax.f32 %v4796_v30, 0.0  ;;  %v2896_v59 = vpop.f32.mrb[128].mxu0  ;;  %v2965_v50 = vpop.f32.mrb[127].mxu1 }
 0x48a   : > { %v4944_v8 = vand.u32 2147483647, %v4912_v10  ;;  %5476 = vmatprep.subr.bf16.mxu1 %v4865_v3  ;;  %v10022_v6 = vmax.f32 %v4797_v26, 0.0  ;;  %v10024_v23 = vmax.f32 %v4974_v38, 0.0  ;;  %v4916_v62 = vsub.f32 %v11096_v5, %v9970_v57  ;;  %v2898_v48 = vpop.f32.mrb[129].mxu0  ;;  %v11099_v10 = vld [vmem:[#allocation162_spill] sm:$0xff] }
 0x48b   : > { %v4917_v39 = vsub.f32 %v11097_v42, %v9994_v55  ;;  %v4840_v4 = vmul.f32 %v9918_v56, %v2959_v44  ;;  %5477 = vmatpush1.bf16.msra.mxu1 %v4864_v27  ;;  %5349 = vmatprep.subr.bf16.mxu0 %v4867_v33  ;;  %v4975_v1 = vsub.f32 1.0, %v4943_v36  ;;  %v4945_v13 = vand.u32 2147483647, %v4913_v9  ;;  %v2900_v30 = vpop.f32.mrb[130].mxu0  ;;  %v11100_v9 = vld [vmem:[#allocation164_spill] sm:$0xff]  ;;  %v11101_v44 = vld [vmem:[#allocation166_spill] sm:$0xff] }
 0x48c   : > { %v4918_v35 = vsub.f32 %v11098_v52, %v11087_v12  ;;  %v4841_v53 = vmul.f32 %v9930_v54, %v2961_v60  ;;  %v4846_v41 = vmul.f32 %v9937_v28, %v2896_v59  ;;  %5350 = vmatpush1.bf16.msra.mxu0 %v4866_v29  ;;  %v4978_v34 = vsub.f32 1.0, %v4946_v49  ;;  %v2902_v61 = vpop.f32.mrb[131].mxu0  ;;  %v11102_v59 = vld [vmem:[#allocation167_spill] sm:$0xff] }
 0x48d   : > { %v4979_v51 = vsub.f32 1.0, %v4947_v46  ;;  %v4844_v56 = vmul.f32 %v9932_v31, %v2963_v58  ;;  %v4847_v25 = vmul.f32 %v9939_v11, %v2898_v48  ;;  %v4976_v63 = vsub.f32 1.0, %v4944_v8  ;;  %v2969_v46 = vpop.f32.mrb[128].mxu1 }
 0x48e   : > { %v4919_v7 = vsub.f32 %v11099_v10, %v11090_v32  ;;  %v4845_v0 = vmul.f32 %v9934_v15, %v2965_v50  ;;  %v4850_v54 = vmul.f32 %v9943_v18, %v2900_v30  ;;  %v4948_v28 = vand.u32 2147483647, %v4916_v62  ;;  %v2971_v42 = vpop.f32.mrb[129].mxu1 }
 0x48f   : > { %v4949_v26 = vand.u32 2147483647, %v4917_v39  ;;  %v4868_v38 = vpack.c.bf16 %v4844_v56, %v4840_v4  ;;  %v4851_v27 = vmul.f32 %v9958_v24, %v2902_v61  ;;  %v4977_v2 = vsub.f32 1.0, %v4945_v13  ;;  %v2906_v39 = vpop.f32.mrb[132].mxu0  ;;  %v2973_v52 = vpop.f32.mrb[130].mxu1 }
 0x490   : > { %v4950_v31 = vand.u32 2147483647, %v4918_v35  ;;  %v4869_v36 = vpack.c.bf16 %v4845_v0, %v4841_v53  ;;  %v4870_v43 = vpack.c.bf16 %v4850_v54, %v4846_v41  ;;  %v10042_v11 = vmax.f32 %v4975_v1, 0.0  ;;  %v2908_v53 = vpop.f32.mrb[133].mxu0 }
 0x491   : > { %v4922_v3 = vsub.f32 %v11100_v9, %v11087_v12  ;;  %v4871_v29 = vpack.c.bf16 %v4851_v27, %v4847_v25  ;;  %v10046_v49 = vmax.f32 %v4978_v34, 0.0  ;;  %v10048_v15 = vmax.f32 %v4979_v51, 0.0  ;;  %v2975_v34 = vpop.f32.mrb[131].mxu1  ;;  %v2910_v56 = vpop.f32.mrb[134].mxu0  ;;  %v11104_v25 = vld [vmem:[#allocation169_spill] sm:$0xff] }
 0x492   : > { %v4951_v18 = vand.u32 2147483647, %v4919_v7  ;;  %5478 = vmatprep.subr.bf16.mxu1 %v4869_v36  ;;  %v10050_v33 = vmax.f32 %v4976_v63, 0.0  ;;  %v4980_v24 = vsub.f32 1.0, %v4948_v28  ;;  %v4981_v8 = vsub.f32 1.0, %v4949_v26  ;;  %v2912_v63 = vpop.f32.mrb[135].mxu0 }
 0x493   : > { %v4923_v5 = vsub.f32 %v11101_v44, %v11090_v32  ;;  %v4848_v62 = vmul.f32 %v9960_v21, %v2969_v46  ;;  %5479 = vmatpush1.bf16.msra.mxu1 %v4868_v38  ;;  %5351 = vmatprep.subr.bf16.mxu0 %v4871_v29  ;;  %v10055_v4 = vmax.f32 %v4977_v2, 0.0  ;;  %v4982_v60 = vsub.f32 1.0, %v4950_v31  ;;  %v11103_v21 = vld [vmem:[#allocation168_spill] sm:$0xff]  ;;  %v11105_v7 = vld [vmem:[#allocation170_spill] sm:$0xff]  ;;  %v2979_v36 = vpop.f32.mrb[132].mxu1 }
 0x494   : > { %v4920_v1 = vsub.f32 %v11102_v59, %v9970_v57  ;;  %v4849_v13 = vmul.f32 %v9962_v20, %v2971_v42  ;;  %v4854_v35 = vmul.f32 %v9986_v19, %v2906_v39  ;;  %5352 = vmatpush1.bf16.msra.mxu0 %v4870_v43  ;;  %v4954_v58 = vand.u32 2147483647, %v4922_v3  ;;  %v2981_v29 = vpop.f32.mrb[133].mxu1  ;;  %v10081_v46 = vld [vmem:[#allocation11 + $0x8] ss:$20 sps:$4 sm:$0x1f]  }
 0x495   : > { %v4921_v41 = vsub.f32 %v11103_v21, %v9994_v55  ;;  %v4852_v48 = vmul.f32 %v9964_v37, %v2973_v52  ;;  %v4855_v51 = vmul.f32 %v9988_v47, %v2908_v53  ;;  %v4983_v50 = vsub.f32 1.0, %v4951_v18  ;;  %v3022_v18 = vpop.f32.mrb[136].mxu0  ;;  %v2983_v39 = vpop.f32.mrb[134].mxu1 }
 0x496   : > { %v4924_v30 = vsub.f32 %v11104_v25, %v9970_v57  ;;  %v4853_v20 = vmul.f32 %v9984_v14, %v2975_v34  ;;  %v4858_v19 = vmul.f32 %v9990_v17, %v2910_v56  ;;  %v4955_v10 = vand.u32 2147483647, %v4923_v5  ;;  %v11107_v5 = vld [vmem:[#allocation178_spill] sm:$0xff]  ;;  %v3024_v59 = vpop.f32.mrb[137].mxu0 }
 0x497   : > { %v4925_v0 = vsub.f32 %v11105_v7, %v9994_v55  ;;  %v4872_v54 = vpack.c.bf16 %v4852_v48, %v4848_v62  ;;  %v4859_v37 = vmul.f32 %v9997_v40, %v2912_v63  ;;  %v10072_v61 = vmax.f32 %v4980_v24, 0.0 }
 0x498   : > { %v4952_v47 = vand.u32 2147483647, %v4920_v1  ;;  %v4873_v28 = vpack.c.bf16 %v4853_v20, %v4849_v13  ;;  %v4874_v26 = vpack.c.bf16 %v4858_v19, %v4854_v35  ;;  %v10074_v38 = vmax.f32 %v4981_v8, 0.0  ;;  %v11106_v8 = vld [vmem:[#allocation177_spill] sm:$0xff]  ;;  %v11108_v1 = vld [vmem:[#allocation180_spill] sm:$0xff]  ;;  %v2985_v35 = vpop.f32.mrb[135].mxu1 }
 0x499   : > { %v4986_v27 = vsub.f32 1.0, %v4954_v58  ;;  %v4875_v2 = vpack.c.bf16 %v4859_v37, %v4855_v51  ;;  %v10076_v14 = vmax.f32 %v4982_v60, 0.0  ;;  %v10078_v17 = vmax.f32 %v4983_v50, 0.0  ;;  %v3026_v58 = vpop.f32.mrb[138].mxu0 }
 0x49a   : > { %v4953_v31 = vand.u32 2147483647, %v4921_v41  ;;  %5480 = vmatprep.subr.bf16.mxu1 %v4873_v28  ;;  %v4987_v43 = vsub.f32 1.0, %v4955_v10  ;;  %v4956_v9 = vand.u32 2147483647, %v4924_v30  ;;  %v4856_v40 = vmul.f32 %v9999_v45, %v2979_v36  ;;  %v11109_v41 = vld [vmem:[#allocation183_spill] sm:$0xff] }
 0x49b   : > { %v4957_v3 = vand.u32 2147483647, %v4925_v0  ;;  %5481 = vmatpush1.bf16.msra.mxu1 %v4872_v54  ;;  %5353 = vmatprep.subr.bf16.mxu0 %v4875_v2  ;;  %v4984_v24 = vsub.f32 1.0, %v4952_v47  ;;  %v4926_v44 = vsub.f32 %v11106_v8, %v11087_v12  ;;  %v4927_v62 = vsub.f32 %v11107_v5, %v11090_v32  ;;  %v3028_v34 = vpop.f32.mrb[139].mxu0  ;;  %v3095_v54 = vpop.f32.mrb[136].mxu1  ;;  %v11114_v5 = vld [vmem:[#allocation139_spill] sm:$0xff] }
 0x49c   : > { %v4857_v42 = vmul.f32 %v10018_v16, %v2981_v29  ;;  %v5038_v60 = vmul.f32 %v10024_v23, %v3022_v18  ;;  %5354 = vmatpush1.bf16.msra.mxu0 %v4874_v26  ;;  %v5018_v45 = vmax.f32 %v4986_v27, 0.0  ;;  %v4930_v13 = vsub.f32 %v11108_v1, %v11087_v12  ;;  %v11112_v26 = vld [vmem:[#allocation185_spill] sm:$0xff]  ;;  %v11115_v1 = vld [vmem:[#allocation140_spill] sm:$0xff] }
 0x49d   : > { %v4860_v52 = vmul.f32 %v10020_v22, %v2983_v39  ;;  %v5039_v53 = vmul.f32 %v10042_v11, %v3024_v59  ;;  %v4985_v21 = vsub.f32 1.0, %v4953_v31  ;;  %v4931_v48 = vsub.f32 %v11109_v41, %v11090_v32  ;;  %v3097_v31 = vpop.f32.mrb[137].mxu1 }
 0x49e   : > { %v4861_v16 = vmul.f32 %v10022_v6, %v2985_v35  ;;  %v5042_v23 = vmul.f32 %v10046_v49, %v3026_v58  ;;  %v4988_v51 = vsub.f32 1.0, %v4956_v9  ;;  %v4989_v56 = vsub.f32 1.0, %v4957_v3  ;;  %v3032_v36 = vpop.f32.mrb[140].mxu0  ;;  %v11113_v3 = vld [vmem:[#allocation188_spill] sm:$0xff]  ;;  %v3099_v18 = vpop.f32.mrb[138].mxu1 }
 0x49f   : > { %v4876_v50 = vpack.c.bf16 %v4860_v52, %v4856_v40  ;;  %v5043_v25 = vmul.f32 %v10048_v15, %v3028_v34  ;;  %5356 = vmatmul.mubr.bf16.vlgmr.msra.gmra.mrb[152].mxu0 %v10081_v46  ;;  %v4958_v22 = vand.u32 2147483647, %v4926_v44  ;;  %v4959_v30 = vand.u32 2147483647, %v4927_v62  ;;  %v11111_v15 = vld [vmem:[#allocation184_spill] sm:$0xff]  ;;  %v3034_v8 = vpop.f32.mrb[141].mxu0 }
 0x4a0   : > { %v4877_v11 = vpack.c.bf16 %v4861_v16, %v4857_v42  ;;  %v5070_v20 = vpack.c.bf16 %v5042_v23, %v5038_v60  ;;  %v5019_v19 = vmax.f32 %v4987_v43, 0.0  ;;  %v4962_v63 = vand.u32 2147483647, %v4930_v13  ;;  %v3101_v42 = vpop.f32.mrb[139].mxu1  ;;  %v3036_v60 = vpop.f32.mrb[142].mxu0  ;;  %v11117_v34 = vld [vmem:[#allocation193_spill] sm:$0xff] }
 0x4a1   : > { %v11110_v10 = vmov 0   ;;  %v5071_v7 = vpack.c.bf16 %v5043_v25, %v5039_v53  ;;  %v5016_v6 = vmax.f32 %v4984_v24, 0.0  ;;  %v5017_v0 = vmax.f32 %v4985_v21, 0.0  ;;  %v3105_v25 = vpop.f32.mrb[140].mxu1 }
 0x4a2   : > { %5398 = vmatprep.mubr.bf16.mxu0 %v11110_v10  ;;  %v4963_v49 = vand.u32 2147483647, %v4931_v48  ;;  %5482 = vmatprep.subr.bf16.mxu1 %v4877_v11  ;;  %v10100_v37 = vmax.f32 %v4988_v51, 0.0  ;;  %v10102_v47 = vmax.f32 %v4989_v56, 0.0  ;;  %v4928_v28 = vsub.f32 %v11111_v15, %v9970_v57 }
 0x4a3   : > { %v4929_v27 = vsub.f32 %v11112_v26, %v9994_v55  ;;  %v5040_v2 = vmul.f32 %v10050_v33, %v3095_v54  ;;  %5483 = vmatpush1.bf16.msra.mxu1 %v4876_v50  ;;  %5366 = vmatprep.subr.bf16.mxu0 %v5071_v7  ;;  %v4990_v43 = vsub.f32 1.0, %v4958_v22  ;;  %v4991_v9 = vsub.f32 1.0, %v4959_v30 }
 0x4a4   : > { %v4932_v40 = vsub.f32 %v11113_v3, %v9970_v57  ;;  %v5041_v29 = vmul.f32 %v10055_v4, %v3097_v31  ;;  %v5046_v24 = vmul.f32 %v10076_v14, %v3032_v36  ;;  %5367 = vmatpush1.bf16.msra.mxu0 %v5070_v20  ;;  %v4994_v44 = vsub.f32 1.0, %v4962_v63  ;;  %v3038_v14 = vpop.f32.mrb[143].mxu0  ;;  %v3107_v63 = vpop.f32.mrb[141].mxu1 }
 0x4a5   : > { %v4933_v33 = vsub.f32 %v11114_v5, %v9994_v55  ;;  %v5044_v62 = vmul.f32 %v10072_v61, %v3099_v18  ;;  %v5047_v39 = vmul.f32 %v10078_v17, %v3034_v8  ;;  %v4995_v59 = vsub.f32 1.0, %v4963_v49  ;;  %v11116_v61 = vld [vmem:[#allocation144_spill] sm:$0xff]  ;;  %v3109_v15 = vpop.f32.mrb[142].mxu1 }
 0x4a6   : > { %v4934_v13 = vsub.f32 %v11115_v1, %v11087_v12  ;;  %v5045_v4 = vmul.f32 %v10074_v38, %v3101_v42  ;;  %v5050_v52 = vmul.f32 %v5018_v45, %v3036_v60  ;;  %5485 = vmatmul.mubr.bf16.vlgmr.msra.gmra.mrb[152].mxu1 %v10081_v46  ;;  %v4960_v35 = vand.u32 2147483647, %v4928_v28  ;;  %v11118_v46 = vld [vmem:[#allocation195_spill] sm:$0xff]  ;;  %v3111_v31 = vpop.f32.mrb[143].mxu1 }
 0x4a7   : > { %v4961_v53 = vand.u32 2147483647, %v4929_v27  ;;  %v5072_v58 = vpack.c.bf16 %v5044_v62, %v5040_v2  ;;  %v5051_v21 = vmul.f32 %v5019_v19, %v3038_v14  ;;  %v4964_v41 = vand.u32 2147483647, %v4932_v40  ;;  %5527 = vmatprep.mubr.bf16.mxu1 %v11110_v10  ;;  %v3042_v10 = vpop.f32.mrb[144].mxu0 }
 0x4a8   : > { %v4935_v48 = vsub.f32 %v11116_v61, %v11090_v32  ;;  %v5073_v17 = vpack.c.bf16 %v5045_v4, %v5041_v29  ;;  %v5074_v16 = vpack.c.bf16 %v5050_v52, %v5046_v24  ;;  %v4965_v23 = vand.u32 2147483647, %v4933_v33  ;;  %v3044_v26 = vpop.f32.mrb[145].mxu0  ;;  %v11120_v24 = vld [vmem:[#allocation196_spill] sm:$0xff]  ;;  %v3115_v14 = vpop.f32.mrb[144].mxu1 }
 0x4a9   : > { %v4938_v38 = vsub.f32 %v11117_v34, %v11087_v12  ;;  %v5075_v45 = vpack.c.bf16 %v5051_v21, %v5047_v39  ;;  %v5022_v51 = vmax.f32 %v4990_v43, 0.0  ;;  %v5023_v56 = vmax.f32 %v4991_v9, 0.0  ;;  %v3046_v43 = vpop.f32.mrb[146].mxu0  ;;  %v11119_v9 = vld [vmem:[#allocation149_spill] sm:$0xff]  ;;  %v3117_v61 = vpop.f32.mrb[145].mxu1 }
 0x4aa   : > { %v4939_v50 = vsub.f32 %v11118_v46, %v11090_v32  ;;  %5495 = vmatprep.subr.bf16.mxu1 %v5073_v17  ;;  %v5026_v22 = vmax.f32 %v4994_v44, 0.0  ;;  %v5027_v30 = vmax.f32 %v4995_v59, 0.0  ;;  %v4992_v11 = vsub.f32 1.0, %v4960_v35  ;;  %v3048_v18 = vpop.f32.mrb[147].mxu0  ;;  %v11122_v59 = vld [vmem:[#allocation198_spill] sm:$0xff] }
 0x4ab   : > { %v4966_v20 = vand.u32 2147483647, %v4934_v13  ;;  %v5048_v19 = vmul.f32 %v5016_v6, %v3105_v25  ;;  %5496 = vmatpush1.bf16.msra.mxu1 %v5072_v58  ;;  %5368 = vmatprep.subr.bf16.mxu0 %v5075_v45  ;;  %v4993_v7 = vsub.f32 1.0, %v4961_v53  ;;  %v4996_v49 = vsub.f32 1.0, %v4964_v41 }
 0x4ac   : > { %v4967_v12 = vand.u32 2147483647, %v4935_v48  ;;  %v5049_v54 = vmul.f32 %v5017_v0, %v3107_v63  ;;  %v5054_v28 = vmul.f32 %v5022_v51, %v3042_v10  ;;  %5369 = vmatpush1.bf16.msra.mxu0 %v5074_v16  ;;  %v4997_v32 = vsub.f32 1.0, %v4965_v23 }
 0x4ad   : > { %v4970_v27 = vand.u32 2147483647, %v4938_v38  ;;  %v5052_v2 = vmul.f32 %v10100_v37, %v3109_v15  ;;  %v5055_v36 = vmul.f32 %v5023_v56, %v3044_v26  ;;  %v4971_v6 = vand.u32 2147483647, %v4939_v50  ;;  %v11121_v37 = vld [vmem:[#allocation197_spill] sm:$0xff] }
 0x4ae   : > { %v4936_v3 = vsub.f32 %v11119_v9, %v9970_v57  ;;  %v5053_v40 = vmul.f32 %v10102_v47, %v3111_v31  ;;  %v5058_v29 = vmul.f32 %v5026_v22, %v3046_v43  ;;  %v4998_v0 = vsub.f32 1.0, %v4966_v20  ;;  %v6426_v43 = vld [vmem:[#allocation11 + $0x10] ss:$20 sps:$4 sm:$0x1f]  }
 0x4af   : > { %v4937_v8 = vsub.f32 %v11120_v24, %v9994_v55  ;;  %v5076_v44 = vpack.c.bf16 %v5052_v2, %v5048_v19  ;;  %v5059_v5 = vmul.f32 %v5027_v30, %v3048_v18  ;;  %v4999_v33 = vsub.f32 1.0, %v4967_v12 }
 0x4b0   : > { %v4940_v62 = vsub.f32 %v11121_v37, %v9970_v57  ;;  %v5077_v42 = vpack.c.bf16 %v5053_v40, %v5049_v54  ;;  %v5078_v39 = vpack.c.bf16 %v5058_v29, %v5054_v28  ;;  %v5002_v60 = vsub.f32 1.0, %v4970_v27 }
 0x4b1   : > { %v4941_v1 = vsub.f32 %v11122_v59, %v9994_v55  ;;  %v5079_v13 = vpack.c.bf16 %v5059_v5, %v5055_v36  ;;  %v5024_v47 = vmax.f32 %v4992_v11, 0.0  ;;  %v5003_v4 = vsub.f32 1.0, %v4971_v6  ;;  %v3052_v48 = vpop.f32.mrb[148].mxu0  ;;  %v3119_v55 = vpop.f32.mrb[146].mxu1 }
 0x4b2   : > { %v4968_v52 = vand.u32 2147483647, %v4936_v3  ;;  %5497 = vmatprep.subr.bf16.mxu1 %v5077_v42  ;;  %v5025_v35 = vmax.f32 %v4993_v7, 0.0  ;;  %v5028_v53 = vmax.f32 %v4996_v49, 0.0  ;;  %v5030_v58 = vmax.f32 %v4998_v0, 0.0  ;;  %v3054_v38 = vpop.f32.mrb[149].mxu0 }
 0x4b3   : > { %v4969_v21 = vand.u32 2147483647, %v4937_v8  ;;  %v5056_v41 = vmul.f32 %v5024_v47, %v3115_v14  ;;  %5498 = vmatpush1.bf16.msra.mxu1 %v5076_v44  ;;  %v5029_v57 = vmax.f32 %v4997_v32, 0.0  ;;  %5370 = vmatprep.subr.bf16.mxu0 %v5079_v13  ;;  %v5031_v17 = vmax.f32 %v4999_v33, 0.0  ;;  %v3121_v46 = vpop.f32.mrb[147].mxu1  ;;  %v3056_v25 = vpop.f32.mrb[150].mxu0 }
 0x4b4   : > { %v4972_v16 = vand.u32 2147483647, %v4940_v62  ;;  %v5057_v23 = vmul.f32 %v5025_v35, %v3117_v61  ;;  %v5062_v34 = vmul.f32 %v5030_v58, %v3052_v48  ;;  %5371 = vmatpush1.bf16.msra.mxu0 %v5078_v39  ;;  %v5034_v45 = vmax.f32 %v5002_v60, 0.0  ;;  %v3058_v19 = vpop.f32.mrb[151].mxu0  ;;  %v3125_v32 = vpop.f32.mrb[148].mxu1 }
 0x4b5   : > { %v4973_v51 = vand.u32 2147483647, %v4941_v1  ;;  %v5060_v56 = vmul.f32 %v5028_v53, %v3119_v55  ;;  %v5063_v50 = vmul.f32 %v5031_v17, %v3054_v38  ;;  %v5035_v22 = vmax.f32 %v5003_v4, 0.0  ;;  %v3127_v31 = vpop.f32.mrb[149].mxu1 }
 0x4b6   : > { %v5000_v30 = vsub.f32 1.0, %v4968_v52  ;;  %v5061_v11 = vmul.f32 %v5029_v57, %v3121_v46  ;;  %v5066_v20 = vmul.f32 %v5034_v45, %v3056_v25  ;;  %v5001_v63 = vsub.f32 1.0, %v4969_v21  ;;  %v3129_v9 = vpop.f32.mrb[150].mxu1 }
 0x4b7   : > { %v5080_v10 = vpack.c.bf16 %v5060_v56, %v5056_v41  ;;  %v5067_v7 = vmul.f32 %v5035_v22, %v3058_v19  ;;  %v5004_v49 = vsub.f32 1.0, %v4972_v16  ;;  %v5005_v15 = vsub.f32 1.0, %v4973_v51  ;;  %v3131_v29 = vpop.f32.mrb[151].mxu1 }
 0x4b8   : > { %v5081_v12 = vpack.c.bf16 %v5061_v11, %v5057_v23  ;;  %v5082_v54 = vpack.c.bf16 %v5066_v20, %v5062_v34  ;;  %v5032_v26 = vmax.f32 %v5000_v30, 0.0  ;;  %v5033_v27 = vmax.f32 %v5001_v63, 0.0 }
 0x4b9   : > { %v5083_v28 = vpack.c.bf16 %v5067_v7, %v5063_v50  ;;  %v5036_v36 = vmax.f32 %v5004_v49, 0.0  ;;  %v5037_v3 = vmax.f32 %v5005_v15, 0.0 }
 0x4ba   : > { %5499 = vmatprep.subr.bf16.mxu1 %v5081_v12  ;;  %v5064_v2 = vmul.f32 %v5032_v26, %v3125_v32  ;;  %v5065_v6 = vmul.f32 %v5033_v27, %v3127_v31 }
 0x4bb   : > { %5500 = vmatpush1.bf16.msra.mxu1 %v5080_v10  ;;  %5372 = vmatprep.subr.bf16.mxu0 %v5083_v28  ;;  %v5068_v40 = vmul.f32 %v5036_v36, %v3129_v9  ;;  %v5069_v18 = vmul.f32 %v5037_v3, %v3131_v29 }
 0x4bc   : > { %5373 = vmatpush1.bf16.msra.mxu0 %v5082_v54 }
 0x4bd   : > { %v5084_v0 = vpack.c.bf16 %v5068_v40, %v5064_v2  ;;  %v5085_v24 = vpack.c.bf16 %v5069_v18, %v5065_v6 }
 0x4bf   : > { %5927 = vmatmul.mubr.msk.bf16.vlgmr.msra.gmra.mrb[152].mxu0 %vm805_vm4, %v6426_v43  ;;  %5501 = vmatprep.subr.bf16.mxu1 %v5085_v24 }
 0x4c0   : > { %5502 = vmatpush1.bf16.msra.mxu1 %v5084_v0 }
 0x4c3   : > { %5928 = vmatmul.mubr.msk.bf16.vlgmr.msra.gmra.mrb[152].mxu1 %vm805_vm4, %v6426_v43 }
 0x592   : > { %v5400_v8 = vpop.f32.mrb[152].mxu0 }
 0x593   : > { %v5929_v44 = vmul.f32 -1.442695, %v5400_v8  ;;  %v5402_v5 = vpop.f32.mrb[153].mxu0 }
 0x594   : > { %v5930_v33 = vmul.f32 -1.442695, %v5402_v5  ;;  %v5404_v37 = vpop.f32.mrb[154].mxu0 }
 0x595   : > { %6427 = vpow2.f32 %v5929_v44  ;;  %v5933_v62 = vmul.f32 -1.442695, %v5404_v37  ;;  %v5406_v42 = vpop.f32.mrb[155].mxu0 }
 0x596   : > { %6429 = vpow2.f32 %v5930_v33  ;;  %v5934_v39 = vmul.f32 -1.442695, %v5406_v42  ;;  %v5529_v60 = vpop.f32.mrb[152].mxu1 }
 0x597   : > { %6431 = vpow2.f32 %v5933_v62  ;;  %v5931_v59 = vmul.f32 -1.442695, %v5529_v60  ;;  %v5531_v1 = vpop.f32.mrb[153].mxu1 }
 0x598   : > { %6433 = vpow2.f32 %v5934_v39  ;;  %v5932_v13 = vmul.f32 -1.442695, %v5531_v1  ;;  %v5533_v47 = vpop.f32.mrb[154].mxu1 }
 0x599   : > { %6435 = vpow2.f32 %v5931_v59  ;;  %v5935_v4 = vmul.f32 -1.442695, %v5533_v47  ;;  %v5535_v52 = vpop.f32.mrb[155].mxu1 }
 0x59a   : > { %6437 = vpow2.f32 %v5932_v13  ;;  %v5936_v14 = vmul.f32 -1.442695, %v5535_v52 }
 0x59b   : > { %6439 = vpow2.f32 %v5935_v4 }
 0x59c   : > { %6441 = vpow2.f32 %v5936_v14 }
 0x59f   : > { %v6428_v35 = vpop.eup %6427 }
 0x5a0   : > { %v6430_v53 = vpop.eup %6429  ;;  %v5562_v58 = vadd.f32 1.0, %v6428_v35 }
 0x5a1   : > { %v6432_v21 = vpop.eup %6431  ;;  %v5563_v41 = vadd.f32 1.0, %v6430_v53 }
 0x5a2   : > { %v6434_v61 = vpop.eup %6433  ;;  %6443 = vrcp.f32 %v5562_v58  ;;  %v5566_v57 = vadd.f32 1.0, %v6432_v21 }
 0x5a3   : > { %6445 = vrcp.f32 %v5563_v41  ;;  %v5567_v48 = vadd.f32 1.0, %v6434_v61  ;;  %v6436_v17 = vpop.eup %6435 }
 0x5a4   : > { %6447 = vrcp.f32 %v5566_v57  ;;  %v6438_v16 = vpop.eup %6437  ;;  %v5564_v23 = vadd.f32 1.0, %v6436_v17 }
 0x5a5   : > { %6449 = vrcp.f32 %v5567_v48  ;;  %v6440_v55 = vpop.eup %6439  ;;  %v5565_v34 = vadd.f32 1.0, %v6438_v16 }
 0x5a6   : > { %v6442_v38 = vpop.eup %6441  ;;  %6451 = vrcp.f32 %v5564_v23  ;;  %v5568_v45 = vadd.f32 1.0, %v6440_v55 }
 0x5a7   : > { %6453 = vrcp.f32 %v5565_v34  ;;  %v5569_v51 = vadd.f32 1.0, %v6442_v38 }
 0x5a8   : > { %6455 = vrcp.f32 %v5568_v45 }
 0x5a9   : > { %6457 = vrcp.f32 %v5569_v51 }
 0x5ac   : > { %v6444_v56 = vpop.eup %6443 }
 0x5ad   : > { %v6446_v46 = vpop.eup %6445  ;;  %5586 = vst [vmem:[%s365_s9] sm:$0xff] %v6444_v56 }
 0x5ae   : > { %v6448_v50 = vpop.eup %6447  ;;  %5587 = vst [vmem:[%s365_s9 + $0x8] sm:$0xff] %v6446_v46 }
 0x5af   : > { %v6450_v25 = vpop.eup %6449  ;;  %5590 = vst [vmem:[%s365_s9 + $0x20] sm:$0x1] %v6448_v50 }
 0x5b0   : > { %5591 = vst [vmem:[%s365_s9 + $0x28] sm:$0x1] %v6450_v25  ;;  %v6452_v22 = vpop.eup %6451 }
 0x5b1   : > { %v6454_v30 = vpop.eup %6453  ;;  %5588 = vst [vmem:[%s365_s9 + $0x10] sm:$0xff] %v6452_v22 }
 0x5b2   : > { %v6456_v11 = vpop.eup %6455  ;;  %5589 = vst [vmem:[%s365_s9 + $0x18] sm:$0xff] %v6454_v30 }
 0x5b3   : > { %v6458_v20 = vpop.eup %6457  ;;  %5592 = vst [vmem:[%s365_s9 + $0x30] sm:$0x1] %v6456_v11 }
 0x5b4   : > { %5593 = vst [vmem:[%s365_s9 + $0x38] sm:$0x1] %v6458_v20 }
 0x5b5   : > { %6748 = shalt.err (!%p6745_p8)
}
 0x5b6   : > { %s6749_s11 = scalar_lea.hbm %s10145_s8, 1024  ;;  %s6753_s2 = scalar_lea.hbm %s10197_s6, 2048 }
 0x5b7   : > { %p6750_p4 = scmp.ne.s32.totalorder %s10145_s8, %s6749_s11  ;;  %p6754_p1 = scmp.lt.u32.totalorder %s10145_s8, %s10197_s6 }
 0x5b8   : > { %p6755_p11 = scmp.lt.u32.totalorder %s6753_s2, %s6749_s11  ;;  %p6757_p0 = scmp.lt.u32.totalorder %s6749_s11, %s10145_s8 }
 0x5b9   : > { %p6751_p3 = pnand %p6750_p4, %p11123_p13 }
 0x5ba   : > { %p6756_p12 = por %p6755_p11, %p6754_p1 }
 0x5bb   : > { %p6752_p10 = pneg %p6751_p3 }
 0x5bc   : > { %p6758_p7 = por %p6757_p0, %p6756_p12 }
 0x5be   : > { %p6759_p9 = pnand %p6758_p7, %p6752_p10 }
 0x5c0   : > { %6762 = shalt.err (!%p6759_p9)
}
 0x5c1   : > { %s6859_s9 = smov 512   ;;  %s6860_s14 = smov 32  }
 0x5c2   : > { %6079 = dma.vmem_to_hbm [thread:$0]  (%p11123_p13), %s10147_s15, 1024, %s10145_s8, %s5595_s27, %s6859_s9, %s6859_s9, %s6860_s14  }
 0x5c3 PF: > { %s5623_s0 = sand.u32 1, %s6805_s21   ;;  %p11124_p6 = scmp.ne.s32.totalorder %s10386_s19, 0 }
 0x5c4   : > { %p11125_p2 = scmp.ge.s32.totalorder %s6817_s24, 2  ;;  %s5624_s28 = scalar_lea.sflag [#allocation7], %s5623_s0 }
 0x5c6   : > { %p6102_p5 = pnand %p11125_p2, %p11124_p6 }
 0x5c8   : > { %6800 = dma.done.wait (!%p6102_p5), %s5624_s28, 1024  }
 0x5c9   : > { %6802 = vsyncadd (!%p6102_p5), %s5624_s28, 4294966272  ;;  %p24_p8 = scmp.ge.s32.totalorder %s7032_s7, 4   ;;  %s11126_s21 = smov %s6809_s22 }
 0x5ca   : > { %s11127_s22 = smov %s6813_s23  ;;  %s11128_s23 = smov %s7043_s18 }
 0x5cb   : > { %s11129_s24 = smov %s7032_s7  ;;  %26 = sbr.rel (!%p24_p8) target bundleno = 12 (0xc), region = 118 }
 0x5d2   :  { %5629 = vsyncpa [#allocation6], 1 }
 0x5d3   :  { %5631 = vsyncpa [#allocation6 + $0x1], 1 }
 0x5d4   :  { %5632 = vsyncpa [#allocation9], 1 }
 0x5d5   :  { %5634 = vsyncpa [#allocation9 + $0x1], 1 }
 0x5d6   :  { %5635 = vsyncpa [#allocation12], 1 }
 0x5d7   :  { %5636 = vsyncpa [#allocation15], 1 }
 0x5d8   :  { %5637 = vsyncpa [#allocation7], 1 }
 0x5d9   :  { %5639 = vsyncpa [#allocation7 + $0x1], 1 }

</bundles_post_ra>
